<compile_context>
chip_gen: v5e
topology: v5e:2x2
jax: 0.10.0
libtpu: 0.0.40
codegen_flags: <defaults>
</compile_context>

<pallas_src>
import jax
import jax.numpy as jnp
from jax.experimental import pallas as pl
from jax.experimental.pallas import tpu as pltpu

# ----------------------------- small config -----------------------------
B = 2                     # batch
CIN = 3                   # input image channels
IMG = 16                  # image height/width
P = 4                     # patch size
NP = (IMG // P) ** 2      # patches per image            = 16
NTOK = NP + 1             # tokens incl. [cls]           = 17
T = B * NTOK              # flattened tokens             = 34
F = CIN * P * P           # patch feature size           = 48
F2 = F + 2                # + conv-bias col + cls col    = 50
C = 32                    # embed dim
NH = 8                    # heads
DH = C // NH              # head dim                     = 4
SCALE = DH ** (-0.5)      # qk_scale=None -> head_dim**-0.5
HID = int(C * 4.0)        # mlp hidden                   = 128
DEPTH = 2                 # transformer blocks
NCLS = 10                 # classifier classes
OUTPAD = 128              # lane-dense padded classifier width
EPS = 1e-6                # LayerNorm eps


# --------------------------- in-kernel helpers ---------------------------
def _erf_f32(z):
    # TODO(synk): lax.erf has no Mosaic lowering; Abramowitz-Stegun 7.1.26
    # polynomial built from exp/mul/add, division moved to the (otherwise idle)
    # EUP via approx reciprocal (~1e-4 abs err, well inside the 1e-2 tolerance).
    a1, a2, a3, a4, a5 = 0.254829592, -0.284496736, 1.421413741, -1.453152027, 1.061405429
    p = 0.3275911
    sgn = jnp.where(z >= 0.0, 1.0, -1.0)
    za = jnp.abs(z)
    t = pl.reciprocal(1.0 + p * za, approx=True)
    poly = ((((a5 * t + a4) * t + a3) * t + a2) * t + a1) * t
    return sgn * (1.0 - poly * jnp.exp(-za * za))


def _gelu_exact(x):
    # PyTorch nn.GELU() default = exact (erf-based) GELU.
    return 0.5 * x * (1.0 + _erf_f32(x * (2.0 ** -0.5)))


def _layernorm(v, gamma, beta):
    mu = jnp.mean(v, axis=-1, keepdims=True)
    var = jnp.mean((v - mu) ** 2, axis=-1, keepdims=True)
    return (v - mu) * jax.lax.rsqrt(var + EPS) * gamma + beta


# -------------------------------- kernel --------------------------------
def transformer_kernel(tokens_ref, wemb_ref, bias_ref, sel_ref,
                       a_ref, bmat_ref, vecc_ref, bm1_ref,
                       w1_ref, w2_ref, fin_ref, whd_ref, bhd_ref,
                       o_ref):
    # Patch embedding + conv bias + [cls] token in a single (T,F2)@(F2,C) matmul.
    x = jnp.dot(tokens_ref[...], wemb_ref[...],
                preferred_element_type=jnp.float32)                     # (T, C)
    attn_bias = bias_ref[...]                                           # (T, T): 0 / -1e30 block-diag

    for d in range(DEPTH):                                              # static unroll over blocks
        # ---------------- x = x + Attn(LN1(x)) ----------------
        xn = _layernorm(x, vecc_ref[d, 0:1], vecc_ref[d, 1:2])          # (T, C)
        xnt = xn.T                                                      # (C, T), once per block
        att = jnp.zeros((T, C), jnp.float32)
        for h in range(NH):                                             # static unroll over heads
            u = jnp.dot(xn, a_ref[d, h],
                        preferred_element_type=jnp.float32)             # (T, C), scale pre-folded
            s = jnp.dot(u, xnt,
                        preferred_element_type=jnp.float32) + attn_bias  # (T, T)
            s = s - jnp.max(s, axis=-1, keepdims=True)
            pr = jnp.exp(s)
            pr = pr * pl.reciprocal(jnp.sum(pr, axis=-1, keepdims=True), approx=True)
            vb = jnp.dot(xn, bmat_ref[d, h],
                         preferred_element_type=jnp.float32)            # (T, C), Wv@Wproj folded
            att = att + jnp.dot(pr, vb, preferred_element_type=jnp.float32)
        x = x + att + vecc_ref[d, 2:3]                                  # + proj bias

        # ---------------- x = x + MLP(LN2(x)) ----------------
        xn2 = _layernorm(x, vecc_ref[d, 3:4], vecc_ref[d, 4:5])
        hmid = jnp.dot(xn2, w1_ref[d], preferred_element_type=jnp.float32) + bm1_ref[d]
        hmid = _gelu_exact(hmid)
        x = x + jnp.dot(hmid, w2_ref[d], preferred_element_type=jnp.float32) + vecc_ref[d, 5:6]

    # --------- final LayerNorm + head on the [cls] rows ---------
    # [cls]-row gather as a tiny selection matmul (MXU) -> no sublane shuffles.
    cls = jnp.dot(sel_ref[...], x, preferred_element_type=jnp.float32)  # (B, C)
    cls = _layernorm(cls, fin_ref[0:1], fin_ref[1:2])
    o_ref[...] = jnp.dot(cls, whd_ref[...],
                         preferred_element_type=jnp.float32) + bhd_ref[...]   # (B, 128) lane-dense


# ------------------------------- wrapper --------------------------------
def _patchify_tokens(x_img):
    """im2col for the stride==kernel patch conv plus two indicator columns
    (conv-bias, cls).  Layout plumbing only; the conv's matmul runs in-kernel."""
    b = x_img.shape[0]
    hp, wp = IMG // P, IMG // P
    pat = x_img.reshape(b, CIN, hp, P, wp, P)
    pat = jnp.transpose(pat, (0, 2, 4, 1, 3, 5)).reshape(b, NP, F)      # (c,i,j)-ordered features
    one = jnp.ones((b, NP, 1), x_img.dtype)
    zero = jnp.zeros((b, NP, 1), x_img.dtype)
    patch_rows = jnp.concatenate([pat, one, zero], axis=-1)             # bias on, cls off
    cls_rows = jnp.concatenate([jnp.zeros((b, 1, F + 1), x_img.dtype),
                                jnp.ones((b, 1, 1), x_img.dtype)], axis=-1)
    toks = jnp.concatenate([cls_rows, patch_rows], axis=1)              # [cls] is token 0
    return toks.reshape(b * NTOK, F2)


@jax.jit
def transformer_forward(x_img, kp):
    tokens = _patchify_tokens(x_img)                                    # (T, F2)
    args = (tokens, kp['wemb'], kp['bias'], kp['sel'],
            kp['amat'], kp['bmat'], kp['vecc'], kp['bm1'],
            kp['w1'], kp['w2'], kp['fin'], kp['whd'], kp['bhd'])

    vmem = pl.BlockSpec(memory_space=pltpu.MemorySpace.VMEM)
    fn = pl.pallas_call(
        transformer_kernel,
        out_shape=jax.ShapeDtypeStruct((B, OUTPAD), jnp.float32),
        in_specs=[vmem] * len(args),
        out_specs=vmem,
    )
    return fn(*args)[:, :NCLS]                                          # slice off lane padding


# --------------------------- parameter handling ---------------------------
def init_raw_params(key):
    """Parameters in PyTorch layout (nn.Linear: (out,in); nn.Conv2d: (out,in,kh,kw))."""
    ks = iter(jax.random.split(key, 8 + 8 * DEPTH))
    std = 0.02
    nrm = lambda shape: jax.random.normal(next(ks), shape, jnp.float32) * std
    raw = {
        'cls': nrm((1, 1, C)),
        'wpe': nrm((C, CIN, P, P)), 'bpe': nrm((C,)),
        'gn': jnp.ones((C,), jnp.float32), 'bn': jnp.zeros((C,), jnp.float32),
        'whead': nrm((NCLS, C)), 'bhead': nrm((NCLS,)),
        'blocks': [],
    }
    for _ in range(DEPTH):
        raw['blocks'].append({
            'g1': jnp.ones((C,), jnp.float32), 'b1': jnp.zeros((C,), jnp.float32),
            'wqkv': nrm((3 * C, C)),                                    # qkv_bias=False
            'wproj': nrm((C, C)), 'bproj': nrm((C,)),
            'g2': jnp.ones((C,), jnp.float32), 'b2': jnp.zeros((C,), jnp.float32),
            'w1': nrm((HID, C)), 'bm1': nrm((HID,)),
            'w2': nrm((C, HID)), 'bm2': nrm((C,)),
        })
    return raw


def prep_params(raw):
    """One-time transform of PyTorch-layout params into the kernel layout:
    folded per-head A = (Wq*scale)@Wk^T and B = Wv@Wproj (C x C each), conv bias
    + [cls] folded into the embedding matrix, small per-block vectors stacked
    into one array, attention mask / cls-selector precomputed, classifier head
    zero-padded to 128 lanes."""
    wpe_t = raw['wpe'].reshape(C, F).T                                  # (F, C)
    wemb = jnp.concatenate([wpe_t, raw['bpe'][None, :], raw['cls'].reshape(1, C)],
                           axis=0)                                      # (F2, C)

    a_l, b_l, vec_l, bm1_l, w1_l, w2_l = [], [], [], [], [], []
    for blk in raw['blocks']:
        wqkv_io = blk['wqkv'].T                                         # (C, 3C)
        heads = lambda w: w.reshape(C, NH, DH).transpose(1, 0, 2)       # (NH, C, DH)
        wqh = heads(wqkv_io[:, 0:C]) * SCALE                            # scale folded in
        wkh = heads(wqkv_io[:, C:2 * C])
        wvh = heads(wqkv_io[:, 2 * C:3 * C])
        wph = blk['wproj'].T.reshape(NH, DH, C)                         # (NH, DH, C)
        a_l.append(jnp.einsum('hcd,hed->hce', wqh, wkh))                # (NH, C, C)
        b_l.append(jnp.einsum('hcd,hde->hce', wvh, wph))                # (NH, C, C)
        vec_l.append(jnp.stack([blk['g1'], blk['b1'], blk['bproj'],
                                blk['g2'], blk['b2'], blk['bm2']], axis=0))   # (6, C)
        bm1_l.append(blk['bm1'][None, :])                               # (1, HID)
        w1_l.append(blk['w1'].T)                                        # (C, HID)
        w2_l.append(blk['w2'].T)                                        # (HID, C)

    batch_id = jnp.arange(T, dtype=jnp.int32) // NTOK
    bias = jnp.where(batch_id[:, None] == batch_id[None, :],
                     0.0, -1e30).astype(jnp.float32)                    # (T, T) block-diag mask
    sel = jnp.zeros((B, T), jnp.float32).at[
        jnp.arange(B), jnp.arange(B) * NTOK].set(1.0)                   # (B, T) [cls]-row selector

    whd = jnp.zeros((C, OUTPAD), jnp.float32).at[:, :NCLS].set(raw['whead'].T)
    bhd = jnp.zeros((1, OUTPAD), jnp.float32).at[0, :NCLS].set(raw['bhead'])

    return {
        'wemb': wemb, 'bias': bias, 'sel': sel,
        'amat': jnp.stack(a_l), 'bmat': jnp.stack(b_l),                 # (DEPTH, NH, C, C)
        'vecc': jnp.stack(vec_l),                                       # (DEPTH, 6, C)
        'bm1': jnp.stack(bm1_l),                                        # (DEPTH, 1, HID)
        'w1': jnp.stack(w1_l), 'w2': jnp.stack(w2_l),
        'fin': jnp.stack([raw['gn'], raw['bn']], axis=0),               # (2, C)
        'whd': whd, 'bhd': bhd,
    }


# --------------------------- pure-JAX reference ---------------------------
def reference_forward(x_img, raw):
    """Mirrors the PyTorch module op-for-op (used only as a sanity check)."""
    def ln(v, g, b):
        mu = jnp.mean(v, axis=-1, keepdims=True)
        var = jnp.mean((v - mu) ** 2, axis=-1, keepdims=True)
        return (v - mu) / jnp.sqrt(var + EPS) * g + b

    emb = jax.lax.conv_general_dilated(x_img, raw['wpe'], window_strides=(P, P),
                                       padding='VALID',
                                       dimension_numbers=('NCHW', 'OIHW', 'NCHW'))
    emb = emb + raw['bpe'][None, :, None, None]
    emb = emb.reshape(B, C, NP).transpose(0, 2, 1)                      # flatten(2).transpose(1,2)
    x = jnp.concatenate([jnp.broadcast_to(raw['cls'], (B, 1, C)), emb], axis=1)

    for blk in raw['blocks']:
        xn = ln(x, blk['g1'], blk['b1'])
        qkv = (xn @ blk['wqkv'].T).reshape(B, NTOK, 3, NH, DH).transpose(2, 0, 3, 1, 4)
        q, k, v = qkv[0], qkv[1], qkv[2]
        a = jax.nn.softmax((q @ k.transpose(0, 1, 3, 2)) * SCALE, axis=-1)
        y = (a @ v).transpose(0, 2, 1, 3).reshape(B, NTOK, C)
        x = x + (y @ blk['wproj'].T + blk['bproj'])
        xn2 = ln(x, blk['g2'], blk['b2'])
        h = jax.nn.gelu(xn2 @ blk['w1'].T + blk['bm1'], approximate=False)
        x = x + (h @ blk['w2'].T + blk['bm2'])

    x = ln(x, raw['gn'], raw['bn'])
    return x[:, 0] @ raw['whead'].T + raw['bhead']


if __name__ == "__main__":
    key = jax.random.PRNGKey(0)
    kx, kparams = jax.random.split(key)
    x_img = jax.random.normal(kx, (B, CIN, IMG, IMG), jnp.float32)

    raw = init_raw_params(kparams)
    params = prep_params(raw)

    out = jax.block_until_ready(transformer_forward(x_img, params))
    assert out.shape == (B, NCLS) and out.dtype == jnp.float32
    assert bool(jnp.all(jnp.isfinite(out)))

    # Sanity-check vs a pure-JAX mirror of the PyTorch module (loose tolerance
    # covers the EUP approx-reciprocal, the erf polynomial and the A/B fold).
    ref = reference_forward(x_img, raw)
    err = float(jnp.max(jnp.abs(out - ref)))
    assert err < 1e-2, f"kernel/reference mismatch: {err}"

    print("KERNEL_OK")
</pallas_src>

<mosaic_0001>
module attributes {stable_mosaic.version = 11 : i64} {
  func.func @transformer_kernel(%arg0: memref<34x50xf32, #tpu.memory_space<vmem>>, %arg1: memref<50x32xf32, #tpu.memory_space<vmem>>, %arg2: memref<34x34xf32, #tpu.memory_space<vmem>>, %arg3: memref<2x34xf32, #tpu.memory_space<vmem>>, %arg4: memref<2x8x32x32xf32, #tpu.memory_space<vmem>>, %arg5: memref<2x8x32x32xf32, #tpu.memory_space<vmem>>, %arg6: memref<2x6x32xf32, #tpu.memory_space<vmem>>, %arg7: memref<2x1x128xf32, #tpu.memory_space<vmem>>, %arg8: memref<2x32x128xf32, #tpu.memory_space<vmem>>, %arg9: memref<2x128x32xf32, #tpu.memory_space<vmem>>, %arg10: memref<2x32xf32, #tpu.memory_space<vmem>>, %arg11: memref<32x128xf32, #tpu.memory_space<vmem>>, %arg12: memref<1x128xf32, #tpu.memory_space<vmem>>, %arg13: memref<2x128xf32, #tpu.memory_space<vmem>>) attributes {dimension_semantics = [], scalar_prefetch = 0 : i64, scratch_operands = 0 : i64, tpu.core_type = #tpu.core_type<tc>} {
    %c0 = arith.constant 0 : index
    %c0_0 = arith.constant 0 : index
    %0 = vector.load %arg0[%c0, %c0_0] : memref<34x50xf32, #tpu.memory_space<vmem>>, vector<34x50xf32>
    %c0_1 = arith.constant 0 : index
    %c0_2 = arith.constant 0 : index
    %1 = vector.load %arg1[%c0_1, %c0_2] : memref<50x32xf32, #tpu.memory_space<vmem>>, vector<50x32xf32>
    %cst = arith.constant dense<0.000000e+00> : vector<34x32xf32>
    %2 = tpu.matmul %0, %1, %cst {dimension_numbers = #tpu.dot_dimension_numbers<[1], [0], [0], [1], [0, 0, 1, 1], [], []>} : vector<34x50xf32>, vector<50x32xf32>, vector<34x32xf32> -> vector<34x32xf32>
    %c0_3 = arith.constant 0 : index
    %c0_4 = arith.constant 0 : index
    %3 = vector.load %arg2[%c0_3, %c0_4] : memref<34x34xf32, #tpu.memory_space<vmem>>, vector<34x34xf32>
    %c0_5 = arith.constant 0 : index
    %c0_6 = arith.constant 0 : index
    %c0_7 = arith.constant 0 : index
    %4 = vector.load %arg6[%c0_5, %c0_6, %c0_7] : memref<2x6x32xf32, #tpu.memory_space<vmem>>, vector<1x1x32xf32>
    %5 = vector.shape_cast %4 : vector<1x1x32xf32> to vector<1x32xf32>
    %c0_8 = arith.constant 0 : index
    %c1 = arith.constant 1 : index
    %c0_9 = arith.constant 0 : index
    %6 = vector.load %arg6[%c0_8, %c1, %c0_9] : memref<2x6x32xf32, #tpu.memory_space<vmem>>, vector<1x1x32xf32>
    %7 = vector.shape_cast %6 : vector<1x1x32xf32> to vector<1x32xf32>
    %cst_10 = arith.constant dense<0.000000e+00> : vector<34xf32>
    %8 = vector.multi_reduction <add>, %2, %cst_10 [1] : vector<34x32xf32> to vector<34xf32>
    %9 = vector.shape_cast %8 : vector<34xf32> to vector<34x1xf32>
    %cst_11 = arith.constant 3.200000e+01 : f32
    %10 = vector.broadcast %cst_11 : f32 to vector<34x1xf32>
    %11 = arith.divf %9, %10 : vector<34x1xf32>
    %12 = vector.broadcast %11 : vector<34x1xf32> to vector<34x32xf32>
    %13 = arith.subf %2, %12 : vector<34x32xf32>
    %14 = arith.mulf %13, %13 : vector<34x32xf32>
    %cst_12 = arith.constant dense<0.000000e+00> : vector<34xf32>
    %15 = vector.multi_reduction <add>, %14, %cst_12 [1] : vector<34x32xf32> to vector<34xf32>
    %16 = vector.shape_cast %15 : vector<34xf32> to vector<34x1xf32>
    %cst_13 = arith.constant 3.200000e+01 : f32
    %17 = vector.broadcast %cst_13 : f32 to vector<34x1xf32>
    %18 = arith.divf %16, %17 : vector<34x1xf32>
    %19 = vector.broadcast %11 : vector<34x1xf32> to vector<34x32xf32>
    %20 = arith.subf %2, %19 : vector<34x32xf32>
    %cst_14 = arith.constant 9.99999997E-7 : f32
    %21 = vector.broadcast %cst_14 : f32 to vector<34x1xf32>
    %22 = arith.addf %18, %21 : vector<34x1xf32>
    %23 = math.rsqrt %22 : vector<34x1xf32>
    %24 = vector.broadcast %23 : vector<34x1xf32> to vector<34x32xf32>
    %25 = arith.mulf %20, %24 : vector<34x32xf32>
    %26 = vector.broadcast %5 : vector<1x32xf32> to vector<34x32xf32>
    %27 = arith.mulf %25, %26 : vector<34x32xf32>
    %28 = vector.broadcast %7 : vector<1x32xf32> to vector<34x32xf32>
    %29 = arith.addf %27, %28 : vector<34x32xf32>
    %30 = tpu.transpose %29, [1, 0] : vector<34x32xf32> -> vector<32x34xf32>
    %cst_15 = arith.constant 0.000000e+00 : f32
    %31 = vector.broadcast %cst_15 : f32 to vector<34x32xf32>
    %c0_16 = arith.constant 0 : index
    %c0_17 = arith.constant 0 : index
    %c0_18 = arith.constant 0 : index
    %c0_19 = arith.constant 0 : index
    %32 = vector.load %arg4[%c0_16, %c0_17, %c0_18, %c0_19] : memref<2x8x32x32xf32, #tpu.memory_space<vmem>>, vector<1x1x32x32xf32>
    %33 = vector.shape_cast %32 : vector<1x1x32x32xf32> to vector<32x32xf32>
    %cst_20 = arith.constant dense<0.000000e+00> : vector<34x32xf32>
    %34 = tpu.matmul %29, %33, %cst_20 {dimension_numbers = #tpu.dot_dimension_numbers<[1], [0], [0], [1], [0, 0, 1, 1], [], []>} : vector<34x32xf32>, vector<32x32xf32>, vector<34x32xf32> -> vector<34x32xf32>
    %cst_21 = arith.constant dense<0.000000e+00> : vector<34x34xf32>
    %35 = tpu.matmul %34, %30, %cst_21 {dimension_numbers = #tpu.dot_dimension_numbers<[1], [0], [0], [1], [0, 0, 1, 1], [], []>} : vector<34x32xf32>, vector<32x34xf32>, vector<34x34xf32> -> vector<34x34xf32>
    %36 = arith.addf %35, %3 : vector<34x34xf32>
    %cst_22 = arith.constant dense<0xFF800000> : vector<34xf32>
    %37 = vector.multi_reduction <maximumf>, %36, %cst_22 [1] : vector<34x34xf32> to vector<34xf32>
    %38 = vector.shape_cast %37 : vector<34xf32> to vector<34x1xf32>
    %39 = vector.broadcast %38 : vector<34x1xf32> to vector<34x34xf32>
    %40 = arith.subf %36, %39 : vector<34x34xf32>
    %41 = math.exp %40 : vector<34x34xf32>
    %cst_23 = arith.constant dense<0.000000e+00> : vector<34xf32>
    %42 = vector.multi_reduction <add>, %41, %cst_23 [1] : vector<34x34xf32> to vector<34xf32>
    %43 = vector.shape_cast %42 : vector<34xf32> to vector<34x1xf32>
    %44 = tpu.reciprocal %43 {approx = true} : vector<34x1xf32> -> vector<34x1xf32>
    %45 = vector.broadcast %44 : vector<34x1xf32> to vector<34x34xf32>
    %46 = arith.mulf %41, %45 : vector<34x34xf32>
    %c0_24 = arith.constant 0 : index
    %c0_25 = arith.constant 0 : index
    %c0_26 = arith.constant 0 : index
    %c0_27 = arith.constant 0 : index
    %47 = vector.load %arg5[%c0_24, %c0_25, %c0_26, %c0_27] : memref<2x8x32x32xf32, #tpu.memory_space<vmem>>, vector<1x1x32x32xf32>
    %48 = vector.shape_cast %47 : vector<1x1x32x32xf32> to vector<32x32xf32>
    %cst_28 = arith.constant dense<0.000000e+00> : vector<34x32xf32>
    %49 = tpu.matmul %29, %48, %cst_28 {dimension_numbers = #tpu.dot_dimension_numbers<[1], [0], [0], [1], [0, 0, 1, 1], [], []>} : vector<34x32xf32>, vector<32x32xf32>, vector<34x32xf32> -> vector<34x32xf32>
    %cst_29 = arith.constant dense<0.000000e+00> : vector<34x32xf32>
    %50 = tpu.matmul %46, %49, %cst_29 {dimension_numbers = #tpu.dot_dimension_numbers<[1], [0], [0], [1], [0, 0, 1, 1], [], []>} : vector<34x34xf32>, vector<34x32xf32>, vector<34x32xf32> -> vector<34x32xf32>
    %51 = arith.addf %31, %50 : vector<34x32xf32>
    %c0_30 = arith.constant 0 : index
    %c1_31 = arith.constant 1 : index
    %c0_32 = arith.constant 0 : index
    %c0_33 = arith.constant 0 : index
    %52 = vector.load %arg4[%c0_30, %c1_31, %c0_32, %c0_33] : memref<2x8x32x32xf32, #tpu.memory_space<vmem>>, vector<1x1x32x32xf32>
    %53 = vector.shape_cast %52 : vector<1x1x32x32xf32> to vector<32x32xf32>
    %cst_34 = arith.constant dense<0.000000e+00> : vector<34x32xf32>
    %54 = tpu.matmul %29, %53, %cst_34 {dimension_numbers = #tpu.dot_dimension_numbers<[1], [0], [0], [1], [0, 0, 1, 1], [], []>} : vector<34x32xf32>, vector<32x32xf32>, vector<34x32xf32> -> vector<34x32xf32>
    %cst_35 = arith.constant dense<0.000000e+00> : vector<34x34xf32>
    %55 = tpu.matmul %54, %30, %cst_35 {dimension_numbers = #tpu.dot_dimension_numbers<[1], [0], [0], [1], [0, 0, 1, 1], [], []>} : vector<34x32xf32>, vector<32x34xf32>, vector<34x34xf32> -> vector<34x34xf32>
    %56 = arith.addf %55, %3 : vector<34x34xf32>
    %cst_36 = arith.constant dense<0xFF800000> : vector<34xf32>
    %57 = vector.multi_reduction <maximumf>, %56, %cst_36 [1] : vector<34x34xf32> to vector<34xf32>
    %58 = vector.shape_cast %57 : vector<34xf32> to vector<34x1xf32>
    %59 = vector.broadcast %58 : vector<34x1xf32> to vector<34x34xf32>
    %60 = arith.subf %56, %59 : vector<34x34xf32>
    %61 = math.exp %60 : vector<34x34xf32>
    %cst_37 = arith.constant dense<0.000000e+00> : vector<34xf32>
    %62 = vector.multi_reduction <add>, %61, %cst_37 [1] : vector<34x34xf32> to vector<34xf32>
    %63 = vector.shape_cast %62 : vector<34xf32> to vector<34x1xf32>
    %64 = tpu.reciprocal %63 {approx = true} : vector<34x1xf32> -> vector<34x1xf32>
    %65 = vector.broadcast %64 : vector<34x1xf32> to vector<34x34xf32>
    %66 = arith.mulf %61, %65 : vector<34x34xf32>
    %c0_38 = arith.constant 0 : index
    %c1_39 = arith.constant 1 : index
    %c0_40 = arith.constant 0 : index
    %c0_41 = arith.constant 0 : index
    %67 = vector.load %arg5[%c0_38, %c1_39, %c0_40, %c0_41] : memref<2x8x32x32xf32, #tpu.memory_space<vmem>>, vector<1x1x32x32xf32>
    %68 = vector.shape_cast %67 : vector<1x1x32x32xf32> to vector<32x32xf32>
    %cst_42 = arith.constant dense<0.000000e+00> : vector<34x32xf32>
    %69 = tpu.matmul %29, %68, %cst_42 {dimension_numbers = #tpu.dot_dimension_numbers<[1], [0], [0], [1], [0, 0, 1, 1], [], []>} : vector<34x32xf32>, vector<32x32xf32>, vector<34x32xf32> -> vector<34x32xf32>
    %cst_43 = arith.constant dense<0.000000e+00> : vector<34x32xf32>
    %70 = tpu.matmul %66, %69, %cst_43 {dimension_numbers = #tpu.dot_dimension_numbers<[1], [0], [0], [1], [0, 0, 1, 1], [], []>} : vector<34x34xf32>, vector<34x32xf32>, vector<34x32xf32> -> vector<34x32xf32>
    %71 = arith.addf %51, %70 : vector<34x32xf32>
    %c0_44 = arith.constant 0 : index
    %c2 = arith.constant 2 : index
    %c0_45 = arith.constant 0 : index
    %c0_46 = arith.constant 0 : index
    %72 = vector.load %arg4[%c0_44, %c2, %c0_45, %c0_46] : memref<2x8x32x32xf32, #tpu.memory_space<vmem>>, vector<1x1x32x32xf32>
    %73 = vector.shape_cast %72 : vector<1x1x32x32xf32> to vector<32x32xf32>
    %cst_47 = arith.constant dense<0.000000e+00> : vector<34x32xf32>
    %74 = tpu.matmul %29, %73, %cst_47 {dimension_numbers = #tpu.dot_dimension_numbers<[1], [0], [0], [1], [0, 0, 1, 1], [], []>} : vector<34x32xf32>, vector<32x32xf32>, vector<34x32xf32> -> vector<34x32xf32>
    %cst_48 = arith.constant dense<0.000000e+00> : vector<34x34xf32>
    %75 = tpu.matmul %74, %30, %cst_48 {dimension_numbers = #tpu.dot_dimension_numbers<[1], [0], [0], [1], [0, 0, 1, 1], [], []>} : vector<34x32xf32>, vector<32x34xf32>, vector<34x34xf32> -> vector<34x34xf32>
    %76 = arith.addf %75, %3 : vector<34x34xf32>
    %cst_49 = arith.constant dense<0xFF800000> : vector<34xf32>
    %77 = vector.multi_reduction <maximumf>, %76, %cst_49 [1] : vector<34x34xf32> to vector<34xf32>
    %78 = vector.shape_cast %77 : vector<34xf32> to vector<34x1xf32>
    %79 = vector.broadcast %78 : vector<34x1xf32> to vector<34x34xf32>
    %80 = arith.subf %76, %79 : vector<34x34xf32>
    %81 = math.exp %80 : vector<34x34xf32>
    %cst_50 = arith.constant dense<0.000000e+00> : vector<34xf32>
    %82 = vector.multi_reduction <add>, %81, %cst_50 [1] : vector<34x34xf32> to vector<34xf32>
    %83 = vector.shape_cast %82 : vector<34xf32> to vector<34x1xf32>
    %84 = tpu.reciprocal %83 {approx = true} : vector<34x1xf32> -> vector<34x1xf32>
    %85 = vector.broadcast %84 : vector<34x1xf32> to vector<34x34xf32>
    %86 = arith.mulf %81, %85 : vector<34x34xf32>
    %c0_51 = arith.constant 0 : index
    %c2_52 = arith.constant 2 : index
    %c0_53 = arith.constant 0 : index
    %c0_54 = arith.constant 0 : index
    %87 = vector.load %arg5[%c0_51, %c2_52, %c0_53, %c0_54] : memref<2x8x32x32xf32, #tpu.memory_space<vmem>>, vector<1x1x32x32xf32>
    %88 = vector.shape_cast %87 : vector<1x1x32x32xf32> to vector<32x32xf32>
    %cst_55 = arith.constant dense<0.000000e+00> : vector<34x32xf32>
    %89 = tpu.matmul %29, %88, %cst_55 {dimension_numbers = #tpu.dot_dimension_numbers<[1], [0], [0], [1], [0, 0, 1, 1], [], []>} : vector<34x32xf32>, vector<32x32xf32>, vector<34x32xf32> -> vector<34x32xf32>
    %cst_56 = arith.constant dense<0.000000e+00> : vector<34x32xf32>
    %90 = tpu.matmul %86, %89, %cst_56 {dimension_numbers = #tpu.dot_dimension_numbers<[1], [0], [0], [1], [0, 0, 1, 1], [], []>} : vector<34x34xf32>, vector<34x32xf32>, vector<34x32xf32> -> vector<34x32xf32>
    %91 = arith.addf %71, %90 : vector<34x32xf32>
    %c0_57 = arith.constant 0 : index
    %c3 = arith.constant 3 : index
    %c0_58 = arith.constant 0 : index
    %c0_59 = arith.constant 0 : index
    %92 = vector.load %arg4[%c0_57, %c3, %c0_58, %c0_59] : memref<2x8x32x32xf32, #tpu.memory_space<vmem>>, vector<1x1x32x32xf32>
    %93 = vector.shape_cast %92 : vector<1x1x32x32xf32> to vector<32x32xf32>
    %cst_60 = arith.constant dense<0.000000e+00> : vector<34x32xf32>
    %94 = tpu.matmul %29, %93, %cst_60 {dimension_numbers = #tpu.dot_dimension_numbers<[1], [0], [0], [1], [0, 0, 1, 1], [], []>} : vector<34x32xf32>, vector<32x32xf32>, vector<34x32xf32> -> vector<34x32xf32>
    %cst_61 = arith.constant dense<0.000000e+00> : vector<34x34xf32>
    %95 = tpu.matmul %94, %30, %cst_61 {dimension_numbers = #tpu.dot_dimension_numbers<[1], [0], [0], [1], [0, 0, 1, 1], [], []>} : vector<34x32xf32>, vector<32x34xf32>, vector<34x34xf32> -> vector<34x34xf32>
    %96 = arith.addf %95, %3 : vector<34x34xf32>
    %cst_62 = arith.constant dense<0xFF800000> : vector<34xf32>
    %97 = vector.multi_reduction <maximumf>, %96, %cst_62 [1] : vector<34x34xf32> to vector<34xf32>
    %98 = vector.shape_cast %97 : vector<34xf32> to vector<34x1xf32>
    %99 = vector.broadcast %98 : vector<34x1xf32> to vector<34x34xf32>
    %100 = arith.subf %96, %99 : vector<34x34xf32>
    %101 = math.exp %100 : vector<34x34xf32>
    %cst_63 = arith.constant dense<0.000000e+00> : vector<34xf32>
    %102 = vector.multi_reduction <add>, %101, %cst_63 [1] : vector<34x34xf32> to vector<34xf32>
    %103 = vector.shape_cast %102 : vector<34xf32> to vector<34x1xf32>
    %104 = tpu.reciprocal %103 {approx = true} : vector<34x1xf32> -> vector<34x1xf32>
    %105 = vector.broadcast %104 : vector<34x1xf32> to vector<34x34xf32>
    %106 = arith.mulf %101, %105 : vector<34x34xf32>
    %c0_64 = arith.constant 0 : index
    %c3_65 = arith.constant 3 : index
    %c0_66 = arith.constant 0 : index
    %c0_67 = arith.constant 0 : index
    %107 = vector.load %arg5[%c0_64, %c3_65, %c0_66, %c0_67] : memref<2x8x32x32xf32, #tpu.memory_space<vmem>>, vector<1x1x32x32xf32>
    %108 = vector.shape_cast %107 : vector<1x1x32x32xf32> to vector<32x32xf32>
    %cst_68 = arith.constant dense<0.000000e+00> : vector<34x32xf32>
    %109 = tpu.matmul %29, %108, %cst_68 {dimension_numbers = #tpu.dot_dimension_numbers<[1], [0], [0], [1], [0, 0, 1, 1], [], []>} : vector<34x32xf32>, vector<32x32xf32>, vector<34x32xf32> -> vector<34x32xf32>
    %cst_69 = arith.constant dense<0.000000e+00> : vector<34x32xf32>
    %110 = tpu.matmul %106, %109, %cst_69 {dimension_numbers = #tpu.dot_dimension_numbers<[1], [0], [0], [1], [0, 0, 1, 1], [], []>} : vector<34x34xf32>, vector<34x32xf32>, vector<34x32xf32> -> vector<34x32xf32>
    %111 = arith.addf %91, %110 : vector<34x32xf32>
    %c0_70 = arith.constant 0 : index
    %c4 = arith.constant 4 : index
    %c0_71 = arith.constant 0 : index
    %c0_72 = arith.constant 0 : index
    %112 = vector.load %arg4[%c0_70, %c4, %c0_71, %c0_72] : memref<2x8x32x32xf32, #tpu.memory_space<vmem>>, vector<1x1x32x32xf32>
    %113 = vector.shape_cast %112 : vector<1x1x32x32xf32> to vector<32x32xf32>
    %cst_73 = arith.constant dense<0.000000e+00> : vector<34x32xf32>
    %114 = tpu.matmul %29, %113, %cst_73 {dimension_numbers = #tpu.dot_dimension_numbers<[1], [0], [0], [1], [0, 0, 1, 1], [], []>} : vector<34x32xf32>, vector<32x32xf32>, vector<34x32xf32> -> vector<34x32xf32>
    %cst_74 = arith.constant dense<0.000000e+00> : vector<34x34xf32>
    %115 = tpu.matmul %114, %30, %cst_74 {dimension_numbers = #tpu.dot_dimension_numbers<[1], [0], [0], [1], [0, 0, 1, 1], [], []>} : vector<34x32xf32>, vector<32x34xf32>, vector<34x34xf32> -> vector<34x34xf32>
    %116 = arith.addf %115, %3 : vector<34x34xf32>
    %cst_75 = arith.constant dense<0xFF800000> : vector<34xf32>
    %117 = vector.multi_reduction <maximumf>, %116, %cst_75 [1] : vector<34x34xf32> to vector<34xf32>
    %118 = vector.shape_cast %117 : vector<34xf32> to vector<34x1xf32>
    %119 = vector.broadcast %118 : vector<34x1xf32> to vector<34x34xf32>
    %120 = arith.subf %116, %119 : vector<34x34xf32>
    %121 = math.exp %120 : vector<34x34xf32>
    %cst_76 = arith.constant dense<0.000000e+00> : vector<34xf32>
    %122 = vector.multi_reduction <add>, %121, %cst_76 [1] : vector<34x34xf32> to vector<34xf32>
    %123 = vector.shape_cast %122 : vector<34xf32> to vector<34x1xf32>
    %124 = tpu.reciprocal %123 {approx = true} : vector<34x1xf32> -> vector<34x1xf32>
    %125 = vector.broadcast %124 : vector<34x1xf32> to vector<34x34xf32>
    %126 = arith.mulf %121, %125 : vector<34x34xf32>
    %c0_77 = arith.constant 0 : index
    %c4_78 = arith.constant 4 : index
    %c0_79 = arith.constant 0 : index
    %c0_80 = arith.constant 0 : index
    %127 = vector.load %arg5[%c0_77, %c4_78, %c0_79, %c0_80] : memref<2x8x32x32xf32, #tpu.memory_space<vmem>>, vector<1x1x32x32xf32>
    %128 = vector.shape_cast %127 : vector<1x1x32x32xf32> to vector<32x32xf32>
    %cst_81 = arith.constant dense<0.000000e+00> : vector<34x32xf32>
    %129 = tpu.matmul %29, %128, %cst_81 {dimension_numbers = #tpu.dot_dimension_numbers<[1], [0], [0], [1], [0, 0, 1, 1], [], []>} : vector<34x32xf32>, vector<32x32xf32>, vector<34x32xf32> -> vector<34x32xf32>
    %cst_82 = arith.constant dense<0.000000e+00> : vector<34x32xf32>
    %130 = tpu.matmul %126, %129, %cst_82 {dimension_numbers = #tpu.dot_dimension_numbers<[1], [0], [0], [1], [0, 0, 1, 1], [], []>} : vector<34x34xf32>, vector<34x32xf32>, vector<34x32xf32> -> vector<34x32xf32>
    %131 = arith.addf %111, %130 : vector<34x32xf32>
    %c0_83 = arith.constant 0 : index
    %c5 = arith.constant 5 : index
    %c0_84 = arith.constant 0 : index
    %c0_85 = arith.constant 0 : index
    %132 = vector.load %arg4[%c0_83, %c5, %c0_84, %c0_85] : memref<2x8x32x32xf32, #tpu.memory_space<vmem>>, vector<1x1x32x32xf32>
    %133 = vector.shape_cast %132 : vector<1x1x32x32xf32> to vector<32x32xf32>
    %cst_86 = arith.constant dense<0.000000e+00> : vector<34x32xf32>
    %134 = tpu.matmul %29, %133, %cst_86 {dimension_numbers = #tpu.dot_dimension_numbers<[1], [0], [0], [1], [0, 0, 1, 1], [], []>} : vector<34x32xf32>, vector<32x32xf32>, vector<34x32xf32> -> vector<34x32xf32>
    %cst_87 = arith.constant dense<0.000000e+00> : vector<34x34xf32>
    %135 = tpu.matmul %134, %30, %cst_87 {dimension_numbers = #tpu.dot_dimension_numbers<[1], [0], [0], [1], [0, 0, 1, 1], [], []>} : vector<34x32xf32>, vector<32x34xf32>, vector<34x34xf32> -> vector<34x34xf32>
    %136 = arith.addf %135, %3 : vector<34x34xf32>
    %cst_88 = arith.constant dense<0xFF800000> : vector<34xf32>
    %137 = vector.multi_reduction <maximumf>, %136, %cst_88 [1] : vector<34x34xf32> to vector<34xf32>
    %138 = vector.shape_cast %137 : vector<34xf32> to vector<34x1xf32>
    %139 = vector.broadcast %138 : vector<34x1xf32> to vector<34x34xf32>
    %140 = arith.subf %136, %139 : vector<34x34xf32>
    %141 = math.exp %140 : vector<34x34xf32>
    %cst_89 = arith.constant dense<0.000000e+00> : vector<34xf32>
    %142 = vector.multi_reduction <add>, %141, %cst_89 [1] : vector<34x34xf32> to vector<34xf32>
    %143 = vector.shape_cast %142 : vector<34xf32> to vector<34x1xf32>
    %144 = tpu.reciprocal %143 {approx = true} : vector<34x1xf32> -> vector<34x1xf32>
    %145 = vector.broadcast %144 : vector<34x1xf32> to vector<34x34xf32>
    %146 = arith.mulf %141, %145 : vector<34x34xf32>
    %c0_90 = arith.constant 0 : index
    %c5_91 = arith.constant 5 : index
    %c0_92 = arith.constant 0 : index
    %c0_93 = arith.constant 0 : index
    %147 = vector.load %arg5[%c0_90, %c5_91, %c0_92, %c0_93] : memref<2x8x32x32xf32, #tpu.memory_space<vmem>>, vector<1x1x32x32xf32>
    %148 = vector.shape_cast %147 : vector<1x1x32x32xf32> to vector<32x32xf32>
    %cst_94 = arith.constant dense<0.000000e+00> : vector<34x32xf32>
    %149 = tpu.matmul %29, %148, %cst_94 {dimension_numbers = #tpu.dot_dimension_numbers<[1], [0], [0], [1], [0, 0, 1, 1], [], []>} : vector<34x32xf32>, vector<32x32xf32>, vector<34x32xf32> -> vector<34x32xf32>
    %cst_95 = arith.constant dense<0.000000e+00> : vector<34x32xf32>
    %150 = tpu.matmul %146, %149, %cst_95 {dimension_numbers = #tpu.dot_dimension_numbers<[1], [0], [0], [1], [0, 0, 1, 1], [], []>} : vector<34x34xf32>, vector<34x32xf32>, vector<34x32xf32> -> vector<34x32xf32>
    %151 = arith.addf %131, %150 : vector<34x32xf32>
    %c0_96 = arith.constant 0 : index
    %c6 = arith.constant 6 : index
    %c0_97 = arith.constant 0 : index
    %c0_98 = arith.constant 0 : index
    %152 = vector.load %arg4[%c0_96, %c6, %c0_97, %c0_98] : memref<2x8x32x32xf32, #tpu.memory_space<vmem>>, vector<1x1x32x32xf32>
    %153 = vector.shape_cast %152 : vector<1x1x32x32xf32> to vector<32x32xf32>
    %cst_99 = arith.constant dense<0.000000e+00> : vector<34x32xf32>
    %154 = tpu.matmul %29, %153, %cst_99 {dimension_numbers = #tpu.dot_dimension_numbers<[1], [0], [0], [1], [0, 0, 1, 1], [], []>} : vector<34x32xf32>, vector<32x32xf32>, vector<34x32xf32> -> vector<34x32xf32>
    %cst_100 = arith.constant dense<0.000000e+00> : vector<34x34xf32>
    %155 = tpu.matmul %154, %30, %cst_100 {dimension_numbers = #tpu.dot_dimension_numbers<[1], [0], [0], [1], [0, 0, 1, 1], [], []>} : vector<34x32xf32>, vector<32x34xf32>, vector<34x34xf32> -> vector<34x34xf32>
    %156 = arith.addf %155, %3 : vector<34x34xf32>
    %cst_101 = arith.constant dense<0xFF800000> : vector<34xf32>
    %157 = vector.multi_reduction <maximumf>, %156, %cst_101 [1] : vector<34x34xf32> to vector<34xf32>
    %158 = vector.shape_cast %157 : vector<34xf32> to vector<34x1xf32>
    %159 = vector.broadcast %158 : vector<34x1xf32> to vector<34x34xf32>
    %160 = arith.subf %156, %159 : vector<34x34xf32>
    %161 = math.exp %160 : vector<34x34xf32>
    %cst_102 = arith.constant dense<0.000000e+00> : vector<34xf32>
    %162 = vector.multi_reduction <add>, %161, %cst_102 [1] : vector<34x34xf32> to vector<34xf32>
    %163 = vector.shape_cast %162 : vector<34xf32> to vector<34x1xf32>
    %164 = tpu.reciprocal %163 {approx = true} : vector<34x1xf32> -> vector<34x1xf32>
    %165 = vector.broadcast %164 : vector<34x1xf32> to vector<34x34xf32>
    %166 = arith.mulf %161, %165 : vector<34x34xf32>
    %c0_103 = arith.constant 0 : index
    %c6_104 = arith.constant 6 : index
    %c0_105 = arith.constant 0 : index
    %c0_106 = arith.constant 0 : index
    %167 = vector.load %arg5[%c0_103, %c6_104, %c0_105, %c0_106] : memref<2x8x32x32xf32, #tpu.memory_space<vmem>>, vector<1x1x32x32xf32>
    %168 = vector.shape_cast %167 : vector<1x1x32x32xf32> to vector<32x32xf32>
    %cst_107 = arith.constant dense<0.000000e+00> : vector<34x32xf32>
    %169 = tpu.matmul %29, %168, %cst_107 {dimension_numbers = #tpu.dot_dimension_numbers<[1], [0], [0], [1], [0, 0, 1, 1], [], []>} : vector<34x32xf32>, vector<32x32xf32>, vector<34x32xf32> -> vector<34x32xf32>
    %cst_108 = arith.constant dense<0.000000e+00> : vector<34x32xf32>
    %170 = tpu.matmul %166, %169, %cst_108 {dimension_numbers = #tpu.dot_dimension_numbers<[1], [0], [0], [1], [0, 0, 1, 1], [], []>} : vector<34x34xf32>, vector<34x32xf32>, vector<34x32xf32> -> vector<34x32xf32>
    %171 = arith.addf %151, %170 : vector<34x32xf32>
    %c0_109 = arith.constant 0 : index
    %c7 = arith.constant 7 : index
    %c0_110 = arith.constant 0 : index
    %c0_111 = arith.constant 0 : index
    %172 = vector.load %arg4[%c0_109, %c7, %c0_110, %c0_111] : memref<2x8x32x32xf32, #tpu.memory_space<vmem>>, vector<1x1x32x32xf32>
    %173 = vector.shape_cast %172 : vector<1x1x32x32xf32> to vector<32x32xf32>
    %cst_112 = arith.constant dense<0.000000e+00> : vector<34x32xf32>
    %174 = tpu.matmul %29, %173, %cst_112 {dimension_numbers = #tpu.dot_dimension_numbers<[1], [0], [0], [1], [0, 0, 1, 1], [], []>} : vector<34x32xf32>, vector<32x32xf32>, vector<34x32xf32> -> vector<34x32xf32>
    %cst_113 = arith.constant dense<0.000000e+00> : vector<34x34xf32>
    %175 = tpu.matmul %174, %30, %cst_113 {dimension_numbers = #tpu.dot_dimension_numbers<[1], [0], [0], [1], [0, 0, 1, 1], [], []>} : vector<34x32xf32>, vector<32x34xf32>, vector<34x34xf32> -> vector<34x34xf32>
    %176 = arith.addf %175, %3 : vector<34x34xf32>
    %cst_114 = arith.constant dense<0xFF800000> : vector<34xf32>
    %177 = vector.multi_reduction <maximumf>, %176, %cst_114 [1] : vector<34x34xf32> to vector<34xf32>
    %178 = vector.shape_cast %177 : vector<34xf32> to vector<34x1xf32>
    %179 = vector.broadcast %178 : vector<34x1xf32> to vector<34x34xf32>
    %180 = arith.subf %176, %179 : vector<34x34xf32>
    %181 = math.exp %180 : vector<34x34xf32>
    %cst_115 = arith.constant dense<0.000000e+00> : vector<34xf32>
    %182 = vector.multi_reduction <add>, %181, %cst_115 [1] : vector<34x34xf32> to vector<34xf32>
    %183 = vector.shape_cast %182 : vector<34xf32> to vector<34x1xf32>
    %184 = tpu.reciprocal %183 {approx = true} : vector<34x1xf32> -> vector<34x1xf32>
    %185 = vector.broadcast %184 : vector<34x1xf32> to vector<34x34xf32>
    %186 = arith.mulf %181, %185 : vector<34x34xf32>
    %c0_116 = arith.constant 0 : index
    %c7_117 = arith.constant 7 : index
    %c0_118 = arith.constant 0 : index
    %c0_119 = arith.constant 0 : index
    %187 = vector.load %arg5[%c0_116, %c7_117, %c0_118, %c0_119] : memref<2x8x32x32xf32, #tpu.memory_space<vmem>>, vector<1x1x32x32xf32>
    %188 = vector.shape_cast %187 : vector<1x1x32x32xf32> to vector<32x32xf32>
    %cst_120 = arith.constant dense<0.000000e+00> : vector<34x32xf32>
    %189 = tpu.matmul %29, %188, %cst_120 {dimension_numbers = #tpu.dot_dimension_numbers<[1], [0], [0], [1], [0, 0, 1, 1], [], []>} : vector<34x32xf32>, vector<32x32xf32>, vector<34x32xf32> -> vector<34x32xf32>
    %cst_121 = arith.constant dense<0.000000e+00> : vector<34x32xf32>
    %190 = tpu.matmul %186, %189, %cst_121 {dimension_numbers = #tpu.dot_dimension_numbers<[1], [0], [0], [1], [0, 0, 1, 1], [], []>} : vector<34x34xf32>, vector<34x32xf32>, vector<34x32xf32> -> vector<34x32xf32>
    %191 = arith.addf %171, %190 : vector<34x32xf32>
    %192 = arith.addf %2, %191 : vector<34x32xf32>
    %c0_122 = arith.constant 0 : index
    %c2_123 = arith.constant 2 : index
    %c0_124 = arith.constant 0 : index
    %193 = vector.load %arg6[%c0_122, %c2_123, %c0_124] : memref<2x6x32xf32, #tpu.memory_space<vmem>>, vector<1x1x32xf32>
    %194 = vector.shape_cast %193 : vector<1x1x32xf32> to vector<1x32xf32>
    %195 = vector.broadcast %194 : vector<1x32xf32> to vector<34x32xf32>
    %196 = arith.addf %192, %195 : vector<34x32xf32>
    %c0_125 = arith.constant 0 : index
    %c3_126 = arith.constant 3 : index
    %c0_127 = arith.constant 0 : index
    %197 = vector.load %arg6[%c0_125, %c3_126, %c0_127] : memref<2x6x32xf32, #tpu.memory_space<vmem>>, vector<1x1x32xf32>
    %198 = vector.shape_cast %197 : vector<1x1x32xf32> to vector<1x32xf32>
    %c0_128 = arith.constant 0 : index
    %c4_129 = arith.constant 4 : index
    %c0_130 = arith.constant 0 : index
    %199 = vector.load %arg6[%c0_128, %c4_129, %c0_130] : memref<2x6x32xf32, #tpu.memory_space<vmem>>, vector<1x1x32xf32>
    %200 = vector.shape_cast %199 : vector<1x1x32xf32> to vector<1x32xf32>
    %cst_131 = arith.constant dense<0.000000e+00> : vector<34xf32>
    %201 = vector.multi_reduction <add>, %196, %cst_131 [1] : vector<34x32xf32> to vector<34xf32>
    %202 = vector.shape_cast %201 : vector<34xf32> to vector<34x1xf32>
    %cst_132 = arith.constant 3.200000e+01 : f32
    %203 = vector.broadcast %cst_132 : f32 to vector<34x1xf32>
    %204 = arith.divf %202, %203 : vector<34x1xf32>
    %205 = vector.broadcast %204 : vector<34x1xf32> to vector<34x32xf32>
    %206 = arith.subf %196, %205 : vector<34x32xf32>
    %207 = arith.mulf %206, %206 : vector<34x32xf32>
    %cst_133 = arith.constant dense<0.000000e+00> : vector<34xf32>
    %208 = vector.multi_reduction <add>, %207, %cst_133 [1] : vector<34x32xf32> to vector<34xf32>
    %209 = vector.shape_cast %208 : vector<34xf32> to vector<34x1xf32>
    %cst_134 = arith.constant 3.200000e+01 : f32
    %210 = vector.broadcast %cst_134 : f32 to vector<34x1xf32>
    %211 = arith.divf %209, %210 : vector<34x1xf32>
    %212 = vector.broadcast %204 : vector<34x1xf32> to vector<34x32xf32>
    %213 = arith.subf %196, %212 : vector<34x32xf32>
    %cst_135 = arith.constant 9.99999997E-7 : f32
    %214 = vector.broadcast %cst_135 : f32 to vector<34x1xf32>
    %215 = arith.addf %211, %214 : vector<34x1xf32>
    %216 = math.rsqrt %215 : vector<34x1xf32>
    %217 = vector.broadcast %216 : vector<34x1xf32> to vector<34x32xf32>
    %218 = arith.mulf %213, %217 : vector<34x32xf32>
    %219 = vector.broadcast %198 : vector<1x32xf32> to vector<34x32xf32>
    %220 = arith.mulf %218, %219 : vector<34x32xf32>
    %221 = vector.broadcast %200 : vector<1x32xf32> to vector<34x32xf32>
    %222 = arith.addf %220, %221 : vector<34x32xf32>
    %c0_136 = arith.constant 0 : index
    %c0_137 = arith.constant 0 : index
    %c0_138 = arith.constant 0 : index
    %223 = vector.load %arg8[%c0_136, %c0_137, %c0_138] : memref<2x32x128xf32, #tpu.memory_space<vmem>>, vector<1x32x128xf32>
    %224 = vector.shape_cast %223 : vector<1x32x128xf32> to vector<32x128xf32>
    %cst_139 = arith.constant dense<0.000000e+00> : vector<34x128xf32>
    %225 = tpu.matmul %222, %224, %cst_139 {dimension_numbers = #tpu.dot_dimension_numbers<[1], [0], [0], [1], [0, 0, 1, 1], [], []>} : vector<34x32xf32>, vector<32x128xf32>, vector<34x128xf32> -> vector<34x128xf32>
    %c0_140 = arith.constant 0 : index
    %c0_141 = arith.constant 0 : index
    %c0_142 = arith.constant 0 : index
    %226 = vector.load %arg7[%c0_140, %c0_141, %c0_142] : memref<2x1x128xf32, #tpu.memory_space<vmem>>, vector<1x1x128xf32>
    %227 = vector.shape_cast %226 : vector<1x1x128xf32> to vector<1x128xf32>
    %228 = vector.broadcast %227 : vector<1x128xf32> to vector<34x128xf32>
    %229 = arith.addf %225, %228 : vector<34x128xf32>
    %cst_143 = arith.constant 5.000000e-01 : f32
    %230 = vector.broadcast %cst_143 : f32 to vector<34x128xf32>
    %231 = arith.mulf %230, %229 : vector<34x128xf32>
    %cst_144 = arith.constant 0.707106769 : f32
    %232 = vector.broadcast %cst_144 : f32 to vector<34x128xf32>
    %233 = arith.mulf %229, %232 : vector<34x128xf32>
    %cst_145 = arith.constant 0.000000e+00 : f32
    %234 = vector.broadcast %cst_145 : f32 to vector<34x128xf32>
    %235 = arith.cmpf oge, %233, %234 : vector<34x128xf32>
    %cst_146 = arith.constant 1.000000e+00 : f32
    %cst_147 = arith.constant -1.000000e+00 : f32
    %236 = vector.broadcast %cst_146 : f32 to vector<34x128xf32>
    %237 = vector.broadcast %cst_147 : f32 to vector<34x128xf32>
    %238 = arith.select %235, %236, %237 : vector<34x128xi1>, vector<34x128xf32>
    %239 = math.absf %233 : vector<34x128xf32>
    %cst_148 = arith.constant 0.327591091 : f32
    %240 = vector.broadcast %cst_148 : f32 to vector<34x128xf32>
    %241 = arith.mulf %240, %239 : vector<34x128xf32>
    %cst_149 = arith.constant 1.000000e+00 : f32
    %242 = vector.broadcast %cst_149 : f32 to vector<34x128xf32>
    %243 = arith.addf %242, %241 : vector<34x128xf32>
    %244 = tpu.reciprocal %243 {approx = true} : vector<34x128xf32> -> vector<34x128xf32>
    %cst_150 = arith.constant 1.06140542 : f32
    %245 = vector.broadcast %cst_150 : f32 to vector<34x128xf32>
    %246 = arith.mulf %245, %244 : vector<34x128xf32>
    %cst_151 = arith.constant -1.45315206 : f32
    %247 = vector.broadcast %cst_151 : f32 to vector<34x128xf32>
    %248 = arith.addf %246, %247 : vector<34x128xf32>
    %249 = arith.mulf %248, %244 : vector<34x128xf32>
    %cst_152 = arith.constant 1.42141378 : f32
    %250 = vector.broadcast %cst_152 : f32 to vector<34x128xf32>
    %251 = arith.addf %249, %250 : vector<34x128xf32>
    %252 = arith.mulf %251, %244 : vector<34x128xf32>
    %cst_153 = arith.constant -0.284496725 : f32
    %253 = vector.broadcast %cst_153 : f32 to vector<34x128xf32>
    %254 = arith.addf %252, %253 : vector<34x128xf32>
    %255 = arith.mulf %254, %244 : vector<34x128xf32>
    %cst_154 = arith.constant 0.254829586 : f32
    %256 = vector.broadcast %cst_154 : f32 to vector<34x128xf32>
    %257 = arith.addf %255, %256 : vector<34x128xf32>
    %258 = arith.mulf %257, %244 : vector<34x128xf32>
    %cst_155 = arith.constant 0.000000e+00 : f32
    %259 = vector.broadcast %cst_155 : f32 to vector<34x128xf32>
    %260 = arith.subf %259, %239 : vector<34x128xf32>
    %261 = arith.mulf %260, %239 : vector<34x128xf32>
    %262 = math.exp %261 : vector<34x128xf32>
    %263 = arith.mulf %258, %262 : vector<34x128xf32>
    %cst_156 = arith.constant 1.000000e+00 : f32
    %264 = vector.broadcast %cst_156 : f32 to vector<34x128xf32>
    %265 = arith.subf %264, %263 : vector<34x128xf32>
    %266 = arith.mulf %238, %265 : vector<34x128xf32>
    %cst_157 = arith.constant 1.000000e+00 : f32
    %267 = vector.broadcast %cst_157 : f32 to vector<34x128xf32>
    %268 = arith.addf %267, %266 : vector<34x128xf32>
    %269 = arith.mulf %231, %268 : vector<34x128xf32>
    %c0_158 = arith.constant 0 : index
    %c0_159 = arith.constant 0 : index
    %c0_160 = arith.constant 0 : index
    %270 = vector.load %arg9[%c0_158, %c0_159, %c0_160] : memref<2x128x32xf32, #tpu.memory_space<vmem>>, vector<1x128x32xf32>
    %271 = vector.shape_cast %270 : vector<1x128x32xf32> to vector<128x32xf32>
    %cst_161 = arith.constant dense<0.000000e+00> : vector<34x32xf32>
    %272 = tpu.matmul %269, %271, %cst_161 {dimension_numbers = #tpu.dot_dimension_numbers<[1], [0], [0], [1], [0, 0, 1, 1], [], []>} : vector<34x128xf32>, vector<128x32xf32>, vector<34x32xf32> -> vector<34x32xf32>
    %273 = arith.addf %196, %272 : vector<34x32xf32>
    %c0_162 = arith.constant 0 : index
    %c5_163 = arith.constant 5 : index
    %c0_164 = arith.constant 0 : index
    %274 = vector.load %arg6[%c0_162, %c5_163, %c0_164] : memref<2x6x32xf32, #tpu.memory_space<vmem>>, vector<1x1x32xf32>
    %275 = vector.shape_cast %274 : vector<1x1x32xf32> to vector<1x32xf32>
    %276 = vector.broadcast %275 : vector<1x32xf32> to vector<34x32xf32>
    %277 = arith.addf %273, %276 : vector<34x32xf32>
    %c1_165 = arith.constant 1 : index
    %c0_166 = arith.constant 0 : index
    %c0_167 = arith.constant 0 : index
    %278 = vector.load %arg6[%c1_165, %c0_166, %c0_167] : memref<2x6x32xf32, #tpu.memory_space<vmem>>, vector<1x1x32xf32>
    %279 = vector.shape_cast %278 : vector<1x1x32xf32> to vector<1x32xf32>
    %c1_168 = arith.constant 1 : index
    %c1_169 = arith.constant 1 : index
    %c0_170 = arith.constant 0 : index
    %280 = vector.load %arg6[%c1_168, %c1_169, %c0_170] : memref<2x6x32xf32, #tpu.memory_space<vmem>>, vector<1x1x32xf32>
    %281 = vector.shape_cast %280 : vector<1x1x32xf32> to vector<1x32xf32>
    %cst_171 = arith.constant dense<0.000000e+00> : vector<34xf32>
    %282 = vector.multi_reduction <add>, %277, %cst_171 [1] : vector<34x32xf32> to vector<34xf32>
    %283 = vector.shape_cast %282 : vector<34xf32> to vector<34x1xf32>
    %cst_172 = arith.constant 3.200000e+01 : f32
    %284 = vector.broadcast %cst_172 : f32 to vector<34x1xf32>
    %285 = arith.divf %283, %284 : vector<34x1xf32>
    %286 = vector.broadcast %285 : vector<34x1xf32> to vector<34x32xf32>
    %287 = arith.subf %277, %286 : vector<34x32xf32>
    %288 = arith.mulf %287, %287 : vector<34x32xf32>
    %cst_173 = arith.constant dense<0.000000e+00> : vector<34xf32>
    %289 = vector.multi_reduction <add>, %288, %cst_173 [1] : vector<34x32xf32> to vector<34xf32>
    %290 = vector.shape_cast %289 : vector<34xf32> to vector<34x1xf32>
    %cst_174 = arith.constant 3.200000e+01 : f32
    %291 = vector.broadcast %cst_174 : f32 to vector<34x1xf32>
    %292 = arith.divf %290, %291 : vector<34x1xf32>
    %293 = vector.broadcast %285 : vector<34x1xf32> to vector<34x32xf32>
    %294 = arith.subf %277, %293 : vector<34x32xf32>
    %cst_175 = arith.constant 9.99999997E-7 : f32
    %295 = vector.broadcast %cst_175 : f32 to vector<34x1xf32>
    %296 = arith.addf %292, %295 : vector<34x1xf32>
    %297 = math.rsqrt %296 : vector<34x1xf32>
    %298 = vector.broadcast %297 : vector<34x1xf32> to vector<34x32xf32>
    %299 = arith.mulf %294, %298 : vector<34x32xf32>
    %300 = vector.broadcast %279 : vector<1x32xf32> to vector<34x32xf32>
    %301 = arith.mulf %299, %300 : vector<34x32xf32>
    %302 = vector.broadcast %281 : vector<1x32xf32> to vector<34x32xf32>
    %303 = arith.addf %301, %302 : vector<34x32xf32>
    %304 = tpu.transpose %303, [1, 0] : vector<34x32xf32> -> vector<32x34xf32>
    %cst_176 = arith.constant 0.000000e+00 : f32
    %305 = vector.broadcast %cst_176 : f32 to vector<34x32xf32>
    %c1_177 = arith.constant 1 : index
    %c0_178 = arith.constant 0 : index
    %c0_179 = arith.constant 0 : index
    %c0_180 = arith.constant 0 : index
    %306 = vector.load %arg4[%c1_177, %c0_178, %c0_179, %c0_180] : memref<2x8x32x32xf32, #tpu.memory_space<vmem>>, vector<1x1x32x32xf32>
    %307 = vector.shape_cast %306 : vector<1x1x32x32xf32> to vector<32x32xf32>
    %cst_181 = arith.constant dense<0.000000e+00> : vector<34x32xf32>
    %308 = tpu.matmul %303, %307, %cst_181 {dimension_numbers = #tpu.dot_dimension_numbers<[1], [0], [0], [1], [0, 0, 1, 1], [], []>} : vector<34x32xf32>, vector<32x32xf32>, vector<34x32xf32> -> vector<34x32xf32>
    %cst_182 = arith.constant dense<0.000000e+00> : vector<34x34xf32>
    %309 = tpu.matmul %308, %304, %cst_182 {dimension_numbers = #tpu.dot_dimension_numbers<[1], [0], [0], [1], [0, 0, 1, 1], [], []>} : vector<34x32xf32>, vector<32x34xf32>, vector<34x34xf32> -> vector<34x34xf32>
    %310 = arith.addf %309, %3 : vector<34x34xf32>
    %cst_183 = arith.constant dense<0xFF800000> : vector<34xf32>
    %311 = vector.multi_reduction <maximumf>, %310, %cst_183 [1] : vector<34x34xf32> to vector<34xf32>
    %312 = vector.shape_cast %311 : vector<34xf32> to vector<34x1xf32>
    %313 = vector.broadcast %312 : vector<34x1xf32> to vector<34x34xf32>
    %314 = arith.subf %310, %313 : vector<34x34xf32>
    %315 = math.exp %314 : vector<34x34xf32>
    %cst_184 = arith.constant dense<0.000000e+00> : vector<34xf32>
    %316 = vector.multi_reduction <add>, %315, %cst_184 [1] : vector<34x34xf32> to vector<34xf32>
    %317 = vector.shape_cast %316 : vector<34xf32> to vector<34x1xf32>
    %318 = tpu.reciprocal %317 {approx = true} : vector<34x1xf32> -> vector<34x1xf32>
    %319 = vector.broadcast %318 : vector<34x1xf32> to vector<34x34xf32>
    %320 = arith.mulf %315, %319 : vector<34x34xf32>
    %c1_185 = arith.constant 1 : index
    %c0_186 = arith.constant 0 : index
    %c0_187 = arith.constant 0 : index
    %c0_188 = arith.constant 0 : index
    %321 = vector.load %arg5[%c1_185, %c0_186, %c0_187, %c0_188] : memref<2x8x32x32xf32, #tpu.memory_space<vmem>>, vector<1x1x32x32xf32>
    %322 = vector.shape_cast %321 : vector<1x1x32x32xf32> to vector<32x32xf32>
    %cst_189 = arith.constant dense<0.000000e+00> : vector<34x32xf32>
    %323 = tpu.matmul %303, %322, %cst_189 {dimension_numbers = #tpu.dot_dimension_numbers<[1], [0], [0], [1], [0, 0, 1, 1], [], []>} : vector<34x32xf32>, vector<32x32xf32>, vector<34x32xf32> -> vector<34x32xf32>
    %cst_190 = arith.constant dense<0.000000e+00> : vector<34x32xf32>
    %324 = tpu.matmul %320, %323, %cst_190 {dimension_numbers = #tpu.dot_dimension_numbers<[1], [0], [0], [1], [0, 0, 1, 1], [], []>} : vector<34x34xf32>, vector<34x32xf32>, vector<34x32xf32> -> vector<34x32xf32>
    %325 = arith.addf %305, %324 : vector<34x32xf32>
    %c1_191 = arith.constant 1 : index
    %c1_192 = arith.constant 1 : index
    %c0_193 = arith.constant 0 : index
    %c0_194 = arith.constant 0 : index
    %326 = vector.load %arg4[%c1_191, %c1_192, %c0_193, %c0_194] : memref<2x8x32x32xf32, #tpu.memory_space<vmem>>, vector<1x1x32x32xf32>
    %327 = vector.shape_cast %326 : vector<1x1x32x32xf32> to vector<32x32xf32>
    %cst_195 = arith.constant dense<0.000000e+00> : vector<34x32xf32>
    %328 = tpu.matmul %303, %327, %cst_195 {dimension_numbers = #tpu.dot_dimension_numbers<[1], [0], [0], [1], [0, 0, 1, 1], [], []>} : vector<34x32xf32>, vector<32x32xf32>, vector<34x32xf32> -> vector<34x32xf32>
    %cst_196 = arith.constant dense<0.000000e+00> : vector<34x34xf32>
    %329 = tpu.matmul %328, %304, %cst_196 {dimension_numbers = #tpu.dot_dimension_numbers<[1], [0], [0], [1], [0, 0, 1, 1], [], []>} : vector<34x32xf32>, vector<32x34xf32>, vector<34x34xf32> -> vector<34x34xf32>
    %330 = arith.addf %329, %3 : vector<34x34xf32>
    %cst_197 = arith.constant dense<0xFF800000> : vector<34xf32>
    %331 = vector.multi_reduction <maximumf>, %330, %cst_197 [1] : vector<34x34xf32> to vector<34xf32>
    %332 = vector.shape_cast %331 : vector<34xf32> to vector<34x1xf32>
    %333 = vector.broadcast %332 : vector<34x1xf32> to vector<34x34xf32>
    %334 = arith.subf %330, %333 : vector<34x34xf32>
    %335 = math.exp %334 : vector<34x34xf32>
    %cst_198 = arith.constant dense<0.000000e+00> : vector<34xf32>
    %336 = vector.multi_reduction <add>, %335, %cst_198 [1] : vector<34x34xf32> to vector<34xf32>
    %337 = vector.shape_cast %336 : vector<34xf32> to vector<34x1xf32>
    %338 = tpu.reciprocal %337 {approx = true} : vector<34x1xf32> -> vector<34x1xf32>
    %339 = vector.broadcast %338 : vector<34x1xf32> to vector<34x34xf32>
    %340 = arith.mulf %335, %339 : vector<34x34xf32>
    %c1_199 = arith.constant 1 : index
    %c1_200 = arith.constant 1 : index
    %c0_201 = arith.constant 0 : index
    %c0_202 = arith.constant 0 : index
    %341 = vector.load %arg5[%c1_199, %c1_200, %c0_201, %c0_202] : memref<2x8x32x32xf32, #tpu.memory_space<vmem>>, vector<1x1x32x32xf32>
    %342 = vector.shape_cast %341 : vector<1x1x32x32xf32> to vector<32x32xf32>
    %cst_203 = arith.constant dense<0.000000e+00> : vector<34x32xf32>
    %343 = tpu.matmul %303, %342, %cst_203 {dimension_numbers = #tpu.dot_dimension_numbers<[1], [0], [0], [1], [0, 0, 1, 1], [], []>} : vector<34x32xf32>, vector<32x32xf32>, vector<34x32xf32> -> vector<34x32xf32>
    %cst_204 = arith.constant dense<0.000000e+00> : vector<34x32xf32>
    %344 = tpu.matmul %340, %343, %cst_204 {dimension_numbers = #tpu.dot_dimension_numbers<[1], [0], [0], [1], [0, 0, 1, 1], [], []>} : vector<34x34xf32>, vector<34x32xf32>, vector<34x32xf32> -> vector<34x32xf32>
    %345 = arith.addf %325, %344 : vector<34x32xf32>
    %c1_205 = arith.constant 1 : index
    %c2_206 = arith.constant 2 : index
    %c0_207 = arith.constant 0 : index
    %c0_208 = arith.constant 0 : index
    %346 = vector.load %arg4[%c1_205, %c2_206, %c0_207, %c0_208] : memref<2x8x32x32xf32, #tpu.memory_space<vmem>>, vector<1x1x32x32xf32>
    %347 = vector.shape_cast %346 : vector<1x1x32x32xf32> to vector<32x32xf32>
    %cst_209 = arith.constant dense<0.000000e+00> : vector<34x32xf32>
    %348 = tpu.matmul %303, %347, %cst_209 {dimension_numbers = #tpu.dot_dimension_numbers<[1], [0], [0], [1], [0, 0, 1, 1], [], []>} : vector<34x32xf32>, vector<32x32xf32>, vector<34x32xf32> -> vector<34x32xf32>
    %cst_210 = arith.constant dense<0.000000e+00> : vector<34x34xf32>
    %349 = tpu.matmul %348, %304, %cst_210 {dimension_numbers = #tpu.dot_dimension_numbers<[1], [0], [0], [1], [0, 0, 1, 1], [], []>} : vector<34x32xf32>, vector<32x34xf32>, vector<34x34xf32> -> vector<34x34xf32>
    %350 = arith.addf %349, %3 : vector<34x34xf32>
    %cst_211 = arith.constant dense<0xFF800000> : vector<34xf32>
    %351 = vector.multi_reduction <maximumf>, %350, %cst_211 [1] : vector<34x34xf32> to vector<34xf32>
    %352 = vector.shape_cast %351 : vector<34xf32> to vector<34x1xf32>
    %353 = vector.broadcast %352 : vector<34x1xf32> to vector<34x34xf32>
    %354 = arith.subf %350, %353 : vector<34x34xf32>
    %355 = math.exp %354 : vector<34x34xf32>
    %cst_212 = arith.constant dense<0.000000e+00> : vector<34xf32>
    %356 = vector.multi_reduction <add>, %355, %cst_212 [1] : vector<34x34xf32> to vector<34xf32>
    %357 = vector.shape_cast %356 : vector<34xf32> to vector<34x1xf32>
    %358 = tpu.reciprocal %357 {approx = true} : vector<34x1xf32> -> vector<34x1xf32>
    %359 = vector.broadcast %358 : vector<34x1xf32> to vector<34x34xf32>
    %360 = arith.mulf %355, %359 : vector<34x34xf32>
    %c1_213 = arith.constant 1 : index
    %c2_214 = arith.constant 2 : index
    %c0_215 = arith.constant 0 : index
    %c0_216 = arith.constant 0 : index
    %361 = vector.load %arg5[%c1_213, %c2_214, %c0_215, %c0_216] : memref<2x8x32x32xf32, #tpu.memory_space<vmem>>, vector<1x1x32x32xf32>
    %362 = vector.shape_cast %361 : vector<1x1x32x32xf32> to vector<32x32xf32>
    %cst_217 = arith.constant dense<0.000000e+00> : vector<34x32xf32>
    %363 = tpu.matmul %303, %362, %cst_217 {dimension_numbers = #tpu.dot_dimension_numbers<[1], [0], [0], [1], [0, 0, 1, 1], [], []>} : vector<34x32xf32>, vector<32x32xf32>, vector<34x32xf32> -> vector<34x32xf32>
    %cst_218 = arith.constant dense<0.000000e+00> : vector<34x32xf32>
    %364 = tpu.matmul %360, %363, %cst_218 {dimension_numbers = #tpu.dot_dimension_numbers<[1], [0], [0], [1], [0, 0, 1, 1], [], []>} : vector<34x34xf32>, vector<34x32xf32>, vector<34x32xf32> -> vector<34x32xf32>
    %365 = arith.addf %345, %364 : vector<34x32xf32>
    %c1_219 = arith.constant 1 : index
    %c3_220 = arith.constant 3 : index
    %c0_221 = arith.constant 0 : index
    %c0_222 = arith.constant 0 : index
    %366 = vector.load %arg4[%c1_219, %c3_220, %c0_221, %c0_222] : memref<2x8x32x32xf32, #tpu.memory_space<vmem>>, vector<1x1x32x32xf32>
    %367 = vector.shape_cast %366 : vector<1x1x32x32xf32> to vector<32x32xf32>
    %cst_223 = arith.constant dense<0.000000e+00> : vector<34x32xf32>
    %368 = tpu.matmul %303, %367, %cst_223 {dimension_numbers = #tpu.dot_dimension_numbers<[1], [0], [0], [1], [0, 0, 1, 1], [], []>} : vector<34x32xf32>, vector<32x32xf32>, vector<34x32xf32> -> vector<34x32xf32>
    %cst_224 = arith.constant dense<0.000000e+00> : vector<34x34xf32>
    %369 = tpu.matmul %368, %304, %cst_224 {dimension_numbers = #tpu.dot_dimension_numbers<[1], [0], [0], [1], [0, 0, 1, 1], [], []>} : vector<34x32xf32>, vector<32x34xf32>, vector<34x34xf32> -> vector<34x34xf32>
    %370 = arith.addf %369, %3 : vector<34x34xf32>
    %cst_225 = arith.constant dense<0xFF800000> : vector<34xf32>
    %371 = vector.multi_reduction <maximumf>, %370, %cst_225 [1] : vector<34x34xf32> to vector<34xf32>
    %372 = vector.shape_cast %371 : vector<34xf32> to vector<34x1xf32>
    %373 = vector.broadcast %372 : vector<34x1xf32> to vector<34x34xf32>
    %374 = arith.subf %370, %373 : vector<34x34xf32>
    %375 = math.exp %374 : vector<34x34xf32>
    %cst_226 = arith.constant dense<0.000000e+00> : vector<34xf32>
    %376 = vector.multi_reduction <add>, %375, %cst_226 [1] : vector<34x34xf32> to vector<34xf32>
    %377 = vector.shape_cast %376 : vector<34xf32> to vector<34x1xf32>
    %378 = tpu.reciprocal %377 {approx = true} : vector<34x1xf32> -> vector<34x1xf32>
    %379 = vector.broadcast %378 : vector<34x1xf32> to vector<34x34xf32>
    %380 = arith.mulf %375, %379 : vector<34x34xf32>
    %c1_227 = arith.constant 1 : index
    %c3_228 = arith.constant 3 : index
    %c0_229 = arith.constant 0 : index
    %c0_230 = arith.constant 0 : index
    %381 = vector.load %arg5[%c1_227, %c3_228, %c0_229, %c0_230] : memref<2x8x32x32xf32, #tpu.memory_space<vmem>>, vector<1x1x32x32xf32>
    %382 = vector.shape_cast %381 : vector<1x1x32x32xf32> to vector<32x32xf32>
    %cst_231 = arith.constant dense<0.000000e+00> : vector<34x32xf32>
    %383 = tpu.matmul %303, %382, %cst_231 {dimension_numbers = #tpu.dot_dimension_numbers<[1], [0], [0], [1], [0, 0, 1, 1], [], []>} : vector<34x32xf32>, vector<32x32xf32>, vector<34x32xf32> -> vector<34x32xf32>
    %cst_232 = arith.constant dense<0.000000e+00> : vector<34x32xf32>
    %384 = tpu.matmul %380, %383, %cst_232 {dimension_numbers = #tpu.dot_dimension_numbers<[1], [0], [0], [1], [0, 0, 1, 1], [], []>} : vector<34x34xf32>, vector<34x32xf32>, vector<34x32xf32> -> vector<34x32xf32>
    %385 = arith.addf %365, %384 : vector<34x32xf32>
    %c1_233 = arith.constant 1 : index
    %c4_234 = arith.constant 4 : index
    %c0_235 = arith.constant 0 : index
    %c0_236 = arith.constant 0 : index
    %386 = vector.load %arg4[%c1_233, %c4_234, %c0_235, %c0_236] : memref<2x8x32x32xf32, #tpu.memory_space<vmem>>, vector<1x1x32x32xf32>
    %387 = vector.shape_cast %386 : vector<1x1x32x32xf32> to vector<32x32xf32>
    %cst_237 = arith.constant dense<0.000000e+00> : vector<34x32xf32>
    %388 = tpu.matmul %303, %387, %cst_237 {dimension_numbers = #tpu.dot_dimension_numbers<[1], [0], [0], [1], [0, 0, 1, 1], [], []>} : vector<34x32xf32>, vector<32x32xf32>, vector<34x32xf32> -> vector<34x32xf32>
    %cst_238 = arith.constant dense<0.000000e+00> : vector<34x34xf32>
    %389 = tpu.matmul %388, %304, %cst_238 {dimension_numbers = #tpu.dot_dimension_numbers<[1], [0], [0], [1], [0, 0, 1, 1], [], []>} : vector<34x32xf32>, vector<32x34xf32>, vector<34x34xf32> -> vector<34x34xf32>
    %390 = arith.addf %389, %3 : vector<34x34xf32>
    %cst_239 = arith.constant dense<0xFF800000> : vector<34xf32>
    %391 = vector.multi_reduction <maximumf>, %390, %cst_239 [1] : vector<34x34xf32> to vector<34xf32>
    %392 = vector.shape_cast %391 : vector<34xf32> to vector<34x1xf32>
    %393 = vector.broadcast %392 : vector<34x1xf32> to vector<34x34xf32>
    %394 = arith.subf %390, %393 : vector<34x34xf32>
    %395 = math.exp %394 : vector<34x34xf32>
    %cst_240 = arith.constant dense<0.000000e+00> : vector<34xf32>
    %396 = vector.multi_reduction <add>, %395, %cst_240 [1] : vector<34x34xf32> to vector<34xf32>
    %397 = vector.shape_cast %396 : vector<34xf32> to vector<34x1xf32>
    %398 = tpu.reciprocal %397 {approx = true} : vector<34x1xf32> -> vector<34x1xf32>
    %399 = vector.broadcast %398 : vector<34x1xf32> to vector<34x34xf32>
    %400 = arith.mulf %395, %399 : vector<34x34xf32>
    %c1_241 = arith.constant 1 : index
    %c4_242 = arith.constant 4 : index
    %c0_243 = arith.constant 0 : index
    %c0_244 = arith.constant 0 : index
    %401 = vector.load %arg5[%c1_241, %c4_242, %c0_243, %c0_244] : memref<2x8x32x32xf32, #tpu.memory_space<vmem>>, vector<1x1x32x32xf32>
    %402 = vector.shape_cast %401 : vector<1x1x32x32xf32> to vector<32x32xf32>
    %cst_245 = arith.constant dense<0.000000e+00> : vector<34x32xf32>
    %403 = tpu.matmul %303, %402, %cst_245 {dimension_numbers = #tpu.dot_dimension_numbers<[1], [0], [0], [1], [0, 0, 1, 1], [], []>} : vector<34x32xf32>, vector<32x32xf32>, vector<34x32xf32> -> vector<34x32xf32>
    %cst_246 = arith.constant dense<0.000000e+00> : vector<34x32xf32>
    %404 = tpu.matmul %400, %403, %cst_246 {dimension_numbers = #tpu.dot_dimension_numbers<[1], [0], [0], [1], [0, 0, 1, 1], [], []>} : vector<34x34xf32>, vector<34x32xf32>, vector<34x32xf32> -> vector<34x32xf32>
    %405 = arith.addf %385, %404 : vector<34x32xf32>
    %c1_247 = arith.constant 1 : index
    %c5_248 = arith.constant 5 : index
    %c0_249 = arith.constant 0 : index
    %c0_250 = arith.constant 0 : index
    %406 = vector.load %arg4[%c1_247, %c5_248, %c0_249, %c0_250] : memref<2x8x32x32xf32, #tpu.memory_space<vmem>>, vector<1x1x32x32xf32>
    %407 = vector.shape_cast %406 : vector<1x1x32x32xf32> to vector<32x32xf32>
    %cst_251 = arith.constant dense<0.000000e+00> : vector<34x32xf32>
    %408 = tpu.matmul %303, %407, %cst_251 {dimension_numbers = #tpu.dot_dimension_numbers<[1], [0], [0], [1], [0, 0, 1, 1], [], []>} : vector<34x32xf32>, vector<32x32xf32>, vector<34x32xf32> -> vector<34x32xf32>
    %cst_252 = arith.constant dense<0.000000e+00> : vector<34x34xf32>
    %409 = tpu.matmul %408, %304, %cst_252 {dimension_numbers = #tpu.dot_dimension_numbers<[1], [0], [0], [1], [0, 0, 1, 1], [], []>} : vector<34x32xf32>, vector<32x34xf32>, vector<34x34xf32> -> vector<34x34xf32>
    %410 = arith.addf %409, %3 : vector<34x34xf32>
    %cst_253 = arith.constant dense<0xFF800000> : vector<34xf32>
    %411 = vector.multi_reduction <maximumf>, %410, %cst_253 [1] : vector<34x34xf32> to vector<34xf32>
    %412 = vector.shape_cast %411 : vector<34xf32> to vector<34x1xf32>
    %413 = vector.broadcast %412 : vector<34x1xf32> to vector<34x34xf32>
    %414 = arith.subf %410, %413 : vector<34x34xf32>
    %415 = math.exp %414 : vector<34x34xf32>
    %cst_254 = arith.constant dense<0.000000e+00> : vector<34xf32>
    %416 = vector.multi_reduction <add>, %415, %cst_254 [1] : vector<34x34xf32> to vector<34xf32>
    %417 = vector.shape_cast %416 : vector<34xf32> to vector<34x1xf32>
    %418 = tpu.reciprocal %417 {approx = true} : vector<34x1xf32> -> vector<34x1xf32>
    %419 = vector.broadcast %418 : vector<34x1xf32> to vector<34x34xf32>
    %420 = arith.mulf %415, %419 : vector<34x34xf32>
    %c1_255 = arith.constant 1 : index
    %c5_256 = arith.constant 5 : index
    %c0_257 = arith.constant 0 : index
    %c0_258 = arith.constant 0 : index
    %421 = vector.load %arg5[%c1_255, %c5_256, %c0_257, %c0_258] : memref<2x8x32x32xf32, #tpu.memory_space<vmem>>, vector<1x1x32x32xf32>
    %422 = vector.shape_cast %421 : vector<1x1x32x32xf32> to vector<32x32xf32>
    %cst_259 = arith.constant dense<0.000000e+00> : vector<34x32xf32>
    %423 = tpu.matmul %303, %422, %cst_259 {dimension_numbers = #tpu.dot_dimension_numbers<[1], [0], [0], [1], [0, 0, 1, 1], [], []>} : vector<34x32xf32>, vector<32x32xf32>, vector<34x32xf32> -> vector<34x32xf32>
    %cst_260 = arith.constant dense<0.000000e+00> : vector<34x32xf32>
    %424 = tpu.matmul %420, %423, %cst_260 {dimension_numbers = #tpu.dot_dimension_numbers<[1], [0], [0], [1], [0, 0, 1, 1], [], []>} : vector<34x34xf32>, vector<34x32xf32>, vector<34x32xf32> -> vector<34x32xf32>
    %425 = arith.addf %405, %424 : vector<34x32xf32>
    %c1_261 = arith.constant 1 : index
    %c6_262 = arith.constant 6 : index
    %c0_263 = arith.constant 0 : index
    %c0_264 = arith.constant 0 : index
    %426 = vector.load %arg4[%c1_261, %c6_262, %c0_263, %c0_264] : memref<2x8x32x32xf32, #tpu.memory_space<vmem>>, vector<1x1x32x32xf32>
    %427 = vector.shape_cast %426 : vector<1x1x32x32xf32> to vector<32x32xf32>
    %cst_265 = arith.constant dense<0.000000e+00> : vector<34x32xf32>
    %428 = tpu.matmul %303, %427, %cst_265 {dimension_numbers = #tpu.dot_dimension_numbers<[1], [0], [0], [1], [0, 0, 1, 1], [], []>} : vector<34x32xf32>, vector<32x32xf32>, vector<34x32xf32> -> vector<34x32xf32>
    %cst_266 = arith.constant dense<0.000000e+00> : vector<34x34xf32>
    %429 = tpu.matmul %428, %304, %cst_266 {dimension_numbers = #tpu.dot_dimension_numbers<[1], [0], [0], [1], [0, 0, 1, 1], [], []>} : vector<34x32xf32>, vector<32x34xf32>, vector<34x34xf32> -> vector<34x34xf32>
    %430 = arith.addf %429, %3 : vector<34x34xf32>
    %cst_267 = arith.constant dense<0xFF800000> : vector<34xf32>
    %431 = vector.multi_reduction <maximumf>, %430, %cst_267 [1] : vector<34x34xf32> to vector<34xf32>
    %432 = vector.shape_cast %431 : vector<34xf32> to vector<34x1xf32>
    %433 = vector.broadcast %432 : vector<34x1xf32> to vector<34x34xf32>
    %434 = arith.subf %430, %433 : vector<34x34xf32>
    %435 = math.exp %434 : vector<34x34xf32>
    %cst_268 = arith.constant dense<0.000000e+00> : vector<34xf32>
    %436 = vector.multi_reduction <add>, %435, %cst_268 [1] : vector<34x34xf32> to vector<34xf32>
    %437 = vector.shape_cast %436 : vector<34xf32> to vector<34x1xf32>
    %438 = tpu.reciprocal %437 {approx = true} : vector<34x1xf32> -> vector<34x1xf32>
    %439 = vector.broadcast %438 : vector<34x1xf32> to vector<34x34xf32>
    %440 = arith.mulf %435, %439 : vector<34x34xf32>
    %c1_269 = arith.constant 1 : index
    %c6_270 = arith.constant 6 : index
    %c0_271 = arith.constant 0 : index
    %c0_272 = arith.constant 0 : index
    %441 = vector.load %arg5[%c1_269, %c6_270, %c0_271, %c0_272] : memref<2x8x32x32xf32, #tpu.memory_space<vmem>>, vector<1x1x32x32xf32>
    %442 = vector.shape_cast %441 : vector<1x1x32x32xf32> to vector<32x32xf32>
    %cst_273 = arith.constant dense<0.000000e+00> : vector<34x32xf32>
    %443 = tpu.matmul %303, %442, %cst_273 {dimension_numbers = #tpu.dot_dimension_numbers<[1], [0], [0], [1], [0, 0, 1, 1], [], []>} : vector<34x32xf32>, vector<32x32xf32>, vector<34x32xf32> -> vector<34x32xf32>
    %cst_274 = arith.constant dense<0.000000e+00> : vector<34x32xf32>
    %444 = tpu.matmul %440, %443, %cst_274 {dimension_numbers = #tpu.dot_dimension_numbers<[1], [0], [0], [1], [0, 0, 1, 1], [], []>} : vector<34x34xf32>, vector<34x32xf32>, vector<34x32xf32> -> vector<34x32xf32>
    %445 = arith.addf %425, %444 : vector<34x32xf32>
    %c1_275 = arith.constant 1 : index
    %c7_276 = arith.constant 7 : index
    %c0_277 = arith.constant 0 : index
    %c0_278 = arith.constant 0 : index
    %446 = vector.load %arg4[%c1_275, %c7_276, %c0_277, %c0_278] : memref<2x8x32x32xf32, #tpu.memory_space<vmem>>, vector<1x1x32x32xf32>
    %447 = vector.shape_cast %446 : vector<1x1x32x32xf32> to vector<32x32xf32>
    %cst_279 = arith.constant dense<0.000000e+00> : vector<34x32xf32>
    %448 = tpu.matmul %303, %447, %cst_279 {dimension_numbers = #tpu.dot_dimension_numbers<[1], [0], [0], [1], [0, 0, 1, 1], [], []>} : vector<34x32xf32>, vector<32x32xf32>, vector<34x32xf32> -> vector<34x32xf32>
    %cst_280 = arith.constant dense<0.000000e+00> : vector<34x34xf32>
    %449 = tpu.matmul %448, %304, %cst_280 {dimension_numbers = #tpu.dot_dimension_numbers<[1], [0], [0], [1], [0, 0, 1, 1], [], []>} : vector<34x32xf32>, vector<32x34xf32>, vector<34x34xf32> -> vector<34x34xf32>
    %450 = arith.addf %449, %3 : vector<34x34xf32>
    %cst_281 = arith.constant dense<0xFF800000> : vector<34xf32>
    %451 = vector.multi_reduction <maximumf>, %450, %cst_281 [1] : vector<34x34xf32> to vector<34xf32>
    %452 = vector.shape_cast %451 : vector<34xf32> to vector<34x1xf32>
    %453 = vector.broadcast %452 : vector<34x1xf32> to vector<34x34xf32>
    %454 = arith.subf %450, %453 : vector<34x34xf32>
    %455 = math.exp %454 : vector<34x34xf32>
    %cst_282 = arith.constant dense<0.000000e+00> : vector<34xf32>
    %456 = vector.multi_reduction <add>, %455, %cst_282 [1] : vector<34x34xf32> to vector<34xf32>
    %457 = vector.shape_cast %456 : vector<34xf32> to vector<34x1xf32>
    %458 = tpu.reciprocal %457 {approx = true} : vector<34x1xf32> -> vector<34x1xf32>
    %459 = vector.broadcast %458 : vector<34x1xf32> to vector<34x34xf32>
    %460 = arith.mulf %455, %459 : vector<34x34xf32>
    %c1_283 = arith.constant 1 : index
    %c7_284 = arith.constant 7 : index
    %c0_285 = arith.constant 0 : index
    %c0_286 = arith.constant 0 : index
    %461 = vector.load %arg5[%c1_283, %c7_284, %c0_285, %c0_286] : memref<2x8x32x32xf32, #tpu.memory_space<vmem>>, vector<1x1x32x32xf32>
    %462 = vector.shape_cast %461 : vector<1x1x32x32xf32> to vector<32x32xf32>
    %cst_287 = arith.constant dense<0.000000e+00> : vector<34x32xf32>
    %463 = tpu.matmul %303, %462, %cst_287 {dimension_numbers = #tpu.dot_dimension_numbers<[1], [0], [0], [1], [0, 0, 1, 1], [], []>} : vector<34x32xf32>, vector<32x32xf32>, vector<34x32xf32> -> vector<34x32xf32>
    %cst_288 = arith.constant dense<0.000000e+00> : vector<34x32xf32>
    %464 = tpu.matmul %460, %463, %cst_288 {dimension_numbers = #tpu.dot_dimension_numbers<[1], [0], [0], [1], [0, 0, 1, 1], [], []>} : vector<34x34xf32>, vector<34x32xf32>, vector<34x32xf32> -> vector<34x32xf32>
    %465 = arith.addf %445, %464 : vector<34x32xf32>
    %466 = arith.addf %277, %465 : vector<34x32xf32>
    %c1_289 = arith.constant 1 : index
    %c2_290 = arith.constant 2 : index
    %c0_291 = arith.constant 0 : index
    %467 = vector.load %arg6[%c1_289, %c2_290, %c0_291] : memref<2x6x32xf32, #tpu.memory_space<vmem>>, vector<1x1x32xf32>
    %468 = vector.shape_cast %467 : vector<1x1x32xf32> to vector<1x32xf32>
    %469 = vector.broadcast %468 : vector<1x32xf32> to vector<34x32xf32>
    %470 = arith.addf %466, %469 : vector<34x32xf32>
    %c1_292 = arith.constant 1 : index
    %c3_293 = arith.constant 3 : index
    %c0_294 = arith.constant 0 : index
    %471 = vector.load %arg6[%c1_292, %c3_293, %c0_294] : memref<2x6x32xf32, #tpu.memory_space<vmem>>, vector<1x1x32xf32>
    %472 = vector.shape_cast %471 : vector<1x1x32xf32> to vector<1x32xf32>
    %c1_295 = arith.constant 1 : index
    %c4_296 = arith.constant 4 : index
    %c0_297 = arith.constant 0 : index
    %473 = vector.load %arg6[%c1_295, %c4_296, %c0_297] : memref<2x6x32xf32, #tpu.memory_space<vmem>>, vector<1x1x32xf32>
    %474 = vector.shape_cast %473 : vector<1x1x32xf32> to vector<1x32xf32>
    %cst_298 = arith.constant dense<0.000000e+00> : vector<34xf32>
    %475 = vector.multi_reduction <add>, %470, %cst_298 [1] : vector<34x32xf32> to vector<34xf32>
    %476 = vector.shape_cast %475 : vector<34xf32> to vector<34x1xf32>
    %cst_299 = arith.constant 3.200000e+01 : f32
    %477 = vector.broadcast %cst_299 : f32 to vector<34x1xf32>
    %478 = arith.divf %476, %477 : vector<34x1xf32>
    %479 = vector.broadcast %478 : vector<34x1xf32> to vector<34x32xf32>
    %480 = arith.subf %470, %479 : vector<34x32xf32>
    %481 = arith.mulf %480, %480 : vector<34x32xf32>
    %cst_300 = arith.constant dense<0.000000e+00> : vector<34xf32>
    %482 = vector.multi_reduction <add>, %481, %cst_300 [1] : vector<34x32xf32> to vector<34xf32>
    %483 = vector.shape_cast %482 : vector<34xf32> to vector<34x1xf32>
    %cst_301 = arith.constant 3.200000e+01 : f32
    %484 = vector.broadcast %cst_301 : f32 to vector<34x1xf32>
    %485 = arith.divf %483, %484 : vector<34x1xf32>
    %486 = vector.broadcast %478 : vector<34x1xf32> to vector<34x32xf32>
    %487 = arith.subf %470, %486 : vector<34x32xf32>
    %cst_302 = arith.constant 9.99999997E-7 : f32
    %488 = vector.broadcast %cst_302 : f32 to vector<34x1xf32>
    %489 = arith.addf %485, %488 : vector<34x1xf32>
    %490 = math.rsqrt %489 : vector<34x1xf32>
    %491 = vector.broadcast %490 : vector<34x1xf32> to vector<34x32xf32>
    %492 = arith.mulf %487, %491 : vector<34x32xf32>
    %493 = vector.broadcast %472 : vector<1x32xf32> to vector<34x32xf32>
    %494 = arith.mulf %492, %493 : vector<34x32xf32>
    %495 = vector.broadcast %474 : vector<1x32xf32> to vector<34x32xf32>
    %496 = arith.addf %494, %495 : vector<34x32xf32>
    %c1_303 = arith.constant 1 : index
    %c0_304 = arith.constant 0 : index
    %c0_305 = arith.constant 0 : index
    %497 = vector.load %arg8[%c1_303, %c0_304, %c0_305] : memref<2x32x128xf32, #tpu.memory_space<vmem>>, vector<1x32x128xf32>
    %498 = vector.shape_cast %497 : vector<1x32x128xf32> to vector<32x128xf32>
    %cst_306 = arith.constant dense<0.000000e+00> : vector<34x128xf32>
    %499 = tpu.matmul %496, %498, %cst_306 {dimension_numbers = #tpu.dot_dimension_numbers<[1], [0], [0], [1], [0, 0, 1, 1], [], []>} : vector<34x32xf32>, vector<32x128xf32>, vector<34x128xf32> -> vector<34x128xf32>
    %c1_307 = arith.constant 1 : index
    %c0_308 = arith.constant 0 : index
    %c0_309 = arith.constant 0 : index
    %500 = vector.load %arg7[%c1_307, %c0_308, %c0_309] : memref<2x1x128xf32, #tpu.memory_space<vmem>>, vector<1x1x128xf32>
    %501 = vector.shape_cast %500 : vector<1x1x128xf32> to vector<1x128xf32>
    %502 = vector.broadcast %501 : vector<1x128xf32> to vector<34x128xf32>
    %503 = arith.addf %499, %502 : vector<34x128xf32>
    %cst_310 = arith.constant 5.000000e-01 : f32
    %504 = vector.broadcast %cst_310 : f32 to vector<34x128xf32>
    %505 = arith.mulf %504, %503 : vector<34x128xf32>
    %cst_311 = arith.constant 0.707106769 : f32
    %506 = vector.broadcast %cst_311 : f32 to vector<34x128xf32>
    %507 = arith.mulf %503, %506 : vector<34x128xf32>
    %cst_312 = arith.constant 0.000000e+00 : f32
    %508 = vector.broadcast %cst_312 : f32 to vector<34x128xf32>
    %509 = arith.cmpf oge, %507, %508 : vector<34x128xf32>
    %cst_313 = arith.constant 1.000000e+00 : f32
    %cst_314 = arith.constant -1.000000e+00 : f32
    %510 = vector.broadcast %cst_313 : f32 to vector<34x128xf32>
    %511 = vector.broadcast %cst_314 : f32 to vector<34x128xf32>
    %512 = arith.select %509, %510, %511 : vector<34x128xi1>, vector<34x128xf32>
    %513 = math.absf %507 : vector<34x128xf32>
    %cst_315 = arith.constant 0.327591091 : f32
    %514 = vector.broadcast %cst_315 : f32 to vector<34x128xf32>
    %515 = arith.mulf %514, %513 : vector<34x128xf32>
    %cst_316 = arith.constant 1.000000e+00 : f32
    %516 = vector.broadcast %cst_316 : f32 to vector<34x128xf32>
    %517 = arith.addf %516, %515 : vector<34x128xf32>
    %518 = tpu.reciprocal %517 {approx = true} : vector<34x128xf32> -> vector<34x128xf32>
    %cst_317 = arith.constant 1.06140542 : f32
    %519 = vector.broadcast %cst_317 : f32 to vector<34x128xf32>
    %520 = arith.mulf %519, %518 : vector<34x128xf32>
    %cst_318 = arith.constant -1.45315206 : f32
    %521 = vector.broadcast %cst_318 : f32 to vector<34x128xf32>
    %522 = arith.addf %520, %521 : vector<34x128xf32>
    %523 = arith.mulf %522, %518 : vector<34x128xf32>
    %cst_319 = arith.constant 1.42141378 : f32
    %524 = vector.broadcast %cst_319 : f32 to vector<34x128xf32>
    %525 = arith.addf %523, %524 : vector<34x128xf32>
    %526 = arith.mulf %525, %518 : vector<34x128xf32>
    %cst_320 = arith.constant -0.284496725 : f32
    %527 = vector.broadcast %cst_320 : f32 to vector<34x128xf32>
    %528 = arith.addf %526, %527 : vector<34x128xf32>
    %529 = arith.mulf %528, %518 : vector<34x128xf32>
    %cst_321 = arith.constant 0.254829586 : f32
    %530 = vector.broadcast %cst_321 : f32 to vector<34x128xf32>
    %531 = arith.addf %529, %530 : vector<34x128xf32>
    %532 = arith.mulf %531, %518 : vector<34x128xf32>
    %cst_322 = arith.constant 0.000000e+00 : f32
    %533 = vector.broadcast %cst_322 : f32 to vector<34x128xf32>
    %534 = arith.subf %533, %513 : vector<34x128xf32>
    %535 = arith.mulf %534, %513 : vector<34x128xf32>
    %536 = math.exp %535 : vector<34x128xf32>
    %537 = arith.mulf %532, %536 : vector<34x128xf32>
    %cst_323 = arith.constant 1.000000e+00 : f32
    %538 = vector.broadcast %cst_323 : f32 to vector<34x128xf32>
    %539 = arith.subf %538, %537 : vector<34x128xf32>
    %540 = arith.mulf %512, %539 : vector<34x128xf32>
    %cst_324 = arith.constant 1.000000e+00 : f32
    %541 = vector.broadcast %cst_324 : f32 to vector<34x128xf32>
    %542 = arith.addf %541, %540 : vector<34x128xf32>
    %543 = arith.mulf %505, %542 : vector<34x128xf32>
    %c1_325 = arith.constant 1 : index
    %c0_326 = arith.constant 0 : index
    %c0_327 = arith.constant 0 : index
    %544 = vector.load %arg9[%c1_325, %c0_326, %c0_327] : memref<2x128x32xf32, #tpu.memory_space<vmem>>, vector<1x128x32xf32>
    %545 = vector.shape_cast %544 : vector<1x128x32xf32> to vector<128x32xf32>
    %cst_328 = arith.constant dense<0.000000e+00> : vector<34x32xf32>
    %546 = tpu.matmul %543, %545, %cst_328 {dimension_numbers = #tpu.dot_dimension_numbers<[1], [0], [0], [1], [0, 0, 1, 1], [], []>} : vector<34x128xf32>, vector<128x32xf32>, vector<34x32xf32> -> vector<34x32xf32>
    %547 = arith.addf %470, %546 : vector<34x32xf32>
    %c1_329 = arith.constant 1 : index
    %c5_330 = arith.constant 5 : index
    %c0_331 = arith.constant 0 : index
    %548 = vector.load %arg6[%c1_329, %c5_330, %c0_331] : memref<2x6x32xf32, #tpu.memory_space<vmem>>, vector<1x1x32xf32>
    %549 = vector.shape_cast %548 : vector<1x1x32xf32> to vector<1x32xf32>
    %550 = vector.broadcast %549 : vector<1x32xf32> to vector<34x32xf32>
    %551 = arith.addf %547, %550 : vector<34x32xf32>
    %c0_332 = arith.constant 0 : index
    %c0_333 = arith.constant 0 : index
    %552 = vector.load %arg3[%c0_332, %c0_333] : memref<2x34xf32, #tpu.memory_space<vmem>>, vector<2x34xf32>
    %cst_334 = arith.constant dense<0.000000e+00> : vector<2x32xf32>
    %553 = tpu.matmul %552, %551, %cst_334 {dimension_numbers = #tpu.dot_dimension_numbers<[1], [0], [0], [1], [0, 0, 1, 1], [], []>} : vector<2x34xf32>, vector<34x32xf32>, vector<2x32xf32> -> vector<2x32xf32>
    %c0_335 = arith.constant 0 : index
    %c0_336 = arith.constant 0 : index
    %554 = vector.load %arg10[%c0_335, %c0_336] : memref<2x32xf32, #tpu.memory_space<vmem>>, vector<1x32xf32>
    %c1_337 = arith.constant 1 : index
    %c0_338 = arith.constant 0 : index
    %555 = vector.load %arg10[%c1_337, %c0_338] : memref<2x32xf32, #tpu.memory_space<vmem>>, vector<1x32xf32>
    %cst_339 = arith.constant dense<0.000000e+00> : vector<2xf32>
    %556 = vector.multi_reduction <add>, %553, %cst_339 [1] : vector<2x32xf32> to vector<2xf32>
    %557 = vector.shape_cast %556 : vector<2xf32> to vector<2x1xf32>
    %cst_340 = arith.constant 3.200000e+01 : f32
    %558 = vector.broadcast %cst_340 : f32 to vector<2x1xf32>
    %559 = arith.divf %557, %558 : vector<2x1xf32>
    %560 = vector.broadcast %559 : vector<2x1xf32> to vector<2x32xf32>
    %561 = arith.subf %553, %560 : vector<2x32xf32>
    %562 = arith.mulf %561, %561 : vector<2x32xf32>
    %cst_341 = arith.constant dense<0.000000e+00> : vector<2xf32>
    %563 = vector.multi_reduction <add>, %562, %cst_341 [1] : vector<2x32xf32> to vector<2xf32>
    %564 = vector.shape_cast %563 : vector<2xf32> to vector<2x1xf32>
    %cst_342 = arith.constant 3.200000e+01 : f32
    %565 = vector.broadcast %cst_342 : f32 to vector<2x1xf32>
    %566 = arith.divf %564, %565 : vector<2x1xf32>
    %567 = vector.broadcast %559 : vector<2x1xf32> to vector<2x32xf32>
    %568 = arith.subf %553, %567 : vector<2x32xf32>
    %cst_343 = arith.constant 9.99999997E-7 : f32
    %569 = vector.broadcast %cst_343 : f32 to vector<2x1xf32>
    %570 = arith.addf %566, %569 : vector<2x1xf32>
    %571 = math.rsqrt %570 : vector<2x1xf32>
    %572 = vector.broadcast %571 : vector<2x1xf32> to vector<2x32xf32>
    %573 = arith.mulf %568, %572 : vector<2x32xf32>
    %574 = vector.broadcast %554 : vector<1x32xf32> to vector<2x32xf32>
    %575 = arith.mulf %573, %574 : vector<2x32xf32>
    %576 = vector.broadcast %555 : vector<1x32xf32> to vector<2x32xf32>
    %577 = arith.addf %575, %576 : vector<2x32xf32>
    %c0_344 = arith.constant 0 : index
    %c0_345 = arith.constant 0 : index
    %578 = vector.load %arg11[%c0_344, %c0_345] : memref<32x128xf32, #tpu.memory_space<vmem>>, vector<32x128xf32>
    %cst_346 = arith.constant dense<0.000000e+00> : vector<2x128xf32>
    %579 = tpu.matmul %577, %578, %cst_346 {dimension_numbers = #tpu.dot_dimension_numbers<[1], [0], [0], [1], [0, 0, 1, 1], [], []>} : vector<2x32xf32>, vector<32x128xf32>, vector<2x128xf32> -> vector<2x128xf32>
    %c0_347 = arith.constant 0 : index
    %c0_348 = arith.constant 0 : index
    %580 = vector.load %arg12[%c0_347, %c0_348] : memref<1x128xf32, #tpu.memory_space<vmem>>, vector<1x128xf32>
    %581 = vector.broadcast %580 : vector<1x128xf32> to vector<2x128xf32>
    %582 = arith.addf %579, %581 : vector<2x128xf32>
    %c0_349 = arith.constant 0 : index
    %c0_350 = arith.constant 0 : index
    %583 = vector.load %arg13[%c0_349, %c0_350] : memref<2x128xf32, #tpu.memory_space<vmem>>, vector<2x128xf32>
    tpu.vector_store %arg13[%c0_349, %c0_350], %582 {strides = array<i32>} : memref<2x128xf32, #tpu.memory_space<vmem>>, vector<2x128xf32>,
    return
  }
}

</mosaic_0001>

<bundles_post_ra>
// kernel: transformer_forward.1
= control target key start
LH: loop header
LB: loop body
LE: loop exit
PB: predicated region body
PF: predicated region fallthrough
CT: control target
= control target key end

     0   :  { %vm73_vm0 = vcmask 1041408   ;;  %s8901_s0 = inlined_call_operand.vmem [shape: f32[34,50], index: 0, kind: input, shape index: {}]   ;;  %s8902_s1 = inlined_call_operand.vmem [shape: f32[50,32], index: 1, kind: input, shape index: {}]   ;;  %s8903_s2 = inlined_call_operand.vmem [shape: f32[34,34], index: 2, kind: input, shape index: {}]   ;;  %s8904_s3 = inlined_call_operand.vmem [shape: f32[2,34], index: 3, kind: input, shape index: {}]   ;;  %s8905_s4 = inlined_call_operand.vmem [shape: f32[2,8,32,32], index: 4, kind: input, shape index: {}]   ;;  %s8906_s5 = inlined_call_operand.vmem [shape: f32[2,8,32,32], index: 5, kind: input, shape index: {}]   ;;  %s8907_s6 = inlined_call_operand.vmem [shape: f32[2,6,32], index: 6, kind: input, shape index: {}]   ;;  %s8908_s7 = inlined_call_operand.vmem [shape: f32[2,1,128], index: 7, kind: input, shape index: {}]   ;;  %s8909_s8 = inlined_call_operand.vmem [shape: f32[2,32,128], index: 8, kind: input, shape index: {}]   ;;  %s8910_s9 = inlined_call_operand.vmem [shape: f32[2,128,32], index: 9, kind: input, shape index: {}]   ;;  %s8911_s10 = inlined_call_operand.vmem [shape: f32[2,32], index: 10, kind: input, shape index: {}]   ;;  %s8912_s11 = inlined_call_operand.vmem [shape: f32[32,128], index: 11, kind: input, shape index: {}]   ;;  %s8913_s12 = inlined_call_operand.vmem [shape: f32[1,128], index: 12, kind: input, shape index: {}]   ;;  %s8914_s13 = inlined_call_operand.hbm [shape: f32[2,128], index: 13, kind: output, shape index: {}]  }
   0x1   :  { %v56_v0 = vld [vmem:[%s8902_s1 + $0x30] sm:$0x3]  ;;  %v55_v1 = vld [vmem:[%s8902_s1 + $0x28] sm:$0xff]  ;;  %v54_v2 = vld [vmem:[%s8902_s1 + $0x20] sm:$0xff] }
   0x2   :  { %4946 = vmatpush.msk.msra.mxu0 %vm73_vm0, %v56_v0  ;;  %v53_v3 = vld [vmem:[%s8902_s1 + $0x18] sm:$0xff]  ;;  %v52_v4 = vld [vmem:[%s8902_s1 + $0x10] sm:$0xff]  ;;  %v51_v5 = vld [vmem:[%s8902_s1 + $0x8] sm:$0xff] }
   0x4   :  { %87 = vmatpush.msra.mxu0 %v55_v1 }
   0x6   :  { %88 = vmatpush.msra.mxu0 %v54_v2 }
   0x8   :  { %89 = vmatpush.msra.mxu0 %v53_v3 }
   0xa   :  { %90 = vmatpush.msra.mxu0 %v52_v4 }
   0xb   :  { %18 = vsyncpa [#allocation3], 0  ;;  %v50_v6 = vld [vmem:[%s8902_s1] sm:$0xff]  ;;  %vm57_vm1 = vcmask 408576   ;;  %v46_v8 = vld [vmem:[%s8901_s0 + $0x8] sm:$0xff]  ;;  %vm116_vm2 = vcmask 261120  }
   0xc   :  { %91 = vmatpush.msra.mxu0 %v51_v5  ;;  %v45_v7 = vld [vmem:[%s8901_s0] sm:$0xff]  ;;  %v47_v9 = vld [vmem:[%s8901_s0 + $0x10] sm:$0xff]  ;;  %v48_v10 = vld [vmem:[%s8901_s0 + $0x18] sm:$0xff]  ;;  %v6001_v20 = vmov 32.0   ;;  %vm129_vm4 = vcmask 254976   ;;  %s4937_s16 = sshll.u32 %s8914_s13, 4  ;;  %s4938_s16 = int_to_ptr.hbm [resolvable:$true] %s4937_s16 }
   0xd   :  { %v49_v11 = vld [vmem:[%s8901_s0 + $0x20] sm:$0x3]  ;;  %5556 = vrcp.f32 %v6001_v20  ;;  %v250_v49 = vld [vmem:[%s8905_s4 + $0x18] sm:$0xff]  ;;  %v249_v51 = vld [vmem:[%s8905_s4 + $0x10] sm:$0xff]  ;;  %s6003_s0 = smov [#allocation2]  }
   0xe   :  { %92 = vmatpush.msra.mxu0 %v50_v6  ;;  %v4994_v50 = vld [vmem:[%s8906_s5 + $0x38] sm:$0xff]  ;;  %278 = vmatpush.msra.mxu1 %v250_v49  ;;  %v4993_v52 = vld [vmem:[%s8906_s5 + $0x30] sm:$0xff]  ;;  %v248_v53 = vld [vmem:[%s8905_s4 + $0x8] sm:$0xff] }
   0xf   :  { %4947 = vmatmul.msk.f32.vlgmr.msra.gmra.mxu0 %vm57_vm1, %v45_v7  ;;  %5528 = vmatpush.msra.mxu2 %v250_v49  ;;  %v4992_v54 = vld [vmem:[%s8906_s5 + $0x28] sm:$0xff]  ;;  %v247_v55 = vld [vmem:[%s8905_s4] sm:$0xff]  ;;  %v4975_v60 = vld [vmem:[%s8905_s4 + $0x38] sm:$0xff] }
  0x10   :  { %594 = vmatpush.msrb.mxu0 %v4994_v50  ;;  %5529 = vmatpush.msra.mxu3 %v250_v49  ;;  %v4991_v56 = vld [vmem:[%s8906_s5 + $0x20] sm:$0xff]  ;;  %v4974_v61 = vld [vmem:[%s8905_s4 + $0x30] sm:$0xff]  ;;  %v4973_v2 = vld [vmem:[%s8905_s4 + $0x28] sm:$0xff] }
  0x11   :  { %279 = vmatpush.msra.mxu1 %v249_v51  ;;  %5530 = vmatpush.msra.mxu2 %v249_v51  ;;  %v4972_v6 = vld [vmem:[%s8905_s4 + $0x20] sm:$0xff] }
  0x12   :  { %595 = vmatpush.msrb.mxu0 %v4993_v52  ;;  %5531 = vmatpush.msra.mxu3 %v249_v51 }
  0x13   :  { %v5557_v21 = vpop.eup %5556  ;;  %280 = vmatpush.msra.mxu1 %v248_v53  ;;  %5532 = vmatpush.msra.mxu2 %v248_v53 }
  0x14   :  { %v134_v22 = vmul.f32 32.0, %v5557_v21  ;;  %vm138_vm3 = vweird.f32 %v5557_v21  ;;  %596 = vmatpush.msrb.mxu0 %v4992_v54  ;;  %5533 = vmatpush.msra.mxu3 %v248_v53 }
  0x15   :  { %281 = vmatpush.msra.mxu1 %v247_v55  ;;  %5534 = vmatpush.msra.mxu2 %v247_v55 }
  0x16   :  { %v135_v23 = vsub.f32 1.0, %v134_v22  ;;  %597 = vmatpush.msrb.mxu0 %v4991_v56  ;;  %5535 = vmatpush.msra.mxu3 %v247_v55 }
  0x17   :  { %4948 = vmatmul.msk.f32.gmra.mxu0 %vm57_vm1, %v46_v8  ;;  %455 = vmatpush.msrb.mxu1 %v4975_v60 }
  0x18   :  { %v136_v24 = vmul.f32 %v5557_v21, %v135_v23  ;;  %v6210_v23 = vld [vmem:[%s8907_s6] ss:$0 sm:$0xff] }
  0x19   :  { %456 = vmatpush.msrb.mxu1 %v4974_v61 }
  0x1a   :  { %v137_v25 = vadd.f32 %v5557_v21, %v136_v24 }
  0x1b   :  { %457 = vmatpush.msrb.mxu1 %v4973_v2 }
  0x1c   :  { %v6127_v26 = vsel %vm138_vm3, %v5557_v21, %v137_v25 }
  0x1d   :  { %458 = vmatpush.msrb.mxu1 %v4972_v6 }
  0x1f   :  { %4949 = vmatmul.msk.f32.gmra.mxu0 %vm57_vm1, %v47_v9 }
  0x27   :  { %4950 = vmatmul.msk.f32.gmra.mxu0 %vm57_vm1, %v48_v10 }
  0x2f   :  { %4951 = vmatmul.msk.f32.gmra.mxu0 %vm57_vm1, %v49_v11 }
  0x8c   :  { %v6111_v12 = vpop.f32.mrf.mxu0 }
  0x8d   :  { %v117_v13 = vsel %vm116_vm2, %v6111_v12, 0.0 }
  0x8e   :  { %118 = vadd.xlane.f32.xlu0 %v117_v13 }
  0x94   :  { %v6115_v14 = vpop.f32.mrf.mxu0 }
  0x95   :  { %v120_v15 = vsel %vm116_vm2, %v6115_v14, 0.0 }
  0x96   :  { %121 = vadd.xlane.f32.xlu0 %v120_v15 }
  0x9c   :  { %v6119_v16 = vpop.f32.mrf.mxu0 }
  0x9d   :  { %v123_v17 = vsel %vm116_vm2, %v6119_v16, 0.0 }
  0x9e   :  { %124 = vadd.xlane.f32.xlu1 %v123_v17 }
  0xa4   :  { %v6123_v18 = vpop.f32.mrf.mxu0 }
  0xa5   :  { %v126_v19 = vsel %vm116_vm2, %v6123_v18, 0.0 }
  0xa6   :  { %127 = vadd.xlane.f32.xlu1 %v126_v19 }
  0xac   :  { %v6137_v34 = vpop.f32.mrf.mxu0 }
  0xad   :  { %v130_v37 = vsel %vm129_vm4, %v6137_v34, 0.0 }
 0x101   :  { %v119_v27 = vpop.xlane.xlu0 %118 }
 0x102   :  { %v140_v28 = vmul.f32 %v6127_v26, %v119_v27  ;;  %v6215_v27 = vld [vmem:[%s8907_s6 + $0x1] ss:$0 sm:$0xff] }
 0x104   :  { %v6131_v29 = vsub.f32 %v6111_v12, %v140_v28 }
 0x106   :  { %v150_v30 = vmul.f32 %v6131_v29, %v6131_v29 }
 0x108   :  { %v155_v31 = vsel %vm116_vm2, %v150_v30, 0.0 }
 0x109   :  { %156 = vadd.xlane.f32.xlu2 %v155_v31  ;;  %v122_v32 = vpop.xlane.xlu0 %121 }
 0x10a   :  { %v141_v33 = vmul.f32 %v6127_v26, %v122_v32 }
 0x10c   :  { %v6140_v35 = vsub.f32 %v6115_v14, %v141_v33 }
 0x10e   :  { %v151_v36 = vmul.f32 %v6140_v35, %v6140_v35 }
 0x110   :  { %v158_v38 = vsel %vm116_vm2, %v151_v36, 0.0 }
 0x111   :  { %159 = vadd.xlane.f32.xlu0 %v158_v38  ;;  %v125_v39 = vpop.xlane.xlu1 %124  ;;  %131 = vadd.xlane.f32.xlu2 %v130_v37 }
 0x112   :  { %v142_v40 = vmul.f32 %v6127_v26, %v125_v39 }
 0x114   :  { %v6149_v41 = vsub.f32 %v6119_v16, %v142_v40 }
 0x116   :  { %v152_v42 = vmul.f32 %v6149_v41, %v6149_v41 }
 0x118   :  { %v161_v43 = vsel %vm116_vm2, %v152_v42, 0.0 }
 0x119   :  { %162 = vadd.xlane.f32.xlu1 %v161_v43  ;;  %v128_v44 = vpop.xlane.xlu1 %127 }
 0x11a   :  { %v143_v45 = vmul.f32 %v6127_v26, %v128_v44 }
 0x11c   :  { %v6156_v46 = vsub.f32 %v6123_v18, %v143_v45 }
 0x11e   :  { %v153_v47 = vmul.f32 %v6156_v46, %v6156_v46 }
 0x120   :  { %v164_v48 = vsel %vm116_vm2, %v153_v47, 0.0 }
 0x121   :  { %165 = vadd.xlane.f32.xlu2 %v164_v48 }
 0x17c   :  { %v157_v57 = vpop.xlane.xlu2 %156 }
 0x17d   :  { %v170_v58 = vmul.f32 %v157_v57, %v6127_v26 }
 0x17f   :  { %v175_v59 = vadd.f32 1e-06, %v170_v58 }
 0x181   :  { %5558 = vrsqrt.f32 %v175_v59  ;;  %vm186_vm6 = vweird.f32 %v175_v59 }
 0x184   :  { %v160_v62 = vpop.xlane.xlu0 %159  ;;  %v132_v63 = vpop.xlane.xlu2 %131 }
 0x185   :  { %v171_v0 = vmul.f32 %v160_v62, %v6127_v26  ;;  %v144_v1 = vmul.f32 %v6127_v26, %v132_v63  ;;  %v404_v63 = vld [vmem:[%s8906_s5 + $0x10] sm:$0xff] }
 0x187   :  { %v5559_v3 = vpop.eup %5558  ;;  %v176_v4 = vadd.f32 1e-06, %v171_v0  ;;  %v6198_v5 = vsub.f32 %v6137_v34, %v144_v1  ;;  %v403_v0 = vld [vmem:[%s8906_s5 + $0x8] sm:$0xff]  ;;  %v402_v1 = vld [vmem:[%s8906_s5] sm:$0xff] }
 0x188   :  { %v181_v7 = vmul.f32 %v5559_v3, %v175_v59  ;;  %vm187_vm5 = vweird.f32 %v5559_v3 }
 0x189   :  { %5560 = vrsqrt.f32 %v176_v4  ;;  %v154_v8 = vmul.f32 %v6198_v5, %v6198_v5  ;;  %vm188_vm7 = vmor %vm186_vm6, %vm187_vm5  ;;  %vm196_vm9 = vweird.f32 %v176_v4 }
 0x18a   :  { %v182_v9 = vmul.f32 %v5559_v3, %v181_v7 }
 0x18b   :  { %v167_v10 = vsel %vm129_vm4, %v154_v8, 0.0 }
 0x18c   :  { %v183_v11 = vmul.f32 0.5, %v182_v9  ;;  %v163_v13 = vpop.xlane.xlu1 %162  ;;  %168 = vadd.xlane.f32.xlu0 %v167_v10 }
 0x18d   :  { %v172_v15 = vmul.f32 %v163_v13, %v6127_v26 }
 0x18e   :  { %v184_v17 = vsub.f32 1.5, %v183_v11 }
 0x18f   :  { %v5561_v19 = vpop.eup %5560  ;;  %v177_v20 = vadd.f32 1e-06, %v172_v15 }
 0x190   :  { %v185_v21 = vmul.f32 %v5559_v3, %v184_v17  ;;  %v191_v22 = vmul.f32 %v5561_v19, %v176_v4  ;;  %vm197_vm8 = vweird.f32 %v5561_v19 }
 0x191   :  { %5562 = vrsqrt.f32 %v177_v20  ;;  %vm198_vm10 = vmor %vm196_vm9, %vm197_vm8  ;;  %vm206_vm12 = vweird.f32 %v177_v20  ;;  %vm358_vm8 = vcmask 271360  }
 0x192   :  { %v189_v24 = vsel %vm188_vm7, %v5559_v3, %v185_v21  ;;  %v192_v25 = vmul.f32 %v5561_v19, %v191_v22  ;;  %vm345_vm7 = vcmask 277504  }
 0x193   :  { %v230_v28 = vmul.f32 %v189_v24, %v6131_v29 }
 0x194   :  { %v193_v30 = vmul.f32 0.5, %v192_v25  ;;  %v166_v31 = vpop.xlane.xlu2 %165 }
 0x195   :  { %v236_v32 = vmul.f32 %v6210_v23, %v230_v28  ;;  %v173_v33 = vmul.f32 %v166_v31, %v6127_v26  ;;  %v5014_v31 = vld [vmem:[%s8905_s4 + $0x50] sm:$0xff] }
 0x196   :  { %v194_v36 = vsub.f32 1.5, %v193_v30  ;;  %v5015_v30 = vld [vmem:[%s8905_s4 + $0x58] sm:$0xff] }
 0x197   :  { %v5563_v37 = vpop.eup %5562  ;;  %v6221_v38 = vadd.f32 %v6215_v27, %v236_v32  ;;  %v178_v39 = vadd.f32 1e-06, %v173_v33  ;;  %v5013_v33 = vld [vmem:[%s8905_s4 + $0x48] sm:$0xff] }
 0x198   :  { %v195_v40 = vmul.f32 %v5561_v19, %v194_v36  ;;  %v201_v42 = vmul.f32 %v5563_v37, %v177_v20  ;;  %vm207_vm11 = vweird.f32 %v5563_v37  ;;  %v5012_v36 = vld [vmem:[%s8905_s4 + $0x40] sm:$0xff] }
 0x199   :  { %5564 = vrsqrt.f32 %v178_v39  ;;  %4952 = vmatmul.msk.f32.vlgmr.msra.gmra.mxu1 %vm116_vm2, %v6221_v38  ;;  %4995 = vmatmul.msk.f32.vlgmr.msrb.gmra.mxu0 %vm116_vm2, %v6221_v38  ;;  %vm208_vm13 = vmor %vm206_vm12, %vm207_vm11  ;;  %vm216_vm15 = vweird.f32 %v178_v39 }
 0x19a   :  { %v199_v29 = vsel %vm198_vm10, %v5561_v19, %v195_v40  ;;  %v202_v43 = vmul.f32 %v5563_v37, %v201_v42 }
 0x19b   :  { %v231_v44 = vmul.f32 %v199_v29, %v6140_v35 }
 0x19c   :  { %v203_v45 = vmul.f32 0.5, %v202_v43  ;;  %v5049_v43 = vld [vmem:[%s8905_s4 + $0x78] sm:$0xff] }
 0x19d   :  { %v237_v47 = vmul.f32 %v6210_v23, %v231_v44  ;;  %v5048_v44 = vld [vmem:[%s8905_s4 + $0x70] sm:$0xff] }
 0x19e   :  { %v204_v48 = vsub.f32 1.5, %v203_v45 }
 0x19f   :  { %v5565_v49 = vpop.eup %5564  ;;  %v6230_v50 = vadd.f32 %v6215_v27, %v237_v47  ;;  %v5047_v47 = vld [vmem:[%s8905_s4 + $0x68] sm:$0xff] }
 0x1a0   :  { %v205_v51 = vmul.f32 %v5563_v37, %v204_v48  ;;  %v211_v52 = vmul.f32 %v5565_v49, %v178_v39  ;;  %vm217_vm14 = vweird.f32 %v5565_v49  ;;  %v5046_v48 = vld [vmem:[%s8905_s4 + $0x60] sm:$0xff] }
 0x1a1   :  { %4953 = vmatmul.msk.f32.gmra.mxu1 %vm116_vm2, %v6230_v50  ;;  %4996 = vmatmul.msk.f32.gmra.mxu0 %vm116_vm2, %v6230_v50  ;;  %vm218_vm1 = vmor %vm216_vm15, %vm217_vm14 }
 0x1a2   :  { %v209_v35 = vsel %vm208_vm13, %v5563_v37, %v205_v51  ;;  %v212_v53 = vmul.f32 %v5565_v49, %v211_v52 }
 0x1a3   :  { %v232_v54 = vmul.f32 %v209_v35, %v6149_v41 }
 0x1a4   :  { %v213_v55 = vmul.f32 0.5, %v212_v53  ;;  %v5083_v53 = vld [vmem:[%s8905_s4 + $0x98] sm:$0xff] }
 0x1a5   :  { %v238_v56 = vmul.f32 %v6210_v23, %v232_v54  ;;  %v5082_v54 = vld [vmem:[%s8905_s4 + $0x90] sm:$0xff] }
 0x1a6   :  { %v214_v57 = vsub.f32 1.5, %v213_v55  ;;  %v5081_v55 = vld [vmem:[%s8905_s4 + $0x88] sm:$0xff] }
 0x1a7   :  { %v6239_v58 = vadd.f32 %v6215_v27, %v238_v56  ;;  %v6396_v56 = vld [vmem:[%s8903_s2] sm:$0xff] }
 0x1a8   :  { %v215_v59 = vmul.f32 %v5565_v49, %v214_v57 }
 0x1a9   :  { %4954 = vmatmul.msk.f32.vlgmr.msra.gmra.mxu2 %vm116_vm2, %v6239_v58  ;;  %4976 = vmatmul.msk.f32.vlgmr.msrb.gmra.mxu1 %vm116_vm2, %v6221_v38 }
 0x1aa   :  { %v219_v60 = vsel %vm218_vm1, %v5565_v49, %v215_v59  ;;  %4997 = vmatmul.msk.f32.gmra.mxu0 %vm116_vm2, %v6239_v58  ;;  %v5080_v59 = vld [vmem:[%s8905_s4 + $0x80] sm:$0xff] }
 0x1ab   :  { %v233_v41 = vmul.f32 %v219_v60, %v6156_v46  ;;  %v405_v46 = vld [vmem:[%s8906_s5 + $0x18] sm:$0xff] }
 0x1ac   :  { %418 = vmatpush.msrb.mxu3 %v405_v46 }
 0x1ad   :  { %v239_v61 = vmul.f32 %v6210_v23, %v233_v41 }
 0x1ae   :  { %419 = vmatpush.msrb.mxu3 %v404_v63 }
 0x1af   :  { %v6250_v62 = vadd.f32 %v6215_v27, %v239_v61  ;;  %v6411_v61 = vld [vmem:[%s8903_s2 + $0x8] sm:$0xff] }
 0x1b0   :  { %420 = vmatpush.msrb.mxu3 %v403_v0 }
 0x1b1   :  { %4955 = vmatmul.msk.f32.gmra.mxu2 %vm116_vm2, %v6250_v62  ;;  %4977 = vmatmul.msk.f32.gmra.mxu1 %vm116_vm2, %v6230_v50 }
 0x1b2   :  { %4998 = vmatmul.msk.f32.gmra.mxu0 %vm116_vm2, %v6250_v62  ;;  %421 = vmatpush.msrb.mxu3 %v402_v1  ;;  %v6423_v1 = vld [vmem:[%s8903_s2 + $0x10] sm:$0xff] }
 0x1b9   :  { %4978 = vmatmul.msk.f32.gmra.mxu1 %vm116_vm2, %v6239_v58 }
 0x1c1   :  { %4979 = vmatmul.msk.f32.gmra.mxu1 %vm116_vm2, %v6250_v62 }
 0x1ff   :  { %v169_v2 = vpop.xlane.xlu0 %168 }
 0x200   :  { %v174_v3 = vmul.f32 %v169_v2, %v6127_v26 }
 0x202   :  { %v179_v4 = vadd.f32 1e-06, %v174_v3 }
 0x204   :  { %5566 = vrsqrt.f32 %v179_v4  ;;  %vm226_vm5 = vweird.f32 %v179_v4 }
 0x20a   :  { %v5567_v6 = vpop.eup %5566 }
 0x20b   :  { %v221_v7 = vmul.f32 %v5567_v6, %v179_v4  ;;  %vm227_vm3 = vweird.f32 %v5567_v6 }
 0x20c   :  { %vm228_vm6 = vmor %vm226_vm5, %vm227_vm3 }
 0x20d   :  { %v222_v8 = vmul.f32 %v5567_v6, %v221_v7 }
 0x20f   :  { %v223_v9 = vmul.f32 0.5, %v222_v8 }
 0x211   :  { %v224_v10 = vsub.f32 1.5, %v223_v9 }
 0x213   :  { %v225_v11 = vmul.f32 %v5567_v6, %v224_v10  ;;  %v5117_v10 = vld [vmem:[%s8905_s4 + $0xb8] sm:$0xff] }
 0x215   :  { %v229_v13 = vsel %vm228_vm6, %v5567_v6, %v225_v11  ;;  %v6435_v6 = vld [vmem:[%s8903_s2 + $0x18] sm:$0xff]  ;;  %v5116_v11 = vld [vmem:[%s8905_s4 + $0xb0] sm:$0xff] }
 0x216   :  { %v234_v15 = vmul.f32 %v229_v13, %v6198_v5  ;;  %v283_v5 = vpop.f32.mrf.mxu1  ;;  %v599_v28 = vpop.f32.mrf.mxu0  ;;  %v5115_v13 = vld [vmem:[%s8905_s4 + $0xa8] sm:$0xff] }
 0x218   :  { %v240_v17 = vmul.f32 %v6210_v23, %v234_v15  ;;  %v5114_v15 = vld [vmem:[%s8905_s4 + $0xa0] sm:$0xff] }
 0x21a   :  { %v6278_v19 = vadd.f32 %v6215_v27, %v240_v17  ;;  %v5151_v17 = vld [vmem:[%s8905_s4 + $0xd8] sm:$0xff] }
 0x21c   :  { %4956 = vmatmul.msk.f32.vlgmr.msra.gmra.mxu3 %vm116_vm2, %v6278_v19  ;;  %4957 = vmatpush.xpose.msk.msrb.mxu2 %vm116_vm2, %v6278_v19 }
 0x21d   :  { %4980 = vmatmul.msk.f32.gmra.mxu1 %vm116_vm2, %v6278_v19  ;;  %4981 = vmatpush.xpose.msk.msra.mxu3 %vm116_vm2, %v6278_v19 }
 0x21e   :  { %4999 = vmatmul.msk.f32.gmra.mxu0 %vm116_vm2, %v6278_v19  ;;  %v286_v20 = vpop.f32.mrf.mxu1  ;;  %v602_v32 = vpop.f32.mrf.mxu0 }
 0x21f   :  { %5021 = vmatpush.xpose.msk.msra.mxu0 %vm116_vm2, %v6278_v19 }
 0x220   :  { %4958 = vmatpush.xpose.msk.msrb.mxu2 %vm116_vm2, %v6250_v62 }
 0x221   :  { %4982 = vmatpush.xpose.msk.msra.mxu3 %vm116_vm2, %v6250_v62 }
 0x223   :  { %5022 = vmatpush.xpose.msk.msra.mxu0 %vm116_vm2, %v6250_v62 }
 0x224   :  { %4959 = vmatpush.xpose.msk.msrb.mxu2 %vm116_vm2, %v6239_v58  ;;  %4967 = vmatmul.msk.f32.vlgmr.msrb.gmra.mxu3 %vm116_vm2, %v6221_v38 }
 0x225   :  { %4983 = vmatpush.xpose.msk.msra.mxu3 %vm116_vm2, %v6239_v58 }
 0x226   :  { %v460_v22 = vpop.f32.mrf.mxu1 }
 0x227   :  { %5023 = vmatpush.xpose.msk.msra.mxu0 %vm116_vm2, %v6239_v58  ;;  %v605_v37 = vpop.f32.mrf.mxu0 }
 0x228   :  { %4960 = vmatpush.xpose.msk.msrb.mxu2 %vm116_vm2, %v6230_v50 }
 0x229   :  { %4984 = vmatpush.xpose.msk.msra.mxu3 %vm116_vm2, %v6230_v50 }
 0x22b   :  { %5024 = vmatpush.xpose.msk.msra.mxu0 %vm116_vm2, %v6230_v50 }
 0x22c   :  { %4961 = vmatpush.xpose.msk.msrb.mxu2 %vm116_vm2, %v6221_v38  ;;  %4968 = vmatmul.msk.f32.gmra.mxu3 %vm116_vm2, %v6230_v50  ;;  %v289_v21 = vpop.f32.mrf.mxu2 }
 0x22d   :  { %4985 = vmatpush.xpose.msk.msra.mxu3 %vm116_vm2, %v6221_v38 }
 0x22e   :  { %v463_v24 = vpop.f32.mrf.mxu1 }
 0x22f   :  { %5025 = vmatpush.xpose.msk.msra.mxu0 %vm116_vm2, %v6221_v38  ;;  %4962 = vmatmul.msk.f32.vlgmr.msrb.gmra.mxu2 %vm116_vm2, %v283_v5  ;;  %v608_v39 = vpop.f32.mrf.mxu0  ;;  %v6474_v5 = vld [vmem:[%s8903_s2 + $0x20] sm:$0x3] }
 0x231   :  { %731 = vmatpush.msrb.mxu3 %v5015_v30 }
 0x233   :  { %5055 = vmatpush.xpose.msk.msrb.mxu0 %vm116_vm2, %v6278_v19  ;;  %732 = vmatpush.msrb.mxu3 %v5014_v31 }
 0x234   :  { %4969 = vmatmul.msk.f32.gmra.mxu3 %vm116_vm2, %v6239_v58  ;;  %v292_v23 = vpop.f32.mrf.mxu2 }
 0x235   :  { %733 = vmatpush.msrb.mxu3 %v5013_v33 }
 0x236   :  { %v466_v25 = vpop.f32.mrf.mxu1 }
 0x237   :  { %5056 = vmatpush.xpose.msk.msrb.mxu0 %vm116_vm2, %v6250_v62  ;;  %4963 = vmatmul.msk.f32.gmra.mxu2 %vm116_vm2, %v286_v20 }
 0x238   :  { %734 = vmatpush.msrb.mxu3 %v5012_v36 }
 0x23b   :  { %5057 = vmatpush.xpose.msk.msrb.mxu0 %vm116_vm2, %v6239_v58 }
 0x23c   :  { %4970 = vmatmul.msk.f32.gmra.mxu3 %vm116_vm2, %v6250_v62 }
 0x23e   :  { %v469_v27 = vpop.f32.mrf.mxu1 }
 0x23f   :  { %5058 = vmatpush.xpose.msk.msrb.mxu0 %vm116_vm2, %v6230_v50  ;;  %4964 = vmatmul.msk.f32.gmra.mxu2 %vm116_vm2, %v289_v21  ;;  %v5150_v21 = vld [vmem:[%s8905_s4 + $0xd0] sm:$0xff] }
 0x243   :  { %5059 = vmatpush.xpose.msk.msrb.mxu0 %vm116_vm2, %v6221_v38 }
 0x244   :  { %4971 = vmatmul.msk.f32.gmra.mxu3 %vm116_vm2, %v6278_v19 }
 0x247   :  { %4965 = vmatmul.msk.f32.gmra.mxu2 %vm116_vm2, %v292_v23  ;;  %v5149_v23 = vld [vmem:[%s8905_s4 + $0xc8] sm:$0xff] }
 0x24c   :  { %4986 = vmatmul.msk.f32.vlgmr.msra.gmra.mxu3 %vm116_vm2, %v460_v22 }
 0x24d   :  { %962 = vmatpush.msra.mxu3 %v5049_v43 }
 0x24f   :  { %963 = vmatpush.msra.mxu3 %v5048_v44 }
 0x251   :  { %964 = vmatpush.msra.mxu3 %v5047_v47 }
 0x253   :  { %965 = vmatpush.msra.mxu3 %v5046_v48 }
 0x254   :  { %4987 = vmatmul.msk.f32.gmra.mxu3 %vm116_vm2, %v463_v24 }
 0x25c   :  { %4988 = vmatmul.msk.f32.gmra.mxu3 %vm116_vm2, %v466_v25  ;;  %v5148_v25 = vld [vmem:[%s8905_s4 + $0xc0] sm:$0xff] }
 0x264   :  { %4989 = vmatmul.msk.f32.gmra.mxu3 %vm116_vm2, %v469_v27 }
 0x29a   :  { %v472_v40 = vpop.f32.mrf.mxu1 }
 0x29b   :  { %v611_v42 = vpop.f32.mrf.mxu0  ;;  %4990 = vmatmul.msk.f32.gmra.mxu3 %vm116_vm2, %v472_v40  ;;  %v5183_v40 = vld [vmem:[%s8905_s4 + $0xe8] sm:$0xff] }
 0x29c   :  { %5000 = vmatpush.msk.msra.mxu2 %vm73_vm0, %v611_v42 }
 0x29e   :  { %644 = vmatpush.msra.mxu2 %v608_v39 }
 0x29f   :  { %v295_v29 = vpop.f32.mrf.mxu3 }
 0x2a0   :  { %645 = vmatpush.msra.mxu2 %v605_v37  ;;  %v5184_v37 = vld [vmem:[%s8905_s4 + $0xf0] sm:$0xff] }
 0x2a1   :  { %4966 = vmatmul.msk.f32.gmra.mxu2 %vm116_vm2, %v295_v29  ;;  %v5182_v29 = vld [vmem:[%s8905_s4 + $0xe0] sm:$0xff] }
 0x2a2   :  { %646 = vmatpush.msra.mxu2 %v602_v32  ;;  %v5185_v32 = vld [vmem:[%s8905_s4 + $0xf8] sm:$0xff] }
 0x2a3   :  { %5016 = vmatmul.msk.f32.vlgmr.msrb.gmra.mxu3 %vm116_vm2, %v6221_v38 }
 0x2a4   :  { %647 = vmatpush.msra.mxu2 %v599_v28  ;;  %1193 = vmatpush.msrb.mxu3 %v5083_v53 }
 0x2a6   :  { %1194 = vmatpush.msrb.mxu3 %v5082_v54 }
 0x2a7   :  { %v423_v45 = vpop.f32.mrf.mxu3 }
 0x2a8   :  { %1195 = vmatpush.msrb.mxu3 %v5081_v55 }
 0x2aa   :  { %1196 = vmatpush.msrb.mxu3 %v5080_v59 }
 0x2ab   :  { %5017 = vmatmul.msk.f32.gmra.mxu3 %vm116_vm2, %v6230_v50 }
 0x2af   :  { %v426_v49 = vpop.f32.mrf.mxu3 }
 0x2b2   :  { %v330_v43 = vpop.f32.mrf.mxu2 }
 0x2b3   :  { %5018 = vmatmul.msk.f32.gmra.mxu3 %vm116_vm2, %v6239_v58 }
 0x2b7   :  { %v429_v51 = vpop.f32.mrf.mxu3 }
 0x2ba   :  { %v333_v53 = vpop.f32.mrf.mxu2 }
 0x2bb   :  { %5019 = vmatmul.msk.f32.gmra.mxu3 %vm116_vm2, %v6250_v62 }
 0x2bf   :  { %v432_v52 = vpop.f32.mrf.mxu3 }
 0x2c3   :  { %5020 = vmatmul.msk.f32.gmra.mxu3 %vm116_vm2, %v6278_v19 }
 0x2c7   :  { %v435_v35 = vpop.f32.mrf.mxu3 }
 0x2c8   :  { %5006 = vmatpush.msk.msra.mxu1 %vm73_vm0, %v435_v35 }
 0x2ca   :  { %694 = vmatpush.msra.mxu1 %v432_v52 }
 0x2cb   :  { %5050 = vmatmul.msk.f32.vlgmr.msra.gmra.mxu3 %vm116_vm2, %v6221_v38 }
 0x2cc   :  { %695 = vmatpush.msra.mxu1 %v429_v51  ;;  %1424 = vmatpush.msra.mxu3 %v5117_v10 }
 0x2ce   :  { %696 = vmatpush.msra.mxu1 %v426_v49  ;;  %1425 = vmatpush.msra.mxu3 %v5116_v11 }
 0x2cf   :  { %v507_v57 = vpop.f32.mrf.mxu3 }
 0x2d0   :  { %v6402_v60 = vadd.f32 %v507_v57, %v6396_v56  ;;  %697 = vmatpush.msra.mxu1 %v423_v45  ;;  %1426 = vmatpush.msra.mxu3 %v5115_v13  ;;  %v6577_v13 = vadd.f32 %v333_v53, %v6411_v61 }
 0x2d2   :  { %v522_v41 = vsel %vm345_vm7, %v6402_v60, -inf  ;;  %1427 = vmatpush.msra.mxu3 %v5114_v15 }
 0x2d3   :  { %5051 = vmatmul.msk.f32.gmra.mxu3 %vm116_vm2, %v6230_v50  ;;  %523 = vmax.xlane.f32.xlu1 %v522_v41 }
 0x2d7   :  { %v510_v46 = vpop.f32.mrf.mxu3 }
 0x2d8   :  { %v6414_v63 = vadd.f32 %v510_v46, %v6411_v61 }
 0x2da   :  { %v525_v0 = vsel %vm345_vm7, %v6414_v63, -inf }
 0x2db   :  { %5052 = vmatmul.msk.f32.gmra.mxu3 %vm116_vm2, %v6239_v58  ;;  %526 = vmax.xlane.f32.xlu2 %v525_v0  ;;  %v336_v0 = vpop.f32.mrf.mxu2 }
 0x2df   :  { %v513_v2 = vpop.f32.mrf.mxu3 }
 0x2e0   :  { %v6426_v3 = vadd.f32 %v513_v2, %v6423_v1 }
 0x2e2   :  { %v528_v4 = vsel %vm345_vm7, %v6426_v3, -inf }
 0x2e3   :  { %5053 = vmatmul.msk.f32.gmra.mxu3 %vm116_vm2, %v6250_v62  ;;  %529 = vmax.xlane.f32.xlu0 %v528_v4  ;;  %v339_v10 = vpop.f32.mrf.mxu2 }
 0x2e7   :  { %v516_v7 = vpop.f32.mrf.mxu3 }
 0x2e8   :  { %v6438_v8 = vadd.f32 %v516_v7, %v6435_v6  ;;  %v6565_v7 = vadd.f32 %v330_v43, %v6396_v56 }
 0x2ea   :  { %v531_v9 = vsel %vm345_vm7, %v6438_v8, -inf  ;;  %v346_v11 = vsel %vm345_vm7, %v6565_v7, -inf }
 0x2eb   :  { %5054 = vmatmul.msk.f32.gmra.mxu3 %vm116_vm2, %v6278_v19  ;;  %532 = vmax.xlane.f32.xlu1 %v531_v9 }
 0x2f3   :  { %5084 = vmatmul.msk.f32.vlgmr.msrb.gmra.mxu3 %vm116_vm2, %v6221_v38 }
 0x2f4   :  { %1655 = vmatpush.msrb.mxu3 %v5151_v17  ;;  %v6580_v17 = vadd.f32 %v339_v10, %v6435_v6 }
 0x2f6   :  { %1656 = vmatpush.msrb.mxu3 %v5150_v21 }
 0x2f8   :  { %1657 = vmatpush.msrb.mxu3 %v5149_v23  ;;  %v355_v23 = vsel %vm345_vm7, %v6580_v17, -inf }
 0x2fa   :  { %1658 = vmatpush.msrb.mxu3 %v5148_v25 }
 0x2fb   :  { %5085 = vmatmul.msk.f32.gmra.mxu3 %vm116_vm2, %v6230_v50 }
 0x303   :  { %5086 = vmatmul.msk.f32.gmra.mxu3 %vm116_vm2, %v6239_v58 }
 0x30b   :  { %5087 = vmatmul.msk.f32.gmra.mxu3 %vm116_vm2, %v6250_v62 }
 0x313   :  { %5088 = vmatmul.msk.f32.gmra.mxu3 %vm116_vm2, %v6278_v19 }
 0x31b   :  { %5118 = vmatmul.msk.f32.vlgmr.msra.gmra.mxu3 %vm116_vm2, %v6221_v38 }
 0x31c   :  { %1886 = vmatpush.msra.mxu3 %v5185_v32 }
 0x31e   :  { %v519_v20 = vpop.f32.mrf.mxu3  ;;  %1887 = vmatpush.msra.mxu3 %v5184_v37 }
 0x31f   :  { %v6480_v22 = vadd.f32 %v519_v20, %v6474_v5  ;;  %v349_v20 = vsel %vm345_vm7, %v6577_v13, -inf }
 0x320   :  { %1888 = vmatpush.msra.mxu3 %v5183_v40 }
 0x321   :  { %v534_v24 = vsel %vm358_vm8, %v6480_v22, -inf }
 0x322   :  { %535 = vmax.xlane.f32.xlu2 %v534_v24  ;;  %1889 = vmatpush.msra.mxu3 %v5182_v29  ;;  %v6626_v29 = vadd.f32 %v336_v0, %v6423_v1 }
 0x323   :  { %5119 = vmatmul.msk.f32.gmra.mxu3 %vm116_vm2, %v6230_v50 }
 0x324   :  { %v342_v21 = vpop.f32.mrf.mxu2 }
 0x325   :  { %v6590_v24 = vadd.f32 %v342_v21, %v6474_v5 }
 0x326   :  { %v736_v27 = vpop.f32.mrf.mxu3 }
 0x327   :  { %5026 = vmatmul.msk.f32.vlgmr.msra.gmra.mxu0 %vm116_vm2, %v736_v27  ;;  %v359_v27 = vsel %vm358_vm8, %v6590_v24, -inf }
 0x328   :  { %5089 = vmatpush.xpose.msk.msra.mxu0 %vm116_vm2, %v6278_v19 }
 0x32b   :  { %5120 = vmatmul.msk.f32.gmra.mxu3 %vm116_vm2, %v6239_v58 }
 0x32c   :  { %5090 = vmatpush.xpose.msk.msra.mxu0 %vm116_vm2, %v6250_v62 }
 0x32e   :  { %v739_v28 = vpop.f32.mrf.mxu3 }
 0x32f   :  { %5027 = vmatmul.msk.f32.gmra.mxu0 %vm116_vm2, %v739_v28 }
 0x330   :  { %5091 = vmatpush.xpose.msk.msra.mxu0 %vm116_vm2, %v6239_v58 }
 0x333   :  { %5121 = vmatmul.msk.f32.gmra.mxu3 %vm116_vm2, %v6250_v62 }
 0x334   :  { %5092 = vmatpush.xpose.msk.msra.mxu0 %vm116_vm2, %v6230_v50 }
 0x336   :  { %v742_v30 = vpop.f32.mrf.mxu3 }
 0x337   :  { %5028 = vmatmul.msk.f32.gmra.mxu0 %vm116_vm2, %v742_v30 }
 0x338   :  { %5093 = vmatpush.xpose.msk.msra.mxu0 %vm116_vm2, %v6221_v38 }
 0x33b   :  { %5122 = vmatmul.msk.f32.gmra.mxu3 %vm116_vm2, %v6278_v19 }
 0x33e   :  { %v745_v31 = vpop.f32.mrf.mxu3 }
 0x33f   :  { %5029 = vmatmul.msk.f32.gmra.mxu0 %vm116_vm2, %v745_v31 }
 0x343   :  { %5152 = vmatmul.msk.f32.vlgmr.msrb.gmra.mxu3 %vm116_vm2, %v6221_v38 }
 0x346   :  { %v748_v33 = vpop.f32.mrf.mxu3  ;;  %v524_v36 = vpop.xlane.xlu1 %523 }
 0x347   :  { %5030 = vmatmul.msk.f32.gmra.mxu0 %vm116_vm2, %v748_v33  ;;  %v537_v39 = vsub.f32 %v6402_v60, %v524_v36 }
 0x349   :  { %v542_v42 = vmul.f32 1.442695, %v537_v39 }
 0x34b   :  { %5568 = vpow2.f32 %v542_v42  ;;  %5153 = vmatmul.msk.f32.gmra.mxu3 %vm116_vm2, %v6230_v50 }
 0x34e   :  { %v967_v44 = vpop.f32.mrf.mxu3  ;;  %v527_v45 = vpop.xlane.xlu2 %526 }
 0x34f   :  { %5060 = vmatmul.msk.f32.vlgmr.msrb.gmra.mxu0 %vm116_vm2, %v967_v44  ;;  %v538_v47 = vsub.f32 %v6414_v63, %v527_v45  ;;  %v352_v44 = vsel %vm345_vm7, %v6626_v29, -inf }
 0x350   :  { %5123 = vmatpush.xpose.msk.msrb.mxu0 %vm116_vm2, %v6278_v19 }
 0x351   :  { %v6534_v48 = vpop.eup %5568  ;;  %v544_v49 = vmul.f32 1.442695, %v538_v47 }
 0x352   :  { %v552_v51 = vsel %vm345_vm7, %v6534_v48, 0.0 }
 0x353   :  { %5570 = vpow2.f32 %v544_v49  ;;  %5154 = vmatmul.msk.f32.gmra.mxu3 %vm116_vm2, %v6239_v58  ;;  %553 = vadd.xlane.f32.xlu0 %v552_v51 }
 0x354   :  { %5124 = vmatpush.xpose.msk.msrb.mxu0 %vm116_vm2, %v6250_v62 }
 0x356   :  { %v970_v52 = vpop.f32.mrf.mxu3  ;;  %v530_v35 = vpop.xlane.xlu0 %529 }
 0x357   :  { %5061 = vmatmul.msk.f32.gmra.mxu0 %vm116_vm2, %v970_v52  ;;  %v539_v54 = vsub.f32 %v6426_v3, %v530_v35 }
 0x358   :  { %5125 = vmatpush.xpose.msk.msrb.mxu0 %vm116_vm2, %v6239_v58 }
 0x359   :  { %v6546_v55 = vpop.eup %5570  ;;  %v546_v57 = vmul.f32 1.442695, %v539_v54 }
 0x35a   :  { %v555_v59 = vsel %vm345_vm7, %v6546_v55, 0.0 }
 0x35b   :  { %5572 = vpow2.f32 %v546_v57  ;;  %5155 = vmatmul.msk.f32.gmra.mxu3 %vm116_vm2, %v6250_v62  ;;  %556 = vadd.xlane.f32.xlu1 %v555_v59 }
 0x35c   :  { %5126 = vmatpush.xpose.msk.msrb.mxu0 %vm116_vm2, %v6230_v50 }
 0x35e   :  { %v973_v60 = vpop.f32.mrf.mxu3  ;;  %v533_v41 = vpop.xlane.xlu1 %532 }
 0x35f   :  { %5062 = vmatmul.msk.f32.gmra.mxu0 %vm116_vm2, %v973_v60  ;;  %v540_v46 = vsub.f32 %v6438_v8, %v533_v41 }
 0x360   :  { %5127 = vmatpush.xpose.msk.msrb.mxu0 %vm116_vm2, %v6221_v38 }
 0x361   :  { %v6558_v63 = vpop.eup %5572  ;;  %v548_v2 = vmul.f32 1.442695, %v540_v46 }
 0x362   :  { %v558_v3 = vsel %vm345_vm7, %v6558_v63, 0.0 }
 0x363   :  { %5574 = vpow2.f32 %v548_v2  ;;  %5156 = vmatmul.msk.f32.gmra.mxu3 %vm116_vm2, %v6278_v19  ;;  %559 = vadd.xlane.f32.xlu2 %v558_v3 }
 0x366   :  { %v976_v4 = vpop.f32.mrf.mxu3 }
 0x367   :  { %5063 = vmatmul.msk.f32.gmra.mxu0 %vm116_vm2, %v976_v4 }
 0x369   :  { %v6568_v8 = vpop.eup %5574 }
 0x36a   :  { %v561_v9 = vsel %vm345_vm7, %v6568_v8, 0.0 }
 0x36b   :  { %5186 = vmatmul.msk.f32.vlgmr.msra.gmra.mxu3 %vm116_vm2, %v6221_v38  ;;  %562 = vadd.xlane.f32.xlu0 %v561_v9 }
 0x36c   :  { %347 = vmax.xlane.f32.xlu2 %v346_v11 }
 0x36e   :  { %v979_v15 = vpop.f32.mrf.mxu3 }
 0x36f   :  { %5064 = vmatmul.msk.f32.gmra.mxu0 %vm116_vm2, %v979_v15 }
 0x373   :  { %5187 = vmatmul.msk.f32.gmra.mxu3 %vm116_vm2, %v6230_v50  ;;  %350 = vmax.xlane.f32.xlu0 %v349_v20 }
 0x374   :  { %356 = vmax.xlane.f32.xlu2 %v355_v23 }
 0x376   :  { %v1198_v25 = vpop.f32.mrf.mxu3 }
 0x377   :  { %5094 = vmatmul.msk.f32.vlgmr.msra.gmra.mxu0 %vm116_vm2, %v1198_v25 }
 0x378   :  { %5157 = vmatpush.xpose.msk.msra.mxu0 %vm116_vm2, %v6278_v19 }
 0x37b   :  { %5188 = vmatmul.msk.f32.gmra.mxu3 %vm116_vm2, %v6239_v58  ;;  %360 = vmax.xlane.f32.xlu0 %v359_v27 }
 0x37c   :  { %5158 = vmatpush.xpose.msk.msra.mxu0 %vm116_vm2, %v6250_v62 }
 0x37e   :  { %v1201_v28 = vpop.f32.mrf.mxu3 }
 0x37f   :  { %5095 = vmatmul.msk.f32.gmra.mxu0 %vm116_vm2, %v1201_v28 }
 0x380   :  { %5159 = vmatpush.xpose.msk.msra.mxu0 %vm116_vm2, %v6239_v58 }
 0x383   :  { %5189 = vmatmul.msk.f32.gmra.mxu3 %vm116_vm2, %v6250_v62 }
 0x384   :  { %5160 = vmatpush.xpose.msk.msra.mxu0 %vm116_vm2, %v6230_v50 }
 0x386   :  { %v1204_v30 = vpop.f32.mrf.mxu3 }
 0x387   :  { %5096 = vmatmul.msk.f32.gmra.mxu0 %vm116_vm2, %v1204_v30 }
 0x388   :  { %5161 = vmatpush.xpose.msk.msra.mxu0 %vm116_vm2, %v6221_v38 }
 0x38b   :  { %5190 = vmatmul.msk.f32.gmra.mxu3 %vm116_vm2, %v6278_v19 }
 0x38e   :  { %v1207_v31 = vpop.f32.mrf.mxu3 }
 0x38f   :  { %5097 = vmatmul.msk.f32.gmra.mxu0 %vm116_vm2, %v1207_v31 }
 0x395   :  { %v536_v32 = vpop.xlane.xlu2 %535 }
 0x396   :  { %v541_v33 = vsub.f32 %v6480_v22, %v536_v32  ;;  %v1210_v36 = vpop.f32.mrf.mxu3 }
 0x397   :  { %5098 = vmatmul.msk.f32.gmra.mxu0 %vm116_vm2, %v1210_v36 }
 0x398   :  { %v550_v37 = vmul.f32 1.442695, %v541_v33 }
 0x39a   :  { %5576 = vpow2.f32 %v550_v37 }
 0x39e   :  { %v1429_v39 = vpop.f32.mrf.mxu3 }
 0x39f   :  { %5128 = vmatmul.msk.f32.vlgmr.msrb.gmra.mxu0 %vm116_vm2, %v1429_v39 }
 0x3a0   :  { %v6617_v40 = vpop.eup %5576  ;;  %5191 = vmatpush.xpose.msk.msrb.mxu0 %vm116_vm2, %v6278_v19 }
 0x3a1   :  { %v564_v42 = vsel %vm358_vm8, %v6617_v40, 0.0 }
 0x3a2   :  { %565 = vadd.xlane.f32.xlu1 %v564_v42 }
 0x3a4   :  { %5192 = vmatpush.xpose.msk.msrb.mxu0 %vm116_vm2, %v6250_v62  ;;  %v783_v22 = vpop.f32.mrf.mxu0 }
 0x3a5   :  { %v6636_v47 = vadd.f32 %v783_v22, %v6396_v56 }
 0x3a6   :  { %v1432_v43 = vpop.f32.mrf.mxu3 }
 0x3a7   :  { %5129 = vmatmul.msk.f32.gmra.mxu0 %vm116_vm2, %v1432_v43  ;;  %v798_v35 = vsel %vm345_vm7, %v6636_v47, -inf }
 0x3a8   :  { %5193 = vmatpush.xpose.msk.msrb.mxu0 %vm116_vm2, %v6239_v58 }
 0x3aa   :  { %353 = vmax.xlane.f32.xlu1 %v352_v44 }
 0x3ac   :  { %5194 = vmatpush.xpose.msk.msrb.mxu0 %vm116_vm2, %v6230_v50  ;;  %v786_v45 = vpop.f32.mrf.mxu0 }
 0x3ad   :  { %v6639_v49 = vadd.f32 %v786_v45, %v6411_v61 }
 0x3ae   :  { %v1435_v51 = vpop.f32.mrf.mxu3 }
 0x3af   :  { %5130 = vmatmul.msk.f32.gmra.mxu0 %vm116_vm2, %v1435_v51  ;;  %v801_v52 = vsel %vm345_vm7, %v6639_v49, -inf }
 0x3b0   :  { %5195 = vmatpush.xpose.msk.msrb.mxu0 %vm116_vm2, %v6221_v38  ;;  %802 = vmax.xlane.f32.xlu2 %v801_v52 }
 0x3b2   :  { %799 = vmax.xlane.f32.xlu1 %v798_v35 }
 0x3b4   :  { %v789_v53 = vpop.f32.mrf.mxu0 }
 0x3b5   :  { %v6649_v54 = vadd.f32 %v789_v53, %v6423_v1 }
 0x3b6   :  { %v1438_v57 = vpop.f32.mrf.mxu3 }
 0x3b7   :  { %5131 = vmatmul.msk.f32.gmra.mxu0 %vm116_vm2, %v1438_v57  ;;  %v804_v59 = vsel %vm345_vm7, %v6649_v54, -inf }
 0x3ba   :  { %805 = vmax.xlane.f32.xlu1 %v804_v59 }
 0x3bc   :  { %v792_v20 = vpop.f32.mrf.mxu0 }
 0x3bd   :  { %v6676_v45 = vadd.f32 %v792_v20, %v6435_v6  ;;  %v5032_v20 = vld [vmem:[%s8906_s5 + $0x48] sm:$0xff] }
 0x3be   :  { %v1441_v60 = vpop.f32.mrf.mxu3 }
 0x3bf   :  { %5132 = vmatmul.msk.f32.gmra.mxu0 %vm116_vm2, %v1441_v60  ;;  %v807_v35 = vsel %vm345_vm7, %v6676_v45, -inf }
 0x3c4   :  { %v795_v31 = vpop.f32.mrf.mxu0 }
 0x3c5   :  { %v6689_v57 = vadd.f32 %v795_v31, %v6474_v5 }
 0x3c6   :  { %v1660_v41 = vpop.f32.mrf.mxu3  ;;  %v554_v46 = vpop.xlane.xlu0 %553 }
 0x3c7   :  { %5162 = vmatmul.msk.f32.vlgmr.msra.gmra.mxu0 %vm116_vm2, %v1660_v41  ;;  %5578 = vrcp.f32 %v554_v46 }
 0x3cd   :  { %v5579_v0 = vpop.eup %5578 }
 0x3ce   :  { %v572_v2 = vmul.f32 %v5579_v0, %v6534_v48  ;;  %v1663_v3 = vpop.f32.mrf.mxu3  ;;  %v557_v4 = vpop.xlane.xlu1 %556 }
 0x3cf   :  { %5163 = vmatmul.msk.f32.gmra.mxu0 %vm116_vm2, %v1663_v3  ;;  %5580 = vrcp.f32 %v557_v4  ;;  %v5034_v4 = vld [vmem:[%s8906_s5 + $0x58] sm:$0xff] }
 0x3d0   :  { %5001 = vmatmul.msk.f32.vlgmr.msra.gmra.mxu2 %vm345_vm7, %v572_v2 }
 0x3d1   :  { %870 = vmatpush.msrb.mxu2 %v5034_v4 }
 0x3d5   :  { %v5581_v9 = vpop.eup %5580 }
 0x3d6   :  { %v1666_v10 = vpop.f32.mrf.mxu3  ;;  %v560_v11 = vpop.xlane.xlu2 %559  ;;  %v573_v15 = vmul.f32 %v5581_v9, %v6546_v55 }
 0x3d7   :  { %5164 = vmatmul.msk.f32.gmra.mxu0 %vm116_vm2, %v1666_v10  ;;  %5582 = vrcp.f32 %v560_v11  ;;  %v5033_v10 = vld [vmem:[%s8906_s5 + $0x50] sm:$0xff] }
 0x3d8   :  { %5002 = vmatmul.msk.f32.gmra.mxu2 %vm345_vm7, %v573_v15 }
 0x3d9   :  { %871 = vmatpush.msrb.mxu2 %v5033_v10 }
 0x3db   :  { %872 = vmatpush.msrb.mxu2 %v5032_v20 }
 0x3dd   :  { %v5583_v21 = vpop.eup %5582 }
 0x3de   :  { %v1669_v48 = vpop.f32.mrf.mxu3  ;;  %v563_v23 = vpop.xlane.xlu0 %562  ;;  %v574_v25 = vmul.f32 %v5583_v21, %v6558_v63 }
 0x3df   :  { %5165 = vmatmul.msk.f32.gmra.mxu0 %vm116_vm2, %v1669_v48  ;;  %5584 = vrcp.f32 %v563_v23  ;;  %v348_v27 = vpop.xlane.xlu2 %347  ;;  %v5031_v23 = vld [vmem:[%s8906_s5 + $0x40] sm:$0xff] }
 0x3e0   :  { %v362_v28 = vsub.f32 %v6565_v7, %v348_v27  ;;  %5003 = vmatmul.msk.f32.gmra.mxu2 %vm345_vm7, %v574_v25 }
 0x3e1   :  { %873 = vmatpush.msrb.mxu2 %v5031_v23 }
 0x3e2   :  { %v367_v55 = vmul.f32 1.442695, %v362_v28 }
 0x3e4   :  { %5586 = vpow2.f32 %v367_v55 }
 0x3e5   :  { %v5585_v30 = vpop.eup %5584 }
 0x3e6   :  { %v1672_v32 = vpop.f32.mrf.mxu3  ;;  %v351_v33 = vpop.xlane.xlu0 %350  ;;  %v575_v36 = vmul.f32 %v5585_v30, %v6568_v8 }
 0x3e7   :  { %5166 = vmatmul.msk.f32.gmra.mxu0 %vm116_vm2, %v1672_v32  ;;  %v363_v63 = vsub.f32 %v6577_v13, %v351_v33  ;;  %v357_v37 = vpop.xlane.xlu2 %356  ;;  %v6678_v13 = vpop.f32.mrf.mxu0 }
 0x3e8   :  { %5004 = vmatmul.msk.f32.gmra.mxu2 %vm345_vm7, %v575_v36  ;;  %v365_v7 = vsub.f32 %v6580_v17, %v357_v37 }
 0x3e9   :  { %v369_v39 = vmul.f32 1.442695, %v363_v63 }
 0x3ea   :  { %v6670_v42 = vpop.eup %5586  ;;  %v373_v43 = vmul.f32 1.442695, %v365_v7 }
 0x3eb   :  { %5588 = vpow2.f32 %v369_v39  ;;  %v377_v22 = vsel %vm345_vm7, %v6670_v42, 0.0 }
 0x3ec   :  { %378 = vadd.xlane.f32.xlu0 %v377_v22  ;;  %5590 = vpow2.f32 %v373_v43  ;;  %v5068_v22 = vld [vmem:[%s8906_s5 + $0x78] sm:$0xff] }
 0x3ed   :  { %1101 = vmatpush.msra.mxu2 %v5068_v22 }
 0x3ee   :  { %v1891_v44 = vpop.f32.mrf.mxu3  ;;  %v361_v8 = vpop.xlane.xlu0 %360 }
 0x3ef   :  { %5196 = vmatmul.msk.f32.vlgmr.msrb.gmra.mxu0 %vm116_vm2, %v1891_v44  ;;  %v366_v52 = vsub.f32 %v6590_v24, %v361_v8  ;;  %v1017_v41 = vpop.f32.mrf.mxu0  ;;  %v810_v24 = vsel %vm358_vm8, %v6689_v57, -inf  ;;  %v5066_v44 = vld [vmem:[%s8906_s5 + $0x68] sm:$0xff] }
 0x3f0   :  { %v6701_v3 = vadd.f32 %v1017_v41, %v6411_v61 }
 0x3f1   :  { %v6681_v51 = vpop.eup %5588  ;;  %v375_v53 = vmul.f32 1.442695, %v366_v52  ;;  %v6749_v52 = vadd.f32 %v6678_v13, %v6396_v56 }
 0x3f2   :  { %v380_v17 = vsel %vm345_vm7, %v6681_v51, 0.0  ;;  %v6692_v60 = vpop.eup %5590  ;;  %v1032_v15 = vsel %vm345_vm7, %v6701_v3, -inf }
 0x3f3   :  { %381 = vadd.xlane.f32.xlu2 %v380_v17  ;;  %5592 = vpow2.f32 %v375_v53  ;;  %v386_v46 = vsel %vm345_vm7, %v6692_v60, 0.0 }
 0x3f4   :  { %808 = vmax.xlane.f32.xlu0 %v807_v35 }
 0x3f6   :  { %v1894_v59 = vpop.f32.mrf.mxu3 }
 0x3f7   :  { %5197 = vmatmul.msk.f32.gmra.mxu0 %vm116_vm2, %v1894_v59  ;;  %v1020_v11 = vpop.f32.mrf.mxu0 }
 0x3f8   :  { %v6718_v21 = vadd.f32 %v1020_v11, %v6423_v1 }
 0x3f9   :  { %v6698_v2 = vpop.eup %5592 }
 0x3fa   :  { %v389_v9 = vsel %vm358_vm8, %v6698_v2, 0.0  ;;  %v1035_v25 = vsel %vm345_vm7, %v6718_v21, -inf }
 0x3fb   :  { %811 = vmax.xlane.f32.xlu2 %v810_v24  ;;  %v1029_v24 = vsel %vm345_vm7, %v6749_v52, -inf }
 0x3fc   :  { %387 = vadd.xlane.f32.xlu0 %v386_v46 }
 0x3fe   :  { %v1897_v0 = vpop.f32.mrf.mxu3 }
 0x3ff   :  { %5198 = vmatmul.msk.f32.gmra.mxu0 %vm116_vm2, %v1897_v0  ;;  %v1023_v39 = vpop.f32.mrf.mxu0 }
 0x403   :  { %390 = vadd.xlane.f32.xlu2 %v389_v9 }
 0x404   :  { %1033 = vmax.xlane.f32.xlu0 %v1032_v15  ;;  %v6779_v15 = vadd.f32 %v1023_v39, %v6435_v6 }
 0x406   :  { %v1900_v48 = vpop.f32.mrf.mxu3 }
 0x407   :  { %5199 = vmatmul.msk.f32.gmra.mxu0 %vm116_vm2, %v1900_v48  ;;  %v1026_v41 = vpop.f32.mrf.mxu0  ;;  %v1038_v48 = vsel %vm345_vm7, %v6779_v15, -inf }
 0x408   :  { %v6764_v46 = vadd.f32 %v1026_v41, %v6474_v5 }
 0x40a   :  { %v1041_v0 = vsel %vm358_vm8, %v6764_v46, -inf }
 0x40b   :  { %1036 = vmax.xlane.f32.xlu2 %v1035_v25  ;;  %v5102_v25 = vld [vmem:[%s8906_s5 + $0x98] sm:$0xff] }
 0x40e   :  { %v1903_v27 = vpop.f32.mrf.mxu3 }
 0x40f   :  { %5200 = vmatmul.msk.f32.gmra.mxu0 %vm116_vm2, %v1903_v27  ;;  %v1245_v11 = vpop.f32.mrf.mxu0  ;;  %v5101_v27 = vld [vmem:[%s8906_s5 + $0x90] sm:$0xff] }
 0x410   :  { %v6782_v20 = vadd.f32 %v1245_v11, %v6396_v56 }
 0x412   :  { %v1260_v23 = vsel %vm345_vm7, %v6782_v20, -inf }
 0x415   :  { %v566_v28 = vpop.xlane.xlu1 %565 }
 0x416   :  { %5594 = vrcp.f32 %v566_v28  ;;  %v5100_v28 = vld [vmem:[%s8906_s5 + $0x88] sm:$0xff] }
 0x41c   :  { %v5595_v55 = vpop.eup %5594 }
 0x41d   :  { %v354_v30 = vpop.xlane.xlu1 %353  ;;  %v576_v31 = vmul.f32 %v5595_v55, %v6617_v40  ;;  %v5067_v40 = vld [vmem:[%s8906_s5 + $0x70] sm:$0xff]  ;;  %v5099_v55 = vld [vmem:[%s8906_s5 + $0x80] sm:$0xff] }
 0x41e   :  { %v364_v32 = vsub.f32 %v6626_v29, %v354_v30  ;;  %1102 = vmatpush.msra.mxu2 %v5067_v40 }
 0x41f   :  { %5005 = vmatmul.msk.f32.gmra.mxu2 %vm345_vm7, %v576_v31  ;;  %v1248_v31 = vpop.f32.mrf.mxu0 }
 0x420   :  { %v371_v33 = vmul.f32 1.442695, %v364_v32  ;;  %1103 = vmatpush.msra.mxu2 %v5066_v44 }
 0x422   :  { %5596 = vpow2.f32 %v371_v33 }
 0x423   :  { %v803_v36 = vpop.xlane.xlu2 %802 }
 0x424   :  { %v814_v63 = vsub.f32 %v6639_v49, %v803_v36 }
 0x425   :  { %v800_v37 = vpop.xlane.xlu1 %799 }
 0x426   :  { %v820_v7 = vmul.f32 1.442695, %v814_v63  ;;  %v813_v43 = vsub.f32 %v6636_v47, %v800_v37  ;;  %v5065_v47 = vld [vmem:[%s8906_s5 + $0x60] sm:$0xff] }
 0x427   :  { %5035 = vmatmul.msk.f32.vlgmr.msrb.gmra.mxu2 %vm116_vm2, %v6221_v38  ;;  %v1251_v22 = vpop.f32.mrf.mxu0 }
 0x428   :  { %v6739_v29 = vpop.eup %5596  ;;  %5598 = vpow2.f32 %v820_v7  ;;  %v818_v8 = vmul.f32 1.442695, %v813_v43  ;;  %1104 = vmatpush.msra.mxu2 %v5065_v47 }
 0x429   :  { %v383_v49 = vsel %vm345_vm7, %v6739_v29, 0.0 }
 0x42a   :  { %384 = vadd.xlane.f32.xlu1 %v383_v49  ;;  %5600 = vpow2.f32 %v818_v8  ;;  %1332 = vmatpush.msrb.mxu2 %v5102_v25 }
 0x42c   :  { %1333 = vmatpush.msrb.mxu2 %v5101_v27 }
 0x42d   :  { %v806_v17 = vpop.xlane.xlu1 %805 }
 0x42e   :  { %v6754_v35 = vpop.eup %5598  ;;  %v815_v53 = vsub.f32 %v6649_v54, %v806_v17  ;;  %1334 = vmatpush.msrb.mxu2 %v5100_v28 }
 0x42f   :  { %5036 = vmatmul.msk.f32.gmra.mxu2 %vm116_vm2, %v6230_v50  ;;  %v831_v59 = vsel %vm345_vm7, %v6754_v35, 0.0  ;;  %v6831_v47 = vpop.f32.mrf.mxu0 }
 0x430   :  { %v822_v13 = vmul.f32 1.442695, %v815_v53  ;;  %832 = vadd.xlane.f32.xlu0 %v831_v59  ;;  %v6766_v54 = vpop.eup %5600  ;;  %1335 = vmatpush.msrb.mxu2 %v5099_v55  ;;  %v5136_v53 = vld [vmem:[%s8906_s5 + $0xb8] sm:$0xff]  ;;  %v5135_v59 = vld [vmem:[%s8906_s5 + $0xb0] sm:$0xff] }
 0x431   :  { %v828_v9 = vsel %vm345_vm7, %v6766_v54, 0.0 }
 0x432   :  { %5602 = vpow2.f32 %v822_v13  ;;  %1030 = vmax.xlane.f32.xlu1 %v1029_v24  ;;  %v5134_v24 = vld [vmem:[%s8906_s5 + $0xa8] sm:$0xff] }
 0x437   :  { %5037 = vmatmul.msk.f32.gmra.mxu2 %vm116_vm2, %v6239_v58  ;;  %v1257_v27 = vpop.f32.mrf.mxu0 }
 0x438   :  { %v6772_v4 = vpop.eup %5602  ;;  %1042 = vmax.xlane.f32.xlu0 %v1041_v0 }
 0x439   :  { %v834_v10 = vsel %vm345_vm7, %v6772_v4, 0.0 }
 0x43a   :  { %829 = vadd.xlane.f32.xlu1 %v828_v9  ;;  %835 = vadd.xlane.f32.xlu2 %v834_v10 }
 0x43f   :  { %5038 = vmatmul.msk.f32.gmra.mxu2 %vm116_vm2, %v6250_v62 }
 0x442   :  { %1039 = vmax.xlane.f32.xlu1 %v1038_v48  ;;  %1261 = vmax.xlane.f32.xlu2 %v1260_v23  ;;  %v5133_v23 = vld [vmem:[%s8906_s5 + $0xa0] sm:$0xff] }
 0x447   :  { %5039 = vmatmul.msk.f32.gmra.mxu2 %vm116_vm2, %v6278_v19 }
 0x44f   :  { %5069 = vmatmul.msk.f32.vlgmr.msra.gmra.mxu2 %vm116_vm2, %v6221_v38 }
 0x450   :  { %1563 = vmatpush.msra.mxu2 %v5136_v53 }
 0x452   :  { %1564 = vmatpush.msra.mxu2 %v5135_v59 }
 0x453   :  { %v6851_v11 = vpop.f32.mrf.mxu2 }
 0x454   :  { %1565 = vmatpush.msra.mxu2 %v5134_v24 }
 0x456   :  { %1566 = vmatpush.msra.mxu2 %v5133_v23 }
 0x457   :  { %5070 = vmatmul.msk.f32.gmra.mxu2 %vm116_vm2, %v6230_v50 }
 0x45f   :  { %5071 = vmatmul.msk.f32.gmra.mxu2 %vm116_vm2, %v6239_v58  ;;  %v379_v30 = vpop.xlane.xlu0 %378 }
 0x460   :  { %5604 = vrcp.f32 %v379_v30 }
 0x466   :  { %v5605_v32 = vpop.eup %5604  ;;  %v382_v33 = vpop.xlane.xlu2 %381 }
 0x467   :  { %v397_v36 = vmul.f32 %v5605_v32, %v6670_v42  ;;  %5072 = vmatmul.msk.f32.gmra.mxu2 %vm116_vm2, %v6250_v62  ;;  %v809_v63 = vpop.xlane.xlu0 %808  ;;  %5606 = vrcp.f32 %v382_v33  ;;  %v6868_v32 = vpop.f32.mrf.mxu2  ;;  %v6871_v33 = vadd.f32 %v1257_v27, %v6474_v5 }
 0x468   :  { %v816_v37 = vsub.f32 %v6676_v45, %v809_v63  ;;  %v1476_v63 = vpop.f32.mrf.mxu0 }
 0x469   :  { %5007 = vmatmul.msk.f32.vlgmr.msra.gmra.mxu1 %vm345_vm7, %v397_v36 }
 0x46a   :  { %v824_v39 = vmul.f32 1.442695, %v816_v37  ;;  %v1272_v37 = vsel %vm358_vm8, %v6871_v33, -inf }
 0x46c   :  { %5608 = vpow2.f32 %v824_v39  ;;  %v6882_v39 = vadd.f32 %v1476_v63, %v6396_v56  ;;  %v5170_v56 = vld [vmem:[%s8906_s5 + $0xd8] sm:$0xff] }
 0x46d   :  { %v5607_v7 = vpop.eup %5606 }
 0x46e   :  { %v812_v40 = vpop.xlane.xlu2 %811  ;;  %v398_v43 = vmul.f32 %v5607_v7, %v6681_v51  ;;  %v6829_v51 = vadd.f32 %v1248_v31, %v6411_v61  ;;  %v1491_v7 = vsel %vm345_vm7, %v6882_v39, -inf }
 0x46f   :  { %5073 = vmatmul.msk.f32.gmra.mxu2 %vm116_vm2, %v6278_v19  ;;  %v6818_v42 = vpop.xlane.xlu0 %387  ;;  %v817_v49 = vsub.f32 %v6689_v57, %v812_v40  ;;  %v6886_v5 = vpop.f32.mrf.mxu2 }
 0x470   :  { %v1263_v10 = vsel %vm345_vm7, %v6829_v51, -inf }
 0x471   :  { %v826_v44 = vmul.f32 1.442695, %v817_v49  ;;  %5008 = vmatmul.msk.f32.gmra.mxu1 %vm345_vm7, %v398_v43  ;;  %v5169_v49 = vld [vmem:[%s8906_s5 + $0xd0] sm:$0xff] }
 0x472   :  { %v6822_v45 = vpop.eup %5608 }
 0x473   :  { %5610 = vpow2.f32 %v826_v44  ;;  %v837_v8 = vsel %vm345_vm7, %v6822_v45, 0.0 }
 0x474   :  { %838 = vadd.xlane.f32.xlu1 %v837_v8  ;;  %v5168_v8 = vld [vmem:[%s8906_s5 + $0xc8] sm:$0xff] }
 0x476   :  { %v6826_v17 = vpop.xlane.xlu2 %390 }
 0x477   :  { %5103 = vmatmul.msk.f32.vlgmr.msrb.gmra.mxu2 %vm116_vm2, %v6221_v38  ;;  %v1034_v57 = vpop.xlane.xlu0 %1033 }
 0x478   :  { %v1045_v41 = vsub.f32 %v6701_v3, %v1034_v57  ;;  %v6854_v3 = vadd.f32 %v1251_v22, %v6423_v1  ;;  %v6892_v22 = vpop.f32.mrf.mxu2  ;;  %1794 = vmatpush.msrb.mxu2 %v5170_v56 }
 0x479   :  { %v6842_v13 = vpop.eup %5610 }
 0x47a   :  { %v1051_v0 = vmul.f32 1.442695, %v1045_v41  ;;  %v840_v9 = vsel %vm358_vm8, %v6842_v13, 0.0  ;;  %v1266_v30 = vsel %vm345_vm7, %v6854_v3, -inf  ;;  %1795 = vmatpush.msrb.mxu2 %v5169_v49  ;;  %v5167_v41 = vld [vmem:[%s8906_s5 + $0xc0] sm:$0xff] }
 0x47b   :  { %841 = vadd.xlane.f32.xlu0 %v840_v9 }
 0x47c   :  { %5612 = vpow2.f32 %v1051_v0  ;;  %1264 = vmax.xlane.f32.xlu1 %v1263_v10  ;;  %1796 = vmatpush.msrb.mxu2 %v5168_v8 }
 0x47e   :  { %v1037_v48 = vpop.xlane.xlu2 %1036  ;;  %1797 = vmatpush.msrb.mxu2 %v5167_v41 }
 0x47f   :  { %5104 = vmatmul.msk.f32.gmra.mxu2 %vm116_vm2, %v6230_v50  ;;  %v1046_v25 = vsub.f32 %v6718_v21, %v1037_v48 }
 0x481   :  { %v1053_v28 = vmul.f32 1.442695, %v1046_v25  ;;  %v1479_v25 = vpop.f32.mrf.mxu0 }
 0x482   :  { %v6862_v55 = vpop.eup %5612 }
 0x483   :  { %5614 = vpow2.f32 %v1053_v28  ;;  %v1062_v31 = vsel %vm345_vm7, %v6862_v55, 0.0  ;;  %1267 = vmax.xlane.f32.xlu0 %v1266_v30 }
 0x484   :  { %1063 = vadd.xlane.f32.xlu1 %v1062_v31  ;;  %v6934_v31 = vadd.f32 %v6831_v47, %v6435_v6 }
 0x487   :  { %5105 = vmatmul.msk.f32.gmra.mxu2 %vm116_vm2, %v6239_v58 }
 0x489   :  { %v6875_v21 = vpop.eup %5614  ;;  %v1482_v47 = vpop.f32.mrf.mxu0 }
 0x48a   :  { %v1065_v36 = vsel %vm345_vm7, %v6875_v21, 0.0 }
 0x48b   :  { %1066 = vadd.xlane.f32.xlu0 %v1065_v36 }
 0x48c   :  { %1273 = vmax.xlane.f32.xlu1 %v1272_v37 }
 0x48f   :  { %5106 = vmatmul.msk.f32.gmra.mxu2 %vm116_vm2, %v6250_v62 }
 0x493   :  { %1492 = vmax.xlane.f32.xlu0 %v1491_v7 }
 0x497   :  { %5107 = vmatmul.msk.f32.gmra.mxu2 %vm116_vm2, %v6278_v19 }
 0x49d   :  { %v385_v40 = vpop.xlane.xlu1 %384 }
 0x49e   :  { %5616 = vrcp.f32 %v385_v40 }
 0x49f   :  { %5137 = vmatmul.msk.f32.vlgmr.msra.gmra.mxu2 %vm116_vm2, %v6221_v38  ;;  %5618 = vrcp.f32 %v6818_v42 }
 0x4a2   :  { %v6899_v43 = vpop.f32.mrf.mxu2 }
 0x4a3   :  { %v6904_v44 = vpop.xlane.xlu0 %832 }
 0x4a4   :  { %v5617_v57 = vpop.eup %5616 }
 0x4a5   :  { %v1031_v53 = vpop.xlane.xlu1 %1030  ;;  %v399_v59 = vmul.f32 %v5617_v57, %v6739_v29  ;;  %v5619_v9 = vpop.eup %5618 }
 0x4a6   :  { %v1044_v24 = vsub.f32 %v6749_v52, %v1031_v53  ;;  %v400_v52 = vmul.f32 %v5619_v9, %v6692_v60  ;;  %v6964_v9 = vadd.f32 %v1479_v25, %v6411_v61 }
 0x4a7   :  { %5009 = vmatmul.msk.f32.gmra.mxu1 %vm345_vm7, %v399_v59  ;;  %5138 = vmatmul.msk.f32.gmra.mxu2 %vm116_vm2, %v6230_v50 }
 0x4a8   :  { %v1049_v0 = vmul.f32 1.442695, %v1044_v24 }
 0x4aa   :  { %5620 = vpow2.f32 %v1049_v0  ;;  %v6918_v42 = vpop.f32.mrf.mxu2  ;;  %v1485_v0 = vpop.f32.mrf.mxu0 }
 0x4ab   :  { %v1043_v10 = vpop.xlane.xlu0 %1042  ;;  %5622 = vrcp.f32 %v6826_v17 }
 0x4ac   :  { %v1048_v29 = vsub.f32 %v6764_v46, %v1043_v10  ;;  %v6967_v10 = vadd.f32 %v1485_v0, %v6435_v6  ;;  %v5203_v6 = vld [vmem:[%s8906_s5 + $0xf0] sm:$0xff] }
 0x4ad   :  { %v830_v48 = vpop.xlane.xlu1 %829  ;;  %v6922_v23 = vpop.xlane.xlu2 %835 }
 0x4ae   :  { %v1057_v27 = vmul.f32 1.442695, %v1048_v29  ;;  %v5204_v29 = vld [vmem:[%s8906_s5 + $0xf8] sm:$0xff]  ;;  %v1500_v61 = vsel %vm345_vm7, %v6967_v10, -inf }
 0x4af   :  { %5010 = vmatmul.msk.f32.gmra.mxu1 %vm345_vm7, %v400_v52  ;;  %5139 = vmatmul.msk.f32.gmra.mxu2 %vm116_vm2, %v6239_v58  ;;  %v1494_v52 = vsel %vm345_vm7, %v6964_v9, -inf }
 0x4b0   :  { %v6928_v28 = vpop.eup %5620  ;;  %5624 = vpow2.f32 %v1057_v27  ;;  %2025 = vmatpush.msra.mxu2 %v5204_v29 }
 0x4b1   :  { %v1059_v17 = vsel %vm345_vm7, %v6928_v28, 0.0  ;;  %v5623_v30 = vpop.eup %5622 }
 0x4b2   :  { %v878_v46 = vpop.f32.mrf.mxu2  ;;  %1060 = vadd.xlane.f32.xlu2 %v1059_v17  ;;  %v401_v63 = vmul.f32 %v5623_v30, %v6698_v2  ;;  %v1269_v2 = vsel %vm345_vm7, %v6934_v31, -inf  ;;  %2026 = vmatpush.msra.mxu2 %v5203_v6  ;;  %v5201_v17 = vld [vmem:[%s8906_s5 + $0xe0] sm:$0xff] }
 0x4b5   :  { %v1040_v60 = vpop.xlane.xlu1 %1039  ;;  %v1262_v36 = vpop.xlane.xlu2 %1261 }
 0x4b6   :  { %v6937_v37 = vpop.eup %5624  ;;  %v1047_v7 = vsub.f32 %v6779_v15, %v1040_v60  ;;  %v1275_v40 = vsub.f32 %v6782_v20, %v1262_v36  ;;  %v6949_v15 = vadd.f32 %v1482_v47, %v6423_v1 }
 0x4b7   :  { %5011 = vmatmul.msk.f32.gmra.mxu1 %vm345_vm7, %v401_v63  ;;  %5140 = vmatmul.msk.f32.gmra.mxu2 %vm116_vm2, %v6250_v62  ;;  %v1071_v56 = vsel %vm358_vm8, %v6937_v37, 0.0 }
 0x4b8   :  { %v1055_v49 = vmul.f32 1.442695, %v1047_v7  ;;  %v1280_v8 = vmul.f32 1.442695, %v1275_v40  ;;  %1072 = vadd.xlane.f32.xlu1 %v1071_v56  ;;  %v1497_v20 = vsel %vm345_vm7, %v6949_v15, -inf  ;;  %v1488_v40 = vpop.f32.mrf.mxu0 }
 0x4ba   :  { %5626 = vpow2.f32 %v1055_v49  ;;  %v881_v57 = vpop.f32.mrf.mxu2  ;;  %1270 = vmax.xlane.f32.xlu2 %v1269_v2 }
 0x4bb   :  { %5628 = vpow2.f32 %v1280_v8 }
 0x4bc   :  { %5630 = vrcp.f32 %v830_v48  ;;  %v5202_v48 = vld [vmem:[%s8906_s5 + $0xe8] sm:$0xff] }
 0x4bd   :  { %2027 = vmatpush.msra.mxu2 %v5202_v48  ;;  %5632 = vrcp.f32 %v6904_v44 }
 0x4be   :  { %5634 = vrcp.f32 %v6922_v23 }
 0x4bf   :  { %5141 = vmatmul.msk.f32.gmra.mxu2 %vm116_vm2, %v6278_v19 }
 0x4c0   :  { %v6955_v53 = vpop.eup %5626  ;;  %1498 = vmax.xlane.f32.xlu1 %v1497_v20  ;;  %2028 = vmatpush.msra.mxu2 %v5201_v17  ;;  %v1707_v20 = vpop.f32.mrf.mxu0 }
 0x4c1   :  { %v6957_v59 = vpop.eup %5628  ;;  %v1068_v41 = vsel %vm345_vm7, %v6955_v53, 0.0 }
 0x4c2   :  { %v884_v24 = vpop.f32.mrf.mxu2  ;;  %1069 = vadd.xlane.f32.xlu2 %v1068_v41  ;;  %v1290_v1 = vsel %vm345_vm7, %v6957_v59, 0.0  ;;  %v5631_v25 = vpop.eup %5630 }
 0x4c3   :  { %1291 = vadd.xlane.f32.xlu0 %v1290_v1  ;;  %v848_v30 = vmul.f32 %v5631_v25, %v6766_v54  ;;  %v5633_v36 = vpop.eup %5632 }
 0x4c4   :  { %v849_v7 = vmul.f32 %v5633_v36, %v6754_v35  ;;  %v5635_v44 = vpop.eup %5634 }
 0x4c7   :  { %5171 = vmatmul.msk.f32.vlgmr.msrb.gmra.mxu2 %vm116_vm2, %v6221_v38 }
 0x4ca   :  { %v887_v27 = vpop.f32.mrf.mxu2  ;;  %1495 = vmax.xlane.f32.xlu2 %v1494_v52  ;;  %v7032_v52 = vpop.f32.mrf.mxu0 }
 0x4cb   :  { %1501 = vmax.xlane.f32.xlu0 %v1500_v61  ;;  %5040 = vmatpush.msk.msrb.mxu1 %vm73_vm0, %v887_v27 }
 0x4cd   :  { %920 = vmatpush.msrb.mxu1 %v884_v24 }
 0x4cf   :  { %921 = vmatpush.msrb.mxu1 %v881_v57  ;;  %5172 = vmatmul.msk.f32.gmra.mxu2 %vm116_vm2, %v6230_v50 }
 0x4d1   :  { %922 = vmatpush.msrb.mxu1 %v878_v46 }
 0x4d2   :  { %v1106_v60 = vpop.f32.mrf.mxu2 }
 0x4d3   :  { %923 = vmatpush.msrb.mxu1 %v6918_v42  ;;  %v850_v42 = vmul.f32 %v5635_v44, %v6772_v4 }
 0x4d4   :  { %5041 = vmatmul.msk.f32.vlgmr.msrb.gmra.mxu1 %vm345_vm7, %v848_v30 }
 0x4d7   :  { %5173 = vmatmul.msk.f32.gmra.mxu2 %vm116_vm2, %v6239_v58 }
 0x4da   :  { %v1109_v63 = vpop.f32.mrf.mxu2 }
 0x4dc   :  { %5042 = vmatmul.msk.f32.gmra.mxu1 %vm345_vm7, %v849_v7 }
 0x4df   :  { %5174 = vmatmul.msk.f32.gmra.mxu2 %vm116_vm2, %v6250_v62 }
 0x4e2   :  { %v1112_v54 = vpop.f32.mrf.mxu2 }
 0x4e4   :  { %5043 = vmatmul.msk.f32.gmra.mxu1 %vm345_vm7, %v850_v42 }
 0x4e7   :  { %5175 = vmatmul.msk.f32.gmra.mxu2 %vm116_vm2, %v6278_v19  ;;  %v839_v46 = vpop.xlane.xlu1 %838 }
 0x4e8   :  { %5636 = vrcp.f32 %v839_v46 }
 0x4ea   :  { %v1115_v23 = vpop.f32.mrf.mxu2 }
 0x4ee   :  { %v5637_v56 = vpop.eup %5636  ;;  %v842_v35 = vpop.xlane.xlu0 %841 }
 0x4ef   :  { %5205 = vmatmul.msk.f32.vlgmr.msra.gmra.mxu2 %vm116_vm2, %v6221_v38  ;;  %v1265_v47 = vpop.xlane.xlu1 %1264  ;;  %5638 = vrcp.f32 %v842_v35  ;;  %v851_v49 = vmul.f32 %v5637_v56, %v6822_v45 }
 0x4f0   :  { %v1276_v4 = vsub.f32 %v6829_v51, %v1265_v47 }
 0x4f1   :  { %5044 = vmatmul.msk.f32.gmra.mxu1 %vm345_vm7, %v851_v49  ;;  %v7079_v49 = vld [vmem:[%s8903_s2 + $0x18] sm:$0xff] }
 0x4f2   :  { %v1282_v8 = vmul.f32 1.442695, %v1276_v4  ;;  %v1118_v2 = vpop.f32.mrf.mxu2 }
 0x4f3   :  { %5074 = vmatpush.msk.msra.mxu1 %vm73_vm0, %v1118_v2 }
 0x4f4   :  { %5640 = vpow2.f32 %v1282_v8 }
 0x4f5   :  { %v5639_v57 = vpop.eup %5638  ;;  %1151 = vmatpush.msra.mxu1 %v1115_v23 }
 0x4f6   :  { %v1268_v41 = vpop.xlane.xlu0 %1267  ;;  %v852_v24 = vmul.f32 %v5639_v57, %v6842_v13 }
 0x4f7   :  { %1152 = vmatpush.msra.mxu1 %v1112_v54  ;;  %5206 = vmatmul.msk.f32.gmra.mxu2 %vm116_vm2, %v6230_v50  ;;  %v7014_v38 = vpop.xlane.xlu1 %1063  ;;  %v1277_v45 = vsub.f32 %v6854_v3, %v1268_v41  ;;  %v7027_v50 = vld [vmem:[%s8903_s2 + $0x20] sm:$0x3] }
 0x4f8   :  { %v7030_v3 = vadd.f32 %v7027_v50, %v1488_v40 }
 0x4f9   :  { %v1284_v51 = vmul.f32 1.442695, %v1277_v45  ;;  %5045 = vmatmul.msk.f32.gmra.mxu1 %vm345_vm7, %v852_v24 }
 0x4fa   :  { %v7018_v1 = vpop.eup %5640  ;;  %1153 = vmatpush.msra.mxu1 %v1109_v63  ;;  %v1337_v0 = vpop.f32.mrf.mxu2  ;;  %v1503_v30 = vsel %vm358_vm8, %v7030_v3, -inf }
 0x4fb   :  { %5642 = vpow2.f32 %v1284_v51  ;;  %v1293_v29 = vsel %vm345_vm7, %v7018_v1, 0.0  ;;  %v1713_v63 = vpop.f32.mrf.mxu0 }
 0x4fc   :  { %1154 = vmatpush.msra.mxu1 %v1106_v60  ;;  %1294 = vadd.xlane.f32.xlu2 %v1293_v29 }
 0x4fe   :  { %v7022_v13 = vpop.xlane.xlu0 %1066 }
 0x4ff   :  { %5207 = vmatmul.msk.f32.gmra.mxu2 %vm116_vm2, %v6239_v58  ;;  %v1274_v27 = vpop.xlane.xlu1 %1273  ;;  %v7046_v58 = vld [vmem:[%s8903_s2] sm:$0xff] }
 0x500   :  { %v1279_v61 = vsub.f32 %v6871_v33, %v1274_v27  ;;  %v7049_v33 = vadd.f32 %v7046_v58, %v1707_v20 }
 0x501   :  { %v7037_v6 = vpop.eup %5642 }
 0x502   :  { %v1288_v48 = vmul.f32 1.442695, %v1279_v61  ;;  %v1340_v25 = vpop.f32.mrf.mxu2  ;;  %v1296_v17 = vsel %vm345_vm7, %v7037_v6, 0.0  ;;  %v1722_v42 = vsel %vm345_vm7, %v7049_v33, -inf }
 0x503   :  { %1297 = vadd.xlane.f32.xlu1 %v1296_v17  ;;  %v1716_v35 = vpop.f32.mrf.mxu0 }
 0x504   :  { %5644 = vpow2.f32 %v1288_v48  ;;  %1504 = vmax.xlane.f32.xlu2 %v1503_v30  ;;  %v7082_v4 = vadd.f32 %v7079_v49, %v1716_v35 }
 0x506   :  { %v1493_v60 = vpop.xlane.xlu0 %1492  ;;  %v1731_v8 = vsel %vm345_vm7, %v7082_v4, -inf }
 0x507   :  { %5208 = vmatmul.msk.f32.gmra.mxu2 %vm116_vm2, %v6250_v62  ;;  %v1506_v36 = vsub.f32 %v6882_v39, %v1493_v60  ;;  %v7063_v62 = vld [vmem:[%s8903_s2 + $0x10] sm:$0xff] }
 0x508   :  { %v7066_v39 = vadd.f32 %v7063_v62, %v1713_v63 }
 0x509   :  { %v1511_v7 = vmul.f32 1.442695, %v1506_v36 }
 0x50a   :  { %v7054_v44 = vpop.eup %5644  ;;  %v1343_v54 = vpop.f32.mrf.mxu2  ;;  %v1728_v47 = vsel %vm345_vm7, %v7066_v39, -inf }
 0x50b   :  { %5646 = vpow2.f32 %v1511_v7  ;;  %v1302_v46 = vsel %vm358_vm8, %v7054_v44, 0.0  ;;  %1723 = vmax.xlane.f32.xlu1 %v1722_v42 }
 0x50c   :  { %1303 = vadd.xlane.f32.xlu2 %v1302_v46 }
 0x50f   :  { %5209 = vmatmul.msk.f32.gmra.mxu2 %vm116_vm2, %v6278_v19 }
 0x511   :  { %v7070_v23 = vpop.eup %5646 }
 0x512   :  { %v1346_v40 = vpop.f32.mrf.mxu2  ;;  %v1521_v56 = vsel %vm345_vm7, %v7070_v23, 0.0 }
 0x513   :  { %1522 = vadd.xlane.f32.xlu1 %v1521_v56 }
 0x514   :  { %1729 = vmax.xlane.f32.xlu2 %v1728_v47 }
 0x51a   :  { %v1349_v19 = vpop.f32.mrf.mxu2 }
 0x51b   :  { %5108 = vmatpush.msk.msrb.mxu1 %vm73_vm0, %v1349_v19  ;;  %1732 = vmax.xlane.f32.xlu1 %v1731_v8 }
 0x51d   :  { %1382 = vmatpush.msrb.mxu1 %v1346_v40 }
 0x51f   :  { %1383 = vmatpush.msrb.mxu1 %v1343_v54 }
 0x521   :  { %1384 = vmatpush.msrb.mxu1 %v1340_v25 }
 0x522   :  { %v7087_v2 = vpop.f32.mrf.mxu2 }
 0x523   :  { %1385 = vmatpush.msrb.mxu1 %v1337_v0 }
 0x525   :  { %v1061_v57 = vpop.xlane.xlu2 %1060 }
 0x526   :  { %5648 = vrcp.f32 %v1061_v57 }
 0x527   :  { %5650 = vrcp.f32 %v7014_v38  ;;  %v1719_v38 = vpop.f32.mrf.mxu0 }
 0x52a   :  { %v1571_v20 = vpop.f32.mrf.mxu2 }
 0x52b   :  { %v1073_v41 = vpop.xlane.xlu1 %1072 }
 0x52c   :  { %v5649_v24 = vpop.eup %5648 }
 0x52d   :  { %v1079_v45 = vmul.f32 %v5649_v24, %v6928_v28  ;;  %v1271_v51 = vpop.xlane.xlu2 %1270  ;;  %v5651_v61 = vpop.eup %5650 }
 0x52e   :  { %v1278_v29 = vsub.f32 %v6934_v31, %v1271_v51  ;;  %v1080_v30 = vmul.f32 %v5651_v61, %v6862_v55  ;;  %v7135_v61 = vadd.f32 %v7027_v50, %v1719_v38 }
 0x52f   :  { %5075 = vmatmul.msk.f32.vlgmr.msra.gmra.mxu1 %vm345_vm7, %v1079_v45  ;;  %v1938_v47 = vpop.f32.mrf.mxu0 }
 0x530   :  { %v1286_v27 = vmul.f32 1.442695, %v1278_v29 }
 0x532   :  { %5652 = vpow2.f32 %v1286_v27  ;;  %v1574_v48 = vpop.f32.mrf.mxu2 }
 0x533   :  { %v1499_v25 = vpop.xlane.xlu1 %1498  ;;  %5654 = vrcp.f32 %v7022_v13 }
 0x534   :  { %v1508_v0 = vsub.f32 %v6949_v15, %v1499_v25  ;;  %v5964_v15 = vld [vmem:[%s8903_s2 + $0x8] sm:$0xff] }
 0x535   :  { %v1070_v17 = vpop.xlane.xlu2 %1069  ;;  %v7105_v55 = vadd.f32 %v5964_v15, %v7032_v52 }
 0x536   :  { %v1515_v60 = vmul.f32 1.442695, %v1508_v0  ;;  %v1292_v28 = vpop.xlane.xlu0 %1291 }
 0x537   :  { %5076 = vmatmul.msk.f32.gmra.mxu1 %vm345_vm7, %v1080_v30  ;;  %v1725_v8 = vsel %vm345_vm7, %v7105_v55, -inf  ;;  %v1941_v27 = vpop.f32.mrf.mxu0 }
 0x538   :  { %v7097_v31 = vpop.eup %5652  ;;  %5656 = vpow2.f32 %v1515_v60  ;;  %v7138_v25 = vadd.f32 %v5964_v15, %v1941_v27 }
 0x539   :  { %v1299_v36 = vsel %vm345_vm7, %v7097_v31, 0.0  ;;  %v5655_v63 = vpop.eup %5654  ;;  %5658 = vrcp.f32 %v1070_v17 }
 0x53a   :  { %v1577_v7 = vpop.f32.mrf.mxu2  ;;  %1300 = vadd.xlane.f32.xlu0 %v1299_v36  ;;  %v1081_v54 = vmul.f32 %v5655_v63, %v6875_v21  ;;  %v1956_v30 = vsel %vm345_vm7, %v7138_v25, -inf }
 0x53d   :  { %v1496_v13 = vpop.xlane.xlu2 %1495 }
 0x53e   :  { %v7108_v42 = vpop.eup %5656  ;;  %v1502_v46 = vpop.xlane.xlu0 %1501  ;;  %v1507_v40 = vsub.f32 %v6964_v9, %v1496_v13  ;;  %v7118_v9 = vadd.f32 %v7046_v58, %v1938_v47 }
 0x53f   :  { %v1509_v56 = vsub.f32 %v6967_v10, %v1502_v46  ;;  %5077 = vmatmul.msk.f32.gmra.mxu1 %vm345_vm7, %v1081_v54  ;;  %v1527_v35 = vsel %vm345_vm7, %v7108_v42, 0.0  ;;  %v5659_v21 = vpop.eup %5658  ;;  %v1944_v47 = vpop.f32.mrf.mxu0 }
 0x540   :  { %v1513_v19 = vmul.f32 1.442695, %v1507_v40  ;;  %1528 = vadd.xlane.f32.xlu2 %v1527_v35  ;;  %v1082_v10 = vmul.f32 %v5659_v21, %v6955_v53  ;;  %v1953_v24 = vsel %vm345_vm7, %v7118_v9, -inf }
 0x541   :  { %v1517_v52 = vmul.f32 1.442695, %v1509_v56 }
 0x542   :  { %5660 = vpow2.f32 %v1513_v19  ;;  %v1580_v57 = vpop.f32.mrf.mxu2  ;;  %1726 = vmax.xlane.f32.xlu0 %v1725_v8  ;;  %v7159_v8 = vadd.f32 %v7063_v62, %v1944_v47 }
 0x543   :  { %5662 = vpow2.f32 %v1517_v52  ;;  %5142 = vmatpush.msk.msra.mxu1 %vm73_vm0, %v1580_v57 }
 0x544   :  { %5664 = vrcp.f32 %v1073_v41 }
 0x545   :  { %1613 = vmatpush.msra.mxu1 %v1577_v7  ;;  %5666 = vrcp.f32 %v1292_v28 }
 0x547   :  { %5078 = vmatmul.msk.f32.gmra.mxu1 %vm345_vm7, %v1082_v10 }
 0x548   :  { %v7125_v45 = vpop.eup %5660  ;;  %1614 = vmatpush.msra.mxu1 %v1574_v48  ;;  %1954 = vmax.xlane.f32.xlu2 %v1953_v24  ;;  %v1947_v24 = vpop.f32.mrf.mxu0 }
 0x549   :  { %v7127_v51 = vpop.eup %5662  ;;  %v1524_v58 = vsel %vm345_vm7, %v7125_v45, 0.0 }
 0x54a   :  { %v5665_v29 = vpop.eup %5664  ;;  %1615 = vmatpush.msra.mxu1 %v1571_v20  ;;  %v1799_v41 = vpop.f32.mrf.mxu2  ;;  %v1530_v53 = vsel %vm345_vm7, %v7127_v51, 0.0  ;;  %1525 = vadd.xlane.f32.xlu0 %v1524_v58  ;;  %v1734_v20 = vsel %vm358_vm8, %v7135_v61, -inf  ;;  %v1959_v58 = vsel %vm345_vm7, %v7159_v8, -inf }
 0x54b   :  { %1531 = vadd.xlane.f32.xlu1 %v1530_v53  ;;  %v1083_v48 = vmul.f32 %v5665_v29, %v6937_v37  ;;  %v5667_v0 = vpop.eup %5666  ;;  %v7169_v29 = vadd.f32 %v7079_v49, %v1947_v24 }
 0x54c   :  { %1616 = vmatpush.msra.mxu1 %v7087_v2  ;;  %v1310_v2 = vmul.f32 %v5667_v0, %v6957_v59 }
 0x54d   :  { %v1962_v27 = vsel %vm345_vm7, %v7169_v29, -inf }
 0x54f   :  { %5079 = vmatmul.msk.f32.gmra.mxu1 %vm345_vm7, %v1083_v48 }
 0x552   :  { %v1802_v17 = vpop.f32.mrf.mxu2  ;;  %1735 = vmax.xlane.f32.xlu0 %v1734_v20 }
 0x553   :  { %1957 = vmax.xlane.f32.xlu1 %v1956_v30 }
 0x557   :  { %5109 = vmatmul.msk.f32.vlgmr.msrb.gmra.mxu1 %vm345_vm7, %v1310_v2 }
 0x55a   :  { %v1805_v38 = vpop.f32.mrf.mxu2 }
 0x562   :  { %v1808_v37 = vpop.f32.mrf.mxu2 }
 0x56a   :  { %v1811_v60 = vpop.f32.mrf.mxu2 }
 0x56b   :  { %5176 = vmatpush.msk.msrb.mxu1 %vm73_vm0, %v1811_v60 }
 0x56d   :  { %1844 = vmatpush.msrb.mxu1 %v1808_v37 }
 0x56f   :  { %1845 = vmatpush.msrb.mxu1 %v1805_v38  ;;  %v1295_v28 = vpop.xlane.xlu2 %1294 }
 0x570   :  { %5668 = vrcp.f32 %v1295_v28 }
 0x571   :  { %1846 = vmatpush.msrb.mxu1 %v1802_v17 }
 0x572   :  { %v2030_v0 = vpop.f32.mrf.mxu2 }
 0x573   :  { %1847 = vmatpush.msrb.mxu1 %v1799_v41 }
 0x576   :  { %v5669_v36 = vpop.eup %5668  ;;  %v1298_v63 = vpop.xlane.xlu1 %1297 }
 0x577   :  { %5670 = vrcp.f32 %v1298_v63  ;;  %v1505_v7 = vpop.xlane.xlu2 %1504  ;;  %v1311_v15 = vmul.f32 %v5669_v36, %v7018_v1 }
 0x578   :  { %v1510_v59 = vsub.f32 %v7030_v3, %v1505_v7 }
 0x579   :  { %5110 = vmatmul.msk.f32.gmra.mxu1 %vm345_vm7, %v1311_v15 }
 0x57a   :  { %v1519_v13 = vmul.f32 1.442695, %v1510_v59 }
 0x57c   :  { %5672 = vpow2.f32 %v1519_v13 }
 0x57d   :  { %v5671_v54 = vpop.eup %5670 }
 0x57e   :  { %v1724_v46 = vpop.xlane.xlu1 %1723  ;;  %v1312_v40 = vmul.f32 %v5671_v54, %v7037_v6 }
 0x57f   :  { %v1737_v56 = vsub.f32 %v7049_v33, %v1724_v46  ;;  %v1304_v35 = vpop.xlane.xlu2 %1303 }
 0x581   :  { %v1742_v19 = vmul.f32 1.442695, %v1737_v56  ;;  %5111 = vmatmul.msk.f32.gmra.mxu1 %vm345_vm7, %v1312_v40  ;;  %v1950_v56 = vpop.f32.mrf.mxu0 }
 0x582   :  { %v7154_v52 = vpop.eup %5672  ;;  %v7193_v47 = vadd.f32 %v7027_v50, %v1950_v56 }
 0x583   :  { %5674 = vpow2.f32 %v1742_v19  ;;  %v1533_v1 = vsel %vm358_vm8, %v7154_v52, 0.0 }
 0x584   :  { %1534 = vadd.xlane.f32.xlu0 %v1533_v1  ;;  %v1965_v50 = vsel %vm358_vm8, %v7193_v47, -inf }
 0x586   :  { %v1523_v3 = vpop.xlane.xlu1 %1522 }
 0x587   :  { %v1730_v21 = vpop.xlane.xlu2 %1729 }
 0x588   :  { %v1739_v6 = vsub.f32 %v7066_v39, %v1730_v21 }
 0x589   :  { %v7162_v33 = vpop.eup %5674 }
 0x58a   :  { %v1746_v57 = vmul.f32 1.442695, %v1739_v6  ;;  %v1752_v10 = vsel %vm345_vm7, %v7162_v33, 0.0  ;;  %v7199_v6 = vpop.f32.mrf.mxu1 }
 0x58b   :  { %1753 = vadd.xlane.f32.xlu2 %v1752_v10 }
 0x58c   :  { %5676 = vpow2.f32 %v1746_v57  ;;  %1960 = vmax.xlane.f32.xlu0 %v1959_v58 }
 0x58e   :  { %v1733_v62 = vpop.xlane.xlu1 %1732 }
 0x58f   :  { %v1740_v41 = vsub.f32 %v7082_v4, %v1733_v62  ;;  %v2033_v4 = vpop.f32.mrf.mxu2 }
 0x591   :  { %v1748_v39 = vmul.f32 1.442695, %v1740_v41 }
 0x592   :  { %v7172_v53 = vpop.eup %5676 }
 0x593   :  { %5678 = vpow2.f32 %v1748_v39  ;;  %1963 = vmax.xlane.f32.xlu2 %v1962_v27  ;;  %v1758_v48 = vsel %vm345_vm7, %v7172_v53, 0.0  ;;  %v7216_v27 = vpop.f32.mrf.mxu1 }
 0x594   :  { %1759 = vadd.xlane.f32.xlu0 %v1758_v48 }
 0x597   :  { %v2036_v30 = vpop.f32.mrf.mxu2 }
 0x599   :  { %v7178_v20 = vpop.eup %5678 }
 0x59a   :  { %v1761_v49 = vsel %vm345_vm7, %v7178_v20, 0.0 }
 0x59b   :  { %1762 = vadd.xlane.f32.xlu2 %v1761_v49 }
 0x59f   :  { %v2039_v7 = vpop.f32.mrf.mxu2 }
 0x5a7   :  { %v2042_v21 = vpop.f32.mrf.mxu2 }
 0x5ad   :  { %v1301_v17 = vpop.xlane.xlu0 %1300 }
 0x5ae   :  { %5680 = vrcp.f32 %v1301_v17 }
 0x5af   :  { %5682 = vrcp.f32 %v1304_v35 }
 0x5b3   :  { %v1529_v2 = vpop.xlane.xlu2 %1528 }
 0x5b4   :  { %v5681_v38 = vpop.eup %5680 }
 0x5b5   :  { %v1727_v37 = vpop.xlane.xlu0 %1726  ;;  %v1313_v60 = vmul.f32 %v5681_v38, %v7097_v31  ;;  %v5683_v63 = vpop.eup %5682 }
 0x5b6   :  { %v1738_v28 = vsub.f32 %v7105_v55, %v1727_v37  ;;  %v1314_v13 = vmul.f32 %v5683_v63, %v7054_v44 }
 0x5b7   :  { %5112 = vmatmul.msk.f32.gmra.mxu1 %vm345_vm7, %v1313_v60 }
 0x5b8   :  { %v1744_v36 = vmul.f32 1.442695, %v1738_v28 }
 0x5ba   :  { %5684 = vpow2.f32 %v1744_v36 }
 0x5bb   :  { %5686 = vrcp.f32 %v1523_v3  ;;  %v1955_v15 = vpop.xlane.xlu2 %1954 }
 0x5bc   :  { %v1968_v31 = vsub.f32 %v7118_v9, %v1955_v15 }
 0x5bd   :  { %v1526_v59 = vpop.xlane.xlu0 %1525 }
 0x5be   :  { %v1532_v54 = vpop.xlane.xlu1 %1531  ;;  %v1973_v35 = vmul.f32 1.442695, %v1968_v31  ;;  %5688 = vrcp.f32 %v1526_v59 }
 0x5bf   :  { %5113 = vmatmul.msk.f32.gmra.mxu1 %vm345_vm7, %v1314_v13 }
 0x5c0   :  { %v7187_v46 = vpop.eup %5684  ;;  %5690 = vpow2.f32 %v1973_v35 }
 0x5c1   :  { %v1755_v55 = vsel %vm345_vm7, %v7187_v46, 0.0  ;;  %v5687_v40 = vpop.eup %5686 }
 0x5c2   :  { %1756 = vadd.xlane.f32.xlu1 %v1755_v55  ;;  %v1541_v44 = vmul.f32 %v5687_v40, %v7070_v23 }
 0x5c4   :  { %v5689_v23 = vpop.eup %5688 }
 0x5c5   :  { %v1736_v19 = vpop.xlane.xlu0 %1735 }
 0x5c6   :  { %v1958_v1 = vpop.xlane.xlu1 %1957  ;;  %v1741_v3 = vsub.f32 %v7135_v61, %v1736_v19  ;;  %v1542_v61 = vmul.f32 %v5689_v23, %v7125_v45 }
 0x5c7   :  { %v1969_v9 = vsub.f32 %v7138_v25, %v1958_v1  ;;  %5143 = vmatmul.msk.f32.vlgmr.msra.gmra.mxu1 %vm345_vm7, %v1541_v44  ;;  %v7205_v25 = vpop.eup %5690 }
 0x5c8   :  { %v1750_v57 = vmul.f32 1.442695, %v1741_v3  ;;  %5210 = vmatpush.msk.msra.mxu1 %vm73_vm0, %v2042_v21  ;;  %v1983_v41 = vsel %vm345_vm7, %v7205_v25, 0.0 }
 0x5c9   :  { %v1975_v10 = vmul.f32 1.442695, %v1969_v9 }
 0x5ca   :  { %5692 = vpow2.f32 %v1750_v57  ;;  %2075 = vmatpush.msra.mxu1 %v2039_v7  ;;  %1966 = vmax.xlane.f32.xlu1 %v1965_v50 }
 0x5cb   :  { %5694 = vpow2.f32 %v1975_v10 }
 0x5cc   :  { %5696 = vrcp.f32 %v1529_v2  ;;  %2076 = vmatpush.msra.mxu1 %v2036_v30 }
 0x5cd   :  { %5698 = vrcp.f32 %v1532_v54 }
 0x5ce   :  { %2077 = vmatpush.msra.mxu1 %v2033_v4 }
 0x5cf   :  { %5144 = vmatmul.msk.f32.gmra.mxu1 %vm345_vm7, %v1542_v61 }
 0x5d0   :  { %v7208_v24 = vpop.eup %5692  ;;  %2078 = vmatpush.msra.mxu1 %v2030_v0  ;;  %v7222_v0 = vpop.f32.mrf.mxu1 }
 0x5d1   :  { %v7210_v58 = vpop.eup %5694  ;;  %v1764_v62 = vsel %vm358_vm8, %v7208_v24, 0.0 }
 0x5d2   :  { %v5697_v39 = vpop.eup %5696  ;;  %v1986_v45 = vsel %vm345_vm7, %v7210_v58, 0.0  ;;  %1765 = vadd.xlane.f32.xlu0 %v1764_v62  ;;  %1984 = vadd.xlane.f32.xlu1 %v1983_v41 }
 0x5d3   :  { %1987 = vadd.xlane.f32.xlu2 %v1986_v45  ;;  %v1543_v48 = vmul.f32 %v5697_v39, %v7108_v42  ;;  %v5699_v49 = vpop.eup %5698 }
 0x5d4   :  { %v1544_v4 = vmul.f32 %v5699_v49, %v7127_v51 }
 0x5d7   :  { %5145 = vmatmul.msk.f32.gmra.mxu1 %vm345_vm7, %v1543_v48 }
 0x5d8   :  { %v7226_v17 = vpop.f32.mrf.mxu1 }
 0x5df   :  { %5146 = vmatmul.msk.f32.gmra.mxu1 %vm345_vm7, %v1544_v4 }
 0x5e0   :  { %v7228_v30 = vpop.f32.mrf.mxu1 }
 0x5e8   :  { %v7230_v2 = vpop.f32.mrf.mxu1 }
 0x5f0   :  { %v7233_v36 = vpop.f32.mrf.mxu1 }
 0x5f7   :  { %v1535_v38 = vpop.xlane.xlu0 %1534 }
 0x5f8   :  { %5700 = vrcp.f32 %v1535_v38 }
 0x5fe   :  { %v5701_v37 = vpop.eup %5700  ;;  %v1754_v60 = vpop.xlane.xlu2 %1753 }
 0x5ff   :  { %v1961_v42 = vpop.xlane.xlu0 %1960  ;;  %5702 = vrcp.f32 %v1754_v60  ;;  %v1545_v28 = vmul.f32 %v5701_v37, %v7154_v52  ;;  %v7242_v52 = vpop.f32.mrf.mxu1 }
 0x600   :  { %v1970_v51 = vsub.f32 %v7159_v8, %v1961_v42 }
 0x601   :  { %5147 = vmatmul.msk.f32.gmra.mxu1 %vm345_vm7, %v1545_v28 }
 0x602   :  { %v1977_v63 = vmul.f32 1.442695, %v1970_v51 }
 0x604   :  { %5704 = vpow2.f32 %v1977_v63 }
 0x605   :  { %v5703_v7 = vpop.eup %5702 }
 0x606   :  { %v1772_v15 = vmul.f32 %v5703_v7, %v7162_v33  ;;  %v1964_v59 = vpop.xlane.xlu2 %1963 }
 0x607   :  { %v1971_v13 = vsub.f32 %v7169_v29, %v1964_v59  ;;  %v7246_v40 = vpop.f32.mrf.mxu1  ;;  %v1760_v1 = vpop.xlane.xlu0 %1759 }
 0x609   :  { %v1979_v54 = vmul.f32 1.442695, %v1971_v13  ;;  %5177 = vmatmul.msk.f32.vlgmr.msrb.gmra.mxu1 %vm345_vm7, %v1772_v15 }
 0x60a   :  { %v7240_v31 = vpop.eup %5704 }
 0x60b   :  { %5706 = vpow2.f32 %v1979_v54  ;;  %v1989_v8 = vsel %vm345_vm7, %v7240_v31, 0.0 }
 0x60c   :  { %1990 = vadd.xlane.f32.xlu0 %v1989_v8 }
 0x60e   :  { %v1763_v50 = vpop.xlane.xlu2 %1762 }
 0x60f   :  { %v7249_v56 = vpop.f32.mrf.mxu1 }
 0x611   :  { %v5707_v55 = vpop.eup %5706 }
 0x612   :  { %v1992_v33 = vsel %vm345_vm7, %v5707_v55, 0.0 }
 0x613   :  { %1993 = vadd.xlane.f32.xlu1 %v1992_v33 }
 0x617   :  { %v7251_v29 = vpop.f32.mrf.mxu1 }
 0x61f   :  { %v7253_v35 = vpop.f32.mrf.mxu1 }
 0x627   :  { %v7255_v19 = vpop.f32.mrf.mxu1 }
 0x62f   :  { %v7260_v61 = vpop.f32.mrf.mxu1 }
 0x635   :  { %v1757_v44 = vpop.xlane.xlu1 %1756 }
 0x636   :  { %5708 = vrcp.f32 %v1757_v44 }
 0x637   :  { %5710 = vrcp.f32 %v1760_v1 }
 0x63c   :  { %v5709_v3 = vpop.eup %5708 }
 0x63d   :  { %v1967_v21 = vpop.xlane.xlu1 %1966  ;;  %v1773_v9 = vmul.f32 %v5709_v3, %v7187_v46  ;;  %v5711_v23 = vpop.eup %5710 }
 0x63e   :  { %v1972_v57 = vsub.f32 %v7193_v47, %v1967_v21  ;;  %v1774_v62 = vmul.f32 %v5711_v23, %v7172_v53  ;;  %v7265_v47 = vpop.f32.mrf.mxu1 }
 0x63f   :  { %5178 = vmatmul.msk.f32.gmra.mxu1 %vm345_vm7, %v1773_v9 }
 0x640   :  { %v1981_v10 = vmul.f32 1.442695, %v1972_v57 }
 0x642   :  { %5712 = vpow2.f32 %v1981_v10 }
 0x643   :  { %5714 = vrcp.f32 %v1763_v50 }
 0x645   :  { %v1766_v39 = vpop.xlane.xlu0 %1765  ;;  %v1985_v49 = vpop.xlane.xlu1 %1984 }
 0x646   :  { %5716 = vrcp.f32 %v1766_v39  ;;  %v1387_v38 = vpop.f32.mrf.mxu1  ;;  %v1988_v37 = vpop.xlane.xlu2 %1987 }
 0x647   :  { %5179 = vmatmul.msk.f32.gmra.mxu1 %vm345_vm7, %v1774_v62  ;;  %5718 = vrcp.f32 %v1985_v49  ;;  %v700_v62 = vadd.f32 %v7199_v6, %v6851_v11  ;;  %v5541_v11 = vld [vmem:[%s8907_s6 + $0x2] ss:$0 sm:$0xff] }
 0x648   :  { %v5713_v41 = vpop.eup %5712  ;;  %5720 = vrcp.f32 %v1988_v37 }
 0x649   :  { %v1995_v45 = vsel %vm358_vm8, %v5713_v41, 0.0  ;;  %v5715_v46 = vpop.eup %5714 }
 0x64a   :  { %1996 = vadd.xlane.f32.xlu2 %v1995_v45  ;;  %v1775_v48 = vmul.f32 %v5715_v46, %v7178_v20 }
 0x64c   :  { %v5717_v4 = vpop.eup %5716 }
 0x64d   :  { %v1776_v53 = vmul.f32 %v5717_v4, %v7208_v24  ;;  %v5719_v60 = vpop.eup %5718 }
 0x64e   :  { %v2003_v42 = vmul.f32 %v5719_v60, %v7205_v25  ;;  %v1390_v28 = vpop.f32.mrf.mxu1  ;;  %v5721_v51 = vpop.eup %5720 }
 0x64f   :  { %5180 = vmatmul.msk.f32.gmra.mxu1 %vm345_vm7, %v1775_v48  ;;  %v2004_v20 = vmul.f32 %v5721_v51, %v7210_v58  ;;  %v703_v48 = vadd.f32 %v7216_v27, %v6868_v32 }
 0x651   :  { %v941_v4 = vadd.f32 %v7233_v36, %v703_v48 }
 0x653   :  { %v1172_v37 = vadd.f32 %v7253_v35, %v941_v4 }
 0x655   :  { %v1403_v6 = vadd.f32 %v1390_v28, %v1172_v37 }
 0x656   :  { %v1393_v63 = vpop.f32.mrf.mxu1 }
 0x657   :  { %5181 = vmatmul.msk.f32.gmra.mxu1 %vm345_vm7, %v1776_v53 }
 0x65e   :  { %v7275_v7 = vpop.f32.mrf.mxu1 }
 0x65f   :  { %5211 = vmatmul.msk.f32.vlgmr.msra.gmra.mxu1 %vm345_vm7, %v2003_v42 }
 0x666   :  { %v7277_v24 = vpop.f32.mrf.mxu1 }
 0x667   :  { %5212 = vmatmul.msk.f32.gmra.mxu1 %vm345_vm7, %v2004_v20 }
 0x66e   :  { %v1618_v59 = vpop.f32.mrf.mxu1 }
 0x676   :  { %v1621_v33 = vpop.f32.mrf.mxu1 }
 0x67e   :  { %v1624_v44 = vpop.f32.mrf.mxu1 }
 0x67f   :  { %v1991_v15 = vpop.xlane.xlu0 %1990 }
 0x680   :  { %5722 = vrcp.f32 %v1991_v15 }
 0x686   :  { %v5723_v13 = vpop.eup %5722  ;;  %v1994_v54 = vpop.xlane.xlu1 %1993 }
 0x687   :  { %5724 = vrcp.f32 %v1994_v54  ;;  %v2005_v25 = vmul.f32 %v5723_v13, %v7240_v31  ;;  %v1627_v1 = vpop.f32.mrf.mxu1  ;;  %v709_v13 = vadd.f32 %v7226_v17, %v6892_v22 }
 0x689   :  { %5213 = vmatmul.msk.f32.gmra.mxu1 %vm345_vm7, %v2005_v25 }
 0x68d   :  { %v5725_v8 = vpop.eup %5724 }
 0x68e   :  { %v2006_v58 = vmul.f32 %v5725_v8, %v5707_v55  ;;  %v940_v55 = vadd.f32 %v7230_v2, %v700_v62 }
 0x68f   :  { %v7282_v3 = vpop.f32.mrf.mxu1 }
 0x690   :  { %v1171_v45 = vadd.f32 %v7251_v29, %v940_v55  ;;  %v1634_v29 = vadd.f32 %v1621_v33, %v1403_v6 }
 0x691   :  { %5214 = vmatmul.msk.f32.gmra.mxu1 %vm345_vm7, %v2006_v58 }
 0x692   :  { %v1402_v46 = vadd.f32 %v1387_v38, %v1171_v45 }
 0x694   :  { %v1633_v49 = vadd.f32 %v1618_v59, %v1402_v46 }
 0x697   :  { %v1849_v21 = vpop.f32.mrf.mxu1 }
 0x698   :  { %v1864_v53 = vadd.f32 %v1849_v21, %v1633_v49 }
 0x6bc   :  { %v1852_v9 = vpop.f32.mrf.mxu1 }
 0x6bd   :  { %v1997_v57 = vpop.xlane.xlu2 %1996  ;;  %v1865_v42 = vadd.f32 %v1852_v9, %v1634_v29 }
 0x6be   :  { %5726 = vrcp.f32 %v1997_v57 }
 0x6c4   :  { %v5727_v10 = vpop.eup %5726  ;;  %v1855_v50 = vpop.f32.mrf.mxu1 }
 0x6c5   :  { %v2007_v23 = vmul.f32 %v5727_v10, %v5713_v41 }
 0x6c7   :  { %5215 = vmatmul.msk.f32.gmra.mxu1 %vm345_vm7, %v2007_v23 }
 0x6cc   :  { %v1858_v31 = vpop.f32.mrf.mxu1 }
 0x6d4   :  { %v1861_v39 = vpop.f32.mrf.mxu1 }
 0x6dc   :  { %v2080_v41 = vpop.f32.mrf.mxu1 }
 0x6dd   :  { %v2095_v60 = vadd.f32 %v2080_v41, %v1864_v53 }
 0x6df   :  { %v2100_v2 = vadd.f32 %v2095_v60, %v6111_v12  ;;  %v706_v12 = vadd.f32 %v7222_v0, %v6886_v5 }
 0x6e1   :  { %v7297_v38 = vadd.f32 %v5541_v11, %v2100_v2  ;;  %v942_v28 = vadd.f32 %v7242_v52, %v706_v12  ;;  %v2236_v12 = vld [vmem:[%s8909_s8] sm:$0xff] }
 0x6e3   :  { %v2114_v32 = vsel %vm116_vm2, %v7297_v38, 0.0  ;;  %v1173_v15 = vadd.f32 %v7255_v19, %v942_v28 }
 0x6e4   :  { %2115 = vadd.xlane.f32.xlu0 %v2114_v32  ;;  %v2083_v27 = vpop.f32.mrf.mxu1 }
 0x6e5   :  { %v2096_v36 = vadd.f32 %v2083_v27, %v1865_v42  ;;  %v1404_v59 = vadd.f32 %v1393_v63, %v1173_v15 }
 0x6e7   :  { %v2101_v35 = vadd.f32 %v2096_v36, %v6115_v14  ;;  %v1635_v54 = vadd.f32 %v1624_v44, %v1404_v59  ;;  %v943_v14 = vadd.f32 %v7246_v40, %v709_v13  ;;  %v2239_v36 = vld [vmem:[%s8909_s8 + $0x18] sm:$0xff] }
 0x6e8   :  { %2271 = vmatpush.msrb.mxu3 %v2239_v36 }
 0x6e9   :  { %v7302_v51 = vadd.f32 %v5541_v11, %v2101_v35  ;;  %v1866_v25 = vadd.f32 %v1855_v50, %v1635_v54  ;;  %v1174_v33 = vadd.f32 %v7260_v61, %v943_v14  ;;  %v2238_v35 = vld [vmem:[%s8909_s8 + $0x10] sm:$0xff] }
 0x6ea   :  { %2272 = vmatpush.msrb.mxu3 %v2238_v35 }
 0x6eb   :  { %v2117_v20 = vsel %vm116_vm2, %v7302_v51, 0.0  ;;  %v1405_v21 = vadd.f32 %v7275_v7, %v1174_v33 }
 0x6ec   :  { %2118 = vadd.xlane.f32.xlu1 %v2117_v20  ;;  %v2237_v20 = vld [vmem:[%s8909_s8 + $0x8] sm:$0xff] }
 0x6ed   :  { %v1636_v0 = vadd.f32 %v1627_v1, %v1405_v21  ;;  %2273 = vmatpush.msrb.mxu3 %v2237_v20 }
 0x6ef   :  { %v1867_v19 = vadd.f32 %v1858_v31, %v1636_v0  ;;  %2274 = vmatpush.msrb.mxu3 %v2236_v12 }
 0x706   :  { %v2086_v8 = vpop.f32.mrf.mxu1 }
 0x707   :  { %v2097_v58 = vadd.f32 %v2086_v8, %v1866_v25 }
 0x709   :  { %v2102_v5 = vadd.f32 %v2097_v58, %v6119_v16  ;;  %v712_v16 = vadd.f32 %v7228_v30, %v6899_v43 }
 0x70b   :  { %v7316_v52 = vadd.f32 %v5541_v11, %v2102_v5  ;;  %v944_v7 = vadd.f32 %v7249_v56, %v712_v16 }
 0x70d   :  { %v2120_v63 = vsel %vm116_vm2, %v7316_v52, 0.0  ;;  %v1175_v1 = vadd.f32 %v7265_v47, %v944_v7 }
 0x70e   :  { %2121 = vadd.xlane.f32.xlu2 %v2120_v63  ;;  %v2089_v22 = vpop.f32.mrf.mxu1  ;;  %v7384_v63 = vld [vmem:[%s8907_s6 + $0x3] ss:$0 sm:$0xff] }
 0x70f   :  { %v2098_v17 = vadd.f32 %v2089_v22, %v1867_v19  ;;  %v1406_v9 = vadd.f32 %v7277_v24, %v1175_v1 }
 0x711   :  { %v2103_v40 = vadd.f32 %v2098_v17, %v6123_v18  ;;  %v1637_v57 = vadd.f32 %v7282_v3, %v1406_v9 }
 0x713   :  { %v7321_v44 = vadd.f32 %v5541_v11, %v2103_v40  ;;  %v1868_v10 = vadd.f32 %v1861_v39, %v1637_v57  ;;  %v7389_v40 = vld [vmem:[%s8907_s6 + $0x4] ss:$0 sm:$0xff] }
 0x715   :  { %v2123_v61 = vsel %vm116_vm2, %v7321_v44, 0.0 }
 0x716   :  { %2124 = vadd.xlane.f32.xlu0 %v2123_v61 }
 0x744   :  { %v2092_v50 = vpop.f32.mrf.mxu1 }
 0x745   :  { %v2099_v18 = vadd.f32 %v2092_v50, %v1868_v10 }
 0x747   :  { %v2104_v23 = vadd.f32 %v2099_v18, %v6137_v34 }
 0x749   :  { %v7332_v31 = vadd.f32 %v5541_v11, %v2104_v23 }
 0x74b   :  { %v2126_v62 = vsel %vm129_vm4, %v7332_v31, 0.0 }
 0x74c   :  { %2127 = vadd.xlane.f32.xlu1 %v2126_v62 }
 0x757   :  { %v2116_v43 = vpop.xlane.xlu0 %2115 }
 0x758   :  { %v2129_v30 = vmul.f32 %v2116_v43, %v6127_v26 }
 0x75a   :  { %v2134_v56 = vsub.f32 %v7297_v38, %v2129_v30 }
 0x75c   :  { %v2139_v47 = vmul.f32 %v2134_v56, %v2134_v56 }
 0x75e   :  { %v2144_v24 = vsel %vm116_vm2, %v2139_v47, 0.0 }
 0x75f   :  { %v2119_v3 = vpop.xlane.xlu1 %2118  ;;  %2145 = vadd.xlane.f32.xlu2 %v2144_v24 }
 0x760   :  { %v2130_v55 = vmul.f32 %v2119_v3, %v6127_v26 }
 0x762   :  { %v7341_v34 = vsub.f32 %v7302_v51, %v2130_v55 }
 0x764   :  { %v2140_v39 = vmul.f32 %v7341_v34, %v7341_v34 }
 0x766   :  { %v2147_v45 = vsel %vm116_vm2, %v2140_v39, 0.0 }
 0x767   :  { %2148 = vadd.xlane.f32.xlu0 %v2147_v45 }
 0x781   :  { %v2122_v46 = vpop.xlane.xlu2 %2121 }
 0x782   :  { %v2131_v48 = vmul.f32 %v2122_v46, %v6127_v26 }
 0x784   :  { %v7348_v49 = vsub.f32 %v7316_v52, %v2131_v48 }
 0x786   :  { %v2141_v4 = vmul.f32 %v7348_v49, %v7348_v49 }
 0x788   :  { %v2150_v53 = vsel %vm116_vm2, %v2141_v4, 0.0 }
 0x789   :  { %v2125_v41 = vpop.xlane.xlu0 %2124  ;;  %2151 = vadd.xlane.f32.xlu1 %v2150_v53 }
 0x78a   :  { %v2132_v37 = vmul.f32 %v2125_v41, %v6127_v26 }
 0x78c   :  { %v7355_v60 = vsub.f32 %v7321_v44, %v2132_v37 }
 0x78e   :  { %v2142_v11 = vmul.f32 %v7355_v60, %v7355_v60 }
 0x790   :  { %v2153_v6 = vsel %vm116_vm2, %v2142_v11, 0.0 }
 0x791   :  { %2154 = vadd.xlane.f32.xlu2 %v2153_v6 }
 0x7bf   :  { %v2128_v2 = vpop.xlane.xlu1 %2127 }
 0x7c0   :  { %v2133_v29 = vmul.f32 %v2128_v2, %v6127_v26 }
 0x7c2   :  { %v7362_v42 = vsub.f32 %v7332_v31, %v2133_v29 }
 0x7c4   :  { %v2143_v32 = vmul.f32 %v7362_v42, %v7362_v42 }
 0x7c6   :  { %v2156_v27 = vsel %vm129_vm4, %v2143_v32, 0.0 }
 0x7c7   :  { %2157 = vadd.xlane.f32.xlu0 %v2156_v27 }
 0x7d2   :  { %v2146_v28 = vpop.xlane.xlu2 %2145 }
 0x7d3   :  { %v2159_v15 = vmul.f32 %v2146_v28, %v6127_v26 }
 0x7d5   :  { %v2164_v59 = vadd.f32 1e-06, %v2159_v15 }
 0x7d7   :  { %5728 = vrsqrt.f32 %v2164_v59  ;;  %vm2175_vm10 = vweird.f32 %v2164_v59 }
 0x7da   :  { %v2149_v13 = vpop.xlane.xlu0 %2148 }
 0x7db   :  { %v2160_v54 = vmul.f32 %v2149_v13, %v6127_v26 }
 0x7dd   :  { %v5729_v14 = vpop.eup %5728  ;;  %v2165_v25 = vadd.f32 1e-06, %v2160_v54 }
 0x7de   :  { %v2170_v8 = vmul.f32 %v5729_v14, %v2164_v59  ;;  %vm2176_vm9 = vweird.f32 %v5729_v14 }
 0x7df   :  { %5730 = vrsqrt.f32 %v2165_v25  ;;  %vm2177_vm11 = vmor %vm2175_vm10, %vm2176_vm9  ;;  %vm2185_vm13 = vweird.f32 %v2165_v25 }
 0x7e0   :  { %v2171_v33 = vmul.f32 %v5729_v14, %v2170_v8 }
 0x7e2   :  { %v2172_v58 = vmul.f32 0.5, %v2171_v33 }
 0x7e4   :  { %v2173_v21 = vsub.f32 1.5, %v2172_v58 }
 0x7e5   :  { %v5731_v5 = vpop.eup %5730 }
 0x7e6   :  { %v2174_v0 = vmul.f32 %v5729_v14, %v2173_v21  ;;  %v2180_v19 = vmul.f32 %v5731_v5, %v2165_v25  ;;  %vm2186_vm12 = vweird.f32 %v5731_v5  ;;  %v2436_v21 = vld [vmem:[%s8910_s9 + $0x78] sm:$0xff] }
 0x7e7   :  { %vm2187_vm14 = vmor %vm2185_vm13, %vm2186_vm12  ;;  %2437 = vmatpush.msra.mxu0 %v2436_v21 }
 0x7e8   :  { %v2178_v22 = vsel %vm2177_vm11, %v5729_v14, %v2174_v0  ;;  %v2181_v17 = vmul.f32 %v5731_v5, %v2180_v19  ;;  %v2433_v0 = vld [vmem:[%s8910_s9 + $0x60] sm:$0xff]  ;;  %v2432_v19 = vld [vmem:[%s8910_s9 + $0x58] sm:$0xff] }
 0x7e9   :  { %v2219_v61 = vmul.f32 %v2178_v22, %v2134_v56  ;;  %v2430_v22 = vld [vmem:[%s8910_s9 + $0x48] sm:$0xff] }
 0x7ea   :  { %v2182_v16 = vmul.f32 0.5, %v2181_v17  ;;  %v7437_v17 = vld [vmem:[%s8908_s7] ss:$0 sm:$0xff] }
 0x7eb   :  { %v2225_v7 = vmul.f32 %v7384_v63, %v2219_v61 }
 0x7ec   :  { %v2183_v1 = vsub.f32 1.5, %v2182_v16  ;;  %v2428_v16 = vld [vmem:[%s8910_s9 + $0x38] sm:$0xff] }
 0x7ed   :  { %v2231_v9 = vadd.f32 %v7389_v40, %v2225_v7 }
 0x7ee   :  { %v2184_v57 = vmul.f32 %v5731_v5, %v2183_v1  ;;  %v2427_v1 = vld [vmem:[%s8910_s9 + $0x30] sm:$0xff] }
 0x7ef   :  { %5216 = vmatmul.msk.f32.vlgmr.msrb.gmra.mxu3 %vm116_vm2, %v2231_v9 }
 0x7f0   :  { %v2188_v10 = vsel %vm2187_vm14, %v5731_v5, %v2184_v57  ;;  %v2435_v5 = vld [vmem:[%s8910_s9 + $0x70] sm:$0xff]  ;;  %v2426_v57 = vld [vmem:[%s8910_s9 + $0x28] sm:$0xff] }
 0x7f1   :  { %v2220_v50 = vmul.f32 %v2188_v10, %v7341_v34  ;;  %2438 = vmatpush.msra.mxu0 %v2435_v5 }
 0x7f3   :  { %v2226_v18 = vmul.f32 %v7384_v63, %v2220_v50  ;;  %v2425_v50 = vld [vmem:[%s8910_s9 + $0x20] sm:$0xff] }
 0x7f5   :  { %v2232_v23 = vadd.f32 %v7389_v40, %v2226_v18 }
 0x7f7   :  { %5217 = vmatmul.msk.f32.gmra.mxu3 %vm116_vm2, %v2232_v23 }
 0x7fc   :  { %v2152_v62 = vpop.xlane.xlu1 %2151 }
 0x7fd   :  { %v2161_v43 = vmul.f32 %v2152_v62, %v6127_v26  ;;  %v2424_v62 = vld [vmem:[%s8910_s9 + $0x18] sm:$0xff] }
 0x7ff   :  { %v2166_v30 = vadd.f32 1e-06, %v2161_v43 }
 0x801   :  { %5732 = vrsqrt.f32 %v2166_v30  ;;  %vm2195_vm1 = vweird.f32 %v2166_v30 }
 0x804   :  { %v2155_v56 = vpop.xlane.xlu2 %2154 }
 0x805   :  { %v2162_v47 = vmul.f32 %v2155_v56, %v6127_v26  ;;  %v2423_v56 = vld [vmem:[%s8910_s9 + $0x10] sm:$0xff] }
 0x807   :  { %v5733_v24 = vpop.eup %5732  ;;  %v2167_v3 = vadd.f32 1e-06, %v2162_v47 }
 0x808   :  { %v2190_v55 = vmul.f32 %v5733_v24, %v2166_v30  ;;  %vm2196_vm15 = vweird.f32 %v5733_v24 }
 0x809   :  { %5734 = vrsqrt.f32 %v2167_v3  ;;  %vm2197_vm3 = vmor %vm2195_vm1, %vm2196_vm15  ;;  %vm2205_vm6 = vweird.f32 %v2167_v3 }
 0x80a   :  { %v2191_v39 = vmul.f32 %v5733_v24, %v2190_v55  ;;  %v2421_v55 = vld [vmem:[%s8910_s9] sm:$0xff] }
 0x80c   :  { %v2192_v34 = vmul.f32 0.5, %v2191_v39 }
 0x80e   :  { %v2193_v45 = vsub.f32 1.5, %v2192_v34 }
 0x80f   :  { %v5735_v46 = vpop.eup %5734 }
 0x810   :  { %v2194_v48 = vmul.f32 %v5733_v24, %v2193_v45  ;;  %v2200_v4 = vmul.f32 %v5735_v46, %v2167_v3  ;;  %vm2206_vm5 = vweird.f32 %v5735_v46 }
 0x811   :  { %vm2207_vm9 = vmor %vm2205_vm6, %vm2206_vm5 }
 0x812   :  { %v2198_v53 = vsel %vm2197_vm3, %v5733_v24, %v2194_v48  ;;  %v2201_v41 = vmul.f32 %v5735_v46, %v2200_v4  ;;  %v2422_v24 = vld [vmem:[%s8910_s9 + $0x8] sm:$0xff] }
 0x813   :  { %v2221_v37 = vmul.f32 %v2198_v53, %v7348_v49 }
 0x814   :  { %v2202_v11 = vmul.f32 0.5, %v2201_v41 }
 0x815   :  { %v2227_v6 = vmul.f32 %v7384_v63, %v2221_v37 }
 0x816   :  { %v2203_v2 = vsub.f32 1.5, %v2202_v11 }
 0x817   :  { %v2233_v29 = vadd.f32 %v7389_v40, %v2227_v6 }
 0x818   :  { %v2204_v32 = vmul.f32 %v5735_v46, %v2203_v2 }
 0x819   :  { %5218 = vmatmul.msk.f32.gmra.mxu3 %vm116_vm2, %v2233_v29 }
 0x81a   :  { %v2208_v27 = vsel %vm2207_vm9, %v5735_v46, %v2204_v32 }
 0x81b   :  { %v2222_v36 = vmul.f32 %v2208_v27, %v7355_v60 }
 0x81d   :  { %v2228_v35 = vmul.f32 %v7384_v63, %v2222_v36 }
 0x81f   :  { %v2234_v20 = vadd.f32 %v7389_v40, %v2228_v35 }
 0x821   :  { %5219 = vmatmul.msk.f32.gmra.mxu3 %vm116_vm2, %v2234_v20 }
 0x83a   :  { %v2158_v49 = vpop.xlane.xlu0 %2157 }
 0x83b   :  { %v2163_v12 = vmul.f32 %v2158_v49, %v6127_v26 }
 0x83d   :  { %v2168_v28 = vadd.f32 1e-06, %v2163_v12 }
 0x83f   :  { %5736 = vrsqrt.f32 %v2168_v28  ;;  %vm2215_vm11 = vweird.f32 %v2168_v28 }
 0x845   :  { %v5737_v15 = vpop.eup %5736 }
 0x846   :  { %v2210_v59 = vmul.f32 %v5737_v15, %v2168_v28  ;;  %vm2216_vm10 = vweird.f32 %v5737_v15 }
 0x847   :  { %vm2217_vm12 = vmor %vm2215_vm11, %vm2216_vm10 }
 0x848   :  { %v2211_v13 = vmul.f32 %v5737_v15, %v2210_v59 }
 0x84a   :  { %v2212_v54 = vmul.f32 0.5, %v2211_v13 }
 0x84c   :  { %v2213_v14 = vsub.f32 1.5, %v2212_v54 }
 0x84e   :  { %v2214_v25 = vmul.f32 %v5737_v15, %v2213_v14 }
 0x850   :  { %v2218_v60 = vsel %vm2217_vm12, %v5737_v15, %v2214_v25 }
 0x851   :  { %v2223_v8 = vmul.f32 %v2218_v60, %v7362_v42  ;;  %v2434_v42 = vld [vmem:[%s8910_s9 + $0x68] sm:$0xff] }
 0x852   :  { %2439 = vmatpush.msra.mxu0 %v2434_v42 }
 0x853   :  { %v2229_v33 = vmul.f32 %v7384_v63, %v2223_v8  ;;  %v2431_v63 = vld [vmem:[%s8910_s9 + $0x50] sm:$0xff] }
 0x854   :  { %2440 = vmatpush.msra.mxu0 %v2433_v0 }
 0x855   :  { %v2235_v58 = vadd.f32 %v7389_v40, %v2229_v33  ;;  %v2429_v40 = vld [vmem:[%s8910_s9 + $0x40] sm:$0xff]  ;;  %v6002_v33 = vmov -1.0  }
 0x856   :  { %2441 = vmatpush.msra.mxu0 %v2432_v19 }
 0x857   :  { %5220 = vmatmul.msk.f32.gmra.mxu3 %vm116_vm2, %v2235_v58 }
 0x858   :  { %2442 = vmatpush.msra.mxu0 %v2431_v63 }
 0x85a   :  { %2443 = vmatpush.msra.mxu0 %v2430_v22 }
 0x85c   :  { %2444 = vmatpush.msra.mxu0 %v2429_v40 }
 0x85e   :  { %2445 = vmatpush.msra.mxu0 %v2428_v16 }
 0x860   :  { %2446 = vmatpush.msra.mxu0 %v2427_v1 }
 0x862   :  { %2447 = vmatpush.msra.mxu0 %v2426_v57 }
 0x864   :  { %2448 = vmatpush.msra.mxu0 %v2425_v50 }
 0x866   :  { %2449 = vmatpush.msra.mxu0 %v2424_v62 }
 0x868   :  { %2450 = vmatpush.msra.mxu0 %v2423_v56 }
 0x86a   :  { %2451 = vmatpush.msra.mxu0 %v2422_v24 }
 0x86c   :  { %2452 = vmatpush.msra.mxu0 %v2421_v55 }
 0x872   :  { %v2276_v61 = vpop.f32.mrf.mxu3 }
 0x873   :  { %v2277_v7 = vadd.f32 %v7437_v17, %v2276_v61 }
 0x875   :  { %v2296_v9 = vmul.f32 0.70710677, %v2277_v7  ;;  %v2291_v42 = vmul.f32 0.5, %v2277_v7 }
 0x877   :  { %v2311_v10 = vand.u32 2147483647, %v2296_v9  ;;  %vm2301_vm13 = vcmp.ge.f32.partialorder %v2296_v9, 0.0 }
 0x878   :  { %v2306_v58 = vsel %vm2301_vm13, 1.0, %v6002_v33 }
 0x879   :  { %v2316_v18 = vmul.f32 0.3275911, %v2311_v10  ;;  %v2376_v45 = vsub.f32 0.0, %v2311_v10 }
 0x87a   :  { %v2279_v23 = vpop.f32.mrf.mxu3 }
 0x87b   :  { %v2321_v43 = vadd.f32 1.0, %v2316_v18  ;;  %v7459_v30 = vadd.f32 %v7437_v17, %v2279_v23  ;;  %v2381_v53 = vmul.f32 %v2376_v45, %v2311_v10 }
 0x87d   :  { %5738 = vrcp.f32 %v2321_v43  ;;  %v2297_v47 = vmul.f32 0.70710677, %v7459_v30  ;;  %v2386_v6 = vmul.f32 1.442695, %v2381_v53  ;;  %v2292_v23 = vmul.f32 0.5, %v7459_v30 }
 0x87f   :  { %v2312_v3 = vand.u32 2147483647, %v2297_v47  ;;  %vm2302_vm14 = vcmp.ge.f32.partialorder %v2297_v47, 0.0 }
 0x880   :  { %v2307_v57 = vsel %vm2302_vm14, 1.0, %v6002_v33 }
 0x881   :  { %v2317_v39 = vmul.f32 0.3275911, %v2312_v3  ;;  %v2377_v2 = vsub.f32 0.0, %v2312_v3 }
 0x883   :  { %v5739_v34 = vpop.eup %5738  ;;  %v2322_v46 = vadd.f32 1.0, %v2317_v39  ;;  %v2382_v35 = vmul.f32 %v2377_v2, %v2312_v3 }
 0x884   :  { %v2331_v48 = vmul.f32 1.0614054, %v5739_v34 }
 0x885   :  { %5740 = vrcp.f32 %v2322_v46  ;;  %v2388_v15 = vmul.f32 1.442695, %v2382_v35 }
 0x886   :  { %v2336_v4 = vadd.f32 -1.4531521, %v2331_v48  ;;  %5742 = vpow2.f32 %v2386_v6 }
 0x887   :  { %5744 = vpow2.f32 %v2388_v15 }
 0x888   :  { %v2341_v41 = vmul.f32 %v5739_v34, %v2336_v4 }
 0x88a   :  { %v2346_v37 = vadd.f32 1.4214138, %v2341_v41 }
 0x88b   :  { %v5741_v11 = vpop.eup %5740 }
 0x88c   :  { %v2351_v29 = vmul.f32 %v5739_v34, %v2346_v37  ;;  %v2332_v32 = vmul.f32 1.0614054, %v5741_v11  ;;  %v5743_v54 = vpop.eup %5742 }
 0x88d   :  { %v5745_v22 = vpop.eup %5744 }
 0x88e   :  { %v2356_v27 = vadd.f32 -0.28449672, %v2351_v29  ;;  %v2337_v36 = vadd.f32 -1.4531521, %v2332_v32 }
 0x890   :  { %v2361_v20 = vmul.f32 %v5739_v34, %v2356_v27  ;;  %v2342_v49 = vmul.f32 %v5741_v11, %v2337_v36 }
 0x892   :  { %v2366_v12 = vadd.f32 0.2548296, %v2361_v20  ;;  %v2347_v28 = vadd.f32 1.4214138, %v2342_v49 }
 0x894   :  { %v2371_v59 = vmul.f32 %v5739_v34, %v2366_v12  ;;  %v2352_v13 = vmul.f32 %v5741_v11, %v2347_v28 }
 0x896   :  { %v2396_v14 = vmul.f32 %v5743_v54, %v2371_v59  ;;  %v2357_v25 = vadd.f32 -0.28449672, %v2352_v13 }
 0x898   :  { %v2401_v60 = vsub.f32 1.0, %v2396_v14  ;;  %v2362_v8 = vmul.f32 %v5741_v11, %v2357_v25 }
 0x89a   :  { %v2406_v21 = vmul.f32 %v2401_v60, %v2306_v58  ;;  %v2367_v5 = vadd.f32 0.2548296, %v2362_v8 }
 0x89c   :  { %v2411_v0 = vadd.f32 1.0, %v2406_v21  ;;  %v2282_v19 = vpop.f32.mrf.mxu3  ;;  %v2372_v63 = vmul.f32 %v5741_v11, %v2367_v5 }
 0x89d   :  { %v2283_v40 = vadd.f32 %v7437_v17, %v2282_v19 }
 0x89e   :  { %v2416_v61 = vmul.f32 %v2411_v0, %v2291_v42  ;;  %v2397_v16 = vmul.f32 %v5745_v22, %v2372_v63 }
 0x89f   :  { %v2298_v1 = vmul.f32 0.70710677, %v2283_v40  ;;  %v2293_v21 = vmul.f32 0.5, %v2283_v40 }
 0x8a0   :  { %2453 = vmatmul.f32.vlgmr.msra.gmra.mxu0 %v2416_v61  ;;  %v2402_v9 = vsub.f32 1.0, %v2397_v16 }
 0x8a1   :  { %v2313_v10 = vand.u32 2147483647, %v2298_v1  ;;  %vm2303_vm15 = vcmp.ge.f32.partialorder %v2298_v1, 0.0 }
 0x8a2   :  { %v2407_v50 = vmul.f32 %v2402_v9, %v2307_v57  ;;  %v2308_v60 = vsel %vm2303_vm15, 1.0, %v6002_v33 }
 0x8a3   :  { %v2318_v18 = vmul.f32 0.3275911, %v2313_v10  ;;  %v2378_v34 = vsub.f32 0.0, %v2313_v10 }
 0x8a4   :  { %v2285_v7 = vpop.f32.mrf.mxu3  ;;  %v2412_v62 = vadd.f32 1.0, %v2407_v50 }
 0x8a5   :  { %v2323_v43 = vadd.f32 1.0, %v2318_v18  ;;  %v2286_v56 = vadd.f32 %v7437_v17, %v2285_v7  ;;  %v2383_v4 = vmul.f32 %v2378_v34, %v2313_v10 }
 0x8a6   :  { %v2417_v24 = vmul.f32 %v2412_v62, %v2292_v23 }
 0x8a7   :  { %5746 = vrcp.f32 %v2323_v43  ;;  %v2299_v3 = vmul.f32 0.70710677, %v2286_v56  ;;  %v2390_v37 = vmul.f32 1.442695, %v2383_v4  ;;  %v2294_v1 = vmul.f32 0.5, %v2286_v56 }
 0x8a8   :  { %2456 = vmatmul.f32.gmra.mxu0 %v2417_v24 }
 0x8a9   :  { %v2314_v47 = vand.u32 2147483647, %v2299_v3  ;;  %vm2304_vm1 = vcmp.ge.f32.partialorder %v2299_v3, 0.0 }
 0x8aa   :  { %v2309_v61 = vsel %vm2304_vm1, 1.0, %v6002_v33 }
 0x8ab   :  { %v2319_v55 = vmul.f32 0.3275911, %v2314_v47  ;;  %v2379_v11 = vsub.f32 0.0, %v2314_v47 }
 0x8ad   :  { %v5747_v39 = vpop.eup %5746  ;;  %v2324_v45 = vadd.f32 1.0, %v2319_v55  ;;  %v2384_v27 = vmul.f32 %v2379_v11, %v2314_v47 }
 0x8ae   :  { %v2333_v46 = vmul.f32 1.0614054, %v5747_v39 }
 0x8af   :  { %5748 = vrcp.f32 %v2324_v45  ;;  %v2392_v12 = vmul.f32 1.442695, %v2384_v27 }
 0x8b0   :  { %v2338_v48 = vadd.f32 -1.4531521, %v2333_v46  ;;  %5750 = vpow2.f32 %v2390_v37 }
 0x8b1   :  { %5752 = vpow2.f32 %v2392_v12 }
 0x8b2   :  { %v2343_v53 = vmul.f32 %v5747_v39, %v2338_v48 }
 0x8b4   :  { %v2348_v30 = vadd.f32 1.4214138, %v2343_v53 }
 0x8b5   :  { %v5749_v41 = vpop.eup %5748 }
 0x8b6   :  { %v2353_v6 = vmul.f32 %v5747_v39, %v2348_v30  ;;  %v2334_v2 = vmul.f32 1.0614054, %v5749_v41  ;;  %v5751_v59 = vpop.eup %5750 }
 0x8b7   :  { %v5753_v0 = vpop.eup %5752 }
 0x8b8   :  { %v2358_v29 = vadd.f32 -0.28449672, %v2353_v6  ;;  %v2339_v32 = vadd.f32 -1.4531521, %v2334_v2 }
 0x8ba   :  { %v2363_v36 = vmul.f32 %v5747_v39, %v2358_v29  ;;  %v2344_v35 = vmul.f32 %v5749_v41, %v2339_v32  ;;  %v5545_v29 = vld [vmem:[%s8907_s6 + $0x5] ss:$0 sm:$0xff] }
 0x8bc   :  { %v2368_v20 = vadd.f32 0.2548296, %v2363_v36  ;;  %v2349_v49 = vadd.f32 1.4214138, %v2344_v35 }
 0x8be   :  { %v2373_v28 = vmul.f32 %v5747_v39, %v2368_v20  ;;  %v2354_v15 = vmul.f32 %v5749_v41, %v2349_v49 }
 0x8c0   :  { %v2398_v13 = vmul.f32 %v5751_v59, %v2373_v28  ;;  %v2359_v54 = vadd.f32 -0.28449672, %v2354_v15 }
 0x8c2   :  { %v2403_v14 = vsub.f32 1.0, %v2398_v13  ;;  %v2364_v25 = vmul.f32 %v5749_v41, %v2359_v54 }
 0x8c4   :  { %v2408_v8 = vmul.f32 %v2403_v14, %v2308_v60  ;;  %v2369_v58 = vadd.f32 0.2548296, %v2364_v25 }
 0x8c6   :  { %v2413_v5 = vadd.f32 1.0, %v2408_v8  ;;  %v2374_v42 = vmul.f32 %v5749_v41, %v2369_v58 }
 0x8c8   :  { %v2418_v19 = vmul.f32 %v2413_v5, %v2293_v21  ;;  %v2399_v63 = vmul.f32 %v5753_v0, %v2374_v42 }
 0x8ca   :  { %2459 = vmatmul.f32.gmra.mxu0 %v2418_v19  ;;  %v2404_v22 = vsub.f32 1.0, %v2399_v63 }
 0x8cc   :  { %v2409_v16 = vmul.f32 %v2404_v22, %v2309_v61 }
 0x8ce   :  { %v2414_v9 = vadd.f32 1.0, %v2409_v16 }
 0x8d0   :  { %v2419_v57 = vmul.f32 %v2414_v9, %v2294_v1 }
 0x8d2   :  { %2462 = vmatmul.f32.gmra.mxu0 %v2419_v57 }
 0x8da   :  { %v2288_v10 = vpop.f32.mrf.mxu3 }
 0x8db   :  { %v2289_v50 = vadd.f32 %v7437_v17, %v2288_v10 }
 0x8dd   :  { %v2300_v18 = vmul.f32 0.70710677, %v2289_v50  ;;  %v2295_v11 = vmul.f32 0.5, %v2289_v50 }
 0x8df   :  { %v2315_v40 = vand.u32 2147483647, %v2300_v18  ;;  %vm2305_vm3 = vcmp.ge.f32.partialorder %v2300_v18, 0.0 }
 0x8e0   :  { %v2310_v41 = vsel %vm2305_vm3, 1.0, %v6002_v33 }
 0x8e1   :  { %v2320_v23 = vmul.f32 0.3275911, %v2315_v40  ;;  %v2380_v43 = vsub.f32 0.0, %v2315_v40 }
 0x8e3   :  { %v2325_v7 = vadd.f32 1.0, %v2320_v23  ;;  %v2385_v47 = vmul.f32 %v2380_v43, %v2315_v40 }
 0x8e5   :  { %5754 = vrcp.f32 %v2325_v7  ;;  %v2394_v34 = vmul.f32 1.442695, %v2385_v47 }
 0x8e7   :  { %5756 = vpow2.f32 %v2394_v34  ;;  %v5254_v34 = vld [vmem:[%s8905_s4 + $0x138] sm:$0xff] }
 0x8e8   :  { %2814 = vmatpush.msrb.mxu0 %v5254_v34 }
 0x8eb   :  { %v5755_v62 = vpop.eup %5754 }
 0x8ec   :  { %v2335_v24 = vmul.f32 1.0614054, %v5755_v62 }
 0x8ed   :  { %v5757_v17 = vpop.eup %5756 }
 0x8ee   :  { %v2340_v3 = vadd.f32 -1.4531521, %v2335_v24 }
 0x8f0   :  { %v2345_v55 = vmul.f32 %v5755_v62, %v2340_v3 }
 0x8f2   :  { %v2350_v39 = vadd.f32 1.4214138, %v2345_v55  ;;  %v5226_v55 = vld [vmem:[%s8905_s4 + $0x118] sm:$0xff] }
 0x8f3   :  { %2638 = vmatpush.msrb.mxu2 %v5226_v55 }
 0x8f4   :  { %v2355_v56 = vmul.f32 %v5755_v62, %v2350_v39  ;;  %v5245_v39 = vld [vmem:[%s8906_s5 + $0x118] sm:$0xff] }
 0x8f5   :  { %2777 = vmatpush.msra.mxu3 %v5245_v39 }
 0x8f6   :  { %v2360_v45 = vadd.f32 -0.28449672, %v2355_v56  ;;  %v5225_v56 = vld [vmem:[%s8905_s4 + $0x110] sm:$0xff] }
 0x8f7   :  { %2639 = vmatpush.msrb.mxu2 %v5225_v56 }
 0x8f8   :  { %v2365_v46 = vmul.f32 %v5755_v62, %v2360_v45  ;;  %v5244_v45 = vld [vmem:[%s8906_s5 + $0x110] sm:$0xff] }
 0x8f9   :  { %2778 = vmatpush.msra.mxu3 %v5244_v45 }
 0x8fa   :  { %v2370_v48 = vadd.f32 0.2548296, %v2365_v46  ;;  %v5253_v46 = vld [vmem:[%s8905_s4 + $0x130] sm:$0xff] }
 0x8fb   :  { %2815 = vmatpush.msrb.mxu0 %v5253_v46 }
 0x8fc   :  { %v2375_v4 = vmul.f32 %v5755_v62, %v2370_v48  ;;  %v5224_v48 = vld [vmem:[%s8905_s4 + $0x108] sm:$0xff] }
 0x8fd   :  { %2640 = vmatpush.msrb.mxu2 %v5224_v48 }
 0x8fe   :  { %v2400_v53 = vmul.f32 %v5757_v17, %v2375_v4  ;;  %v5243_v4 = vld [vmem:[%s8906_s5 + $0x108] sm:$0xff] }
 0x8ff   :  { %v5252_v17 = vld [vmem:[%s8905_s4 + $0x128] sm:$0xff]  ;;  %2779 = vmatpush.msra.mxu3 %v5243_v4 }
 0x900   :  { %v2405_v30 = vsub.f32 1.0, %v2400_v53  ;;  %2816 = vmatpush.msrb.mxu0 %v5252_v17  ;;  %v5223_v53 = vld [vmem:[%s8905_s4 + $0x100] sm:$0xff] }
 0x901   :  { %2641 = vmatpush.msrb.mxu2 %v5223_v53 }
 0x902   :  { %v2410_v37 = vmul.f32 %v2405_v30, %v2310_v41  ;;  %v5242_v30 = vld [vmem:[%s8906_s5 + $0x100] sm:$0xff] }
 0x903   :  { %v5251_v41 = vld [vmem:[%s8905_s4 + $0x120] sm:$0xff]  ;;  %2780 = vmatpush.msra.mxu3 %v5242_v30 }
 0x904   :  { %v2415_v6 = vadd.f32 1.0, %v2410_v37  ;;  %2817 = vmatpush.msrb.mxu0 %v5251_v41 }
 0x906   :  { %v2420_v2 = vmul.f32 %v2415_v6, %v2295_v11 }
 0x908   :  { %2465 = vmatmul.f32.gmra.mxu0 %v2420_v2 }
 0x91d   :  { %v2454_v32 = vpop.f32.mrf.mxu0 }
 0x91e   :  { %v2469_v27 = vadd.f32 %v2454_v32, %v7297_v38 }
 0x920   :  { %v7484_v36 = vadd.f32 %v5545_v29, %v2469_v27 }
 0x922   :  { %v2484_v35 = vsel %vm116_vm2, %v7484_v36, 0.0 }
 0x923   :  { %2485 = vadd.xlane.f32.xlu1 %v2484_v35 }
 0x925   :  { %v2457_v20 = vpop.f32.mrf.mxu0 }
 0x926   :  { %v2470_v49 = vadd.f32 %v2457_v20, %v7302_v51 }
 0x928   :  { %v7489_v12 = vadd.f32 %v5545_v29, %v2470_v49 }
 0x92a   :  { %v2487_v28 = vsel %vm116_vm2, %v7489_v12, 0.0 }
 0x92b   :  { %2488 = vadd.xlane.f32.xlu2 %v2487_v28 }
 0x947   :  { %v2460_v15 = vpop.f32.mrf.mxu0 }
 0x948   :  { %v2471_v59 = vadd.f32 %v2460_v15, %v7316_v52 }
 0x94a   :  { %v7494_v13 = vadd.f32 %v5545_v29, %v2471_v59 }
 0x94c   :  { %v2490_v38 = vsel %vm116_vm2, %v7494_v13, 0.0 }
 0x94d   :  { %2491 = vadd.xlane.f32.xlu0 %v2490_v38 }
 0x94f   :  { %v2463_v54 = vpop.f32.mrf.mxu0 }
 0x950   :  { %v2472_v14 = vadd.f32 %v2463_v54, %v7321_v44  ;;  %v7584_v54 = vld [vmem:[%s8907_s6 + $0x8] ss:$0 sm:$0xff] }
 0x952   :  { %v7499_v25 = vadd.f32 %v5545_v29, %v2472_v14 }
 0x954   :  { %v2493_v51 = vsel %vm116_vm2, %v7499_v25, 0.0 }
 0x955   :  { %2494 = vadd.xlane.f32.xlu1 %v2493_v51 }
 0x985   :  { %v2466_v60 = vpop.f32.mrf.mxu0 }
 0x986   :  { %v2473_v8 = vadd.f32 %v2466_v60, %v7332_v31  ;;  %v7589_v60 = vld [vmem:[%s8907_s6 + $0x9] ss:$0 sm:$0xff] }
 0x988   :  { %v7504_v58 = vadd.f32 %v5545_v29, %v2473_v8 }
 0x98a   :  { %v2496_v52 = vsel %vm129_vm4, %v7504_v58, 0.0 }
 0x98b   :  { %2497 = vadd.xlane.f32.xlu2 %v2496_v52 }
 0x996   :  { %v2486_v21 = vpop.xlane.xlu1 %2485 }
 0x997   :  { %v2499_v5 = vmul.f32 %v2486_v21, %v6127_v26 }
 0x999   :  { %v7510_v44 = vsub.f32 %v7484_v36, %v2499_v5 }
 0x99b   :  { %v2509_v42 = vmul.f32 %v7510_v44, %v7510_v44 }
 0x99d   :  { %v2514_v0 = vsel %vm116_vm2, %v2509_v42, 0.0 }
 0x99e   :  { %2515 = vadd.xlane.f32.xlu0 %v2514_v0  ;;  %v2489_v19 = vpop.xlane.xlu2 %2488 }
 0x99f   :  { %v2500_v31 = vmul.f32 %v2489_v19, %v6127_v26 }
 0x9a1   :  { %v7517_v63 = vsub.f32 %v7489_v12, %v2500_v31 }
 0x9a3   :  { %v2510_v22 = vmul.f32 %v7517_v63, %v7517_v63 }
 0x9a5   :  { %v2517_v61 = vsel %vm116_vm2, %v2510_v22, 0.0 }
 0x9a6   :  { %2518 = vadd.xlane.f32.xlu1 %v2517_v61 }
 0x9c0   :  { %v2492_v16 = vpop.xlane.xlu0 %2491 }
 0x9c1   :  { %v2501_v1 = vmul.f32 %v2492_v16, %v6127_v26 }
 0x9c3   :  { %v7524_v9 = vsub.f32 %v7494_v13, %v2501_v1 }
 0x9c5   :  { %v2511_v57 = vmul.f32 %v7524_v9, %v7524_v9 }
 0x9c7   :  { %v2520_v10 = vsel %vm116_vm2, %v2511_v57, 0.0 }
 0x9c8   :  { %v2495_v50 = vpop.xlane.xlu1 %2494  ;;  %2521 = vadd.xlane.f32.xlu2 %v2520_v10 }
 0x9c9   :  { %v2502_v18 = vmul.f32 %v2495_v50, %v6127_v26 }
 0x9cb   :  { %v7531_v40 = vsub.f32 %v7499_v25, %v2502_v18 }
 0x9cd   :  { %v2512_v23 = vmul.f32 %v7531_v40, %v7531_v40 }
 0x9cf   :  { %v2523_v7 = vsel %vm116_vm2, %v2512_v23, 0.0 }
 0x9d0   :  { %2524 = vadd.xlane.f32.xlu0 %v2523_v7 }
 0x9fe   :  { %v2498_v62 = vpop.xlane.xlu2 %2497 }
 0x9ff   :  { %v2503_v43 = vmul.f32 %v2498_v62, %v6127_v26 }
 0xa01   :  { %v7538_v24 = vsub.f32 %v7504_v58, %v2503_v43 }
 0xa03   :  { %v2513_v3 = vmul.f32 %v7538_v24, %v7538_v24 }
 0xa05   :  { %v2526_v47 = vsel %vm129_vm4, %v2513_v3, 0.0 }
 0xa06   :  { %2527 = vadd.xlane.f32.xlu1 %v2526_v47 }
 0xa11   :  { %v2516_v37 = vpop.xlane.xlu0 %2515 }
 0xa12   :  { %v2529_v11 = vmul.f32 %v2516_v37, %v6127_v26 }
 0xa14   :  { %v2534_v6 = vadd.f32 1e-06, %v2529_v11 }
 0xa16   :  { %5758 = vrsqrt.f32 %v2534_v6  ;;  %vm2545_vm6 = vweird.f32 %v2534_v6 }
 0xa19   :  { %v2519_v2 = vpop.xlane.xlu1 %2518 }
 0xa1a   :  { %v2530_v29 = vmul.f32 %v2519_v2, %v6127_v26 }
 0xa1c   :  { %v5759_v32 = vpop.eup %5758  ;;  %v2535_v27 = vadd.f32 1e-06, %v2530_v29 }
 0xa1d   :  { %v2540_v35 = vmul.f32 %v5759_v32, %v2534_v6  ;;  %vm2546_vm5 = vweird.f32 %v5759_v32 }
 0xa1e   :  { %5760 = vrsqrt.f32 %v2535_v27  ;;  %vm2547_vm9 = vmor %vm2545_vm6, %vm2546_vm5  ;;  %vm2555_vm11 = vweird.f32 %v2535_v27 }
 0xa1f   :  { %v2541_v20 = vmul.f32 %v5759_v32, %v2540_v35 }
 0xa21   :  { %v2542_v49 = vmul.f32 0.5, %v2541_v20 }
 0xa23   :  { %v2543_v28 = vsub.f32 1.5, %v2542_v49 }
 0xa24   :  { %v5761_v15 = vpop.eup %5760 }
 0xa25   :  { %v2544_v59 = vmul.f32 %v5759_v32, %v2543_v28  ;;  %v2550_v38 = vmul.f32 %v5761_v15, %v2535_v27  ;;  %vm2556_vm10 = vweird.f32 %v5761_v15 }
 0xa26   :  { %vm2557_vm12 = vmor %vm2555_vm11, %vm2556_vm10 }
 0xa27   :  { %v2548_v14 = vsel %vm2547_vm9, %v5759_v32, %v2544_v59  ;;  %v2551_v51 = vmul.f32 %v5761_v15, %v2550_v38  ;;  %v5271_v59 = vld [vmem:[%s8906_s5 + $0x128] sm:$0xff]  ;;  %v5270_v38 = vld [vmem:[%s8906_s5 + $0x120] sm:$0xff] }
 0xa28   :  { %v2589_v8 = vmul.f32 %v2548_v14, %v7510_v44 }
 0xa29   :  { %v2552_v52 = vmul.f32 0.5, %v2551_v51 }
 0xa2a   :  { %v2595_v21 = vmul.f32 %v7584_v54, %v2589_v8 }
 0xa2b   :  { %v2553_v5 = vsub.f32 1.5, %v2552_v52 }
 0xa2c   :  { %v7594_v42 = vadd.f32 %v7589_v60, %v2595_v21 }
 0xa2d   :  { %v2554_v0 = vmul.f32 %v5761_v15, %v2553_v5 }
 0xa2e   :  { %5227 = vmatmul.msk.f32.vlgmr.msrb.gmra.mxu2 %vm116_vm2, %v7594_v42  ;;  %5246 = vmatmul.msk.f32.vlgmr.msra.gmra.mxu3 %vm116_vm2, %v7594_v42 }
 0xa2f   :  { %v2558_v19 = vsel %vm2557_vm12, %v5761_v15, %v2554_v0  ;;  %5255 = vmatmul.msk.f32.vlgmr.msrb.gmra.mxu0 %vm116_vm2, %v7594_v42  ;;  %v5272_v15 = vld [vmem:[%s8906_s5 + $0x130] sm:$0xff]  ;;  %v5294_v0 = vld [vmem:[%s8905_s4 + $0x158] sm:$0xff] }
 0xa30   :  { %v2590_v44 = vmul.f32 %v2558_v19, %v7517_v63  ;;  %v5293_v19 = vld [vmem:[%s8905_s4 + $0x150] sm:$0xff] }
 0xa32   :  { %v2596_v31 = vmul.f32 %v7584_v54, %v2590_v44 }
 0xa34   :  { %v7605_v22 = vadd.f32 %v7589_v60, %v2596_v31  ;;  %v5292_v31 = vld [vmem:[%s8905_s4 + $0x148] sm:$0xff] }
 0xa36   :  { %5228 = vmatmul.msk.f32.gmra.mxu2 %vm116_vm2, %v7605_v22  ;;  %5247 = vmatmul.msk.f32.gmra.mxu3 %vm116_vm2, %v7605_v22 }
 0xa37   :  { %5256 = vmatmul.msk.f32.gmra.mxu0 %vm116_vm2, %v7605_v22 }
 0xa3b   :  { %v2522_v61 = vpop.xlane.xlu2 %2521 }
 0xa3c   :  { %v2531_v16 = vmul.f32 %v2522_v61, %v6127_v26  ;;  %v5291_v61 = vld [vmem:[%s8905_s4 + $0x140] sm:$0xff] }
 0xa3e   :  { %v2536_v1 = vadd.f32 1e-06, %v2531_v16 }
 0xa40   :  { %5762 = vrsqrt.f32 %v2536_v1  ;;  %vm2565_vm14 = vweird.f32 %v2536_v1 }
 0xa43   :  { %v2525_v63 = vpop.xlane.xlu0 %2524 }
 0xa44   :  { %v2532_v57 = vmul.f32 %v2525_v63, %v6127_v26 }
 0xa46   :  { %v5763_v10 = vpop.eup %5762  ;;  %v2537_v50 = vadd.f32 1e-06, %v2532_v57 }
 0xa47   :  { %v2560_v18 = vmul.f32 %v5763_v10, %v2536_v1  ;;  %vm2566_vm13 = vweird.f32 %v5763_v10 }
 0xa48   :  { %5764 = vrsqrt.f32 %v2537_v50  ;;  %vm2567_vm15 = vmor %vm2565_vm14, %vm2566_vm13  ;;  %vm2575_vm3 = vweird.f32 %v2537_v50 }
 0xa49   :  { %v2561_v23 = vmul.f32 %v5763_v10, %v2560_v18  ;;  %v5328_v18 = vld [vmem:[%s8905_s4 + $0x178] sm:$0xff] }
 0xa4b   :  { %v2562_v7 = vmul.f32 0.5, %v2561_v23  ;;  %v5327_v23 = vld [vmem:[%s8905_s4 + $0x170] sm:$0xff] }
 0xa4d   :  { %v2563_v62 = vsub.f32 1.5, %v2562_v7  ;;  %v5326_v7 = vld [vmem:[%s8905_s4 + $0x168] sm:$0xff] }
 0xa4e   :  { %v5765_v43 = vpop.eup %5764 }
 0xa4f   :  { %v2564_v3 = vmul.f32 %v5763_v10, %v2563_v62  ;;  %v2570_v47 = vmul.f32 %v5765_v43, %v2537_v50  ;;  %vm2576_vm1 = vweird.f32 %v5765_v43  ;;  %v5325_v62 = vld [vmem:[%s8905_s4 + $0x160] sm:$0xff] }
 0xa50   :  { %vm2577_vm5 = vmor %vm2575_vm3, %vm2576_vm1 }
 0xa51   :  { %v2568_v55 = vsel %vm2567_vm15, %v5763_v10, %v2564_v3  ;;  %v2571_v39 = vmul.f32 %v5765_v43, %v2570_v47  ;;  %v7747_v3 = vld [vmem:[%s8903_s2] sm:$0xff] }
 0xa52   :  { %v2591_v34 = vmul.f32 %v2568_v55, %v7524_v9 }
 0xa53   :  { %v2572_v56 = vmul.f32 0.5, %v2571_v39 }
 0xa54   :  { %v2597_v45 = vmul.f32 %v7584_v54, %v2591_v34  ;;  %v7763_v34 = vld [vmem:[%s8903_s2 + $0x8] sm:$0xff] }
 0xa55   :  { %v2573_v46 = vsub.f32 1.5, %v2572_v56 }
 0xa56   :  { %v7618_v48 = vadd.f32 %v7589_v60, %v2597_v45 }
 0xa57   :  { %v2574_v4 = vmul.f32 %v5765_v43, %v2573_v46  ;;  %v5362_v46 = vld [vmem:[%s8905_s4 + $0x198] sm:$0xff] }
 0xa58   :  { %5229 = vmatmul.msk.f32.gmra.mxu2 %vm116_vm2, %v7618_v48  ;;  %5248 = vmatmul.msk.f32.gmra.mxu3 %vm116_vm2, %v7618_v48 }
 0xa59   :  { %v2578_v17 = vsel %vm2577_vm5, %v5765_v43, %v2574_v4  ;;  %5257 = vmatmul.msk.f32.gmra.mxu0 %vm116_vm2, %v7618_v48  ;;  %v5361_v4 = vld [vmem:[%s8905_s4 + $0x190] sm:$0xff] }
 0xa5a   :  { %v2592_v9 = vmul.f32 %v2578_v17, %v7531_v40  ;;  %v5360_v17 = vld [vmem:[%s8905_s4 + $0x188] sm:$0xff] }
 0xa5c   :  { %v2598_v53 = vmul.f32 %v7584_v54, %v2592_v9  ;;  %v5359_v9 = vld [vmem:[%s8905_s4 + $0x180] sm:$0xff] }
 0xa5e   :  { %v7629_v30 = vadd.f32 %v7589_v60, %v2598_v53 }
 0xa60   :  { %5230 = vmatmul.msk.f32.gmra.mxu2 %vm116_vm2, %v7629_v30  ;;  %5249 = vmatmul.msk.f32.gmra.mxu3 %vm116_vm2, %v7629_v30 }
 0xa61   :  { %5258 = vmatmul.msk.f32.gmra.mxu0 %vm116_vm2, %v7629_v30 }
 0xa79   :  { %v2528_v41 = vpop.xlane.xlu1 %2527 }
 0xa7a   :  { %v2533_v37 = vmul.f32 %v2528_v41, %v6127_v26  ;;  %v7797_v41 = vld [vmem:[%s8903_s2 + $0x10] sm:$0xff] }
 0xa7c   :  { %v2538_v11 = vadd.f32 1e-06, %v2533_v37 }
 0xa7e   :  { %5766 = vrsqrt.f32 %v2538_v11  ;;  %vm2585_vm9 = vweird.f32 %v2538_v11 }
 0xa84   :  { %v5767_v40 = vpop.eup %5766 }
 0xa85   :  { %v2580_v6 = vmul.f32 %v5767_v40, %v2538_v11  ;;  %vm2586_vm6 = vweird.f32 %v5767_v40 }
 0xa86   :  { %vm2587_vm10 = vmor %vm2585_vm9, %vm2586_vm6 }
 0xa87   :  { %v2581_v2 = vmul.f32 %v5767_v40, %v2580_v6  ;;  %v7809_v6 = vld [vmem:[%s8903_s2 + $0x18] sm:$0xff] }
 0xa89   :  { %v2582_v29 = vmul.f32 0.5, %v2581_v2 }
 0xa8b   :  { %v2583_v32 = vsub.f32 1.5, %v2582_v29 }
 0xa8d   :  { %v2584_v27 = vmul.f32 %v5767_v40, %v2583_v32  ;;  %v5396_v32 = vld [vmem:[%s8905_s4 + $0x1b8] sm:$0xff] }
 0xa8f   :  { %v2588_v35 = vsel %vm2587_vm10, %v5767_v40, %v2584_v27  ;;  %v5395_v27 = vld [vmem:[%s8905_s4 + $0x1b0] sm:$0xff] }
 0xa90   :  { %v2593_v20 = vmul.f32 %v2588_v35, %v7538_v24  ;;  %v5273_v24 = vld [vmem:[%s8906_s5 + $0x138] sm:$0xff]  ;;  %v5394_v35 = vld [vmem:[%s8905_s4 + $0x1a8] sm:$0xff] }
 0xa92   :  { %v2599_v49 = vmul.f32 %v7584_v54, %v2593_v20  ;;  %v5393_v20 = vld [vmem:[%s8905_s4 + $0x1a0] sm:$0xff] }
 0xa94   :  { %v7641_v28 = vadd.f32 %v7589_v60, %v2599_v49 }
 0xa96   :  { %5231 = vmatmul.msk.f32.gmra.mxu2 %vm116_vm2, %v7641_v28  ;;  %5232 = vmatpush.xpose.msk.msrb.mxu1 %vm116_vm2, %v7641_v28 }
 0xa97   :  { %5250 = vmatmul.msk.f32.gmra.mxu3 %vm116_vm2, %v7641_v28  ;;  %5259 = vmatmul.msk.f32.gmra.mxu0 %vm116_vm2, %v7641_v28 }
 0xa98   :  { %5260 = vmatpush.xpose.msk.msra.mxu2 %vm116_vm2, %v7641_v28 }
 0xa9a   :  { %5233 = vmatpush.xpose.msk.msrb.mxu1 %vm116_vm2, %v7629_v30 }
 0xa9c   :  { %5261 = vmatpush.xpose.msk.msra.mxu2 %vm116_vm2, %v7629_v30 }
 0xa9e   :  { %5234 = vmatpush.xpose.msk.msrb.mxu1 %vm116_vm2, %v7618_v48 }
 0xaa0   :  { %5262 = vmatpush.xpose.msk.msra.mxu2 %vm116_vm2, %v7618_v48 }
 0xaa2   :  { %5235 = vmatpush.xpose.msk.msrb.mxu1 %vm116_vm2, %v7605_v22 }
 0xaa4   :  { %5263 = vmatpush.xpose.msk.msra.mxu2 %vm116_vm2, %v7605_v22 }
 0xaa6   :  { %5236 = vmatpush.xpose.msk.msrb.mxu1 %vm116_vm2, %v7594_v42 }
 0xaa8   :  { %5264 = vmatpush.xpose.msk.msra.mxu2 %vm116_vm2, %v7594_v42 }
 0xaaa   :  { %2953 = vmatpush.msra.mxu1 %v5273_v24 }
 0xaac   :  { %2954 = vmatpush.msra.mxu1 %v5272_v15  ;;  %v2819_v54 = vpop.f32.mrf.mxu0  ;;  %3090 = vmatpush.msrb.mxu2 %v5294_v0 }
 0xaad   :  { %5265 = vmatmul.msk.f32.vlgmr.msra.gmra.mxu2 %vm116_vm2, %v2819_v54 }
 0xaae   :  { %2955 = vmatpush.msra.mxu1 %v5271_v59  ;;  %3091 = vmatpush.msrb.mxu2 %v5293_v19 }
 0xab0   :  { %2956 = vmatpush.msra.mxu1 %v5270_v38  ;;  %3092 = vmatpush.msrb.mxu2 %v5292_v31  ;;  %v5430_v38 = vld [vmem:[%s8905_s4 + $0x1d8] sm:$0xff] }
 0xab1   :  { %v2643_v14 = vpop.f32.mrf.mxu2  ;;  %v2782_v44 = vpop.f32.mrf.mxu3 }
 0xab2   :  { %5237 = vmatmul.msk.f32.vlgmr.msrb.gmra.mxu1 %vm116_vm2, %v2643_v14  ;;  %3093 = vmatpush.msrb.mxu2 %v5291_v61 }
 0xab3   :  { %5300 = vmatpush.xpose.msk.msrb.mxu1 %vm116_vm2, %v7641_v28 }
 0xab4   :  { %v2822_v51 = vpop.f32.mrf.mxu0  ;;  %3321 = vmatpush.msra.mxu2 %v5328_v18 }
 0xab5   :  { %5266 = vmatmul.msk.f32.gmra.mxu2 %vm116_vm2, %v2822_v51  ;;  %v5429_v51 = vld [vmem:[%s8905_s4 + $0x1d0] sm:$0xff] }
 0xab6   :  { %3322 = vmatpush.msra.mxu2 %v5327_v23 }
 0xab7   :  { %5301 = vmatpush.xpose.msk.msrb.mxu1 %vm116_vm2, %v7629_v30 }
 0xab8   :  { %3323 = vmatpush.msra.mxu2 %v5326_v7 }
 0xab9   :  { %v2646_v60 = vpop.f32.mrf.mxu2  ;;  %v2785_v16 = vpop.f32.mrf.mxu3 }
 0xaba   :  { %5238 = vmatmul.msk.f32.gmra.mxu1 %vm116_vm2, %v2646_v60  ;;  %3324 = vmatpush.msra.mxu2 %v5325_v62  ;;  %v7861_v60 = vld [vmem:[%s8903_s2 + $0x20] sm:$0x3] }
 0xabb   :  { %5302 = vmatpush.xpose.msk.msrb.mxu1 %vm116_vm2, %v7618_v48 }
 0xabf   :  { %5303 = vmatpush.xpose.msk.msrb.mxu1 %vm116_vm2, %v7605_v22 }
 0xac3   :  { %5304 = vmatpush.xpose.msk.msrb.mxu1 %vm116_vm2, %v7594_v42 }
 0xad6   :  { %v2825_v8 = vpop.f32.mrf.mxu0 }
 0xad7   :  { %5267 = vmatmul.msk.f32.gmra.mxu2 %vm116_vm2, %v2825_v8 }
 0xadb   :  { %v2649_v52 = vpop.f32.mrf.mxu2  ;;  %v2788_v1 = vpop.f32.mrf.mxu3 }
 0xadc   :  { %5239 = vmatmul.msk.f32.gmra.mxu1 %vm116_vm2, %v2649_v52  ;;  %v5428_v52 = vld [vmem:[%s8905_s4 + $0x1c8] sm:$0xff] }
 0xade   :  { %v2828_v21 = vpop.f32.mrf.mxu0 }
 0xadf   :  { %5268 = vmatmul.msk.f32.gmra.mxu2 %vm116_vm2, %v2828_v21 }
 0xae3   :  { %v2652_v5 = vpop.f32.mrf.mxu2  ;;  %v2791_v63 = vpop.f32.mrf.mxu3 }
 0xae4   :  { %5240 = vmatmul.msk.f32.gmra.mxu1 %vm116_vm2, %v2652_v5  ;;  %v5427_v5 = vld [vmem:[%s8905_s4 + $0x1c0] sm:$0xff] }
 0xb14   :  { %v2831_v57 = vpop.f32.mrf.mxu0 }
 0xb15   :  { %5269 = vmatmul.msk.f32.gmra.mxu2 %vm116_vm2, %v2831_v57 }
 0xb19   :  { %v2655_v10 = vpop.f32.mrf.mxu2 }
 0xb1a   :  { %v2794_v50 = vpop.f32.mrf.mxu3  ;;  %5241 = vmatmul.msk.f32.gmra.mxu1 %vm116_vm2, %v2655_v10 }
 0xb1b   :  { %5285 = vmatpush.msk.msra.mxu0 %vm73_vm0, %v2794_v50 }
 0xb1d   :  { %3053 = vmatpush.msra.mxu0 %v2791_v63  ;;  %5295 = vmatmul.msk.f32.vlgmr.msrb.gmra.mxu2 %vm116_vm2, %v7594_v42 }
 0xb1e   :  { %3552 = vmatpush.msrb.mxu2 %v5362_v46  ;;  %v5463_v46 = vld [vmem:[%s8905_s4 + $0x1f0] sm:$0xff] }
 0xb1f   :  { %3054 = vmatpush.msra.mxu0 %v2788_v1 }
 0xb20   :  { %3553 = vmatpush.msrb.mxu2 %v5361_v4  ;;  %v5462_v4 = vld [vmem:[%s8905_s4 + $0x1e8] sm:$0xff] }
 0xb21   :  { %3055 = vmatpush.msra.mxu0 %v2785_v16 }
 0xb22   :  { %5274 = vmatmul.msk.f32.vlgmr.msra.gmra.mxu1 %vm116_vm2, %v7594_v42  ;;  %3554 = vmatpush.msrb.mxu2 %v5360_v17  ;;  %v5461_v17 = vld [vmem:[%s8905_s4 + $0x1e0] sm:$0xff] }
 0xb23   :  { %3056 = vmatpush.msra.mxu0 %v2782_v44  ;;  %5334 = vmatpush.xpose.msk.msra.mxu1 %vm116_vm2, %v7641_v28 }
 0xb24   :  { %3555 = vmatpush.msrb.mxu2 %v5359_v9 }
 0xb25   :  { %5296 = vmatmul.msk.f32.gmra.mxu2 %vm116_vm2, %v7605_v22 }
 0xb27   :  { %5335 = vmatpush.xpose.msk.msra.mxu1 %vm116_vm2, %v7629_v30 }
 0xb2a   :  { %5275 = vmatmul.msk.f32.gmra.mxu1 %vm116_vm2, %v7605_v22 }
 0xb2b   :  { %5336 = vmatpush.xpose.msk.msra.mxu1 %vm116_vm2, %v7618_v48 }
 0xb2d   :  { %5297 = vmatmul.msk.f32.gmra.mxu2 %vm116_vm2, %v7618_v48 }
 0xb2f   :  { %5337 = vmatpush.xpose.msk.msra.mxu1 %vm116_vm2, %v7605_v22  ;;  %v7832_v49 = vpop.f32.mrf.mxu1 }
 0xb30   :  { %v2866_v43 = vpop.f32.mrf.mxu2 }
 0xb31   :  { %v7750_v47 = vadd.f32 %v7747_v3, %v2866_v43 }
 0xb32   :  { %5276 = vmatmul.msk.f32.gmra.mxu1 %vm116_vm2, %v7618_v48 }
 0xb33   :  { %5338 = vmatpush.xpose.msk.msra.mxu1 %vm116_vm2, %v7594_v42  ;;  %v2881_v55 = vsel %vm345_vm7, %v7750_v47, -inf }
 0xb34   :  { %2882 = vmax.xlane.f32.xlu2 %v2881_v55 }
 0xb35   :  { %5298 = vmatmul.msk.f32.gmra.mxu2 %vm116_vm2, %v7629_v30 }
 0xb37   :  { %v7836_v24 = vpop.f32.mrf.mxu1 }
 0xb38   :  { %v2869_v39 = vpop.f32.mrf.mxu2 }
 0xb39   :  { %v7766_v56 = vadd.f32 %v7763_v34, %v2869_v39  ;;  %v5464_v39 = vld [vmem:[%s8905_s4 + $0x1f8] sm:$0xff] }
 0xb3a   :  { %5277 = vmatmul.msk.f32.gmra.mxu1 %vm116_vm2, %v7629_v30 }
 0xb3b   :  { %v2884_v45 = vsel %vm345_vm7, %v7766_v56, -inf }
 0xb3c   :  { %2885 = vmax.xlane.f32.xlu0 %v2884_v45 }
 0xb3d   :  { %5299 = vmatmul.msk.f32.gmra.mxu2 %vm116_vm2, %v7641_v28 }
 0xb42   :  { %5278 = vmatmul.msk.f32.gmra.mxu1 %vm116_vm2, %v7641_v28 }
 0xb45   :  { %5329 = vmatmul.msk.f32.vlgmr.msra.gmra.mxu2 %vm116_vm2, %v7594_v42 }
 0xb46   :  { %3783 = vmatpush.msra.mxu2 %v5396_v32 }
 0xb48   :  { %3784 = vmatpush.msra.mxu2 %v5395_v27 }
 0xb4a   :  { %3785 = vmatpush.msra.mxu2 %v5394_v35 }
 0xb4c   :  { %3786 = vmatpush.msra.mxu2 %v5393_v20 }
 0xb4d   :  { %5330 = vmatmul.msk.f32.gmra.mxu2 %vm116_vm2, %v7605_v22 }
 0xb55   :  { %5331 = vmatmul.msk.f32.gmra.mxu2 %vm116_vm2, %v7618_v48 }
 0xb59   :  { %v7840_v15 = vpop.f32.mrf.mxu1 }
 0xb5a   :  { %v2872_v53 = vpop.f32.mrf.mxu2 }
 0xb5b   :  { %v7800_v37 = vadd.f32 %v7797_v41, %v2872_v53 }
 0xb5d   :  { %5332 = vmatmul.msk.f32.gmra.mxu2 %vm116_vm2, %v7629_v30  ;;  %v2887_v11 = vsel %vm345_vm7, %v7800_v37, -inf }
 0xb5e   :  { %2888 = vmax.xlane.f32.xlu1 %v2887_v11 }
 0xb61   :  { %v7846_v59 = vpop.f32.mrf.mxu1 }
 0xb62   :  { %v2875_v40 = vpop.f32.mrf.mxu2 }
 0xb63   :  { %v7812_v2 = vadd.f32 %v7809_v6, %v2875_v40 }
 0xb65   :  { %5333 = vmatmul.msk.f32.gmra.mxu2 %vm116_vm2, %v7641_v28  ;;  %v2890_v29 = vsel %vm345_vm7, %v7812_v2, -inf }
 0xb66   :  { %2891 = vmax.xlane.f32.xlu2 %v2890_v29 }
 0xb6d   :  { %5363 = vmatmul.msk.f32.vlgmr.msrb.gmra.mxu2 %vm116_vm2, %v7594_v42 }
 0xb6e   :  { %4014 = vmatpush.msrb.mxu2 %v5430_v38 }
 0xb70   :  { %4015 = vmatpush.msrb.mxu2 %v5429_v51  ;;  %v7951_v51 = vadd.f32 %v7747_v3, %v7832_v49  ;;  %v7964_v49 = vadd.f32 %v7763_v34, %v7836_v24 }
 0xb72   :  { %4016 = vmatpush.msrb.mxu2 %v5428_v52  ;;  %v2705_v52 = vsel %vm345_vm7, %v7951_v51, -inf }
 0xb74   :  { %4017 = vmatpush.msrb.mxu2 %v5427_v5 }
 0xb75   :  { %5364 = vmatmul.msk.f32.gmra.mxu2 %vm116_vm2, %v7605_v22 }
 0xb7d   :  { %5365 = vmatmul.msk.f32.gmra.mxu2 %vm116_vm2, %v7618_v48 }
 0xb85   :  { %5366 = vmatmul.msk.f32.gmra.mxu2 %vm116_vm2, %v7629_v30 }
 0xb8d   :  { %5367 = vmatmul.msk.f32.gmra.mxu2 %vm116_vm2, %v7641_v28 }
 0xb95   :  { %5397 = vmatmul.msk.f32.vlgmr.msra.gmra.mxu2 %vm116_vm2, %v7594_v42 }
 0xb96   :  { %4245 = vmatpush.msra.mxu2 %v5464_v39 }
 0xb97   :  { %v7853_v54 = vpop.f32.mrf.mxu1 }
 0xb98   :  { %v2878_v14 = vpop.f32.mrf.mxu2  ;;  %4246 = vmatpush.msra.mxu2 %v5463_v46  ;;  %v7979_v24 = vadd.f32 %v7861_v60, %v7853_v54 }
 0xb99   :  { %v7864_v8 = vadd.f32 %v7861_v60, %v2878_v14 }
 0xb9a   :  { %4247 = vmatpush.msra.mxu2 %v5462_v4 }
 0xb9b   :  { %v2893_v21 = vsel %vm358_vm8, %v7864_v8, -inf }
 0xb9c   :  { %2894 = vmax.xlane.f32.xlu0 %v2893_v21  ;;  %4248 = vmatpush.msra.mxu2 %v5461_v17 }
 0xb9d   :  { %5398 = vmatmul.msk.f32.gmra.mxu2 %vm116_vm2, %v7605_v22 }
 0xb9f   :  { %v2958_v0 = vpop.f32.mrf.mxu1 }
 0xba0   :  { %v3095_v19 = vpop.f32.mrf.mxu2 }
 0xba1   :  { %5305 = vmatmul.msk.f32.vlgmr.msrb.gmra.mxu1 %vm116_vm2, %v3095_v19 }
 0xba2   :  { %5368 = vmatpush.xpose.msk.msrb.mxu1 %vm116_vm2, %v7641_v28 }
 0xba5   :  { %5399 = vmatmul.msk.f32.gmra.mxu2 %vm116_vm2, %v7618_v48 }
 0xba6   :  { %5369 = vmatpush.xpose.msk.msrb.mxu1 %vm116_vm2, %v7629_v30 }
 0xba7   :  { %v2883_v44 = vpop.xlane.xlu2 %2882  ;;  %v2961_v31 = vpop.f32.mrf.mxu1 }
 0xba8   :  { %v2896_v61 = vsub.f32 %v7750_v47, %v2883_v44  ;;  %v3098_v16 = vpop.f32.mrf.mxu2  ;;  %v2708_v44 = vsel %vm345_vm7, %v7964_v49, -inf }
 0xba9   :  { %5306 = vmatmul.msk.f32.gmra.mxu1 %vm116_vm2, %v3098_v16 }
 0xbaa   :  { %v2901_v1 = vmul.f32 1.442695, %v2896_v61  ;;  %5370 = vmatpush.xpose.msk.msrb.mxu1 %vm116_vm2, %v7618_v48 }
 0xbac   :  { %5768 = vpow2.f32 %v2901_v1 }
 0xbad   :  { %5400 = vmatmul.msk.f32.gmra.mxu2 %vm116_vm2, %v7629_v30 }
 0xbae   :  { %5371 = vmatpush.xpose.msk.msrb.mxu1 %vm116_vm2, %v7605_v22 }
 0xbaf   :  { %v2886_v63 = vpop.xlane.xlu0 %2885  ;;  %v2964_v57 = vpop.f32.mrf.mxu1 }
 0xbb0   :  { %v2897_v10 = vsub.f32 %v7766_v56, %v2886_v63  ;;  %v3101_v50 = vpop.f32.mrf.mxu2 }
 0xbb1   :  { %5307 = vmatmul.msk.f32.gmra.mxu1 %vm116_vm2, %v3101_v50 }
 0xbb2   :  { %v7893_v18 = vpop.eup %5768  ;;  %v2903_v23 = vmul.f32 1.442695, %v2897_v10  ;;  %5372 = vmatpush.xpose.msk.msrb.mxu1 %vm116_vm2, %v7594_v42 }
 0xbb3   :  { %v2911_v7 = vsel %vm345_vm7, %v7893_v18, 0.0 }
 0xbb4   :  { %5770 = vpow2.f32 %v2903_v23  ;;  %2912 = vadd.xlane.f32.xlu1 %v2911_v7 }
 0xbb5   :  { %5401 = vmatmul.msk.f32.gmra.mxu2 %vm116_vm2, %v7641_v28 }
 0xbb7   :  { %v2967_v62 = vpop.f32.mrf.mxu1 }
 0xbb8   :  { %v3104_v43 = vpop.f32.mrf.mxu2 }
 0xbb9   :  { %5308 = vmatmul.msk.f32.gmra.mxu1 %vm116_vm2, %v3104_v43 }
 0xbba   :  { %v7902_v47 = vpop.eup %5770 }
 0xbbb   :  { %v2914_v55 = vsel %vm345_vm7, %v7902_v47, 0.0 }
 0xbbc   :  { %2915 = vadd.xlane.f32.xlu2 %v2914_v55 }
 0xbbd   :  { %5431 = vmatmul.msk.f32.vlgmr.msrb.gmra.mxu2 %vm116_vm2, %v7594_v42 }
 0xbbf   :  { %v2970_v56 = vpop.f32.mrf.mxu1 }
 0xbc0   :  { %v3107_v45 = vpop.f32.mrf.mxu2  ;;  %5279 = vmatpush.msk.msrb.mxu3 %vm73_vm0, %v2970_v56 }
 0xbc1   :  { %5309 = vmatmul.msk.f32.gmra.mxu1 %vm116_vm2, %v3107_v45 }
 0xbc2   :  { %3003 = vmatpush.msrb.mxu3 %v2967_v62  ;;  %v8016_v62 = vadd.f32 %v7797_v41, %v7840_v15 }
 0xbc4   :  { %3004 = vmatpush.msrb.mxu3 %v2964_v57  ;;  %v2711_v55 = vsel %vm345_vm7, %v8016_v62, -inf }
 0xbc5   :  { %5432 = vmatmul.msk.f32.gmra.mxu2 %vm116_vm2, %v7605_v22 }
 0xbc6   :  { %3005 = vmatpush.msrb.mxu3 %v2961_v31 }
 0xbc8   :  { %v3326_v9 = vpop.f32.mrf.mxu2  ;;  %3006 = vmatpush.msrb.mxu3 %v2958_v0  ;;  %v7968_v0 = vadd.f32 %v7809_v6, %v7846_v59  ;;  %v2717_v59 = vsel %vm358_vm8, %v7979_v24, -inf }
 0xbc9   :  { %5339 = vmatmul.msk.f32.vlgmr.msra.gmra.mxu1 %vm116_vm2, %v3326_v9 }
 0xbca   :  { %5402 = vmatpush.xpose.msk.msra.mxu1 %vm116_vm2, %v7641_v28  ;;  %v2714_v19 = vsel %vm345_vm7, %v7968_v0, -inf }
 0xbcd   :  { %5433 = vmatmul.msk.f32.gmra.mxu2 %vm116_vm2, %v7618_v48 }
 0xbce   :  { %5403 = vmatpush.xpose.msk.msra.mxu1 %vm116_vm2, %v7629_v30 }
 0xbd0   :  { %v3329_v53 = vpop.f32.mrf.mxu2 }
 0xbd1   :  { %v2889_v11 = vpop.xlane.xlu1 %2888  ;;  %5340 = vmatmul.msk.f32.gmra.mxu1 %vm116_vm2, %v3329_v53 }
 0xbd2   :  { %v2898_v40 = vsub.f32 %v7800_v37, %v2889_v11  ;;  %5404 = vmatpush.xpose.msk.msra.mxu1 %vm116_vm2, %v7618_v48 }
 0xbd4   :  { %v2905_v29 = vmul.f32 1.442695, %v2898_v40 }
 0xbd5   :  { %5434 = vmatmul.msk.f32.gmra.mxu2 %vm116_vm2, %v7629_v30 }
 0xbd6   :  { %5772 = vpow2.f32 %v2905_v29  ;;  %5405 = vmatpush.xpose.msk.msra.mxu1 %vm116_vm2, %v7605_v22 }
 0xbd8   :  { %v3332_v32 = vpop.f32.mrf.mxu2 }
 0xbd9   :  { %v2892_v27 = vpop.xlane.xlu2 %2891  ;;  %5341 = vmatmul.msk.f32.gmra.mxu1 %vm116_vm2, %v3332_v32 }
 0xbda   :  { %v2899_v35 = vsub.f32 %v7812_v2, %v2892_v27  ;;  %5406 = vmatpush.xpose.msk.msra.mxu1 %vm116_vm2, %v7594_v42 }
 0xbdc   :  { %v7943_v37 = vpop.eup %5772  ;;  %v2907_v20 = vmul.f32 1.442695, %v2899_v35 }
 0xbdd   :  { %5435 = vmatmul.msk.f32.gmra.mxu2 %vm116_vm2, %v7641_v28  ;;  %v2917_v38 = vsel %vm345_vm7, %v7943_v37, 0.0 }
 0xbde   :  { %5774 = vpow2.f32 %v2907_v20  ;;  %2918 = vadd.xlane.f32.xlu0 %v2917_v38 }
 0xbe0   :  { %v3335_v14 = vpop.f32.mrf.mxu2 }
 0xbe1   :  { %5342 = vmatmul.msk.f32.gmra.mxu1 %vm116_vm2, %v3335_v14 }
 0xbe4   :  { %v7954_v2 = vpop.eup %5774 }
 0xbe5   :  { %5465 = vmatmul.msk.f32.vlgmr.msra.gmra.mxu2 %vm116_vm2, %v7594_v42  ;;  %v2920_v21 = vsel %vm345_vm7, %v7954_v2, 0.0 }
 0xbe6   :  { %2706 = vmax.xlane.f32.xlu0 %v2705_v52  ;;  %2921 = vadd.xlane.f32.xlu1 %v2920_v21 }
 0xbe8   :  { %v3338_v5 = vpop.f32.mrf.mxu2 }
 0xbe9   :  { %5343 = vmatmul.msk.f32.gmra.mxu1 %vm116_vm2, %v3338_v5 }
 0xbed   :  { %5466 = vmatmul.msk.f32.gmra.mxu2 %vm116_vm2, %v7605_v22 }
 0xbee   :  { %2715 = vmax.xlane.f32.xlu0 %v2714_v19  ;;  %2709 = vmax.xlane.f32.xlu1 %v2708_v44 }
 0xbf0   :  { %v3557_v31 = vpop.f32.mrf.mxu2 }
 0xbf1   :  { %5373 = vmatmul.msk.f32.vlgmr.msrb.gmra.mxu1 %vm116_vm2, %v3557_v31 }
 0xbf2   :  { %5436 = vmatpush.xpose.msk.msrb.mxu1 %vm116_vm2, %v7641_v28 }
 0xbf5   :  { %5467 = vmatmul.msk.f32.gmra.mxu2 %vm116_vm2, %v7618_v48 }
 0xbf6   :  { %5437 = vmatpush.xpose.msk.msrb.mxu1 %vm116_vm2, %v7629_v30  ;;  %2718 = vmax.xlane.f32.xlu1 %v2717_v59 }
 0xbf8   :  { %v3560_v61 = vpop.f32.mrf.mxu2 }
 0xbf9   :  { %5374 = vmatmul.msk.f32.gmra.mxu1 %vm116_vm2, %v3560_v61 }
 0xbfa   :  { %5438 = vmatpush.xpose.msk.msrb.mxu1 %vm116_vm2, %v7618_v48 }
 0xbfd   :  { %5468 = vmatmul.msk.f32.gmra.mxu2 %vm116_vm2, %v7629_v30 }
 0xbfe   :  { %5439 = vmatpush.xpose.msk.msrb.mxu1 %vm116_vm2, %v7605_v22 }
 0xc00   :  { %v3563_v54 = vpop.f32.mrf.mxu2 }
 0xc01   :  { %5375 = vmatmul.msk.f32.gmra.mxu1 %vm116_vm2, %v3563_v54 }
 0xc02   :  { %5440 = vmatpush.xpose.msk.msrb.mxu1 %vm116_vm2, %v7594_v42 }
 0xc05   :  { %5469 = vmatmul.msk.f32.gmra.mxu2 %vm116_vm2, %v7641_v28 }
 0xc08   :  { %v3566_v16 = vpop.f32.mrf.mxu2 }
 0xc09   :  { %5376 = vmatmul.msk.f32.gmra.mxu1 %vm116_vm2, %v3566_v16 }
 0xc0f   :  { %v2895_v1 = vpop.xlane.xlu0 %2894 }
 0xc10   :  { %v2900_v63 = vsub.f32 %v7864_v8, %v2895_v1  ;;  %v3569_v57 = vpop.f32.mrf.mxu2 }
 0xc11   :  { %5377 = vmatmul.msk.f32.gmra.mxu1 %vm116_vm2, %v3569_v57 }
 0xc12   :  { %v2909_v10 = vmul.f32 1.442695, %v2900_v63 }
 0xc14   :  { %5776 = vpow2.f32 %v2909_v10 }
 0xc18   :  { %v3788_v50 = vpop.f32.mrf.mxu2 }
 0xc19   :  { %5407 = vmatmul.msk.f32.vlgmr.msra.gmra.mxu1 %vm116_vm2, %v3788_v50 }
 0xc1a   :  { %v8006_v23 = vpop.eup %5776  ;;  %5470 = vmatpush.xpose.msk.msra.mxu1 %vm116_vm2, %v7641_v28 }
 0xc1b   :  { %v2923_v7 = vsel %vm358_vm8, %v8006_v23, 0.0 }
 0xc1c   :  { %2924 = vadd.xlane.f32.xlu2 %v2923_v7 }
 0xc1e   :  { %5471 = vmatpush.xpose.msk.msra.mxu1 %vm116_vm2, %v7629_v30  ;;  %v3142_v8 = vpop.f32.mrf.mxu1 }
 0xc1f   :  { %v8026_v56 = vadd.f32 %v7747_v3, %v3142_v8 }
 0xc20   :  { %v3791_v43 = vpop.f32.mrf.mxu2 }
 0xc21   :  { %5408 = vmatmul.msk.f32.gmra.mxu1 %vm116_vm2, %v3791_v43  ;;  %v3157_v17 = vsel %vm345_vm7, %v8026_v56, -inf }
 0xc22   :  { %5472 = vmatpush.xpose.msk.msra.mxu1 %vm116_vm2, %v7618_v48 }
 0xc24   :  { %2712 = vmax.xlane.f32.xlu2 %v2711_v55 }
 0xc26   :  { %5473 = vmatpush.xpose.msk.msra.mxu1 %vm116_vm2, %v7605_v22  ;;  %v3145_v39 = vpop.f32.mrf.mxu1 }
 0xc27   :  { %v8029_v15 = vadd.f32 %v7763_v34, %v3145_v39  ;;  %v2913_v45 = vpop.xlane.xlu1 %2912 }
 0xc28   :  { %5778 = vrcp.f32 %v2913_v45  ;;  %v3794_v46 = vpop.f32.mrf.mxu2 }
 0xc29   :  { %5409 = vmatmul.msk.f32.gmra.mxu1 %vm116_vm2, %v3794_v46  ;;  %v3160_v4 = vsel %vm345_vm7, %v8029_v15, -inf }
 0xc2a   :  { %5474 = vmatpush.xpose.msk.msra.mxu1 %vm116_vm2, %v7594_v42  ;;  %3161 = vmax.xlane.f32.xlu0 %v3160_v4 }
 0xc2c   :  { %3158 = vmax.xlane.f32.xlu2 %v3157_v17 }
 0xc2e   :  { %v5779_v9 = vpop.eup %5778  ;;  %v3148_v53 = vpop.f32.mrf.mxu1 }
 0xc2f   :  { %v2931_v11 = vmul.f32 %v5779_v9, %v7893_v18  ;;  %v8040_v40 = vadd.f32 %v7797_v41, %v3148_v53  ;;  %v2916_v29 = vpop.xlane.xlu2 %2915 }
 0xc30   :  { %5780 = vrcp.f32 %v2916_v29  ;;  %v3797_v32 = vpop.f32.mrf.mxu2 }
 0xc31   :  { %5280 = vmatmul.msk.f32.vlgmr.msrb.gmra.mxu3 %vm345_vm7, %v2931_v11  ;;  %5410 = vmatmul.msk.f32.gmra.mxu1 %vm116_vm2, %v3797_v32  ;;  %v3163_v27 = vsel %vm345_vm7, %v8040_v40, -inf }
 0xc34   :  { %3164 = vmax.xlane.f32.xlu2 %v3163_v27 }
 0xc36   :  { %v5781_v35 = vpop.eup %5780  ;;  %v3151_v5 = vpop.f32.mrf.mxu1 }
 0xc37   :  { %v2932_v20 = vmul.f32 %v5781_v35, %v7902_v47  ;;  %v8066_v45 = vadd.f32 %v7809_v6, %v3151_v5  ;;  %v5311_v5 = vld [vmem:[%s8906_s5 + $0x148] sm:$0xff] }
 0xc38   :  { %v3800_v38 = vpop.f32.mrf.mxu2 }
 0xc39   :  { %5281 = vmatmul.msk.f32.gmra.mxu3 %vm345_vm7, %v2932_v20  ;;  %5411 = vmatmul.msk.f32.gmra.mxu1 %vm116_vm2, %v3800_v38  ;;  %v3166_v4 = vsel %vm345_vm7, %v8066_v45, -inf  ;;  %v5313_v38 = vld [vmem:[%s8906_s5 + $0x158] sm:$0xff] }
 0xc3a   :  { %3229 = vmatpush.msra.mxu3 %v5313_v38 }
 0xc3e   :  { %v3154_v1 = vpop.f32.mrf.mxu1 }
 0xc3f   :  { %v8082_v29 = vadd.f32 %v7861_v60, %v3154_v1 }
 0xc40   :  { %v4019_v18 = vpop.f32.mrf.mxu2 }
 0xc41   :  { %5441 = vmatmul.msk.f32.vlgmr.msrb.gmra.mxu1 %vm116_vm2, %v4019_v18  ;;  %v3169_v27 = vsel %vm358_vm8, %v8082_v29, -inf }
 0xc48   :  { %v4022_v14 = vpop.f32.mrf.mxu2 }
 0xc49   :  { %5442 = vmatmul.msk.f32.gmra.mxu1 %vm116_vm2, %v4022_v14  ;;  %v5312_v14 = vld [vmem:[%s8906_s5 + $0x150] sm:$0xff] }
 0xc4a   :  { %3230 = vmatpush.msra.mxu3 %v5312_v14 }
 0xc4c   :  { %3231 = vmatpush.msra.mxu3 %v5311_v5 }
 0xc50   :  { %v4025_v52 = vpop.f32.mrf.mxu2 }
 0xc51   :  { %v2919_v21 = vpop.xlane.xlu0 %2918  ;;  %5443 = vmatmul.msk.f32.gmra.mxu1 %vm116_vm2, %v4025_v52 }
 0xc52   :  { %5782 = vrcp.f32 %v2919_v21 }
 0xc58   :  { %v5783_v19 = vpop.eup %5782  ;;  %v4028_v44 = vpop.f32.mrf.mxu2 }
 0xc59   :  { %v2707_v47 = vpop.xlane.xlu0 %2706  ;;  %v2922_v31 = vpop.xlane.xlu1 %2921  ;;  %5444 = vmatmul.msk.f32.gmra.mxu1 %vm116_vm2, %v4028_v44  ;;  %v2933_v59 = vmul.f32 %v5783_v19, %v7943_v37 }
 0xc5a   :  { %v2720_v61 = vsub.f32 %v7951_v51, %v2707_v47  ;;  %5784 = vrcp.f32 %v2922_v31  ;;  %v5310_v47 = vld [vmem:[%s8906_s5 + $0x140] sm:$0xff] }
 0xc5b   :  { %5282 = vmatmul.msk.f32.gmra.mxu3 %vm345_vm7, %v2933_v59 }
 0xc5c   :  { %v2725_v54 = vmul.f32 1.442695, %v2720_v61  ;;  %3232 = vmatpush.msra.mxu3 %v5310_v47 }
 0xc5e   :  { %5786 = vpow2.f32 %v2725_v54 }
 0xc60   :  { %v5785_v16 = vpop.eup %5784  ;;  %v4031_v63 = vpop.f32.mrf.mxu2 }
 0xc61   :  { %v2716_v57 = vpop.xlane.xlu0 %2715  ;;  %v2710_v10 = vpop.xlane.xlu1 %2709  ;;  %5445 = vmatmul.msk.f32.gmra.mxu1 %vm116_vm2, %v4031_v63  ;;  %v2934_v50 = vmul.f32 %v5785_v16, %v7954_v2 }
 0xc62   :  { %v2721_v7 = vsub.f32 %v7964_v49, %v2710_v10  ;;  %v2723_v51 = vsub.f32 %v7968_v0, %v2716_v57  ;;  %v8069_v49 = vpop.f32.mrf.mxu1 }
 0xc63   :  { %5283 = vmatmul.msk.f32.gmra.mxu3 %vm345_vm7, %v2934_v50 }
 0xc64   :  { %v8060_v37 = vpop.eup %5786  ;;  %v2727_v8 = vmul.f32 1.442695, %v2721_v7  ;;  %v2731_v55 = vmul.f32 1.442695, %v2723_v51 }
 0xc65   :  { %v2735_v43 = vsel %vm345_vm7, %v8060_v37, 0.0 }
 0xc66   :  { %2736 = vadd.xlane.f32.xlu1 %v2735_v43  ;;  %5788 = vpow2.f32 %v2727_v8 }
 0xc67   :  { %5790 = vpow2.f32 %v2731_v55  ;;  %v5347_v55 = vld [vmem:[%s8906_s5 + $0x178] sm:$0xff] }
 0xc68   :  { %v4250_v39 = vpop.f32.mrf.mxu2  ;;  %3460 = vmatpush.msrb.mxu3 %v5347_v55 }
 0xc69   :  { %5475 = vmatmul.msk.f32.vlgmr.msra.gmra.mxu1 %vm116_vm2, %v4250_v39  ;;  %v2719_v2 = vpop.xlane.xlu1 %2718 }
 0xc6a   :  { %v2724_v0 = vsub.f32 %v7979_v24, %v2719_v2  ;;  %v3376_v32 = vpop.f32.mrf.mxu1  ;;  %v5345_v2 = vld [vmem:[%s8906_s5 + $0x168] sm:$0xff] }
 0xc6b   :  { %v8089_v20 = vadd.f32 %v7763_v34, %v3376_v32 }
 0xc6c   :  { %v8071_v46 = vpop.eup %5788  ;;  %v2733_v53 = vmul.f32 1.442695, %v2724_v0 }
 0xc6d   :  { %v2738_v17 = vsel %vm345_vm7, %v8071_v46, 0.0  ;;  %v8079_v11 = vpop.eup %5790  ;;  %v3391_v52 = vsel %vm345_vm7, %v8089_v20, -inf }
 0xc6e   :  { %3167 = vmax.xlane.f32.xlu1 %v3166_v4  ;;  %2739 = vadd.xlane.f32.xlu0 %v2738_v17  ;;  %5792 = vpow2.f32 %v2733_v53  ;;  %v2744_v24 = vsel %vm345_vm7, %v8079_v11, 0.0  ;;  %v8139_v4 = vadd.f32 %v7747_v3, %v8069_v49 }
 0xc70   :  { %v4253_v9 = vpop.f32.mrf.mxu2 }
 0xc71   :  { %5476 = vmatmul.msk.f32.gmra.mxu1 %vm116_vm2, %v4253_v9 }
 0xc72   :  { %v3379_v19 = vpop.f32.mrf.mxu1 }
 0xc73   :  { %v8112_v31 = vadd.f32 %v7797_v41, %v3379_v19 }
 0xc74   :  { %v8095_v18 = vpop.eup %5792 }
 0xc75   :  { %v2747_v21 = vsel %vm358_vm8, %v8095_v18, 0.0  ;;  %v3394_v59 = vsel %vm345_vm7, %v8112_v31, -inf }
 0xc76   :  { %2745 = vadd.xlane.f32.xlu1 %v2744_v24  ;;  %3170 = vmax.xlane.f32.xlu0 %v3169_v27  ;;  %v3388_v27 = vsel %vm345_vm7, %v8139_v4, -inf }
 0xc78   :  { %v4256_v35 = vpop.f32.mrf.mxu2 }
 0xc79   :  { %5477 = vmatmul.msk.f32.gmra.mxu1 %vm116_vm2, %v4256_v35 }
 0xc7a   :  { %v3382_v8 = vpop.f32.mrf.mxu1 }
 0xc7b   :  { %v8169_v19 = vadd.f32 %v7809_v6, %v3382_v8 }
 0xc7d   :  { %v3397_v47 = vsel %vm345_vm7, %v8169_v19, -inf }
 0xc7e   :  { %3392 = vmax.xlane.f32.xlu1 %v3391_v52  ;;  %2748 = vadd.xlane.f32.xlu0 %v2747_v21 }
 0xc80   :  { %v4259_v44 = vpop.f32.mrf.mxu2 }
 0xc81   :  { %5478 = vmatmul.msk.f32.gmra.mxu1 %vm116_vm2, %v4259_v44 }
 0xc82   :  { %v3385_v24 = vpop.f32.mrf.mxu1 }
 0xc83   :  { %v8154_v35 = vadd.f32 %v7861_v60, %v3385_v24 }
 0xc85   :  { %v3400_v38 = vsel %vm358_vm8, %v8154_v35, -inf }
 0xc86   :  { %3395 = vmax.xlane.f32.xlu0 %v3394_v59 }
 0xc88   :  { %v4262_v61 = vpop.f32.mrf.mxu2 }
 0xc89   :  { %5479 = vmatmul.msk.f32.gmra.mxu1 %vm116_vm2, %v4262_v61  ;;  %v5381_v61 = vld [vmem:[%s8906_s5 + $0x198] sm:$0xff] }
 0xc8a   :  { %v3604_v5 = vpop.f32.mrf.mxu1 }
 0xc8b   :  { %v8172_v44 = vadd.f32 %v7747_v3, %v3604_v5  ;;  %v5412_v5 = vld [vmem:[%s8906_s5 + $0x1a0] sm:$0xff] }
 0xc8d   :  { %v3619_v59 = vsel %vm345_vm7, %v8172_v44, -inf }
 0xc8f   :  { %v2925_v54 = vpop.xlane.xlu2 %2924 }
 0xc90   :  { %5794 = vrcp.f32 %v2925_v54  ;;  %v5380_v54 = vld [vmem:[%s8906_s5 + $0x190] sm:$0xff] }
 0xc96   :  { %v5795_v16 = vpop.eup %5794 }
 0xc97   :  { %v2713_v1 = vpop.xlane.xlu2 %2712  ;;  %v2935_v63 = vmul.f32 %v5795_v16, %v8006_v23  ;;  %v5346_v23 = vld [vmem:[%s8906_s5 + $0x170] sm:$0xff]  ;;  %v5379_v16 = vld [vmem:[%s8906_s5 + $0x188] sm:$0xff] }
 0xc98   :  { %v2722_v57 = vsub.f32 %v8016_v62, %v2713_v1  ;;  %3461 = vmatpush.msrb.mxu3 %v5346_v23  ;;  %v5378_v1 = vld [vmem:[%s8906_s5 + $0x180] sm:$0xff] }
 0xc99   :  { %5284 = vmatmul.msk.f32.gmra.mxu3 %vm345_vm7, %v2935_v63 }
 0xc9a   :  { %v2729_v10 = vmul.f32 1.442695, %v2722_v57  ;;  %3462 = vmatpush.msrb.mxu3 %v5345_v2  ;;  %v3607_v57 = vpop.f32.mrf.mxu1 }
 0xc9c   :  { %5796 = vpow2.f32 %v2729_v10 }
 0xc9d   :  { %v3162_v50 = vpop.xlane.xlu0 %3161 }
 0xc9e   :  { %v3173_v7 = vsub.f32 %v8029_v15, %v3162_v50 }
 0xc9f   :  { %v3159_v51 = vpop.xlane.xlu2 %3158 }
 0xca0   :  { %v3179_v43 = vmul.f32 1.442695, %v3173_v7  ;;  %v3172_v39 = vsub.f32 %v8026_v56, %v3159_v51  ;;  %v5344_v56 = vld [vmem:[%s8906_s5 + $0x160] sm:$0xff] }
 0xca1   :  { %5314 = vmatmul.msk.f32.vlgmr.msra.gmra.mxu3 %vm116_vm2, %v7594_v42 }
 0xca2   :  { %v8129_v62 = vpop.eup %5796  ;;  %5798 = vpow2.f32 %v3179_v43  ;;  %v3177_v0 = vmul.f32 1.442695, %v3172_v39  ;;  %3463 = vmatpush.msrb.mxu3 %v5344_v56  ;;  %v3610_v23 = vpop.f32.mrf.mxu1  ;;  %v8217_v56 = vadd.f32 %v7763_v34, %v3607_v57  ;;  %v5413_v34 = vld [vmem:[%s8906_s5 + $0x1a8] sm:$0xff] }
 0xca3   :  { %v2741_v15 = vsel %vm345_vm7, %v8129_v62, 0.0 }
 0xca4   :  { %2742 = vadd.xlane.f32.xlu2 %v2741_v15  ;;  %5800 = vpow2.f32 %v3177_v0  ;;  %3691 = vmatpush.msra.mxu3 %v5381_v61 }
 0xca6   :  { %3692 = vmatpush.msra.mxu3 %v5380_v54 }
 0xca7   :  { %v3165_v17 = vpop.xlane.xlu2 %3164 }
 0xca8   :  { %v8144_v9 = vpop.eup %5798  ;;  %v3174_v53 = vsub.f32 %v8040_v40, %v3165_v17  ;;  %3693 = vmatpush.msra.mxu3 %v5379_v16 }
 0xca9   :  { %5315 = vmatmul.msk.f32.gmra.mxu3 %vm116_vm2, %v7605_v22  ;;  %v3190_v32 = vsel %vm345_vm7, %v8144_v9, 0.0 }
 0xcaa   :  { %v3181_v49 = vmul.f32 1.442695, %v3174_v53  ;;  %3191 = vadd.xlane.f32.xlu1 %v3190_v32  ;;  %v8156_v40 = vpop.eup %5800  ;;  %3694 = vmatpush.msra.mxu3 %v5378_v1 }
 0xcab   :  { %v3187_v52 = vsel %vm345_vm7, %v8156_v40, 0.0 }
 0xcac   :  { %5802 = vpow2.f32 %v3181_v49  ;;  %3389 = vmax.xlane.f32.xlu2 %v3388_v27  ;;  %v8230_v49 = vpop.f32.mrf.mxu1 }
 0xcb1   :  { %5316 = vmatmul.msk.f32.gmra.mxu3 %vm116_vm2, %v7618_v48 }
 0xcb2   :  { %v8162_v14 = vpop.eup %5802  ;;  %3401 = vmax.xlane.f32.xlu1 %v3400_v38 }
 0xcb3   :  { %v3193_v21 = vsel %vm345_vm7, %v8162_v14, 0.0 }
 0xcb4   :  { %3188 = vadd.xlane.f32.xlu2 %v3187_v52  ;;  %3194 = vadd.xlane.f32.xlu0 %v3193_v21  ;;  %v3622_v52 = vsel %vm345_vm7, %v8217_v56, -inf  ;;  %v3616_v16 = vpop.f32.mrf.mxu1 }
 0xcb9   :  { %5317 = vmatmul.msk.f32.gmra.mxu3 %vm116_vm2, %v7629_v30 }
 0xcbc   :  { %3398 = vmax.xlane.f32.xlu2 %v3397_v47  ;;  %3620 = vmax.xlane.f32.xlu0 %v3619_v59  ;;  %v8249_v47 = vadd.f32 %v7797_v41, %v3610_v23 }
 0xcbe   :  { %v3625_v57 = vsel %vm345_vm7, %v8249_v47, -inf }
 0xcc1   :  { %5318 = vmatmul.msk.f32.gmra.mxu3 %vm116_vm2, %v7641_v28 }
 0xcc9   :  { %5348 = vmatmul.msk.f32.vlgmr.msrb.gmra.mxu3 %vm116_vm2, %v7594_v42 }
 0xcd1   :  { %5349 = vmatmul.msk.f32.gmra.mxu3 %vm116_vm2, %v7605_v22 }
 0xcd9   :  { %5350 = vmatmul.msk.f32.gmra.mxu3 %vm116_vm2, %v7618_v48  ;;  %v2737_v63 = vpop.xlane.xlu1 %2736 }
 0xcda   :  { %5804 = vrcp.f32 %v2737_v63 }
 0xce0   :  { %v5805_v10 = vpop.eup %5804 }
 0xce1   :  { %v2755_v50 = vmul.f32 %v5805_v10, %v8060_v37  ;;  %5351 = vmatmul.msk.f32.gmra.mxu3 %vm116_vm2, %v7629_v30  ;;  %v3168_v7 = vpop.xlane.xlu1 %3167  ;;  %v2740_v51 = vpop.xlane.xlu0 %2739  ;;  %v8259_v10 = vadd.f32 %v7861_v60, %v3616_v16 }
 0xce2   :  { %v3175_v8 = vsub.f32 %v8066_v45, %v3168_v7  ;;  %5806 = vrcp.f32 %v2740_v51 }
 0xce3   :  { %5286 = vmatmul.msk.f32.vlgmr.msra.gmra.mxu0 %vm345_vm7, %v2755_v50  ;;  %v3631_v7 = vsel %vm358_vm8, %v8259_v10, -inf }
 0xce4   :  { %v3183_v43 = vmul.f32 1.442695, %v3175_v8  ;;  %v3835_v8 = vpop.f32.mrf.mxu1 }
 0xce5   :  { %v8274_v60 = vadd.f32 %v7747_v3, %v3835_v8  ;;  %v5449_v3 = vld [vmem:[%s8906_s5 + $0x1d8] sm:$0xff] }
 0xce6   :  { %5808 = vpow2.f32 %v3183_v43 }
 0xce8   :  { %v5807_v55 = vpop.eup %5806 }
 0xce9   :  { %5352 = vmatmul.msk.f32.gmra.mxu3 %vm116_vm2, %v7641_v28  ;;  %v8207_v39 = vpop.xlane.xlu1 %2745  ;;  %v3171_v37 = vpop.xlane.xlu0 %3170  ;;  %v2756_v15 = vmul.f32 %v5807_v55, %v8071_v46  ;;  %v5415_v46 = vld [vmem:[%s8906_s5 + $0x1b8] sm:$0xff]  ;;  %v3850_v55 = vsel %vm345_vm7, %v8274_v60, -inf }
 0xcea   :  { %v3176_v2 = vsub.f32 %v8082_v29, %v3171_v37  ;;  %v5414_v29 = vld [vmem:[%s8906_s5 + $0x1b0] sm:$0xff]  ;;  %3922 = vmatpush.msrb.mxu3 %v5415_v46 }
 0xceb   :  { %5287 = vmatmul.msk.f32.gmra.mxu0 %vm345_vm7, %v2756_v15 }
 0xcec   :  { %v8211_v0 = vpop.eup %5808  ;;  %v3185_v45 = vmul.f32 1.442695, %v3176_v2  ;;  %3923 = vmatpush.msrb.mxu3 %v5414_v29  ;;  %v5448_v2 = vld [vmem:[%s8906_s5 + $0x1d0] sm:$0xff] }
 0xced   :  { %v3196_v17 = vsel %vm345_vm7, %v8211_v0, 0.0 }
 0xcee   :  { %3197 = vadd.xlane.f32.xlu2 %v3196_v17  ;;  %5810 = vpow2.f32 %v3185_v45  ;;  %3924 = vmatpush.msrb.mxu3 %v5413_v34  ;;  %v5447_v17 = vld [vmem:[%s8906_s5 + $0x1c8] sm:$0xff] }
 0xcf0   :  { %3925 = vmatpush.msrb.mxu3 %v5412_v5 }
 0xcf1   :  { %5382 = vmatmul.msk.f32.vlgmr.msra.gmra.mxu3 %vm116_vm2, %v7594_v42  ;;  %v3393_v53 = vpop.xlane.xlu1 %3392  ;;  %v8227_v32 = vpop.xlane.xlu0 %2748 }
 0xcf2   :  { %v3404_v24 = vsub.f32 %v8089_v20, %v3393_v53  ;;  %v8241_v20 = vpop.f32.mrf.mxu3  ;;  %4153 = vmatpush.msra.mxu3 %v5449_v3 }
 0xcf4   :  { %v3410_v27 = vmul.f32 1.442695, %v3404_v24  ;;  %v8235_v38 = vpop.eup %5810  ;;  %4154 = vmatpush.msra.mxu3 %v5448_v2  ;;  %v5446_v24 = vld [vmem:[%s8906_s5 + $0x1c0] sm:$0xff] }
 0xcf5   :  { %v3199_v21 = vsel %vm358_vm8, %v8235_v38, 0.0 }
 0xcf6   :  { %5812 = vpow2.f32 %v3410_v27  ;;  %3623 = vmax.xlane.f32.xlu2 %v3622_v52  ;;  %3200 = vadd.xlane.f32.xlu1 %v3199_v21 }
 0xcf7   :  { %4155 = vmatpush.msra.mxu3 %v5447_v17 }
 0xcf9   :  { %5383 = vmatmul.msk.f32.gmra.mxu3 %vm116_vm2, %v7605_v22  ;;  %v3396_v59 = vpop.xlane.xlu0 %3395 }
 0xcfa   :  { %v3405_v61 = vsub.f32 %v8112_v31, %v3396_v59  ;;  %v8263_v31 = vpop.f32.mrf.mxu3  ;;  %4156 = vmatpush.msra.mxu3 %v5446_v24 }
 0xcfc   :  { %v8252_v54 = vpop.eup %5812  ;;  %v3412_v1 = vmul.f32 1.442695, %v3405_v61  ;;  %v3838_v61 = vpop.f32.mrf.mxu1 }
 0xcfd   :  { %v3421_v63 = vsel %vm345_vm7, %v8252_v54, 0.0 }
 0xcfe   :  { %3422 = vadd.xlane.f32.xlu2 %v3421_v63  ;;  %5814 = vpow2.f32 %v3412_v1  ;;  %3626 = vmax.xlane.f32.xlu1 %v3625_v57  ;;  %v8324_v57 = vadd.f32 %v7809_v6, %v8230_v49 }
 0xd01   :  { %5384 = vmatmul.msk.f32.gmra.mxu3 %vm116_vm2, %v7618_v48 }
 0xd02   :  { %v8276_v43 = vpop.f32.mrf.mxu3 }
 0xd04   :  { %v8265_v50 = vpop.eup %5814  ;;  %v3841_v49 = vpop.f32.mrf.mxu1 }
 0xd05   :  { %v3424_v51 = vsel %vm345_vm7, %v8265_v50, 0.0 }
 0xd06   :  { %3632 = vmax.xlane.f32.xlu2 %v3631_v7  ;;  %3425 = vadd.xlane.f32.xlu1 %v3424_v51 }
 0xd09   :  { %5385 = vmatmul.msk.f32.gmra.mxu3 %vm116_vm2, %v7629_v30 }
 0xd0a   :  { %v8282_v23 = vpop.f32.mrf.mxu3 }
 0xd0e   :  { %3851 = vmax.xlane.f32.xlu1 %v3850_v55 }
 0xd11   :  { %5386 = vmatmul.msk.f32.gmra.mxu3 %vm116_vm2, %v7641_v28 }
 0xd17   :  { %v2743_v37 = vpop.xlane.xlu2 %2742 }
 0xd18   :  { %5816 = vrcp.f32 %v2743_v37 }
 0xd19   :  { %5416 = vmatmul.msk.f32.vlgmr.msrb.gmra.mxu3 %vm116_vm2, %v7594_v42  ;;  %5818 = vrcp.f32 %v8207_v39 }
 0xd1c   :  { %v8289_v15 = vpop.f32.mrf.mxu3 }
 0xd1d   :  { %v8294_v45 = vpop.xlane.xlu1 %3191 }
 0xd1e   :  { %v5817_v53 = vpop.eup %5816 }
 0xd1f   :  { %v3390_v46 = vpop.xlane.xlu2 %3389  ;;  %v2757_v29 = vmul.f32 %v5817_v53, %v8129_v62  ;;  %v5819_v52 = vpop.eup %5818 }
 0xd20   :  { %v3403_v34 = vsub.f32 %v8139_v4, %v3390_v46  ;;  %v2758_v4 = vmul.f32 %v5819_v52, %v8079_v11  ;;  %v8356_v52 = vld [vmem:[%s8903_s2 + $0x8] sm:$0xff] }
 0xd21   :  { %5288 = vmatmul.msk.f32.gmra.mxu0 %vm345_vm7, %v2757_v29  ;;  %5417 = vmatmul.msk.f32.gmra.mxu3 %vm116_vm2, %v7605_v22 }
 0xd22   :  { %v3408_v27 = vmul.f32 1.442695, %v3403_v34 }
 0xd24   :  { %5820 = vpow2.f32 %v3408_v27  ;;  %v8308_v39 = vpop.f32.mrf.mxu3  ;;  %v3844_v27 = vpop.f32.mrf.mxu1 }
 0xd25   :  { %v3402_v21 = vpop.xlane.xlu1 %3401  ;;  %5822 = vrcp.f32 %v8227_v32 }
 0xd26   :  { %v3407_v62 = vsub.f32 %v8154_v35, %v3402_v21  ;;  %v8359_v21 = vadd.f32 %v8356_v52, %v3838_v61 }
 0xd27   :  { %v3189_v5 = vpop.xlane.xlu2 %3188  ;;  %v8312_v59 = vpop.xlane.xlu0 %3194 }
 0xd28   :  { %v3416_v16 = vmul.f32 1.442695, %v3407_v62  ;;  %v8362_v62 = vadd.f32 %v7809_v6, %v3844_v27  ;;  %v5482_v6 = vld [vmem:[%s8906_s5 + $0x1f0] sm:$0xff] }
 0xd29   :  { %5289 = vmatmul.msk.f32.gmra.mxu0 %vm345_vm7, %v2758_v4  ;;  %5418 = vmatmul.msk.f32.gmra.mxu3 %vm116_vm2, %v7618_v48  ;;  %v5483_v4 = vld [vmem:[%s8906_s5 + $0x1f8] sm:$0xff] }
 0xd2a   :  { %v8318_v1 = vpop.eup %5820  ;;  %5824 = vpow2.f32 %v3416_v16  ;;  %v3853_v16 = vsel %vm345_vm7, %v8359_v21, -inf  ;;  %4384 = vmatpush.msrb.mxu3 %v5483_v4  ;;  %v3859_v61 = vsel %vm345_vm7, %v8362_v62, -inf }
 0xd2b   :  { %v3418_v32 = vsel %vm345_vm7, %v8318_v1, 0.0  ;;  %v5823_v63 = vpop.eup %5822 }
 0xd2c   :  { %v3237_v35 = vpop.f32.mrf.mxu3  ;;  %3419 = vadd.xlane.f32.xlu0 %v3418_v32  ;;  %v2759_v51 = vmul.f32 %v5823_v63, %v8095_v18  ;;  %v3628_v18 = vsel %vm345_vm7, %v8324_v57, -inf  ;;  %4385 = vmatpush.msrb.mxu3 %v5482_v6  ;;  %v5480_v63 = vld [vmem:[%s8906_s5 + $0x1e0] sm:$0xff] }
 0xd2f   :  { %v3399_v11 = vpop.xlane.xlu2 %3398  ;;  %v3621_v7 = vpop.xlane.xlu0 %3620 }
 0xd30   :  { %v8327_v8 = vpop.eup %5824  ;;  %v3406_v55 = vsub.f32 %v8169_v19, %v3399_v11  ;;  %v3634_v37 = vsub.f32 %v8172_v44, %v3621_v7  ;;  %v8339_v19 = vadd.f32 %v7797_v41, %v3841_v49  ;;  %v3847_v49 = vpop.f32.mrf.mxu1 }
 0xd31   :  { %5290 = vmatmul.msk.f32.gmra.mxu0 %vm345_vm7, %v2759_v51  ;;  %5419 = vmatmul.msk.f32.gmra.mxu3 %vm116_vm2, %v7629_v30  ;;  %v3430_v3 = vsel %vm358_vm8, %v8327_v8, 0.0 }
 0xd32   :  { %v3414_v2 = vmul.f32 1.442695, %v3406_v55  ;;  %v3639_v17 = vmul.f32 1.442695, %v3634_v37  ;;  %3431 = vadd.xlane.f32.xlu2 %v3430_v3  ;;  %v3856_v44 = vsel %vm345_vm7, %v8339_v19, -inf }
 0xd34   :  { %5826 = vpow2.f32 %v3414_v2  ;;  %v3240_v53 = vpop.f32.mrf.mxu3  ;;  %3629 = vmax.xlane.f32.xlu0 %v3628_v18 }
 0xd35   :  { %5828 = vpow2.f32 %v3639_v17 }
 0xd36   :  { %5830 = vrcp.f32 %v3189_v5  ;;  %v5481_v5 = vld [vmem:[%s8906_s5 + $0x1e8] sm:$0xff]  ;;  %s4935_s5 = sshll.u32 %s6003_s0, 4  ;;  %s4936_s5 = int_to_ptr.vmem [resolvable:$true] %s4935_s5 }
 0xd37   :  { %4386 = vmatpush.msrb.mxu3 %v5481_v5  ;;  %5832 = vrcp.f32 %v8294_v45 }
 0xd38   :  { %5834 = vrcp.f32 %v8312_v59 }
 0xd39   :  { %5420 = vmatmul.msk.f32.gmra.mxu3 %vm116_vm2, %v7641_v28 }
 0xd3a   :  { %v8345_v46 = vpop.eup %5826  ;;  %3857 = vmax.xlane.f32.xlu2 %v3856_v44  ;;  %4387 = vmatpush.msrb.mxu3 %v5480_v63 }
 0xd3b   :  { %v8347_v29 = vpop.eup %5828  ;;  %v3427_v24 = vsel %vm345_vm7, %v8345_v46, 0.0 }
 0xd3c   :  { %v3243_v34 = vpop.f32.mrf.mxu3  ;;  %3428 = vadd.xlane.f32.xlu0 %v3427_v24  ;;  %v3649_v41 = vsel %vm345_vm7, %v8347_v29, 0.0  ;;  %v5831_v11 = vpop.eup %5830 }
 0xd3d   :  { %3650 = vadd.xlane.f32.xlu1 %v3649_v41  ;;  %v3207_v7 = vmul.f32 %v5831_v11, %v8156_v40  ;;  %v5833_v55 = vpop.eup %5832 }
 0xd3e   :  { %v3208_v3 = vmul.f32 %v5833_v55, %v8144_v9  ;;  %v5835_v45 = vpop.eup %5834 }
 0xd41   :  { %5450 = vmatmul.msk.f32.vlgmr.msra.gmra.mxu3 %vm116_vm2, %v7594_v42 }
 0xd44   :  { %v3246_v32 = vpop.f32.mrf.mxu3  ;;  %3854 = vmax.xlane.f32.xlu0 %v3853_v16 }
 0xd45   :  { %3860 = vmax.xlane.f32.xlu1 %v3859_v61  ;;  %5319 = vmatpush.msk.msrb.mxu0 %vm73_vm0, %v3246_v32 }
 0xd47   :  { %3279 = vmatpush.msrb.mxu0 %v3243_v34  ;;  %v4066_v34 = vpop.f32.mrf.mxu1 }
 0xd49   :  { %3280 = vmatpush.msrb.mxu0 %v3240_v53  ;;  %5451 = vmatmul.msk.f32.gmra.mxu3 %vm116_vm2, %v7605_v22 }
 0xd4b   :  { %3281 = vmatpush.msrb.mxu0 %v3237_v35 }
 0xd4c   :  { %v3465_v51 = vpop.f32.mrf.mxu3 }
 0xd4d   :  { %3282 = vmatpush.msrb.mxu0 %v8308_v39  ;;  %v3209_v39 = vmul.f32 %v5835_v45, %v8162_v14 }
 0xd4e   :  { %5320 = vmatmul.msk.f32.vlgmr.msrb.gmra.mxu0 %vm345_vm7, %v3207_v7 }
 0xd4f   :  { %v8428_v5 = vpop.f32.mrf.mxu1 }
 0xd51   :  { %5452 = vmatmul.msk.f32.gmra.mxu3 %vm116_vm2, %v7618_v48 }
 0xd54   :  { %v3468_v37 = vpop.f32.mrf.mxu3 }
 0xd56   :  { %5321 = vmatmul.msk.f32.gmra.mxu0 %vm345_vm7, %v3208_v3 }
 0xd59   :  { %5453 = vmatmul.msk.f32.gmra.mxu3 %vm116_vm2, %v7629_v30 }
 0xd5c   :  { %v3471_v40 = vpop.f32.mrf.mxu3 }
 0xd5e   :  { %5322 = vmatmul.msk.f32.gmra.mxu0 %vm345_vm7, %v3209_v39  ;;  %v4072_v39 = vpop.f32.mrf.mxu1 }
 0xd61   :  { %5454 = vmatmul.msk.f32.gmra.mxu3 %vm116_vm2, %v7641_v28  ;;  %v3198_v35 = vpop.xlane.xlu2 %3197 }
 0xd62   :  { %5836 = vrcp.f32 %v3198_v35 }
 0xd64   :  { %v3474_v59 = vpop.f32.mrf.mxu3 }
 0xd68   :  { %v5837_v2 = vpop.eup %5836 }
 0xd69   :  { %5484 = vmatmul.msk.f32.vlgmr.msrb.gmra.mxu3 %vm116_vm2, %v7594_v42  ;;  %v3624_v9 = vpop.xlane.xlu2 %3623  ;;  %v3210_v17 = vmul.f32 %v5837_v2, %v8211_v0  ;;  %v3201_v53 = vpop.xlane.xlu1 %3200 }
 0xd6a   :  { %v3635_v18 = vsub.f32 %v8217_v56, %v3624_v9  ;;  %5838 = vrcp.f32 %v3201_v53  ;;  %v4075_v53 = vpop.f32.mrf.mxu1 }
 0xd6b   :  { %5323 = vmatmul.msk.f32.gmra.mxu0 %vm345_vm7, %v3210_v17 }
 0xd6c   :  { %v3641_v14 = vmul.f32 1.442695, %v3635_v18  ;;  %v3477_v44 = vpop.f32.mrf.mxu3 }
 0xd6d   :  { %5353 = vmatpush.msk.msra.mxu0 %vm73_vm0, %v3477_v44 }
 0xd6e   :  { %5840 = vpow2.f32 %v3641_v14  ;;  %v8472_v14 = vld [vmem:[%s8903_s2 + $0x18] sm:$0xff] }
 0xd6f   :  { %3510 = vmatpush.msra.mxu0 %v3474_v59  ;;  %v8475_v44 = vadd.f32 %v8472_v14, %v4075_v53 }
 0xd70   :  { %v5839_v24 = vpop.eup %5838 }
 0xd71   :  { %3511 = vmatpush.msra.mxu0 %v3471_v40  ;;  %5485 = vmatmul.msk.f32.gmra.mxu3 %vm116_vm2, %v7605_v22  ;;  %v8408_v42 = vpop.xlane.xlu2 %3422  ;;  %v3627_v0 = vpop.xlane.xlu1 %3626  ;;  %v3211_v56 = vmul.f32 %v5839_v24, %v8235_v38  ;;  %v8420_v22 = vld [vmem:[%s8903_s2 + $0x20] sm:$0x3]  ;;  %v4090_v24 = vsel %vm345_vm7, %v8475_v44, -inf }
 0xd72   :  { %v3636_v41 = vsub.f32 %v8249_v47, %v3627_v0  ;;  %v8423_v38 = vadd.f32 %v8420_v22, %v3847_v49  ;;  %v8456_v49 = vld [vmem:[%s8903_s2 + $0x10] sm:$0xff] }
 0xd73   :  { %3512 = vmatpush.msra.mxu0 %v3468_v37 }
 0xd74   :  { %v8412_v27 = vpop.eup %5840  ;;  %5324 = vmatmul.msk.f32.gmra.mxu0 %vm345_vm7, %v3211_v56  ;;  %v3696_v4 = vpop.f32.mrf.mxu3  ;;  %v3643_v16 = vmul.f32 1.442695, %v3636_v41 }
 0xd75   :  { %3513 = vmatpush.msra.mxu0 %v3465_v51  ;;  %v3652_v32 = vsel %vm345_vm7, %v8412_v27, 0.0  ;;  %v3862_v51 = vsel %vm358_vm8, %v8423_v38, -inf }
 0xd76   :  { %3653 = vadd.xlane.f32.xlu0 %v3652_v32  ;;  %5842 = vpow2.f32 %v3643_v16 }
 0xd79   :  { %5486 = vmatmul.msk.f32.gmra.mxu3 %vm116_vm2, %v7618_v48  ;;  %v3633_v47 = vpop.xlane.xlu2 %3632  ;;  %v3426_v6 = vpop.xlane.xlu1 %3425  ;;  %v8441_v48 = vld [vmem:[%s8903_s2] sm:$0xff] }
 0xd7a   :  { %v3638_v61 = vsub.f32 %v8259_v10, %v3633_v47  ;;  %v8444_v10 = vadd.f32 %v8441_v48, %v4066_v34 }
 0xd7c   :  { %v3647_v63 = vmul.f32 1.442695, %v3638_v61  ;;  %v3699_v11 = vpop.f32.mrf.mxu3  ;;  %v8430_v7 = vpop.eup %5842 }
 0xd7d   :  { %v3655_v55 = vsel %vm345_vm7, %v8430_v7, 0.0 }
 0xd7e   :  { %5844 = vpow2.f32 %v3647_v63  ;;  %3863 = vmax.xlane.f32.xlu0 %v3862_v51  ;;  %3656 = vadd.xlane.f32.xlu2 %v3655_v55 }
 0xd81   :  { %5487 = vmatmul.msk.f32.gmra.mxu3 %vm116_vm2, %v7629_v30  ;;  %v3852_v37 = vpop.xlane.xlu1 %3851  ;;  %v4081_v30 = vsel %vm345_vm7, %v8444_v10, -inf }
 0xd82   :  { %v3865_v3 = vsub.f32 %v8274_v60, %v3852_v37  ;;  %v8459_v60 = vadd.f32 %v8456_v49, %v4072_v39 }
 0xd84   :  { %v8447_v45 = vpop.eup %5844  ;;  %v3702_v40 = vpop.f32.mrf.mxu3  ;;  %v3870_v35 = vmul.f32 1.442695, %v3865_v3  ;;  %v4087_v17 = vsel %vm345_vm7, %v8459_v60, -inf }
 0xd85   :  { %v3661_v59 = vsel %vm358_vm8, %v8447_v45, 0.0 }
 0xd86   :  { %3662 = vadd.xlane.f32.xlu0 %v3661_v59  ;;  %5846 = vpow2.f32 %v3870_v35  ;;  %4082 = vmax.xlane.f32.xlu2 %v4081_v30 }
 0xd89   :  { %5488 = vmatmul.msk.f32.gmra.mxu3 %vm116_vm2, %v7641_v28 }
 0xd8c   :  { %v3705_v2 = vpop.f32.mrf.mxu3  ;;  %v8463_v9 = vpop.eup %5846 }
 0xd8d   :  { %v3880_v18 = vsel %vm345_vm7, %v8463_v9, 0.0 }
 0xd8e   :  { %4088 = vmax.xlane.f32.xlu0 %v4087_v17  ;;  %3881 = vadd.xlane.f32.xlu2 %v3880_v18 }
 0xd94   :  { %v3708_v28 = vpop.f32.mrf.mxu3 }
 0xd95   :  { %5387 = vmatpush.msk.msrb.mxu0 %vm73_vm0, %v3708_v28 }
 0xd96   :  { %4091 = vmax.xlane.f32.xlu2 %v4090_v24 }
 0xd97   :  { %3741 = vmatpush.msrb.mxu0 %v3705_v2 }
 0xd99   :  { %3742 = vmatpush.msrb.mxu0 %v3702_v40  ;;  %v4078_v40 = vpop.f32.mrf.mxu1 }
 0xd9b   :  { %3743 = vmatpush.msrb.mxu0 %v3699_v11 }
 0xd9c   :  { %v8480_v34 = vpop.f32.mrf.mxu3 }
 0xd9d   :  { %3744 = vmatpush.msrb.mxu0 %v3696_v4 }
 0xd9f   :  { %v3420_v0 = vpop.xlane.xlu0 %3419 }
 0xda0   :  { %5848 = vrcp.f32 %v3420_v0 }
 0xda1   :  { %5850 = vrcp.f32 %v8408_v42  ;;  %v4297_v28 = vpop.f32.mrf.mxu1 }
 0xda4   :  { %v3930_v56 = vpop.f32.mrf.mxu3 }
 0xda5   :  { %v3432_v41 = vpop.xlane.xlu2 %3431 }
 0xda6   :  { %v5849_v16 = vpop.eup %5848 }
 0xda7   :  { %v3438_v32 = vmul.f32 %v5849_v16, %v8318_v1  ;;  %v3630_v47 = vpop.xlane.xlu0 %3629  ;;  %v5851_v51 = vpop.eup %5850 }
 0xda8   :  { %v3637_v61 = vsub.f32 %v8324_v57, %v3630_v47  ;;  %v3439_v3 = vmul.f32 %v5851_v51, %v8252_v54 }
 0xda9   :  { %5354 = vmatmul.msk.f32.vlgmr.msra.gmra.mxu0 %vm345_vm7, %v3438_v32  ;;  %v4300_v51 = vpop.f32.mrf.mxu1 }
 0xdaa   :  { %v3645_v63 = vmul.f32 1.442695, %v3637_v61 }
 0xdac   :  { %5852 = vpow2.f32 %v3645_v63  ;;  %v3933_v11 = vpop.f32.mrf.mxu3 }
 0xdad   :  { %v3858_v55 = vpop.xlane.xlu2 %3857  ;;  %5854 = vrcp.f32 %v3426_v6 }
 0xdae   :  { %v3867_v4 = vsub.f32 %v8339_v19, %v3858_v55  ;;  %v8495_v19 = vadd.f32 %v8356_v52, %v8428_v5 }
 0xdaf   :  { %v3429_v37 = vpop.xlane.xlu0 %3428 }
 0xdb0   :  { %v3874_v42 = vmul.f32 1.442695, %v3867_v4  ;;  %v3651_v39 = vpop.xlane.xlu1 %3650  ;;  %v4084_v0 = vsel %vm345_vm7, %v8495_v19, -inf  ;;  %v8529_v4 = vadd.f32 %v8356_v52, %v4300_v51 }
 0xdb1   :  { %5355 = vmatmul.msk.f32.gmra.mxu0 %vm345_vm7, %v3439_v3 }
 0xdb2   :  { %v8489_v1 = vpop.eup %5852  ;;  %5856 = vpow2.f32 %v3874_v42  ;;  %v4315_v42 = vsel %vm345_vm7, %v8529_v4, -inf }
 0xdb3   :  { %v3658_v57 = vsel %vm345_vm7, %v8489_v1, 0.0  ;;  %v5855_v35 = vpop.eup %5854  ;;  %5858 = vrcp.f32 %v3429_v37 }
 0xdb4   :  { %v3936_v59 = vpop.f32.mrf.mxu3  ;;  %3659 = vadd.xlane.f32.xlu1 %v3658_v57  ;;  %v3440_v6 = vmul.f32 %v5855_v35, %v8265_v50 }
 0xdb7   :  { %v3855_v54 = vpop.xlane.xlu0 %3854 }
 0xdb8   :  { %v8498_v30 = vpop.eup %5856  ;;  %v3866_v2 = vsub.f32 %v8359_v21, %v3855_v54  ;;  %v3861_v17 = vpop.xlane.xlu1 %3860  ;;  %v8508_v21 = vadd.f32 %v8441_v48, %v4297_v28 }
 0xdb9   :  { %v3868_v18 = vsub.f32 %v8362_v62, %v3861_v17  ;;  %5356 = vmatmul.msk.f32.gmra.mxu0 %vm345_vm7, %v3440_v6  ;;  %v3886_v53 = vsel %vm345_vm7, %v8498_v30, 0.0  ;;  %v5859_v50 = vpop.eup %5858 }
 0xdba   :  { %v3872_v24 = vmul.f32 1.442695, %v3866_v2  ;;  %3887 = vadd.xlane.f32.xlu0 %v3886_v53  ;;  %v3441_v62 = vmul.f32 %v5859_v50, %v8345_v46  ;;  %v4312_v32 = vsel %vm345_vm7, %v8508_v21, -inf }
 0xdbb   :  { %v3876_v5 = vmul.f32 1.442695, %v3868_v18 }
 0xdbc   :  { %5860 = vpow2.f32 %v3872_v24  ;;  %v3939_v16 = vpop.f32.mrf.mxu3  ;;  %4085 = vmax.xlane.f32.xlu1 %v4084_v0 }
 0xdbd   :  { %5862 = vpow2.f32 %v3876_v5  ;;  %5421 = vmatpush.msk.msra.mxu0 %vm73_vm0, %v3939_v16 }
 0xdbe   :  { %5864 = vrcp.f32 %v3432_v41 }
 0xdbf   :  { %3972 = vmatpush.msra.mxu0 %v3936_v59  ;;  %5866 = vrcp.f32 %v3651_v39 }
 0xdc1   :  { %5357 = vmatmul.msk.f32.gmra.mxu0 %vm345_vm7, %v3441_v62 }
 0xdc2   :  { %v8515_v47 = vpop.eup %5860  ;;  %3973 = vmatpush.msra.mxu0 %v3933_v11  ;;  %4313 = vmax.xlane.f32.xlu0 %v4312_v32  ;;  %v8525_v11 = vadd.f32 %v8420_v22, %v4078_v40  ;;  %v8538_v40 = vpop.f32.mrf.mxu0 }
 0xdc3   :  { %v8517_v61 = vpop.eup %5862  ;;  %v3883_v48 = vsel %vm345_vm7, %v8515_v47, 0.0 }
 0xdc4   :  { %v5865_v63 = vpop.eup %5864  ;;  %3974 = vmatpush.msra.mxu0 %v3930_v56  ;;  %v4158_v41 = vpop.f32.mrf.mxu3  ;;  %3884 = vadd.xlane.f32.xlu1 %v3883_v48  ;;  %v3889_v46 = vsel %vm345_vm7, %v8517_v61, 0.0  ;;  %v4093_v56 = vsel %vm358_vm8, %v8525_v11, -inf }
 0xdc5   :  { %3890 = vadd.xlane.f32.xlu2 %v3889_v46  ;;  %v3442_v55 = vmul.f32 %v5865_v63, %v8327_v8  ;;  %v5867_v37 = vpop.eup %5866 }
 0xdc6   :  { %3975 = vmatpush.msra.mxu0 %v8480_v34  ;;  %v3669_v34 = vmul.f32 %v5867_v37, %v8347_v29 }
 0xdc9   :  { %5358 = vmatmul.msk.f32.gmra.mxu0 %vm345_vm7, %v3442_v55 }
 0xdca   :  { %v8540_v39 = vpop.f32.mrf.mxu0 }
 0xdcc   :  { %v4161_v3 = vpop.f32.mrf.mxu3  ;;  %4094 = vmax.xlane.f32.xlu1 %v4093_v56 }
 0xdcd   :  { %4316 = vmax.xlane.f32.xlu2 %v4315_v42 }
 0xdd1   :  { %5388 = vmatmul.msk.f32.vlgmr.msrb.gmra.mxu0 %vm345_vm7, %v3669_v34 }
 0xdd2   :  { %v8543_v59 = vpop.f32.mrf.mxu0 }
 0xdd4   :  { %v4164_v8 = vpop.f32.mrf.mxu3 }
 0xdda   :  { %v8548_v53 = vpop.f32.mrf.mxu0 }
 0xddc   :  { %v4167_v52 = vpop.f32.mrf.mxu3 }
 0xde2   :  { %v8557_v32 = vpop.f32.mrf.mxu0 }
 0xde4   :  { %v4170_v57 = vpop.f32.mrf.mxu3 }
 0xde5   :  { %5455 = vmatpush.msk.msrb.mxu0 %vm73_vm0, %v4170_v57 }
 0xde7   :  { %4203 = vmatpush.msrb.mxu0 %v4167_v52 }
 0xde9   :  { %v3654_v35 = vpop.xlane.xlu0 %3653  ;;  %4204 = vmatpush.msrb.mxu0 %v4164_v8 }
 0xdea   :  { %5868 = vrcp.f32 %v3654_v35  ;;  %v8569_v37 = vpop.f32.mrf.mxu0 }
 0xdeb   :  { %4205 = vmatpush.msrb.mxu0 %v4161_v3 }
 0xded   :  { %4206 = vmatpush.msrb.mxu0 %v4158_v41 }
 0xdf0   :  { %v5869_v29 = vpop.eup %5868 }
 0xdf1   :  { %v3864_v54 = vpop.xlane.xlu0 %3863  ;;  %v3670_v6 = vmul.f32 %v5869_v29, %v8412_v27  ;;  %v3657_v17 = vpop.xlane.xlu2 %3656 }
 0xdf2   :  { %v3869_v2 = vsub.f32 %v8423_v38, %v3864_v54  ;;  %5870 = vrcp.f32 %v3657_v17  ;;  %v4303_v27 = vpop.f32.mrf.mxu1  ;;  %v8581_v57 = vpop.f32.mrf.mxu0 }
 0xdf3   :  { %5389 = vmatmul.msk.f32.gmra.mxu0 %vm345_vm7, %v3670_v6  ;;  %v8560_v48 = vadd.f32 %v8456_v49, %v4303_v27 }
 0xdf4   :  { %v3878_v18 = vmul.f32 1.442695, %v3869_v2 }
 0xdf5   :  { %v4318_v51 = vsel %vm345_vm7, %v8560_v48, -inf }
 0xdf6   :  { %5872 = vpow2.f32 %v3878_v18 }
 0xdf8   :  { %v5871_v28 = vpop.eup %5870 }
 0xdf9   :  { %v3663_v24 = vpop.xlane.xlu0 %3662  ;;  %v4083_v5 = vpop.xlane.xlu2 %4082  ;;  %v3671_v0 = vmul.f32 %v5871_v28, %v8430_v7 }
 0xdfa   :  { %v4096_v50 = vsub.f32 %v8444_v10, %v4083_v5  ;;  %v4306_v56 = vpop.f32.mrf.mxu1  ;;  %v8587_v29 = vpop.f32.mrf.mxu0 }
 0xdfb   :  { %5390 = vmatmul.msk.f32.gmra.mxu0 %vm345_vm7, %v3671_v0  ;;  %v8572_v49 = vadd.f32 %v8472_v14, %v4306_v56 }
 0xdfc   :  { %v8552_v16 = vpop.eup %5872  ;;  %v4101_v38 = vmul.f32 1.442695, %v4096_v50 }
 0xdfd   :  { %v3892_v62 = vsel %vm358_vm8, %v8552_v16, 0.0  ;;  %v4321_v52 = vsel %vm345_vm7, %v8572_v49, -inf }
 0xdfe   :  { %3893 = vadd.xlane.f32.xlu1 %v3892_v62  ;;  %5874 = vpow2.f32 %v4101_v38 }
 0xe01   :  { %v4089_v63 = vpop.xlane.xlu0 %4088  ;;  %v3882_v10 = vpop.xlane.xlu2 %3881 }
 0xe02   :  { %v4098_v7 = vsub.f32 %v8459_v60, %v4089_v63  ;;  %v8589_v6 = vpop.f32.mrf.mxu0 }
 0xe04   :  { %v4105_v41 = vmul.f32 1.442695, %v4098_v7  ;;  %v8563_v46 = vpop.eup %5874 }
 0xe05   :  { %v4111_v55 = vsel %vm345_vm7, %v8563_v46, 0.0 }
 0xe06   :  { %5876 = vpow2.f32 %v4105_v41  ;;  %4319 = vmax.xlane.f32.xlu1 %v4318_v51  ;;  %4112 = vadd.xlane.f32.xlu0 %v4111_v55 }
 0xe09   :  { %v4092_v60 = vpop.xlane.xlu2 %4091 }
 0xe0a   :  { %v4099_v3 = vsub.f32 %v8475_v44, %v4092_v60  ;;  %v4389_v44 = vpop.f32.mrf.mxu3  ;;  %v8591_v5 = vpop.f32.mrf.mxu0 }
 0xe0c   :  { %v8575_v42 = vpop.eup %5876  ;;  %v4107_v34 = vmul.f32 1.442695, %v4099_v3  ;;  %v4309_v3 = vpop.f32.mrf.mxu1 }
 0xe0d   :  { %v4117_v8 = vsel %vm345_vm7, %v8575_v42, 0.0 }
 0xe0e   :  { %4118 = vadd.xlane.f32.xlu1 %v4117_v8  ;;  %5878 = vpow2.f32 %v4107_v34  ;;  %4322 = vmax.xlane.f32.xlu0 %v4321_v52  ;;  %v8606_v34 = vadd.f32 %v8420_v22, %v4309_v3  ;;  %v3065_v3 = vadd.f32 %v8543_v59, %v8276_v43 }
 0xe10   :  { %v4324_v22 = vsel %vm358_vm8, %v8606_v34, -inf }
 0xe12   :  { %v4392_v54 = vpop.f32.mrf.mxu3 }
 0xe14   :  { %v8583_v35 = vpop.eup %5878 }
 0xe15   :  { %v4120_v14 = vsel %vm345_vm7, %v8583_v35, 0.0 }
 0xe16   :  { %4121 = vadd.xlane.f32.xlu0 %v4120_v14 }
 0xe1a   :  { %v4395_v17 = vpop.f32.mrf.mxu3 }
 0xe22   :  { %v4398_v63 = vpop.f32.mrf.mxu3 }
 0xe26   :  { %v8596_v7 = vpop.f32.mrf.mxu0 }
 0xe27   :  { %v3660_v2 = vpop.xlane.xlu1 %3659 }
 0xe28   :  { %5880 = vrcp.f32 %v3660_v2 }
 0xe29   :  { %5882 = vrcp.f32 %v3663_v24 }
 0xe2d   :  { %v3888_v18 = vpop.xlane.xlu0 %3887 }
 0xe2e   :  { %v5881_v28 = vpop.eup %5880  ;;  %v8609_v52 = vpop.f32.mrf.mxu0 }
 0xe2f   :  { %v4086_v0 = vpop.xlane.xlu1 %4085  ;;  %v3672_v50 = vmul.f32 %v5881_v28, %v8489_v1  ;;  %v5883_v62 = vpop.eup %5882 }
 0xe30   :  { %v4097_v27 = vsub.f32 %v8495_v19, %v4086_v0  ;;  %v3673_v55 = vmul.f32 %v5883_v62, %v8447_v45 }
 0xe31   :  { %5391 = vmatmul.msk.f32.gmra.mxu0 %vm345_vm7, %v3672_v50 }
 0xe32   :  { %v4103_v38 = vmul.f32 1.442695, %v4097_v27 }
 0xe34   :  { %5884 = vpow2.f32 %v4103_v38 }
 0xe35   :  { %5886 = vrcp.f32 %v3882_v10  ;;  %v4314_v41 = vpop.xlane.xlu0 %4313 }
 0xe36   :  { %v4327_v1 = vsub.f32 %v8508_v21, %v4314_v41  ;;  %v4401_v21 = vpop.f32.mrf.mxu3  ;;  %v3521_v38 = vpop.f32.mrf.mxu0 }
 0xe37   :  { %v3885_v51 = vpop.xlane.xlu1 %3884 }
 0xe38   :  { %v3891_v56 = vpop.xlane.xlu2 %3890  ;;  %v4332_v10 = vmul.f32 1.442695, %v4327_v1  ;;  %5888 = vrcp.f32 %v3885_v51 }
 0xe39   :  { %5392 = vmatmul.msk.f32.gmra.mxu0 %vm345_vm7, %v3673_v55 }
 0xe3a   :  { %v8600_v24 = vpop.eup %5884  ;;  %5890 = vpow2.f32 %v4332_v10 }
 0xe3b   :  { %v4114_v19 = vsel %vm345_vm7, %v8600_v24, 0.0  ;;  %v5887_v60 = vpop.eup %5886 }
 0xe3c   :  { %4115 = vadd.xlane.f32.xlu2 %v4114_v19  ;;  %v3900_v45 = vmul.f32 %v5887_v60, %v8463_v9 }
 0xe3e   :  { %v5889_v9 = vpop.eup %5888  ;;  %v3524_v41 = vpop.f32.mrf.mxu0 }
 0xe3f   :  { %v4095_v8 = vpop.xlane.xlu1 %4094 }
 0xe40   :  { %v4317_v14 = vpop.xlane.xlu2 %4316  ;;  %v4100_v2 = vsub.f32 %v8525_v11, %v4095_v8  ;;  %v3901_v11 = vmul.f32 %v5889_v9, %v8515_v47 }
 0xe41   :  { %v4328_v28 = vsub.f32 %v8529_v4, %v4317_v14  ;;  %5422 = vmatmul.msk.f32.vlgmr.msra.gmra.mxu0 %vm345_vm7, %v3900_v45  ;;  %v8618_v4 = vpop.eup %5890 }
 0xe42   :  { %v4109_v0 = vmul.f32 1.442695, %v4100_v2  ;;  %5489 = vmatpush.msk.msra.mxu0 %vm73_vm0, %v4401_v21 }
 0xe43   :  { %v4334_v50 = vmul.f32 1.442695, %v4328_v28 }
 0xe44   :  { %5892 = vpow2.f32 %v4109_v0  ;;  %4434 = vmatpush.msra.mxu0 %v4398_v63  ;;  %4325 = vmax.xlane.f32.xlu2 %v4324_v22  ;;  %v4342_v63 = vsel %vm345_vm7, %v8618_v4, 0.0 }
 0xe45   :  { %5894 = vpow2.f32 %v4334_v50 }
 0xe46   :  { %5896 = vrcp.f32 %v3888_v18  ;;  %4435 = vmatpush.msra.mxu0 %v4395_v17  ;;  %v3527_v55 = vpop.f32.mrf.mxu0 }
 0xe47   :  { %5898 = vrcp.f32 %v3891_v56  ;;  %v3301_v56 = vadd.f32 %v8587_v29, %v3065_v3 }
 0xe48   :  { %4436 = vmatpush.msra.mxu0 %v4392_v54 }
 0xe49   :  { %5423 = vmatmul.msk.f32.gmra.mxu0 %vm345_vm7, %v3901_v11  ;;  %v3532_v10 = vadd.f32 %v3521_v38, %v3301_v56 }
 0xe4a   :  { %v8621_v27 = vpop.eup %5892  ;;  %4437 = vmatpush.msra.mxu0 %v4389_v44 }
 0xe4b   :  { %v8623_v62 = vpop.eup %5894  ;;  %v4123_v18 = vsel %vm358_vm8, %v8621_v27, 0.0 }
 0xe4c   :  { %v5897_v17 = vpop.eup %5896  ;;  %v4345_v47 = vsel %vm345_vm7, %v8623_v62, 0.0  ;;  %4343 = vadd.xlane.f32.xlu2 %v4342_v63  ;;  %4124 = vadd.xlane.f32.xlu1 %v4123_v18 }
 0xe4d   :  { %4346 = vadd.xlane.f32.xlu0 %v4345_v47  ;;  %v3902_v54 = vmul.f32 %v5897_v17, %v8498_v30  ;;  %v5899_v44 = vpop.eup %5898  ;;  %v3071_v17 = vadd.f32 %v8557_v32, %v8289_v15 }
 0xe4e   :  { %v3903_v51 = vmul.f32 %v5899_v44, %v8517_v61  ;;  %v3746_v1 = vpop.f32.mrf.mxu0 }
 0xe4f   :  { %v3303_v47 = vadd.f32 %v8591_v5, %v3071_v17 }
 0xe51   :  { %5424 = vmatmul.msk.f32.gmra.mxu0 %vm345_vm7, %v3902_v54  ;;  %v3534_v44 = vadd.f32 %v3527_v55, %v3303_v47 }
 0xe59   :  { %5425 = vmatmul.msk.f32.gmra.mxu0 %vm345_vm7, %v3903_v51 }
 0xe70   :  { %v8635_v19 = vpop.f32.mrf.mxu0 }
 0xe71   :  { %v3894_v60 = vpop.xlane.xlu1 %3893 }
 0xe72   :  { %5900 = vrcp.f32 %v3894_v60 }
 0xe78   :  { %v5901_v30 = vpop.eup %5900  ;;  %v3752_v45 = vpop.f32.mrf.mxu0 }
 0xe79   :  { %v4320_v8 = vpop.xlane.xlu1 %4319  ;;  %v3904_v14 = vmul.f32 %v5901_v30, %v8552_v16  ;;  %v8641_v61 = vadd.f32 %v3752_v45, %v3532_v10  ;;  %v4113_v2 = vpop.xlane.xlu0 %4112 }
 0xe7a   :  { %v4329_v21 = vsub.f32 %v8560_v48, %v4320_v8  ;;  %5902 = vrcp.f32 %v4113_v2 }
 0xe7b   :  { %5426 = vmatmul.msk.f32.gmra.mxu0 %vm345_vm7, %v3904_v14 }
 0xe7c   :  { %v4336_v28 = vmul.f32 1.442695, %v4329_v21 }
 0xe7e   :  { %5904 = vpow2.f32 %v4336_v28 }
 0xe80   :  { %v5903_v0 = vpop.eup %5902 }
 0xe81   :  { %v4131_v43 = vmul.f32 %v5903_v0, %v8563_v46  ;;  %v4323_v59 = vpop.xlane.xlu0 %4322  ;;  %v3068_v46 = vadd.f32 %v8548_v53, %v8282_v23  ;;  %v4119_v54 = vpop.xlane.xlu1 %4118  ;;  %v3059_v23 = vadd.f32 %v8538_v40, %v8241_v20  ;;  %v3062_v20 = vadd.f32 %v8540_v39, %v8263_v31 }
 0xe82   :  { %v4330_v29 = vsub.f32 %v8572_v49, %v4323_v59 }
 0xe83   :  { %5456 = vmatmul.msk.f32.vlgmr.msrb.gmra.mxu0 %vm345_vm7, %v4131_v43  ;;  %v3302_v49 = vadd.f32 %v8589_v6, %v3068_v46  ;;  %v3299_v56 = vadd.f32 %v8569_v37, %v3059_v23 }
 0xe84   :  { %v8647_v50 = vpop.eup %5904  ;;  %v4338_v16 = vmul.f32 1.442695, %v4330_v29 }
 0xe85   :  { %v4348_v22 = vsel %vm345_vm7, %v8647_v50, 0.0  ;;  %v3533_v11 = vadd.f32 %v3524_v41, %v3302_v49  ;;  %v3530_v32 = vadd.f32 %v8596_v7, %v3299_v56 }
 0xe86   :  { %4349 = vadd.xlane.f32.xlu1 %v4348_v22  ;;  %5906 = vpow2.f32 %v4338_v16 }
 0xe87   :  { %v3761_v30 = vadd.f32 %v3746_v1, %v3530_v32 }
 0xe89   :  { %v4122_v5 = vpop.xlane.xlu0 %4121 }
 0xe8c   :  { %v8652_v48 = vpop.eup %5906 }
 0xe8d   :  { %v4351_v9 = vsel %vm345_vm7, %v8652_v48, 0.0 }
 0xe8e   :  { %4352 = vadd.xlane.f32.xlu2 %v4351_v9 }
 0xeae   :  { %v3755_v38 = vpop.f32.mrf.mxu0 }
 0xeaf   :  { %v3764_v63 = vadd.f32 %v3755_v38, %v3533_v11  ;;  %v4116_v18 = vpop.xlane.xlu2 %4115 }
 0xeb0   :  { %5908 = vrcp.f32 %v4116_v18 }
 0xeb1   :  { %5910 = vrcp.f32 %v4119_v54 }
 0xeb6   :  { %v5909_v51 = vpop.eup %5908  ;;  %v3758_v60 = vpop.f32.mrf.mxu0 }
 0xeb7   :  { %v3765_v53 = vadd.f32 %v3758_v60, %v3534_v44  ;;  %v4326_v6 = vpop.xlane.xlu2 %4325  ;;  %v4132_v41 = vmul.f32 %v5909_v51, %v8600_v24  ;;  %v5911_v55 = vpop.eup %5910 }
 0xeb8   :  { %v4331_v3 = vsub.f32 %v8606_v34, %v4326_v6  ;;  %v4133_v24 = vmul.f32 %v5911_v55, %v8575_v42  ;;  %v3300_v34 = vadd.f32 %v8581_v57, %v3062_v20 }
 0xeb9   :  { %5457 = vmatmul.msk.f32.gmra.mxu0 %vm345_vm7, %v4132_v41 }
 0xeba   :  { %v4340_v15 = vmul.f32 1.442695, %v4331_v3  ;;  %v3531_v45 = vadd.f32 %v8609_v52, %v3300_v34 }
 0xebc   :  { %5912 = vpow2.f32 %v4340_v15  ;;  %v3762_v1 = vadd.f32 %v8635_v19, %v3531_v45 }
 0xebd   :  { %5914 = vrcp.f32 %v4122_v5 }
 0xebe   :  { %v3977_v10 = vpop.f32.mrf.mxu0 }
 0xebf   :  { %v3992_v40 = vadd.f32 %v3977_v10, %v3761_v30  ;;  %v4125_v7 = vpop.xlane.xlu1 %4124  ;;  %v4344_v42 = vpop.xlane.xlu2 %4343 }
 0xec0   :  { %5916 = vrcp.f32 %v4125_v7  ;;  %v4347_v0 = vpop.xlane.xlu0 %4346 }
 0xec1   :  { %5458 = vmatmul.msk.f32.gmra.mxu0 %vm345_vm7, %v4133_v24  ;;  %5918 = vrcp.f32 %v4344_v42 }
 0xec2   :  { %v5913_v37 = vpop.eup %5912  ;;  %5920 = vrcp.f32 %v4347_v0 }
 0xec3   :  { %v4354_v8 = vsel %vm358_vm8, %v5913_v37, 0.0  ;;  %v5915_v14 = vpop.eup %5914 }
 0xec4   :  { %4355 = vadd.xlane.f32.xlu0 %v4354_v8  ;;  %v4134_v39 = vmul.f32 %v5915_v14, %v8583_v35 }
 0xec6   :  { %v3980_v2 = vpop.f32.mrf.mxu0  ;;  %v5917_v57 = vpop.eup %5916 }
 0xec7   :  { %v3993_v31 = vadd.f32 %v3980_v2, %v3762_v1  ;;  %v4135_v28 = vmul.f32 %v5917_v57, %v8621_v27  ;;  %v5919_v43 = vpop.eup %5918 }
 0xec8   :  { %v4362_v59 = vmul.f32 %v5919_v43, %v8618_v4  ;;  %v5921_v35 = vpop.eup %5920 }
 0xec9   :  { %5459 = vmatmul.msk.f32.gmra.mxu0 %vm345_vm7, %v4134_v39  ;;  %v4363_v16 = vmul.f32 %v5921_v35, %v8623_v62 }
 0xece   :  { %v3983_v21 = vpop.f32.mrf.mxu0 }
 0xecf   :  { %v3994_v52 = vadd.f32 %v3983_v21, %v8641_v61 }
 0xed1   :  { %5460 = vmatmul.msk.f32.gmra.mxu0 %vm345_vm7, %v4135_v28 }
 0xed6   :  { %v3986_v19 = vpop.f32.mrf.mxu0 }
 0xed7   :  { %v3995_v29 = vadd.f32 %v3986_v19, %v3764_v63 }
 0xed9   :  { %5490 = vmatmul.msk.f32.vlgmr.msra.gmra.mxu0 %vm345_vm7, %v4362_v59 }
 0xee1   :  { %5491 = vmatmul.msk.f32.gmra.mxu0 %vm345_vm7, %v4363_v16 }
 0xef8   :  { %v3989_v22 = vpop.f32.mrf.mxu0 }
 0xef9   :  { %v3996_v61 = vadd.f32 %v3989_v22, %v3765_v53  ;;  %v4350_v9 = vpop.xlane.xlu1 %4349 }
 0xefa   :  { %5922 = vrcp.f32 %v4350_v9 }
 0xf00   :  { %v5923_v27 = vpop.eup %5922  ;;  %v4208_v38 = vpop.f32.mrf.mxu0 }
 0xf01   :  { %v4364_v46 = vmul.f32 %v5923_v27, %v8647_v50  ;;  %v4353_v49 = vpop.xlane.xlu2 %4352  ;;  %v4223_v23 = vadd.f32 %v4208_v38, %v3992_v40 }
 0xf02   :  { %5924 = vrcp.f32 %v4353_v49 }
 0xf03   :  { %5492 = vmatmul.msk.f32.gmra.mxu0 %vm345_vm7, %v4364_v46 }
 0xf08   :  { %v5925_v4 = vpop.eup %5924 }
 0xf09   :  { %v4365_v11 = vmul.f32 %v5925_v4, %v8652_v48  ;;  %v5548_v48 = vld [vmem:[%s8907_s6 + $0xa] ss:$0 sm:$0xff] }
 0xf0b   :  { %5493 = vmatmul.msk.f32.gmra.mxu0 %vm345_vm7, %v4365_v11 }
 0xf36   :  { %v4211_v62 = vpop.f32.mrf.mxu0 }
 0xf37   :  { %v4356_v63 = vpop.xlane.xlu0 %4355  ;;  %v4224_v56 = vadd.f32 %v4211_v62, %v3993_v31 }
 0xf38   :  { %5926 = vrcp.f32 %v4356_v63  ;;  %v5501_v63 = vld [vmem:[%s8909_s8 + $0x38] sm:$0xff] }
 0xf39   :  { %4632 = vmatpush.msrb.mxu2 %v5501_v63 }
 0xf3e   :  { %v5927_v18 = vpop.eup %5926  ;;  %v4214_v17 = vpop.f32.mrf.mxu0 }
 0xf3f   :  { %v4225_v47 = vadd.f32 %v4214_v17, %v3994_v52  ;;  %v4366_v54 = vmul.f32 %v5927_v18, %v5913_v37  ;;  %v5500_v18 = vld [vmem:[%s8909_s8 + $0x30] sm:$0xff]  ;;  %v5499_v17 = vld [vmem:[%s8909_s8 + $0x28] sm:$0xff] }
 0xf40   :  { %4633 = vmatpush.msrb.mxu2 %v5500_v18 }
 0xf41   :  { %5494 = vmatmul.msk.f32.gmra.mxu0 %vm345_vm7, %v4366_v54 }
 0xf42   :  { %4634 = vmatpush.msrb.mxu2 %v5499_v17 }
 0xf46   :  { %v4217_v50 = vpop.f32.mrf.mxu0 }
 0xf47   :  { %v4226_v44 = vadd.f32 %v4217_v50, %v3995_v29 }
 0xf4e   :  { %v4220_v51 = vpop.f32.mrf.mxu0 }
 0xf4f   :  { %v4227_v60 = vadd.f32 %v4220_v51, %v3996_v61 }
 0xf56   :  { %v4439_v53 = vpop.f32.mrf.mxu0 }
 0xf57   :  { %v4454_v6 = vadd.f32 %v4439_v53, %v4223_v23 }
 0xf59   :  { %v4459_v41 = vadd.f32 %v4454_v6, %v7484_v36 }
 0xf5b   :  { %v8695_v3 = vadd.f32 %v5548_v48, %v4459_v41 }
 0xf5d   :  { %v4473_v15 = vsel %vm116_vm2, %v8695_v3, 0.0 }
 0xf5e   :  { %4474 = vadd.xlane.f32.xlu1 %v4473_v15  ;;  %v4442_v32 = vpop.f32.mrf.mxu0 }
 0xf5f   :  { %v4455_v5 = vadd.f32 %v4442_v32, %v4224_v56 }
 0xf61   :  { %v4460_v55 = vadd.f32 %v4455_v5, %v7489_v12 }
 0xf63   :  { %v8700_v30 = vadd.f32 %v5548_v48, %v4460_v55  ;;  %v8767_v55 = vld [vmem:[%s8907_s6 + $0xb] ss:$0 sm:$0xff] }
 0xf65   :  { %v4476_v10 = vsel %vm116_vm2, %v8700_v30, 0.0 }
 0xf66   :  { %4477 = vadd.xlane.f32.xlu2 %v4476_v10 }
 0xf80   :  { %v4445_v20 = vpop.f32.mrf.mxu0 }
 0xf81   :  { %v4456_v40 = vadd.f32 %v4445_v20, %v4225_v47  ;;  %v5498_v47 = vld [vmem:[%s8909_s8 + $0x20] sm:$0xff] }
 0xf82   :  { %4635 = vmatpush.msrb.mxu2 %v5498_v47 }
 0xf83   :  { %v4461_v36 = vadd.f32 %v4456_v40, %v7494_v13  ;;  %v8772_v40 = vld [vmem:[%s8907_s6 + $0xc] ss:$0 sm:$0xff] }
 0xf85   :  { %v8705_v24 = vadd.f32 %v5548_v48, %v4461_v36 }
 0xf87   :  { %v4479_v34 = vsel %vm116_vm2, %v8705_v24, 0.0 }
 0xf88   :  { %4480 = vadd.xlane.f32.xlu0 %v4479_v34  ;;  %v4448_v37 = vpop.f32.mrf.mxu0 }
 0xf89   :  { %v4457_v45 = vadd.f32 %v4448_v37, %v4226_v44 }
 0xf8b   :  { %v4462_v12 = vadd.f32 %v4457_v45, %v7499_v25 }
 0xf8d   :  { %v8710_v7 = vadd.f32 %v5548_v48, %v4462_v12 }
 0xf8f   :  { %v4482_v8 = vsel %vm116_vm2, %v8710_v7, 0.0 }
 0xf90   :  { %4483 = vadd.xlane.f32.xlu1 %v4482_v8 }
 0xfbe   :  { %v4451_v14 = vpop.f32.mrf.mxu0 }
 0xfbf   :  { %v4458_v1 = vadd.f32 %v4451_v14, %v4227_v60 }
 0xfc1   :  { %v4463_v13 = vadd.f32 %v4458_v1, %v7504_v58 }
 0xfc3   :  { %v8715_v2 = vadd.f32 %v5548_v48, %v4463_v13 }
 0xfc5   :  { %v4485_v31 = vsel %vm129_vm4, %v8715_v2, 0.0 }
 0xfc6   :  { %4486 = vadd.xlane.f32.xlu2 %v4485_v31 }
 0xfd1   :  { %v4475_v39 = vpop.xlane.xlu1 %4474 }
 0xfd2   :  { %v4488_v42 = vmul.f32 %v4475_v39, %v6127_v26 }
 0xfd4   :  { %v4493_v25 = vsub.f32 %v8695_v3, %v4488_v42 }
 0xfd6   :  { %v4498_v57 = vmul.f32 %v4493_v25, %v4493_v25 }
 0xfd8   :  { %v4503_v21 = vsel %vm116_vm2, %v4498_v57, 0.0 }
 0xfd9   :  { %v4478_v52 = vpop.xlane.xlu2 %4477  ;;  %4504 = vadd.xlane.f32.xlu0 %v4503_v21 }
 0xfda   :  { %v4489_v28 = vmul.f32 %v4478_v52, %v6127_v26 }
 0xfdc   :  { %v8724_v58 = vsub.f32 %v8700_v30, %v4489_v28 }
 0xfde   :  { %v4499_v0 = vmul.f32 %v8724_v58, %v8724_v58 }
 0xfe0   :  { %v4506_v43 = vsel %vm116_vm2, %v4499_v0, 0.0 }
 0xfe1   :  { %4507 = vadd.xlane.f32.xlu1 %v4506_v43 }
 0xffb   :  { %v4481_v19 = vpop.xlane.xlu0 %4480 }
 0xffc   :  { %v4490_v59 = vmul.f32 %v4481_v19, %v6127_v26 }
 0xffe   :  { %v8731_v29 = vsub.f32 %v8705_v24, %v4490_v59 }
0x1000   :  { %v4500_v35 = vmul.f32 %v8731_v29, %v8731_v29 }
0x1002   :  { %v4509_v16 = vsel %vm116_vm2, %v4500_v35, 0.0 }
0x1003   :  { %4510 = vadd.xlane.f32.xlu2 %v4509_v16  ;;  %v4484_v22 = vpop.xlane.xlu1 %4483 }
0x1004   :  { %v4491_v61 = vmul.f32 %v4484_v22, %v6127_v26 }
0x1006   :  { %v8738_v9 = vsub.f32 %v8710_v7, %v4491_v61 }
0x1008   :  { %v4501_v27 = vmul.f32 %v8738_v9, %v8738_v9 }
0x100a   :  { %v4512_v46 = vsel %vm116_vm2, %v4501_v27, 0.0 }
0x100b   :  { %4513 = vadd.xlane.f32.xlu0 %v4512_v46 }
0x1039   :  { %v4487_v49 = vpop.xlane.xlu2 %4486 }
0x103a   :  { %v4492_v4 = vmul.f32 %v4487_v49, %v6127_v26 }
0x103c   :  { %v8745_v11 = vsub.f32 %v8715_v2, %v4492_v4 }
0x103e   :  { %v4502_v38 = vmul.f32 %v8745_v11, %v8745_v11 }
0x1040   :  { %v4515_v62 = vsel %vm129_vm4, %v4502_v38, 0.0 }
0x1041   :  { %4516 = vadd.xlane.f32.xlu1 %v4515_v62 }
0x104c   :  { %v4505_v54 = vpop.xlane.xlu0 %4504 }
0x104d   :  { %v4518_v50 = vmul.f32 %v4505_v54, %v6127_v26 }
0x104f   :  { %v4523_v44 = vadd.f32 1e-06, %v4518_v50 }
0x1051   :  { %5928 = vrsqrt.f32 %v4523_v44  ;;  %vm4534_vm11 = vweird.f32 %v4523_v44 }
0x1054   :  { %v4508_v51 = vpop.xlane.xlu1 %4507 }
0x1055   :  { %v4519_v60 = vmul.f32 %v4508_v51, %v6127_v26 }
0x1057   :  { %v5929_v23 = vpop.eup %5928  ;;  %v4524_v53 = vadd.f32 1e-06, %v4519_v60 }
0x1058   :  { %v4529_v6 = vmul.f32 %v5929_v23, %v4523_v44  ;;  %vm4535_vm8 = vweird.f32 %v5929_v23 }
0x1059   :  { %5930 = vrsqrt.f32 %v4524_v53  ;;  %vm4536_vm12 = vmor %vm4534_vm11, %vm4535_vm8  ;;  %vm4544_vm14 = vweird.f32 %v4524_v53 }
0x105a   :  { %v4530_v48 = vmul.f32 %v5929_v23, %v4529_v6 }
0x105c   :  { %v4531_v41 = vmul.f32 0.5, %v4530_v48 }
0x105e   :  { %v4532_v56 = vsub.f32 1.5, %v4531_v41 }
0x105f   :  { %v5931_v15 = vpop.eup %5930 }
0x1060   :  { %v4533_v32 = vmul.f32 %v5929_v23, %v4532_v56  ;;  %v4539_v5 = vmul.f32 %v5931_v15, %v4524_v53  ;;  %vm4545_vm13 = vweird.f32 %v5931_v15 }
0x1061   :  { %vm4546_vm15 = vmor %vm4544_vm14, %vm4545_vm13 }
0x1062   :  { %v4537_v10 = vsel %vm4536_vm12, %v5929_v23, %v4533_v32  ;;  %v4540_v20 = vmul.f32 %v5931_v15, %v4539_v5  ;;  %v5522_v32 = vld [vmem:[%s8910_s9 + $0xf0] sm:$0xff]  ;;  %v5520_v5 = vld [vmem:[%s8910_s9 + $0xe0] sm:$0xff] }
0x1063   :  { %v4578_v36 = vmul.f32 %v4537_v10, %v4493_v25  ;;  %v5518_v10 = vld [vmem:[%s8910_s9 + $0xd0] sm:$0xff] }
0x1064   :  { %v4541_v34 = vmul.f32 0.5, %v4540_v20  ;;  %v5517_v20 = vld [vmem:[%s8910_s9 + $0xc8] sm:$0xff] }
0x1065   :  { %v4584_v37 = vmul.f32 %v8767_v55, %v4578_v36  ;;  %v5516_v36 = vld [vmem:[%s8910_s9 + $0xc0] sm:$0xff] }
0x1066   :  { %v4542_v45 = vsub.f32 1.5, %v4541_v34 }
0x1067   :  { %v4590_v12 = vadd.f32 %v8772_v40, %v4584_v37  ;;  %v5515_v37 = vld [vmem:[%s8910_s9 + $0xb8] sm:$0xff] }
0x1068   :  { %v4543_v8 = vmul.f32 %v5931_v15, %v4542_v45 }
0x1069   :  { %5503 = vmatmul.msk.f32.vlgmr.msrb.gmra.mxu2 %vm116_vm2, %v4590_v12  ;;  %v5514_v12 = vld [vmem:[%s8910_s9 + $0xb0] sm:$0xff] }
0x106a   :  { %v4547_v14 = vsel %vm4546_vm15, %v5931_v15, %v4543_v8  ;;  %v5523_v15 = vld [vmem:[%s8910_s9 + $0xf8] sm:$0xff] }
0x106b   :  { %v4579_v1 = vmul.f32 %v4547_v14, %v8724_v58  ;;  %4799 = vmatpush.msrb.mxu1 %v5523_v15  ;;  %v5513_v14 = vld [vmem:[%s8910_s9 + $0xa8] sm:$0xff] }
0x106d   :  { %v4585_v13 = vmul.f32 %v8767_v55, %v4579_v1  ;;  %4800 = vmatpush.msrb.mxu1 %v5522_v32 }
0x106f   :  { %v4591_v31 = vadd.f32 %v8772_v40, %v4585_v13  ;;  %v5512_v13 = vld [vmem:[%s8910_s9 + $0xa0] sm:$0xff] }
0x1071   :  { %5504 = vmatmul.msk.f32.gmra.mxu2 %vm116_vm2, %v4591_v31 }
0x1076   :  { %v4511_v39 = vpop.xlane.xlu2 %4510 }
0x1077   :  { %v4520_v42 = vmul.f32 %v4511_v39, %v6127_v26 }
0x1079   :  { %v4525_v25 = vadd.f32 1e-06, %v4520_v42  ;;  %v5511_v42 = vld [vmem:[%s8910_s9 + $0x98] sm:$0xff] }
0x107b   :  { %5932 = vrsqrt.f32 %v4525_v25  ;;  %vm4554_vm3 = vweird.f32 %v4525_v25 }
0x107e   :  { %v4514_v57 = vpop.xlane.xlu0 %4513 }
0x107f   :  { %v4521_v21 = vmul.f32 %v4514_v57, %v6127_v26 }
0x1081   :  { %v5933_v52 = vpop.eup %5932  ;;  %v4526_v0 = vadd.f32 1e-06, %v4521_v21  ;;  %v5510_v21 = vld [vmem:[%s8910_s9 + $0x90] sm:$0xff] }
0x1082   :  { %v4549_v28 = vmul.f32 %v5933_v52, %v4525_v25  ;;  %vm4555_vm1 = vweird.f32 %v5933_v52 }
0x1083   :  { %5934 = vrsqrt.f32 %v4526_v0  ;;  %vm4556_vm5 = vmor %vm4554_vm3, %vm4555_vm1  ;;  %vm4564_vm9 = vweird.f32 %v4526_v0 }
0x1084   :  { %v4550_v43 = vmul.f32 %v5933_v52, %v4549_v28  ;;  %v5509_v28 = vld [vmem:[%s8910_s9 + $0x88] sm:$0xff] }
0x1086   :  { %v4551_v58 = vmul.f32 0.5, %v4550_v43  ;;  %v5508_v43 = vld [vmem:[%s8910_s9 + $0x80] sm:$0xff] }
0x1088   :  { %v4552_v19 = vsub.f32 1.5, %v4551_v58 }
0x1089   :  { %v5935_v59 = vpop.eup %5934 }
0x108a   :  { %v4553_v35 = vmul.f32 %v5933_v52, %v4552_v19  ;;  %v4559_v16 = vmul.f32 %v5935_v59, %v4526_v0  ;;  %vm4565_vm6 = vweird.f32 %v5935_v59 }
0x108b   :  { %vm4566_vm10 = vmor %vm4564_vm9, %vm4565_vm6 }
0x108c   :  { %v4557_v22 = vsel %vm4556_vm5, %v5933_v52, %v4553_v35  ;;  %v4560_v27 = vmul.f32 %v5935_v59, %v4559_v16 }
0x108d   :  { %v4580_v61 = vmul.f32 %v4557_v22, %v8731_v29 }
0x108e   :  { %v4561_v46 = vmul.f32 0.5, %v4560_v27 }
0x108f   :  { %v4586_v49 = vmul.f32 %v8767_v55, %v4580_v61 }
0x1090   :  { %v4562_v4 = vsub.f32 1.5, %v4561_v46 }
0x1091   :  { %v4592_v38 = vadd.f32 %v8772_v40, %v4586_v49 }
0x1092   :  { %v4563_v62 = vmul.f32 %v5935_v59, %v4562_v4 }
0x1093   :  { %5505 = vmatmul.msk.f32.gmra.mxu2 %vm116_vm2, %v4592_v38 }
0x1094   :  { %v4567_v63 = vsel %vm4566_vm10, %v5935_v59, %v4563_v62 }
0x1095   :  { %v4581_v18 = vmul.f32 %v4567_v63, %v8738_v9 }
0x1097   :  { %v4587_v17 = vmul.f32 %v8767_v55, %v4581_v18 }
0x1099   :  { %v4593_v29 = vadd.f32 %v8772_v40, %v4587_v17 }
0x109b   :  { %5506 = vmatmul.msk.f32.gmra.mxu2 %vm116_vm2, %v4593_v29 }
0x10b4   :  { %v4517_v47 = vpop.xlane.xlu1 %4516 }
0x10b5   :  { %v4522_v54 = vmul.f32 %v4517_v47, %v6127_v26 }
0x10b7   :  { %v4527_v50 = vadd.f32 1e-06, %v4522_v54 }
0x10b9   :  { %5936 = vrsqrt.f32 %v4527_v50  ;;  %vm4574_vm11 = vweird.f32 %v4527_v50 }
0x10bf   :  { %v5937_v44 = vpop.eup %5936 }
0x10c0   :  { %v4569_v51 = vmul.f32 %v5937_v44, %v4527_v50  ;;  %vm4575_vm8 = vweird.f32 %v5937_v44 }
0x10c1   :  { %vm4576_vm12 = vmor %vm4574_vm11, %vm4575_vm8 }
0x10c2   :  { %v4570_v60 = vmul.f32 %v5937_v44, %v4569_v51 }
0x10c4   :  { %v4571_v23 = vmul.f32 0.5, %v4570_v60 }
0x10c6   :  { %v4572_v53 = vsub.f32 1.5, %v4571_v23 }
0x10c8   :  { %v4573_v6 = vmul.f32 %v5937_v44, %v4572_v53 }
0x10ca   :  { %v4577_v9 = vsel %vm4576_vm12, %v5937_v44, %v4573_v6 }
0x10cb   :  { %v4582_v48 = vmul.f32 %v4577_v9, %v8745_v11  ;;  %v5521_v11 = vld [vmem:[%s8910_s9 + $0xe8] sm:$0xff] }
0x10cc   :  { %4801 = vmatpush.msrb.mxu1 %v5521_v11 }
0x10cd   :  { %v4588_v41 = vmul.f32 %v8767_v55, %v4582_v48  ;;  %v5519_v55 = vld [vmem:[%s8910_s9 + $0xd8] sm:$0xff] }
0x10ce   :  { %4802 = vmatpush.msrb.mxu1 %v5520_v5 }
0x10cf   :  { %v4594_v56 = vadd.f32 %v8772_v40, %v4588_v41  ;;  %v8820_v40 = vld [vmem:[%s8908_s7 + $0x1] ss:$0 sm:$0xff] }
0x10d0   :  { %4803 = vmatpush.msrb.mxu1 %v5519_v55 }
0x10d1   :  { %5507 = vmatmul.msk.f32.gmra.mxu2 %vm116_vm2, %v4594_v56 }
0x10d2   :  { %4804 = vmatpush.msrb.mxu1 %v5518_v10 }
0x10d4   :  { %4805 = vmatpush.msrb.mxu1 %v5517_v20 }
0x10d6   :  { %4806 = vmatpush.msrb.mxu1 %v5516_v36 }
0x10d8   :  { %4807 = vmatpush.msrb.mxu1 %v5515_v37 }
0x10da   :  { %4808 = vmatpush.msrb.mxu1 %v5514_v12 }
0x10dc   :  { %4809 = vmatpush.msrb.mxu1 %v5513_v14 }
0x10de   :  { %4810 = vmatpush.msrb.mxu1 %v5512_v13 }
0x10e0   :  { %4811 = vmatpush.msrb.mxu1 %v5511_v42 }
0x10e2   :  { %4812 = vmatpush.msrb.mxu1 %v5510_v21 }
0x10e4   :  { %4813 = vmatpush.msrb.mxu1 %v5509_v28 }
0x10e6   :  { %4814 = vmatpush.msrb.mxu1 %v5508_v43 }
0x10ec   :  { %v4637_v34 = vpop.f32.mrf.mxu2 }
0x10ed   :  { %v4638_v45 = vadd.f32 %v8820_v40, %v4637_v34 }
0x10ef   :  { %v4657_v8 = vmul.f32 0.70710677, %v4638_v45  ;;  %v4652_v11 = vmul.f32 0.5, %v4638_v45 }
0x10f1   :  { %v4672_v1 = vand.u32 2147483647, %v4657_v8  ;;  %vm4662_vm13 = vcmp.ge.f32.partialorder %v4657_v8, 0.0 }
0x10f2   :  { %v4667_v56 = vsel %vm4662_vm13, 1.0, %v6002_v33 }
0x10f3   :  { %v4677_v31 = vmul.f32 0.3275911, %v4672_v1  ;;  %v4737_v59 = vsub.f32 0.0, %v4672_v1 }
0x10f4   :  { %v4640_v39 = vpop.f32.mrf.mxu2 }
0x10f5   :  { %v4682_v25 = vadd.f32 1.0, %v4677_v31  ;;  %v4641_v57 = vadd.f32 %v8820_v40, %v4640_v39  ;;  %v4742_v61 = vmul.f32 %v4737_v59, %v4672_v1 }
0x10f7   :  { %5938 = vrcp.f32 %v4682_v25  ;;  %v4658_v52 = vmul.f32 0.70710677, %v4641_v57  ;;  %v4747_v4 = vmul.f32 1.442695, %v4742_v61  ;;  %v4653_v39 = vmul.f32 0.5, %v4641_v57 }
0x10f9   :  { %v4673_v0 = vand.u32 2147483647, %v4658_v52  ;;  %vm4663_vm14 = vcmp.ge.f32.partialorder %v4658_v52, 0.0 }
0x10fa   :  { %v4668_v14 = vsel %vm4663_vm14, 1.0, %v6002_v33 }
0x10fb   :  { %v4678_v58 = vmul.f32 0.3275911, %v4673_v0  ;;  %v4738_v38 = vsub.f32 0.0, %v4673_v0 }
0x10fd   :  { %v5939_v19 = vpop.eup %5938  ;;  %v4683_v35 = vadd.f32 1.0, %v4678_v58  ;;  %v4743_v29 = vmul.f32 %v4738_v38, %v4673_v0 }
0x10fe   :  { %v4692_v16 = vmul.f32 1.0614054, %v5939_v19 }
0x10ff   :  { %5940 = vrcp.f32 %v4683_v35  ;;  %v4749_v51 = vmul.f32 1.442695, %v4743_v29 }
0x1100   :  { %v4697_v22 = vadd.f32 -1.4531521, %v4692_v16  ;;  %5942 = vpow2.f32 %v4747_v4 }
0x1101   :  { %5944 = vpow2.f32 %v4749_v51 }
0x1102   :  { %v4702_v27 = vmul.f32 %v5939_v19, %v4697_v22 }
0x1104   :  { %v4707_v46 = vadd.f32 1.4214138, %v4702_v27 }
0x1105   :  { %v5941_v49 = vpop.eup %5940 }
0x1106   :  { %v4712_v62 = vmul.f32 %v5939_v19, %v4707_v46  ;;  %v4693_v63 = vmul.f32 1.0614054, %v5941_v49  ;;  %v5943_v53 = vpop.eup %5942 }
0x1107   :  { %v5945_v20 = vpop.eup %5944 }
0x1108   :  { %v4717_v18 = vadd.f32 -0.28449672, %v4712_v62  ;;  %v4698_v17 = vadd.f32 -1.4531521, %v4693_v63 }
0x110a   :  { %v4722_v47 = vmul.f32 %v5939_v19, %v4717_v18  ;;  %v4703_v54 = vmul.f32 %v5941_v49, %v4698_v17 }
0x110c   :  { %v4727_v50 = vadd.f32 0.2548296, %v4722_v47  ;;  %v4708_v44 = vadd.f32 1.4214138, %v4703_v54 }
0x110e   :  { %v4732_v60 = vmul.f32 %v5939_v19, %v4727_v50  ;;  %v4713_v23 = vmul.f32 %v5941_v49, %v4708_v44 }
0x1110   :  { %v4757_v6 = vmul.f32 %v5943_v53, %v4732_v60  ;;  %v4718_v9 = vadd.f32 -0.28449672, %v4713_v23 }
0x1112   :  { %v4762_v48 = vsub.f32 1.0, %v4757_v6  ;;  %v4723_v41 = vmul.f32 %v5941_v49, %v4718_v9 }
0x1114   :  { %v4767_v15 = vmul.f32 %v4762_v48, %v4667_v56  ;;  %v4728_v32 = vadd.f32 0.2548296, %v4723_v41 }
0x1116   :  { %v4772_v5 = vadd.f32 1.0, %v4767_v15  ;;  %v4643_v55 = vpop.f32.mrf.mxu2  ;;  %v4733_v10 = vmul.f32 %v5941_v49, %v4728_v32 }
0x1117   :  { %v4644_v36 = vadd.f32 %v8820_v40, %v4643_v55 }
0x1118   :  { %v4777_v34 = vmul.f32 %v4772_v5, %v4652_v11  ;;  %v4758_v37 = vmul.f32 %v5945_v20, %v4733_v10 }
0x1119   :  { %v4659_v12 = vmul.f32 0.70710677, %v4644_v36  ;;  %v4654_v15 = vmul.f32 0.5, %v4644_v36 }
0x111a   :  { %4815 = vmatmul.f32.vlgmr.msrb.gmra.mxu1 %v4777_v34  ;;  %v4763_v8 = vsub.f32 1.0, %v4758_v37 }
0x111b   :  { %v4674_v1 = vand.u32 2147483647, %v4659_v12  ;;  %vm4664_vm15 = vcmp.ge.f32.partialorder %v4659_v12, 0.0 }
0x111c   :  { %v4768_v13 = vmul.f32 %v4763_v8, %v4668_v14  ;;  %v4669_v9 = vsel %vm4664_vm15, 1.0, %v6002_v33 }
0x111d   :  { %v4679_v31 = vmul.f32 0.3275911, %v4674_v1  ;;  %v4739_v19 = vsub.f32 0.0, %v4674_v1 }
0x111e   :  { %v4773_v42 = vadd.f32 1.0, %v4768_v13  ;;  %v4646_v25 = vpop.f32.mrf.mxu2 }
0x111f   :  { %v4684_v45 = vadd.f32 1.0, %v4679_v31  ;;  %v4647_v21 = vadd.f32 %v8820_v40, %v4646_v25  ;;  %v4744_v22 = vmul.f32 %v4739_v19, %v4674_v1 }
0x1120   :  { %v4778_v28 = vmul.f32 %v4773_v42, %v4653_v39 }
0x1121   :  { %5946 = vrcp.f32 %v4684_v45  ;;  %v4660_v0 = vmul.f32 0.70710677, %v4647_v21  ;;  %v4751_v27 = vmul.f32 1.442695, %v4744_v22  ;;  %v4655_v12 = vmul.f32 0.5, %v4647_v21 }
0x1122   :  { %4818 = vmatmul.f32.gmra.mxu1 %v4778_v28 }
0x1123   :  { %v4675_v52 = vand.u32 2147483647, %v4660_v0  ;;  %vm4665_vm1 = vcmp.ge.f32.partialorder %v4660_v0, 0.0 }
0x1124   :  { %v4670_v34 = vsel %vm4665_vm1, 1.0, %v6002_v33 }
0x1125   :  { %v4680_v43 = vmul.f32 0.3275911, %v4675_v52  ;;  %v4740_v49 = vsub.f32 0.0, %v4675_v52 }
0x1127   :  { %v5947_v58 = vpop.eup %5946  ;;  %v4685_v59 = vadd.f32 1.0, %v4680_v43  ;;  %v4745_v18 = vmul.f32 %v4740_v49, %v4675_v52 }
0x1128   :  { %v4694_v35 = vmul.f32 1.0614054, %v5947_v58 }
0x1129   :  { %5948 = vrcp.f32 %v4685_v59  ;;  %v4753_v50 = vmul.f32 1.442695, %v4745_v18 }
0x112a   :  { %v4699_v16 = vadd.f32 -1.4531521, %v4694_v35  ;;  %5950 = vpow2.f32 %v4751_v27 }
0x112b   :  { %5952 = vpow2.f32 %v4753_v50 }
0x112c   :  { %v4704_v61 = vmul.f32 %v5947_v58, %v4699_v16 }
0x112e   :  { %v4709_v57 = vadd.f32 1.4214138, %v4704_v61 }
0x112f   :  { %v5949_v46 = vpop.eup %5948 }
0x1130   :  { %v4714_v4 = vmul.f32 %v5947_v58, %v4709_v57  ;;  %v4695_v38 = vmul.f32 1.0614054, %v5949_v46  ;;  %v5951_v51 = vpop.eup %5950 }
0x1131   :  { %v5953_v5 = vpop.eup %5952 }
0x1132   :  { %v4719_v62 = vadd.f32 -0.28449672, %v4714_v4  ;;  %v4700_v63 = vadd.f32 -1.4531521, %v4695_v38 }
0x1134   :  { %v4724_v17 = vmul.f32 %v5947_v58, %v4719_v62  ;;  %v4705_v29 = vmul.f32 %v5949_v46, %v4700_v63 }
0x1136   :  { %v4729_v47 = vadd.f32 0.2548296, %v4724_v17  ;;  %v4710_v54 = vadd.f32 1.4214138, %v4705_v29 }
0x1138   :  { %v4734_v44 = vmul.f32 %v5947_v58, %v4729_v47  ;;  %v4715_v60 = vmul.f32 %v5949_v46, %v4710_v54  ;;  %v5552_v47 = vld [vmem:[%s8907_s6 + $0xd] ss:$0 sm:$0xff] }
0x113a   :  { %v4759_v23 = vmul.f32 %v5951_v51, %v4734_v44  ;;  %v4720_v53 = vadd.f32 -0.28449672, %v4715_v60 }
0x113c   :  { %v4764_v6 = vsub.f32 1.0, %v4759_v23  ;;  %v4725_v48 = vmul.f32 %v5949_v46, %v4720_v53 }
0x113e   :  { %v4769_v41 = vmul.f32 %v4764_v6, %v4669_v9  ;;  %v4730_v56 = vadd.f32 0.2548296, %v4725_v48 }
0x1140   :  { %v4774_v32 = vadd.f32 1.0, %v4769_v41  ;;  %v4735_v11 = vmul.f32 %v5949_v46, %v4730_v56 }
0x1142   :  { %v4779_v55 = vmul.f32 %v4774_v32, %v4654_v15  ;;  %v4760_v10 = vmul.f32 %v5953_v5, %v4735_v11  ;;  %v4901_v15 = vld [vmem:[%s8912_s11 + $0x18] sm:$0xff]  ;;  %v4900_v32 = vld [vmem:[%s8912_s11 + $0x10] sm:$0xff]  ;;  %v4899_v11 = vld [vmem:[%s8912_s11 + $0x8] sm:$0xff] }
0x1143   :  { %4921 = vmatpush.msrb.mxu0 %v4901_v15  ;;  %v4898_v5 = vld [vmem:[%s8912_s11] sm:$0xff] }
0x1144   :  { %4821 = vmatmul.f32.gmra.mxu1 %v4779_v55  ;;  %v4765_v20 = vsub.f32 1.0, %v4760_v10 }
0x1145   :  { %4922 = vmatpush.msrb.mxu0 %v4900_v32 }
0x1146   :  { %v4770_v37 = vmul.f32 %v4765_v20, %v4670_v34 }
0x1147   :  { %4923 = vmatpush.msrb.mxu0 %v4899_v11 }
0x1148   :  { %v4775_v8 = vadd.f32 1.0, %v4770_v37 }
0x1149   :  { %4924 = vmatpush.msrb.mxu0 %v4898_v5 }
0x114a   :  { %v4780_v14 = vmul.f32 %v4775_v8, %v4655_v12 }
0x114c   :  { %4824 = vmatmul.f32.gmra.mxu1 %v4780_v14 }
0x1154   :  { %v4649_v1 = vpop.f32.mrf.mxu2 }
0x1155   :  { %v4650_v13 = vadd.f32 %v8820_v40, %v4649_v1 }
0x1157   :  { %v4661_v31 = vmul.f32 0.70710677, %v4650_v13  ;;  %v4656_v49 = vmul.f32 0.5, %v4650_v13  ;;  %v5553_v13 = vld [vmem:[%s8911_s10] ss:$0 sm:$0xff] }
0x1159   :  { %v4676_v36 = vand.u32 2147483647, %v4661_v31  ;;  %vm4666_vm3 = vcmp.ge.f32.partialorder %v4661_v31, 0.0 }
0x115a   :  { %v4671_v27 = vsel %vm4666_vm3, 1.0, %v6002_v33 }
0x115b   :  { %v4681_v39 = vmul.f32 0.3275911, %v4676_v36  ;;  %v4741_v25 = vsub.f32 0.0, %v4676_v36 }
0x115d   :  { %v4686_v42 = vadd.f32 1.0, %v4681_v39  ;;  %v4746_v52 = vmul.f32 %v4741_v25, %v4676_v36 }
0x115f   :  { %5954 = vrcp.f32 %v4686_v42  ;;  %v4755_v19 = vmul.f32 1.442695, %v4746_v52 }
0x1161   :  { %5956 = vpow2.f32 %v4755_v19 }
0x1165   :  { %v5955_v45 = vpop.eup %5954 }
0x1166   :  { %v4696_v28 = vmul.f32 1.0614054, %v5955_v45 }
0x1167   :  { %v5957_v40 = vpop.eup %5956 }
0x1168   :  { %v4701_v0 = vadd.f32 -1.4531521, %v4696_v28 }
0x116a   :  { %v4706_v43 = vmul.f32 %v5955_v45, %v4701_v0 }
0x116c   :  { %v4711_v58 = vadd.f32 1.4214138, %v4706_v43 }
0x116e   :  { %v4716_v21 = vmul.f32 %v5955_v45, %v4711_v58 }
0x1170   :  { %v4721_v59 = vadd.f32 -0.28449672, %v4716_v21 }
0x1172   :  { %v4726_v35 = vmul.f32 %v5955_v45, %v4721_v59 }
0x1174   :  { %v4731_v16 = vadd.f32 0.2548296, %v4726_v35 }
0x1176   :  { %v4736_v22 = vmul.f32 %v5955_v45, %v4731_v16  ;;  %v5555_v45 = vld [vmem:[%s8913_s12] ss:$0 sm:$0xff] }
0x1178   :  { %v4761_v61 = vmul.f32 %v5957_v40, %v4736_v22 }
0x117a   :  { %v4766_v57 = vsub.f32 1.0, %v4761_v61 }
0x117c   :  { %v4771_v46 = vmul.f32 %v4766_v57, %v4671_v27 }
0x117e   :  { %v4776_v4 = vadd.f32 1.0, %v4771_v46 }
0x1180   :  { %v4781_v38 = vmul.f32 %v4776_v4, %v4656_v49 }
0x1182   :  { %4827 = vmatmul.f32.gmra.mxu1 %v4781_v38 }
0x1197   :  { %v4816_v62 = vpop.f32.mrf.mxu1 }
0x1198   :  { %v4831_v23 = vadd.f32 %v4816_v62, %v8695_v3 }
0x119a   :  { %v4838_v9 = vadd.f32 %v5552_v47, %v4831_v23 }
0x119f   :  { %v4819_v63 = vpop.f32.mrf.mxu1 }
0x11a0   :  { %v4832_v51 = vadd.f32 %v4819_v63, %v8700_v30 }
0x11a2   :  { %v4839_v6 = vadd.f32 %v5552_v47, %v4832_v51 }
0x11c1   :  { %v4822_v18 = vpop.f32.mrf.mxu1 }
0x11c2   :  { %v4833_v33 = vadd.f32 %v4822_v18, %v8705_v24 }
0x11c4   :  { %v4840_v53 = vadd.f32 %v5552_v47, %v4833_v33 }
0x11c9   :  { %v4825_v17 = vpop.f32.mrf.mxu1 }
0x11ca   :  { %v4834_v54 = vadd.f32 %v4825_v17, %v8710_v7  ;;  %v4843_v7 = vld [vmem:[%s8904_s3] sm:$0x3] }
0x11cc   :  { %v4841_v60 = vadd.f32 %v5552_v47, %v4834_v54 }
0x11ff   :  { %v4828_v29 = vpop.f32.mrf.mxu1 }
0x1200   :  { %v4835_v50 = vadd.f32 %v4828_v29, %v8715_v2 }
0x1202   :  { %v4842_v44 = vadd.f32 %v5552_v47, %v4835_v50 }
0x1204   :  { %5525 = vmatpush.msk.msra.mxu3 %vm73_vm0, %v4842_v44 }
0x1206   :  { %4862 = vmatpush.msra.mxu3 %v4841_v60 }
0x1208   :  { %4863 = vmatpush.msra.mxu3 %v4840_v53 }
0x120a   :  { %4864 = vmatpush.msra.mxu3 %v4839_v6 }
0x120c   :  { %4865 = vmatpush.msra.mxu3 %v4838_v9 }
0x120d   :  { %5526 = vmatmul.msk.f32.vlgmr.msra.gmra.mxu3 %vm345_vm7, %v4843_v7 }
0x1290   :  { %v4867_v24 = vpop.f32.mrf.mxu3 }
0x1291   :  { %v4872_v30 = vsel %vm129_vm4, %v4867_v24, 0.0 }
0x1292   :  { %4873 = vadd.xlane.f32.xlu2 %v4872_v30 }
0x1305   :  { %v4874_v2 = vpop.xlane.xlu2 %4873 }
0x1306   :  { %v4875_v3 = vmul.f32 %v4874_v2, %v6127_v26 }
0x1308   :  { %v4876_v48 = vsub.f32 %v4867_v24, %v4875_v3 }
0x130a   :  { %v4877_v41 = vmul.f32 %v4876_v48, %v4876_v48 }
0x130c   :  { %v4878_v56 = vsel %vm129_vm4, %v4877_v41, 0.0 }
0x130d   :  { %4879 = vadd.xlane.f32.xlu0 %v4878_v56 }
0x1380   :  { %v4880_v55 = vpop.xlane.xlu0 %4879 }
0x1381   :  { %v4881_v10 = vmul.f32 %v4880_v55, %v6127_v26  ;;  %v5554_v26 = vld [vmem:[%s8911_s10 + $0x1] ss:$0 sm:$0xff] }
0x1383   :  { %v4882_v20 = vadd.f32 1e-06, %v4881_v10 }
0x1385   :  { %5958 = vrsqrt.f32 %v4882_v20  ;;  %vm4889_vm4 = vweird.f32 %v4882_v20 }
0x138b   :  { %v5959_v34 = vpop.eup %5958 }
0x138c   :  { %v4884_v37 = vmul.f32 %v5959_v34, %v4882_v20  ;;  %vm4890_vm0 = vweird.f32 %v5959_v34 }
0x138d   :  { %vm4891_vm7 = vmor %vm4889_vm4, %vm4890_vm0 }
0x138e   :  { %v4885_v12 = vmul.f32 %v5959_v34, %v4884_v37 }
0x1390   :  { %v4886_v8 = vmul.f32 0.5, %v4885_v12 }
0x1392   :  { %v4887_v14 = vsub.f32 1.5, %v4886_v8 }
0x1394   :  { %v4888_v1 = vmul.f32 %v5959_v34, %v4887_v14 }
0x1396   :  { %v4892_v31 = vsel %vm4891_vm7, %v5959_v34, %v4888_v1 }
0x1397   :  { %v4893_v36 = vmul.f32 %v4892_v31, %v4876_v48 }
0x1399   :  { %v4895_v39 = vmul.f32 %v5553_v13, %v4893_v36 }
0x139b   :  { %v4897_v42 = vadd.f32 %v5554_v26, %v4895_v39 }
0x139d   :  { %5527 = vmatmul.msk.f32.vlgmr.msrb.gmra.mxu0 %vm116_vm2, %v4897_v42 }
0x141a   :  { %v4926_v25 = vpop.f32.mrf.mxu0 }
0x141b   :  { %v4927_v28 = vadd.f32 %v5555_v45, %v4926_v25 }
0x141d   :  { %4929 = vst [vmem:[#allocation2] sm:$0x3] %v4927_v28 }
0x141e   :  { %4940 = dma.vmem_to_hbm [thread:$0]  %s4936_s5, 32, %s4938_s16, [#allocation3]  }
0x141f   :  { %5999 = dma.done.wait [#allocation3], 32  }
0x1420   :  { %6000 = vsyncadd [#allocation3], 4294967264 }
0x1421   :  { %4945 = vsyncpa [#allocation3], 1 }

</bundles_post_ra>
